<compile_context>
chip_gen: v7x
topology: tpu7x:2x2x1
jax: 0.10.0
libtpu: 0.0.40
codegen_flags: <defaults>
</compile_context>

<pallas_src>
import numpy as np
import jax
import jax.numpy as jnp
from jax import lax
from jax.experimental import pallas as pl
from jax.experimental.pallas import tpu as pltpu

# ----------------------------- static config --------------------------------
B = 2
H = 16                        # data_h_steps
W = 16                        # data_t_steps
CIN = 1
K = 5                         # filter_size
KK = K * K                    # 25 taps
NK = 8                        # num_kernels
DIL = 5                       # Residual2DBlock conv dilation
PAD_IN = (K - 1) // 2         # 2  : 'same' padding, dilation 1
PAD_RES = DIL * (K - 1) // 2  # 10 : 'same' padding, dilation 5
HO = (H - 2) // 2 + 1         # 8  : MaxPool2d((2,5), stride=2)
WO = (W - 5) // 2 + 1         # 6
POOL = HO * WO                # 48
NUM_NEURONS = 32
NUM_CLASSES = 5
FEAT = NK * POOL              # 384 = num_kernels * data_total_steps
HW = H * W                    # 256
TOT = B * HW                  # 512 lanes: batch-major, spatial-minor


# -------------------- host-precomputed masks / shifts / indices --------------
def _boundary_mask(dil):
    """(K*K, B*HW) 0/1 masks: mask[t, b*HW + h*W + w] = 1 iff the tap
    (h+dh, w+dw), (dh,dw) = (kh*dil - pad, kw*dil - pad), stays inside the
    HxW map.  Zeroes both out-of-image taps and cross-batch roll bleed."""
    pad = dil * (K - 1) // 2
    m = np.zeros((KK, HW), np.float32)
    for kh in range(K):
        for kw in range(K):
            dh, dw = kh * dil - pad, kw * dil - pad
            t = kh * K + kw
            for h in range(H):
                if not (0 <= h + dh < H):
                    continue
                for w in range(W):
                    if 0 <= w + dw < W:
                        m[t, h * W + w] = 1.0
    return np.tile(m, (1, B))                       # (25, 512)


def _shift_table(dil):
    """Lane-roll amounts so that rolled[p] == x[p + dh*W + dw] (pre-mask)."""
    pad = dil * (K - 1) // 2
    return [(-((kh * dil - pad) * W + (kw * dil - pad))) % TOT
            for kh in range(K) for kw in range(K)]


def _qstack_index():
    """Gather indices folding pool-anchor selection + CHW flatten + linear1
    into one (NK*HW, NUM_NEURONS) matrix (zero rows at non-anchor lanes)."""
    rows, cols = [], []
    for c in range(NK):
        for ho in range(HO):
            for wo in range(WO):
                rows.append(c * HW + (2 * ho) * W + 2 * wo)
                cols.append(c * POOL + ho * WO + wo)
    return np.asarray(rows, np.int32), np.asarray(cols, np.int32)


_MASK_IN_NP = _boundary_mask(1)       # (25, 512) dilation-1 masks
_MASK_RES_NP = _boundary_mask(DIL)    # (25, 512) dilation-5 masks
IN_SHIFTS = _shift_table(1)
RES_SHIFTS = _shift_table(DIL)
_Q_ROWS, _Q_COLS = _qstack_index()


# ------------------------------ Pallas kernel --------------------------------
def _fused_kernel(x_ref, w_in_ref, b_in_ref, w_res_ref, b_res_ref,
                  mask_in_ref, mask_res_ref, q_ref, b1_ref, w3t_ref, b3_ref,
                  out_ref, a_ref, fl_ref):
    """Whole forward pass for the full batch.

    Feature maps live as (NK, B*HW) = (8, 512): row = channel, lane =
    b*HW + h*W + w.  a_ref is the merged im2col buffer (K*K*NK, B*HW);
    fl_ref is the (B, NK*HW) flatten buffer feeding the folded linear1.
    """
    f32 = jnp.float32

    # ---- self.input: Conv2d(1, NK, (5,5), padding='same') — VPU FMAs on the
    #      unreplicated (1, 512) input row; masks kill out-of-image taps. ----
    x_row = x_ref[...]                                  # (1, TOT)
    w_in = w_in_ref[...]                                # (NK, KK)
    acc = jnp.zeros((NK, TOT), f32)
    for t in range(KK):
        tap = pltpu.roll(x_row, IN_SHIFTS[t], axis=1) * mask_in_ref[t:t + 1, :]
        acc = acc + tap * w_in[:, t:t + 1]              # (1,TOT)*(NK,1) bcast FMA
    x0 = acc + b_in_ref[...]                            # (NK, TOT)

    # ---- Residual2DBlock conv: Conv2d(NK,NK,(5,5),'same',dilation=5) ----
    # Rolled+masked taps -> one im2col slab -> ONE (8,200)@(200,512) MXU dot
    # covering both batch elements.
    def conv_res(v):
        for t in range(KK):
            a_ref[t * NK:(t + 1) * NK, :] = (
                pltpu.roll(v, RES_SHIFTS[t], axis=1) * mask_res_ref[t:t + 1, :])
        return (jnp.dot(w_res_ref[...], a_ref[...],
                        preferred_element_type=f32) + b_res_ref[...])

    # Residual2DBlock.forward: x = conv(x); relu_(x); x = conv(x); x + original
    y1 = jnp.maximum(conv_res(x0), 0.0)
    y2 = conv_res(y1)
    # Convolutional2DBlock: relu_(residual output)
    z = jnp.maximum(y2 + x0, 0.0)                       # (NK, TOT)

    # ---- MaxPool2d((2,5), stride=2): rolled maxima, maskless.  Valid because
    #      every anchor lane (<= 234 within its 256-lane map) only reads
    #      offsets <= 20, so wrap-around / cross-batch lanes are never anchor
    #      sources at this config.  Non-anchor lanes hold garbage maxima but
    #      their qstack rows are zero. ----
    m = z
    for dh in range(2):
        for dw in range(5):
            if dh == 0 and dw == 0:
                continue
            m = jnp.maximum(m, pltpu.roll(z, (-(dh * W + dw)) % TOT, axis=1))

    # ---- CHW flatten + (pool-select folded) linear1 -> relu -> linear3 ----
    for b in range(B):
        for c in range(NK):
            fl_ref[b:b + 1, c * HW:(c + 1) * HW] = m[c:c + 1, b * HW:(b + 1) * HW]
    h1 = (jnp.dot(fl_ref[...], q_ref[...], preferred_element_type=f32)
          + b1_ref[...])                                # (B, 32)
    # TODO(synk): nn.Dropout(p=0.25) is identity in eval mode; training-mode
    # masking (pltpu.prng_seed / prng_random_bits) is not implemented.
    h1 = jnp.maximum(h1, 0.0)
    out_ref[...] = (jnp.dot(h1, w3t_ref[...], preferred_element_type=f32)
                    + b3_ref[...])                      # (B, NUM_CLASSES)


# ------------------------------ JAX wrapper ----------------------------------
@jax.jit
def forward(x_nchw, params):
    (w_in, b_in, w_res, b_res, w1, b1, w3, b3) = params

    # Parameter / input relayout into the kernel layout.  In a real deployment
    # the weight side of this is done once at load time.
    x_row = x_nchw.reshape(1, TOT)                                  # (1, 512)
    w_in_mat = w_in.reshape(NK, KK)                                 # (8, 25)
    b_in_col = b_in.reshape(NK, 1)
    w_res_mat = jnp.transpose(w_res, (0, 2, 3, 1)).reshape(NK, KK * NK)  # (8, 200)
    b_res_col = b_res.reshape(NK, 1)
    # qstack[c*HW + anchor_p, :] = w1[:, c*POOL + pool_idx]; zero elsewhere.
    qstack = (jnp.zeros((NK * HW, NUM_NEURONS), jnp.float32)
              .at[_Q_ROWS].set(w1.T[_Q_COLS]))                      # (2048, 32)
    b1r = b1.reshape(1, NUM_NEURONS)
    w3t = w3.T                                                      # (32, 5)
    b3r = b3.reshape(1, NUM_CLASSES)
    mask_in = jnp.asarray(_MASK_IN_NP)                              # (25, 512)
    mask_res = jnp.asarray(_MASK_RES_NP)                            # (25, 512)

    return pl.pallas_call(
        _fused_kernel,
        out_shape=jax.ShapeDtypeStruct((B, NUM_CLASSES), jnp.float32),
        scratch_shapes=[
            pltpu.VMEM((KK * NK, TOT), jnp.float32),   # merged im2col buffer
            pltpu.VMEM((B, NK * HW), jnp.float32),     # flatten buffer
        ],
    )(x_row, w_in_mat, b_in_col, w_res_mat, b_res_col,
      mask_in, mask_res, qstack, b1r, w3t, b3r)


# --------------------------- pure-JAX reference ------------------------------
def reference_forward(x, params):
    (w_in, b_in, w_res, b_res, w1, b1, w3, b3) = params
    dn = ('NCHW', 'OIHW', 'NCHW')
    hp = jax.lax.Precision.HIGHEST
    y = lax.conv_general_dilated(
        x, w_in, (1, 1), [(PAD_IN, PAD_IN)] * 2,
        dimension_numbers=dn, precision=hp) + b_in.reshape(1, -1, 1, 1)

    def conv_res(v):
        return lax.conv_general_dilated(
            v, w_res, (1, 1), [(PAD_RES, PAD_RES)] * 2,
            rhs_dilation=(DIL, DIL),
            dimension_numbers=dn, precision=hp) + b_res.reshape(1, -1, 1, 1)

    c1 = jnp.maximum(conv_res(y), 0.0)
    z = jnp.maximum(conv_res(c1) + y, 0.0)
    p = lax.reduce_window(z, -jnp.inf, lax.max,
                          (1, 1, 2, 5), (1, 1, 2, 2), 'VALID')
    flat = p.reshape(B, -1)
    h = jnp.maximum(jnp.dot(flat, w1.T, precision=hp) + b1, 0.0)
    return jnp.dot(h, w3.T, precision=hp) + b3


# ----------------------------------- main ------------------------------------
if __name__ == "__main__":
    key = jax.random.PRNGKey(0)
    ks = jax.random.split(key, 9)
    x = jax.random.normal(ks[0], (B, CIN, H, W), jnp.float32)

    # Deterministic synthetic parameters (PyTorch shapes: OIHW convs, (out,in) linears).
    w_in = jax.random.normal(ks[1], (NK, CIN, K, K), jnp.float32) / (CIN * K * K) ** 0.5
    b_in = jax.random.normal(ks[2], (NK,), jnp.float32) * 0.1
    w_res = jax.random.normal(ks[3], (NK, NK, K, K), jnp.float32) / (NK * K * K) ** 0.5
    b_res = jax.random.normal(ks[4], (NK,), jnp.float32) * 0.1
    w1 = jax.random.normal(ks[5], (NUM_NEURONS, FEAT), jnp.float32) / FEAT ** 0.5
    b1 = jax.random.normal(ks[6], (NUM_NEURONS,), jnp.float32) * 0.1
    w3 = jax.random.normal(ks[7], (NUM_CLASSES, NUM_NEURONS), jnp.float32) / NUM_NEURONS ** 0.5
    b3 = jax.random.normal(ks[8], (NUM_CLASSES,), jnp.float32) * 0.1
    params = (w_in, b_in, w_res, b_res, w1, b1, w3, b3)

    logits = jax.block_until_ready(forward(x, params))
    ref = jax.block_until_ready(reference_forward(x, params))

    assert logits.shape == (B, NUM_CLASSES)
    assert jnp.allclose(logits, ref, rtol=2e-3, atol=2e-3), (logits, ref)
    print("KERNEL_OK")
</pallas_src>

<mosaic_0001>
module attributes {stable_mosaic.version = 11 : i64} {
  func.func @_fused_kernel(%arg0: memref<1x512xf32, #tpu.memory_space<vmem>>, %arg1: memref<8x25xf32, #tpu.memory_space<vmem>>, %arg2: memref<8x1xf32, #tpu.memory_space<vmem>>, %arg3: memref<8x200xf32, #tpu.memory_space<vmem>>, %arg4: memref<8x1xf32, #tpu.memory_space<vmem>>, %arg5: memref<25x512xf32, #tpu.memory_space<vmem>>, %arg6: memref<25x512xf32, #tpu.memory_space<vmem>>, %arg7: memref<2048x32xf32, #tpu.memory_space<vmem>>, %arg8: memref<1x32xf32, #tpu.memory_space<vmem>>, %arg9: memref<32x5xf32, #tpu.memory_space<vmem>>, %arg10: memref<1x5xf32, #tpu.memory_space<vmem>>, %arg11: memref<2x5xf32, #tpu.memory_space<vmem>>, %arg12: memref<200x512xf32, #tpu.memory_space<vmem>>, %arg13: memref<2x2048xf32, #tpu.memory_space<vmem>>) attributes {dimension_semantics = [], scalar_prefetch = 0 : i64, scratch_operands = 2 : i64, tpu.core_type = #tpu.core_type<tc>} {
    %c0 = arith.constant 0 : index
    %c0_0 = arith.constant 0 : index
    %0 = vector.load %arg0[%c0, %c0_0] : memref<1x512xf32, #tpu.memory_space<vmem>>, vector<1x512xf32>
    %c0_1 = arith.constant 0 : index
    %c0_2 = arith.constant 0 : index
    %1 = vector.load %arg1[%c0_1, %c0_2] : memref<8x25xf32, #tpu.memory_space<vmem>>, vector<8x25xf32>
    %cst = arith.constant 0.000000e+00 : f32
    %2 = vector.broadcast %cst : f32 to vector<8x512xf32>
    %c34_i32 = arith.constant 34 : i32
    %3 = tpu.dynamic_rotate %0 by %c34_i32 dim 1 : vector<1x512xf32>, i32 -> vector<1x512xf32>
    %c0_3 = arith.constant 0 : index
    %c0_4 = arith.constant 0 : index
    %4 = vector.load %arg5[%c0_3, %c0_4] : memref<25x512xf32, #tpu.memory_space<vmem>>, vector<1x512xf32>
    %5 = arith.mulf %3, %4 : vector<1x512xf32>
    %6 = vector.extract_strided_slice %1 {offsets = [0, 0], sizes = [8, 1], strides = [1, 1]} : vector<8x25xf32> to vector<8x1xf32>
    %7 = vector.broadcast %5 : vector<1x512xf32> to vector<8x512xf32>
    %8 = vector.broadcast %6 : vector<8x1xf32> to vector<8x512xf32>
    %9 = arith.mulf %7, %8 : vector<8x512xf32>
    %10 = arith.addf %2, %9 : vector<8x512xf32>
    %c33_i32 = arith.constant 33 : i32
    %11 = tpu.dynamic_rotate %0 by %c33_i32 dim 1 : vector<1x512xf32>, i32 -> vector<1x512xf32>
    %c1 = arith.constant 1 : index
    %c0_5 = arith.constant 0 : index
    %12 = vector.load %arg5[%c1, %c0_5] : memref<25x512xf32, #tpu.memory_space<vmem>>, vector<1x512xf32>
    %13 = arith.mulf %11, %12 : vector<1x512xf32>
    %14 = vector.extract_strided_slice %1 {offsets = [0, 1], sizes = [8, 1], strides = [1, 1]} : vector<8x25xf32> to vector<8x1xf32>
    %15 = vector.broadcast %13 : vector<1x512xf32> to vector<8x512xf32>
    %16 = vector.broadcast %14 : vector<8x1xf32> to vector<8x512xf32>
    %17 = arith.mulf %15, %16 : vector<8x512xf32>
    %18 = arith.addf %10, %17 : vector<8x512xf32>
    %c32_i32 = arith.constant 32 : i32
    %19 = tpu.dynamic_rotate %0 by %c32_i32 dim 1 : vector<1x512xf32>, i32 -> vector<1x512xf32>
    %c2 = arith.constant 2 : index
    %c0_6 = arith.constant 0 : index
    %20 = vector.load %arg5[%c2, %c0_6] : memref<25x512xf32, #tpu.memory_space<vmem>>, vector<1x512xf32>
    %21 = arith.mulf %19, %20 : vector<1x512xf32>
    %22 = vector.extract_strided_slice %1 {offsets = [0, 2], sizes = [8, 1], strides = [1, 1]} : vector<8x25xf32> to vector<8x1xf32>
    %23 = vector.broadcast %21 : vector<1x512xf32> to vector<8x512xf32>
    %24 = vector.broadcast %22 : vector<8x1xf32> to vector<8x512xf32>
    %25 = arith.mulf %23, %24 : vector<8x512xf32>
    %26 = arith.addf %18, %25 : vector<8x512xf32>
    %c31_i32 = arith.constant 31 : i32
    %27 = tpu.dynamic_rotate %0 by %c31_i32 dim 1 : vector<1x512xf32>, i32 -> vector<1x512xf32>
    %c3 = arith.constant 3 : index
    %c0_7 = arith.constant 0 : index
    %28 = vector.load %arg5[%c3, %c0_7] : memref<25x512xf32, #tpu.memory_space<vmem>>, vector<1x512xf32>
    %29 = arith.mulf %27, %28 : vector<1x512xf32>
    %30 = vector.extract_strided_slice %1 {offsets = [0, 3], sizes = [8, 1], strides = [1, 1]} : vector<8x25xf32> to vector<8x1xf32>
    %31 = vector.broadcast %29 : vector<1x512xf32> to vector<8x512xf32>
    %32 = vector.broadcast %30 : vector<8x1xf32> to vector<8x512xf32>
    %33 = arith.mulf %31, %32 : vector<8x512xf32>
    %34 = arith.addf %26, %33 : vector<8x512xf32>
    %c30_i32 = arith.constant 30 : i32
    %35 = tpu.dynamic_rotate %0 by %c30_i32 dim 1 : vector<1x512xf32>, i32 -> vector<1x512xf32>
    %c4 = arith.constant 4 : index
    %c0_8 = arith.constant 0 : index
    %36 = vector.load %arg5[%c4, %c0_8] : memref<25x512xf32, #tpu.memory_space<vmem>>, vector<1x512xf32>
    %37 = arith.mulf %35, %36 : vector<1x512xf32>
    %38 = vector.extract_strided_slice %1 {offsets = [0, 4], sizes = [8, 1], strides = [1, 1]} : vector<8x25xf32> to vector<8x1xf32>
    %39 = vector.broadcast %37 : vector<1x512xf32> to vector<8x512xf32>
    %40 = vector.broadcast %38 : vector<8x1xf32> to vector<8x512xf32>
    %41 = arith.mulf %39, %40 : vector<8x512xf32>
    %42 = arith.addf %34, %41 : vector<8x512xf32>
    %c18_i32 = arith.constant 18 : i32
    %43 = tpu.dynamic_rotate %0 by %c18_i32 dim 1 : vector<1x512xf32>, i32 -> vector<1x512xf32>
    %c5 = arith.constant 5 : index
    %c0_9 = arith.constant 0 : index
    %44 = vector.load %arg5[%c5, %c0_9] : memref<25x512xf32, #tpu.memory_space<vmem>>, vector<1x512xf32>
    %45 = arith.mulf %43, %44 : vector<1x512xf32>
    %46 = vector.extract_strided_slice %1 {offsets = [0, 5], sizes = [8, 1], strides = [1, 1]} : vector<8x25xf32> to vector<8x1xf32>
    %47 = vector.broadcast %45 : vector<1x512xf32> to vector<8x512xf32>
    %48 = vector.broadcast %46 : vector<8x1xf32> to vector<8x512xf32>
    %49 = arith.mulf %47, %48 : vector<8x512xf32>
    %50 = arith.addf %42, %49 : vector<8x512xf32>
    %c17_i32 = arith.constant 17 : i32
    %51 = tpu.dynamic_rotate %0 by %c17_i32 dim 1 : vector<1x512xf32>, i32 -> vector<1x512xf32>
    %c6 = arith.constant 6 : index
    %c0_10 = arith.constant 0 : index
    %52 = vector.load %arg5[%c6, %c0_10] : memref<25x512xf32, #tpu.memory_space<vmem>>, vector<1x512xf32>
    %53 = arith.mulf %51, %52 : vector<1x512xf32>
    %54 = vector.extract_strided_slice %1 {offsets = [0, 6], sizes = [8, 1], strides = [1, 1]} : vector<8x25xf32> to vector<8x1xf32>
    %55 = vector.broadcast %53 : vector<1x512xf32> to vector<8x512xf32>
    %56 = vector.broadcast %54 : vector<8x1xf32> to vector<8x512xf32>
    %57 = arith.mulf %55, %56 : vector<8x512xf32>
    %58 = arith.addf %50, %57 : vector<8x512xf32>
    %c16_i32 = arith.constant 16 : i32
    %59 = tpu.dynamic_rotate %0 by %c16_i32 dim 1 : vector<1x512xf32>, i32 -> vector<1x512xf32>
    %c7 = arith.constant 7 : index
    %c0_11 = arith.constant 0 : index
    %60 = vector.load %arg5[%c7, %c0_11] : memref<25x512xf32, #tpu.memory_space<vmem>>, vector<1x512xf32>
    %61 = arith.mulf %59, %60 : vector<1x512xf32>
    %62 = vector.extract_strided_slice %1 {offsets = [0, 7], sizes = [8, 1], strides = [1, 1]} : vector<8x25xf32> to vector<8x1xf32>
    %63 = vector.broadcast %61 : vector<1x512xf32> to vector<8x512xf32>
    %64 = vector.broadcast %62 : vector<8x1xf32> to vector<8x512xf32>
    %65 = arith.mulf %63, %64 : vector<8x512xf32>
    %66 = arith.addf %58, %65 : vector<8x512xf32>
    %c15_i32 = arith.constant 15 : i32
    %67 = tpu.dynamic_rotate %0 by %c15_i32 dim 1 : vector<1x512xf32>, i32 -> vector<1x512xf32>
    %c8 = arith.constant 8 : index
    %c0_12 = arith.constant 0 : index
    %68 = vector.load %arg5[%c8, %c0_12] : memref<25x512xf32, #tpu.memory_space<vmem>>, vector<1x512xf32>
    %69 = arith.mulf %67, %68 : vector<1x512xf32>
    %70 = vector.extract_strided_slice %1 {offsets = [0, 8], sizes = [8, 1], strides = [1, 1]} : vector<8x25xf32> to vector<8x1xf32>
    %71 = vector.broadcast %69 : vector<1x512xf32> to vector<8x512xf32>
    %72 = vector.broadcast %70 : vector<8x1xf32> to vector<8x512xf32>
    %73 = arith.mulf %71, %72 : vector<8x512xf32>
    %74 = arith.addf %66, %73 : vector<8x512xf32>
    %c14_i32 = arith.constant 14 : i32
    %75 = tpu.dynamic_rotate %0 by %c14_i32 dim 1 : vector<1x512xf32>, i32 -> vector<1x512xf32>
    %c9 = arith.constant 9 : index
    %c0_13 = arith.constant 0 : index
    %76 = vector.load %arg5[%c9, %c0_13] : memref<25x512xf32, #tpu.memory_space<vmem>>, vector<1x512xf32>
    %77 = arith.mulf %75, %76 : vector<1x512xf32>
    %78 = vector.extract_strided_slice %1 {offsets = [0, 9], sizes = [8, 1], strides = [1, 1]} : vector<8x25xf32> to vector<8x1xf32>
    %79 = vector.broadcast %77 : vector<1x512xf32> to vector<8x512xf32>
    %80 = vector.broadcast %78 : vector<8x1xf32> to vector<8x512xf32>
    %81 = arith.mulf %79, %80 : vector<8x512xf32>
    %82 = arith.addf %74, %81 : vector<8x512xf32>
    %c2_i32 = arith.constant 2 : i32
    %83 = tpu.dynamic_rotate %0 by %c2_i32 dim 1 : vector<1x512xf32>, i32 -> vector<1x512xf32>
    %c10 = arith.constant 10 : index
    %c0_14 = arith.constant 0 : index
    %84 = vector.load %arg5[%c10, %c0_14] : memref<25x512xf32, #tpu.memory_space<vmem>>, vector<1x512xf32>
    %85 = arith.mulf %83, %84 : vector<1x512xf32>
    %86 = vector.extract_strided_slice %1 {offsets = [0, 10], sizes = [8, 1], strides = [1, 1]} : vector<8x25xf32> to vector<8x1xf32>
    %87 = vector.broadcast %85 : vector<1x512xf32> to vector<8x512xf32>
    %88 = vector.broadcast %86 : vector<8x1xf32> to vector<8x512xf32>
    %89 = arith.mulf %87, %88 : vector<8x512xf32>
    %90 = arith.addf %82, %89 : vector<8x512xf32>
    %c1_i32 = arith.constant 1 : i32
    %91 = tpu.dynamic_rotate %0 by %c1_i32 dim 1 : vector<1x512xf32>, i32 -> vector<1x512xf32>
    %c11 = arith.constant 11 : index
    %c0_15 = arith.constant 0 : index
    %92 = vector.load %arg5[%c11, %c0_15] : memref<25x512xf32, #tpu.memory_space<vmem>>, vector<1x512xf32>
    %93 = arith.mulf %91, %92 : vector<1x512xf32>
    %94 = vector.extract_strided_slice %1 {offsets = [0, 11], sizes = [8, 1], strides = [1, 1]} : vector<8x25xf32> to vector<8x1xf32>
    %95 = vector.broadcast %93 : vector<1x512xf32> to vector<8x512xf32>
    %96 = vector.broadcast %94 : vector<8x1xf32> to vector<8x512xf32>
    %97 = arith.mulf %95, %96 : vector<8x512xf32>
    %98 = arith.addf %90, %97 : vector<8x512xf32>
    %c0_i32 = arith.constant 0 : i32
    %99 = tpu.dynamic_rotate %0 by %c0_i32 dim 1 : vector<1x512xf32>, i32 -> vector<1x512xf32>
    %c12 = arith.constant 12 : index
    %c0_16 = arith.constant 0 : index
    %100 = vector.load %arg5[%c12, %c0_16] : memref<25x512xf32, #tpu.memory_space<vmem>>, vector<1x512xf32>
    %101 = arith.mulf %99, %100 : vector<1x512xf32>
    %102 = vector.extract_strided_slice %1 {offsets = [0, 12], sizes = [8, 1], strides = [1, 1]} : vector<8x25xf32> to vector<8x1xf32>
    %103 = vector.broadcast %101 : vector<1x512xf32> to vector<8x512xf32>
    %104 = vector.broadcast %102 : vector<8x1xf32> to vector<8x512xf32>
    %105 = arith.mulf %103, %104 : vector<8x512xf32>
    %106 = arith.addf %98, %105 : vector<8x512xf32>
    %c511_i32 = arith.constant 511 : i32
    %107 = tpu.dynamic_rotate %0 by %c511_i32 dim 1 : vector<1x512xf32>, i32 -> vector<1x512xf32>
    %c13 = arith.constant 13 : index
    %c0_17 = arith.constant 0 : index
    %108 = vector.load %arg5[%c13, %c0_17] : memref<25x512xf32, #tpu.memory_space<vmem>>, vector<1x512xf32>
    %109 = arith.mulf %107, %108 : vector<1x512xf32>
    %110 = vector.extract_strided_slice %1 {offsets = [0, 13], sizes = [8, 1], strides = [1, 1]} : vector<8x25xf32> to vector<8x1xf32>
    %111 = vector.broadcast %109 : vector<1x512xf32> to vector<8x512xf32>
    %112 = vector.broadcast %110 : vector<8x1xf32> to vector<8x512xf32>
    %113 = arith.mulf %111, %112 : vector<8x512xf32>
    %114 = arith.addf %106, %113 : vector<8x512xf32>
    %c510_i32 = arith.constant 510 : i32
    %115 = tpu.dynamic_rotate %0 by %c510_i32 dim 1 : vector<1x512xf32>, i32 -> vector<1x512xf32>
    %c14 = arith.constant 14 : index
    %c0_18 = arith.constant 0 : index
    %116 = vector.load %arg5[%c14, %c0_18] : memref<25x512xf32, #tpu.memory_space<vmem>>, vector<1x512xf32>
    %117 = arith.mulf %115, %116 : vector<1x512xf32>
    %118 = vector.extract_strided_slice %1 {offsets = [0, 14], sizes = [8, 1], strides = [1, 1]} : vector<8x25xf32> to vector<8x1xf32>
    %119 = vector.broadcast %117 : vector<1x512xf32> to vector<8x512xf32>
    %120 = vector.broadcast %118 : vector<8x1xf32> to vector<8x512xf32>
    %121 = arith.mulf %119, %120 : vector<8x512xf32>
    %122 = arith.addf %114, %121 : vector<8x512xf32>
    %c498_i32 = arith.constant 498 : i32
    %123 = tpu.dynamic_rotate %0 by %c498_i32 dim 1 : vector<1x512xf32>, i32 -> vector<1x512xf32>
    %c15 = arith.constant 15 : index
    %c0_19 = arith.constant 0 : index
    %124 = vector.load %arg5[%c15, %c0_19] : memref<25x512xf32, #tpu.memory_space<vmem>>, vector<1x512xf32>
    %125 = arith.mulf %123, %124 : vector<1x512xf32>
    %126 = vector.extract_strided_slice %1 {offsets = [0, 15], sizes = [8, 1], strides = [1, 1]} : vector<8x25xf32> to vector<8x1xf32>
    %127 = vector.broadcast %125 : vector<1x512xf32> to vector<8x512xf32>
    %128 = vector.broadcast %126 : vector<8x1xf32> to vector<8x512xf32>
    %129 = arith.mulf %127, %128 : vector<8x512xf32>
    %130 = arith.addf %122, %129 : vector<8x512xf32>
    %c497_i32 = arith.constant 497 : i32
    %131 = tpu.dynamic_rotate %0 by %c497_i32 dim 1 : vector<1x512xf32>, i32 -> vector<1x512xf32>
    %c16 = arith.constant 16 : index
    %c0_20 = arith.constant 0 : index
    %132 = vector.load %arg5[%c16, %c0_20] : memref<25x512xf32, #tpu.memory_space<vmem>>, vector<1x512xf32>
    %133 = arith.mulf %131, %132 : vector<1x512xf32>
    %134 = vector.extract_strided_slice %1 {offsets = [0, 16], sizes = [8, 1], strides = [1, 1]} : vector<8x25xf32> to vector<8x1xf32>
    %135 = vector.broadcast %133 : vector<1x512xf32> to vector<8x512xf32>
    %136 = vector.broadcast %134 : vector<8x1xf32> to vector<8x512xf32>
    %137 = arith.mulf %135, %136 : vector<8x512xf32>
    %138 = arith.addf %130, %137 : vector<8x512xf32>
    %c496_i32 = arith.constant 496 : i32
    %139 = tpu.dynamic_rotate %0 by %c496_i32 dim 1 : vector<1x512xf32>, i32 -> vector<1x512xf32>
    %c17 = arith.constant 17 : index
    %c0_21 = arith.constant 0 : index
    %140 = vector.load %arg5[%c17, %c0_21] : memref<25x512xf32, #tpu.memory_space<vmem>>, vector<1x512xf32>
    %141 = arith.mulf %139, %140 : vector<1x512xf32>
    %142 = vector.extract_strided_slice %1 {offsets = [0, 17], sizes = [8, 1], strides = [1, 1]} : vector<8x25xf32> to vector<8x1xf32>
    %143 = vector.broadcast %141 : vector<1x512xf32> to vector<8x512xf32>
    %144 = vector.broadcast %142 : vector<8x1xf32> to vector<8x512xf32>
    %145 = arith.mulf %143, %144 : vector<8x512xf32>
    %146 = arith.addf %138, %145 : vector<8x512xf32>
    %c495_i32 = arith.constant 495 : i32
    %147 = tpu.dynamic_rotate %0 by %c495_i32 dim 1 : vector<1x512xf32>, i32 -> vector<1x512xf32>
    %c18 = arith.constant 18 : index
    %c0_22 = arith.constant 0 : index
    %148 = vector.load %arg5[%c18, %c0_22] : memref<25x512xf32, #tpu.memory_space<vmem>>, vector<1x512xf32>
    %149 = arith.mulf %147, %148 : vector<1x512xf32>
    %150 = vector.extract_strided_slice %1 {offsets = [0, 18], sizes = [8, 1], strides = [1, 1]} : vector<8x25xf32> to vector<8x1xf32>
    %151 = vector.broadcast %149 : vector<1x512xf32> to vector<8x512xf32>
    %152 = vector.broadcast %150 : vector<8x1xf32> to vector<8x512xf32>
    %153 = arith.mulf %151, %152 : vector<8x512xf32>
    %154 = arith.addf %146, %153 : vector<8x512xf32>
    %c494_i32 = arith.constant 494 : i32
    %155 = tpu.dynamic_rotate %0 by %c494_i32 dim 1 : vector<1x512xf32>, i32 -> vector<1x512xf32>
    %c19 = arith.constant 19 : index
    %c0_23 = arith.constant 0 : index
    %156 = vector.load %arg5[%c19, %c0_23] : memref<25x512xf32, #tpu.memory_space<vmem>>, vector<1x512xf32>
    %157 = arith.mulf %155, %156 : vector<1x512xf32>
    %158 = vector.extract_strided_slice %1 {offsets = [0, 19], sizes = [8, 1], strides = [1, 1]} : vector<8x25xf32> to vector<8x1xf32>
    %159 = vector.broadcast %157 : vector<1x512xf32> to vector<8x512xf32>
    %160 = vector.broadcast %158 : vector<8x1xf32> to vector<8x512xf32>
    %161 = arith.mulf %159, %160 : vector<8x512xf32>
    %162 = arith.addf %154, %161 : vector<8x512xf32>
    %c482_i32 = arith.constant 482 : i32
    %163 = tpu.dynamic_rotate %0 by %c482_i32 dim 1 : vector<1x512xf32>, i32 -> vector<1x512xf32>
    %c20 = arith.constant 20 : index
    %c0_24 = arith.constant 0 : index
    %164 = vector.load %arg5[%c20, %c0_24] : memref<25x512xf32, #tpu.memory_space<vmem>>, vector<1x512xf32>
    %165 = arith.mulf %163, %164 : vector<1x512xf32>
    %166 = vector.extract_strided_slice %1 {offsets = [0, 20], sizes = [8, 1], strides = [1, 1]} : vector<8x25xf32> to vector<8x1xf32>
    %167 = vector.broadcast %165 : vector<1x512xf32> to vector<8x512xf32>
    %168 = vector.broadcast %166 : vector<8x1xf32> to vector<8x512xf32>
    %169 = arith.mulf %167, %168 : vector<8x512xf32>
    %170 = arith.addf %162, %169 : vector<8x512xf32>
    %c481_i32 = arith.constant 481 : i32
    %171 = tpu.dynamic_rotate %0 by %c481_i32 dim 1 : vector<1x512xf32>, i32 -> vector<1x512xf32>
    %c21 = arith.constant 21 : index
    %c0_25 = arith.constant 0 : index
    %172 = vector.load %arg5[%c21, %c0_25] : memref<25x512xf32, #tpu.memory_space<vmem>>, vector<1x512xf32>
    %173 = arith.mulf %171, %172 : vector<1x512xf32>
    %174 = vector.extract_strided_slice %1 {offsets = [0, 21], sizes = [8, 1], strides = [1, 1]} : vector<8x25xf32> to vector<8x1xf32>
    %175 = vector.broadcast %173 : vector<1x512xf32> to vector<8x512xf32>
    %176 = vector.broadcast %174 : vector<8x1xf32> to vector<8x512xf32>
    %177 = arith.mulf %175, %176 : vector<8x512xf32>
    %178 = arith.addf %170, %177 : vector<8x512xf32>
    %c480_i32 = arith.constant 480 : i32
    %179 = tpu.dynamic_rotate %0 by %c480_i32 dim 1 : vector<1x512xf32>, i32 -> vector<1x512xf32>
    %c22 = arith.constant 22 : index
    %c0_26 = arith.constant 0 : index
    %180 = vector.load %arg5[%c22, %c0_26] : memref<25x512xf32, #tpu.memory_space<vmem>>, vector<1x512xf32>
    %181 = arith.mulf %179, %180 : vector<1x512xf32>
    %182 = vector.extract_strided_slice %1 {offsets = [0, 22], sizes = [8, 1], strides = [1, 1]} : vector<8x25xf32> to vector<8x1xf32>
    %183 = vector.broadcast %181 : vector<1x512xf32> to vector<8x512xf32>
    %184 = vector.broadcast %182 : vector<8x1xf32> to vector<8x512xf32>
    %185 = arith.mulf %183, %184 : vector<8x512xf32>
    %186 = arith.addf %178, %185 : vector<8x512xf32>
    %c479_i32 = arith.constant 479 : i32
    %187 = tpu.dynamic_rotate %0 by %c479_i32 dim 1 : vector<1x512xf32>, i32 -> vector<1x512xf32>
    %c23 = arith.constant 23 : index
    %c0_27 = arith.constant 0 : index
    %188 = vector.load %arg5[%c23, %c0_27] : memref<25x512xf32, #tpu.memory_space<vmem>>, vector<1x512xf32>
    %189 = arith.mulf %187, %188 : vector<1x512xf32>
    %190 = vector.extract_strided_slice %1 {offsets = [0, 23], sizes = [8, 1], strides = [1, 1]} : vector<8x25xf32> to vector<8x1xf32>
    %191 = vector.broadcast %189 : vector<1x512xf32> to vector<8x512xf32>
    %192 = vector.broadcast %190 : vector<8x1xf32> to vector<8x512xf32>
    %193 = arith.mulf %191, %192 : vector<8x512xf32>
    %194 = arith.addf %186, %193 : vector<8x512xf32>
    %c478_i32 = arith.constant 478 : i32
    %195 = tpu.dynamic_rotate %0 by %c478_i32 dim 1 : vector<1x512xf32>, i32 -> vector<1x512xf32>
    %c24 = arith.constant 24 : index
    %c0_28 = arith.constant 0 : index
    %196 = vector.load %arg5[%c24, %c0_28] : memref<25x512xf32, #tpu.memory_space<vmem>>, vector<1x512xf32>
    %197 = arith.mulf %195, %196 : vector<1x512xf32>
    %198 = vector.extract_strided_slice %1 {offsets = [0, 24], sizes = [8, 1], strides = [1, 1]} : vector<8x25xf32> to vector<8x1xf32>
    %199 = vector.broadcast %197 : vector<1x512xf32> to vector<8x512xf32>
    %200 = vector.broadcast %198 : vector<8x1xf32> to vector<8x512xf32>
    %201 = arith.mulf %199, %200 : vector<8x512xf32>
    %202 = arith.addf %194, %201 : vector<8x512xf32>
    %c0_29 = arith.constant 0 : index
    %c0_30 = arith.constant 0 : index
    %203 = vector.load %arg2[%c0_29, %c0_30] : memref<8x1xf32, #tpu.memory_space<vmem>>, vector<8x1xf32>
    %204 = vector.broadcast %203 : vector<8x1xf32> to vector<8x512xf32>
    %205 = arith.addf %202, %204 : vector<8x512xf32>
    %c170_i32 = arith.constant 170 : i32
    %206 = tpu.dynamic_rotate %205 by %c170_i32 dim 1 : vector<8x512xf32>, i32 -> vector<8x512xf32>
    %c0_31 = arith.constant 0 : index
    %c0_32 = arith.constant 0 : index
    %207 = vector.load %arg6[%c0_31, %c0_32] : memref<25x512xf32, #tpu.memory_space<vmem>>, vector<1x512xf32>
    %208 = vector.broadcast %207 : vector<1x512xf32> to vector<8x512xf32>
    %209 = arith.mulf %206, %208 : vector<8x512xf32>
    %c0_33 = arith.constant 0 : index
    %c0_34 = arith.constant 0 : index
    %210 = vector.load %arg12[%c0_33, %c0_34] : memref<200x512xf32, #tpu.memory_space<vmem>>, vector<8x512xf32>
    tpu.vector_store %arg12[%c0_33, %c0_34], %209 {strides = array<i32>} : memref<200x512xf32, #tpu.memory_space<vmem>>, vector<8x512xf32>,
    %c165_i32 = arith.constant 165 : i32
    %211 = tpu.dynamic_rotate %205 by %c165_i32 dim 1 : vector<8x512xf32>, i32 -> vector<8x512xf32>
    %c1_35 = arith.constant 1 : index
    %c0_36 = arith.constant 0 : index
    %212 = vector.load %arg6[%c1_35, %c0_36] : memref<25x512xf32, #tpu.memory_space<vmem>>, vector<1x512xf32>
    %213 = vector.broadcast %212 : vector<1x512xf32> to vector<8x512xf32>
    %214 = arith.mulf %211, %213 : vector<8x512xf32>
    %c8_37 = arith.constant 8 : index
    %c0_38 = arith.constant 0 : index
    %215 = vector.load %arg12[%c8_37, %c0_38] : memref<200x512xf32, #tpu.memory_space<vmem>>, vector<8x512xf32>
    tpu.vector_store %arg12[%c8_37, %c0_38], %214 {strides = array<i32>} : memref<200x512xf32, #tpu.memory_space<vmem>>, vector<8x512xf32>,
    %c160_i32 = arith.constant 160 : i32
    %216 = tpu.dynamic_rotate %205 by %c160_i32 dim 1 : vector<8x512xf32>, i32 -> vector<8x512xf32>
    %c2_39 = arith.constant 2 : index
    %c0_40 = arith.constant 0 : index
    %217 = vector.load %arg6[%c2_39, %c0_40] : memref<25x512xf32, #tpu.memory_space<vmem>>, vector<1x512xf32>
    %218 = vector.broadcast %217 : vector<1x512xf32> to vector<8x512xf32>
    %219 = arith.mulf %216, %218 : vector<8x512xf32>
    %c16_41 = arith.constant 16 : index
    %c0_42 = arith.constant 0 : index
    %220 = vector.load %arg12[%c16_41, %c0_42] : memref<200x512xf32, #tpu.memory_space<vmem>>, vector<8x512xf32>
    tpu.vector_store %arg12[%c16_41, %c0_42], %219 {strides = array<i32>} : memref<200x512xf32, #tpu.memory_space<vmem>>, vector<8x512xf32>,
    %c155_i32 = arith.constant 155 : i32
    %221 = tpu.dynamic_rotate %205 by %c155_i32 dim 1 : vector<8x512xf32>, i32 -> vector<8x512xf32>
    %c3_43 = arith.constant 3 : index
    %c0_44 = arith.constant 0 : index
    %222 = vector.load %arg6[%c3_43, %c0_44] : memref<25x512xf32, #tpu.memory_space<vmem>>, vector<1x512xf32>
    %223 = vector.broadcast %222 : vector<1x512xf32> to vector<8x512xf32>
    %224 = arith.mulf %221, %223 : vector<8x512xf32>
    %c24_45 = arith.constant 24 : index
    %c0_46 = arith.constant 0 : index
    %225 = vector.load %arg12[%c24_45, %c0_46] : memref<200x512xf32, #tpu.memory_space<vmem>>, vector<8x512xf32>
    tpu.vector_store %arg12[%c24_45, %c0_46], %224 {strides = array<i32>} : memref<200x512xf32, #tpu.memory_space<vmem>>, vector<8x512xf32>,
    %c150_i32 = arith.constant 150 : i32
    %226 = tpu.dynamic_rotate %205 by %c150_i32 dim 1 : vector<8x512xf32>, i32 -> vector<8x512xf32>
    %c4_47 = arith.constant 4 : index
    %c0_48 = arith.constant 0 : index
    %227 = vector.load %arg6[%c4_47, %c0_48] : memref<25x512xf32, #tpu.memory_space<vmem>>, vector<1x512xf32>
    %228 = vector.broadcast %227 : vector<1x512xf32> to vector<8x512xf32>
    %229 = arith.mulf %226, %228 : vector<8x512xf32>
    %c32 = arith.constant 32 : index
    %c0_49 = arith.constant 0 : index
    %230 = vector.load %arg12[%c32, %c0_49] : memref<200x512xf32, #tpu.memory_space<vmem>>, vector<8x512xf32>
    tpu.vector_store %arg12[%c32, %c0_49], %229 {strides = array<i32>} : memref<200x512xf32, #tpu.memory_space<vmem>>, vector<8x512xf32>,
    %c90_i32 = arith.constant 90 : i32
    %231 = tpu.dynamic_rotate %205 by %c90_i32 dim 1 : vector<8x512xf32>, i32 -> vector<8x512xf32>
    %c5_50 = arith.constant 5 : index
    %c0_51 = arith.constant 0 : index
    %232 = vector.load %arg6[%c5_50, %c0_51] : memref<25x512xf32, #tpu.memory_space<vmem>>, vector<1x512xf32>
    %233 = vector.broadcast %232 : vector<1x512xf32> to vector<8x512xf32>
    %234 = arith.mulf %231, %233 : vector<8x512xf32>
    %c40 = arith.constant 40 : index
    %c0_52 = arith.constant 0 : index
    %235 = vector.load %arg12[%c40, %c0_52] : memref<200x512xf32, #tpu.memory_space<vmem>>, vector<8x512xf32>
    tpu.vector_store %arg12[%c40, %c0_52], %234 {strides = array<i32>} : memref<200x512xf32, #tpu.memory_space<vmem>>, vector<8x512xf32>,
    %c85_i32 = arith.constant 85 : i32
    %236 = tpu.dynamic_rotate %205 by %c85_i32 dim 1 : vector<8x512xf32>, i32 -> vector<8x512xf32>
    %c6_53 = arith.constant 6 : index
    %c0_54 = arith.constant 0 : index
    %237 = vector.load %arg6[%c6_53, %c0_54] : memref<25x512xf32, #tpu.memory_space<vmem>>, vector<1x512xf32>
    %238 = vector.broadcast %237 : vector<1x512xf32> to vector<8x512xf32>
    %239 = arith.mulf %236, %238 : vector<8x512xf32>
    %c48 = arith.constant 48 : index
    %c0_55 = arith.constant 0 : index
    %240 = vector.load %arg12[%c48, %c0_55] : memref<200x512xf32, #tpu.memory_space<vmem>>, vector<8x512xf32>
    tpu.vector_store %arg12[%c48, %c0_55], %239 {strides = array<i32>} : memref<200x512xf32, #tpu.memory_space<vmem>>, vector<8x512xf32>,
    %c80_i32 = arith.constant 80 : i32
    %241 = tpu.dynamic_rotate %205 by %c80_i32 dim 1 : vector<8x512xf32>, i32 -> vector<8x512xf32>
    %c7_56 = arith.constant 7 : index
    %c0_57 = arith.constant 0 : index
    %242 = vector.load %arg6[%c7_56, %c0_57] : memref<25x512xf32, #tpu.memory_space<vmem>>, vector<1x512xf32>
    %243 = vector.broadcast %242 : vector<1x512xf32> to vector<8x512xf32>
    %244 = arith.mulf %241, %243 : vector<8x512xf32>
    %c56 = arith.constant 56 : index
    %c0_58 = arith.constant 0 : index
    %245 = vector.load %arg12[%c56, %c0_58] : memref<200x512xf32, #tpu.memory_space<vmem>>, vector<8x512xf32>
    tpu.vector_store %arg12[%c56, %c0_58], %244 {strides = array<i32>} : memref<200x512xf32, #tpu.memory_space<vmem>>, vector<8x512xf32>,
    %c75_i32 = arith.constant 75 : i32
    %246 = tpu.dynamic_rotate %205 by %c75_i32 dim 1 : vector<8x512xf32>, i32 -> vector<8x512xf32>
    %c8_59 = arith.constant 8 : index
    %c0_60 = arith.constant 0 : index
    %247 = vector.load %arg6[%c8_59, %c0_60] : memref<25x512xf32, #tpu.memory_space<vmem>>, vector<1x512xf32>
    %248 = vector.broadcast %247 : vector<1x512xf32> to vector<8x512xf32>
    %249 = arith.mulf %246, %248 : vector<8x512xf32>
    %c64 = arith.constant 64 : index
    %c0_61 = arith.constant 0 : index
    %250 = vector.load %arg12[%c64, %c0_61] : memref<200x512xf32, #tpu.memory_space<vmem>>, vector<8x512xf32>
    tpu.vector_store %arg12[%c64, %c0_61], %249 {strides = array<i32>} : memref<200x512xf32, #tpu.memory_space<vmem>>, vector<8x512xf32>,
    %c70_i32 = arith.constant 70 : i32
    %251 = tpu.dynamic_rotate %205 by %c70_i32 dim 1 : vector<8x512xf32>, i32 -> vector<8x512xf32>
    %c9_62 = arith.constant 9 : index
    %c0_63 = arith.constant 0 : index
    %252 = vector.load %arg6[%c9_62, %c0_63] : memref<25x512xf32, #tpu.memory_space<vmem>>, vector<1x512xf32>
    %253 = vector.broadcast %252 : vector<1x512xf32> to vector<8x512xf32>
    %254 = arith.mulf %251, %253 : vector<8x512xf32>
    %c72 = arith.constant 72 : index
    %c0_64 = arith.constant 0 : index
    %255 = vector.load %arg12[%c72, %c0_64] : memref<200x512xf32, #tpu.memory_space<vmem>>, vector<8x512xf32>
    tpu.vector_store %arg12[%c72, %c0_64], %254 {strides = array<i32>} : memref<200x512xf32, #tpu.memory_space<vmem>>, vector<8x512xf32>,
    %c10_i32 = arith.constant 10 : i32
    %256 = tpu.dynamic_rotate %205 by %c10_i32 dim 1 : vector<8x512xf32>, i32 -> vector<8x512xf32>
    %c10_65 = arith.constant 10 : index
    %c0_66 = arith.constant 0 : index
    %257 = vector.load %arg6[%c10_65, %c0_66] : memref<25x512xf32, #tpu.memory_space<vmem>>, vector<1x512xf32>
    %258 = vector.broadcast %257 : vector<1x512xf32> to vector<8x512xf32>
    %259 = arith.mulf %256, %258 : vector<8x512xf32>
    %c80 = arith.constant 80 : index
    %c0_67 = arith.constant 0 : index
    %260 = vector.load %arg12[%c80, %c0_67] : memref<200x512xf32, #tpu.memory_space<vmem>>, vector<8x512xf32>
    tpu.vector_store %arg12[%c80, %c0_67], %259 {strides = array<i32>} : memref<200x512xf32, #tpu.memory_space<vmem>>, vector<8x512xf32>,
    %c5_i32 = arith.constant 5 : i32
    %261 = tpu.dynamic_rotate %205 by %c5_i32 dim 1 : vector<8x512xf32>, i32 -> vector<8x512xf32>
    %c11_68 = arith.constant 11 : index
    %c0_69 = arith.constant 0 : index
    %262 = vector.load %arg6[%c11_68, %c0_69] : memref<25x512xf32, #tpu.memory_space<vmem>>, vector<1x512xf32>
    %263 = vector.broadcast %262 : vector<1x512xf32> to vector<8x512xf32>
    %264 = arith.mulf %261, %263 : vector<8x512xf32>
    %c88 = arith.constant 88 : index
    %c0_70 = arith.constant 0 : index
    %265 = vector.load %arg12[%c88, %c0_70] : memref<200x512xf32, #tpu.memory_space<vmem>>, vector<8x512xf32>
    tpu.vector_store %arg12[%c88, %c0_70], %264 {strides = array<i32>} : memref<200x512xf32, #tpu.memory_space<vmem>>, vector<8x512xf32>,
    %c0_i32_71 = arith.constant 0 : i32
    %266 = tpu.dynamic_rotate %205 by %c0_i32_71 dim 1 : vector<8x512xf32>, i32 -> vector<8x512xf32>
    %c12_72 = arith.constant 12 : index
    %c0_73 = arith.constant 0 : index
    %267 = vector.load %arg6[%c12_72, %c0_73] : memref<25x512xf32, #tpu.memory_space<vmem>>, vector<1x512xf32>
    %268 = vector.broadcast %267 : vector<1x512xf32> to vector<8x512xf32>
    %269 = arith.mulf %266, %268 : vector<8x512xf32>
    %c96 = arith.constant 96 : index
    %c0_74 = arith.constant 0 : index
    %270 = vector.load %arg12[%c96, %c0_74] : memref<200x512xf32, #tpu.memory_space<vmem>>, vector<8x512xf32>
    tpu.vector_store %arg12[%c96, %c0_74], %269 {strides = array<i32>} : memref<200x512xf32, #tpu.memory_space<vmem>>, vector<8x512xf32>,
    %c507_i32 = arith.constant 507 : i32
    %271 = tpu.dynamic_rotate %205 by %c507_i32 dim 1 : vector<8x512xf32>, i32 -> vector<8x512xf32>
    %c13_75 = arith.constant 13 : index
    %c0_76 = arith.constant 0 : index
    %272 = vector.load %arg6[%c13_75, %c0_76] : memref<25x512xf32, #tpu.memory_space<vmem>>, vector<1x512xf32>
    %273 = vector.broadcast %272 : vector<1x512xf32> to vector<8x512xf32>
    %274 = arith.mulf %271, %273 : vector<8x512xf32>
    %c104 = arith.constant 104 : index
    %c0_77 = arith.constant 0 : index
    %275 = vector.load %arg12[%c104, %c0_77] : memref<200x512xf32, #tpu.memory_space<vmem>>, vector<8x512xf32>
    tpu.vector_store %arg12[%c104, %c0_77], %274 {strides = array<i32>} : memref<200x512xf32, #tpu.memory_space<vmem>>, vector<8x512xf32>,
    %c502_i32 = arith.constant 502 : i32
    %276 = tpu.dynamic_rotate %205 by %c502_i32 dim 1 : vector<8x512xf32>, i32 -> vector<8x512xf32>
    %c14_78 = arith.constant 14 : index
    %c0_79 = arith.constant 0 : index
    %277 = vector.load %arg6[%c14_78, %c0_79] : memref<25x512xf32, #tpu.memory_space<vmem>>, vector<1x512xf32>
    %278 = vector.broadcast %277 : vector<1x512xf32> to vector<8x512xf32>
    %279 = arith.mulf %276, %278 : vector<8x512xf32>
    %c112 = arith.constant 112 : index
    %c0_80 = arith.constant 0 : index
    %280 = vector.load %arg12[%c112, %c0_80] : memref<200x512xf32, #tpu.memory_space<vmem>>, vector<8x512xf32>
    tpu.vector_store %arg12[%c112, %c0_80], %279 {strides = array<i32>} : memref<200x512xf32, #tpu.memory_space<vmem>>, vector<8x512xf32>,
    %c442_i32 = arith.constant 442 : i32
    %281 = tpu.dynamic_rotate %205 by %c442_i32 dim 1 : vector<8x512xf32>, i32 -> vector<8x512xf32>
    %c15_81 = arith.constant 15 : index
    %c0_82 = arith.constant 0 : index
    %282 = vector.load %arg6[%c15_81, %c0_82] : memref<25x512xf32, #tpu.memory_space<vmem>>, vector<1x512xf32>
    %283 = vector.broadcast %282 : vector<1x512xf32> to vector<8x512xf32>
    %284 = arith.mulf %281, %283 : vector<8x512xf32>
    %c120 = arith.constant 120 : index
    %c0_83 = arith.constant 0 : index
    %285 = vector.load %arg12[%c120, %c0_83] : memref<200x512xf32, #tpu.memory_space<vmem>>, vector<8x512xf32>
    tpu.vector_store %arg12[%c120, %c0_83], %284 {strides = array<i32>} : memref<200x512xf32, #tpu.memory_space<vmem>>, vector<8x512xf32>,
    %c437_i32 = arith.constant 437 : i32
    %286 = tpu.dynamic_rotate %205 by %c437_i32 dim 1 : vector<8x512xf32>, i32 -> vector<8x512xf32>
    %c16_84 = arith.constant 16 : index
    %c0_85 = arith.constant 0 : index
    %287 = vector.load %arg6[%c16_84, %c0_85] : memref<25x512xf32, #tpu.memory_space<vmem>>, vector<1x512xf32>
    %288 = vector.broadcast %287 : vector<1x512xf32> to vector<8x512xf32>
    %289 = arith.mulf %286, %288 : vector<8x512xf32>
    %c128 = arith.constant 128 : index
    %c0_86 = arith.constant 0 : index
    %290 = vector.load %arg12[%c128, %c0_86] : memref<200x512xf32, #tpu.memory_space<vmem>>, vector<8x512xf32>
    tpu.vector_store %arg12[%c128, %c0_86], %289 {strides = array<i32>} : memref<200x512xf32, #tpu.memory_space<vmem>>, vector<8x512xf32>,
    %c432_i32 = arith.constant 432 : i32
    %291 = tpu.dynamic_rotate %205 by %c432_i32 dim 1 : vector<8x512xf32>, i32 -> vector<8x512xf32>
    %c17_87 = arith.constant 17 : index
    %c0_88 = arith.constant 0 : index
    %292 = vector.load %arg6[%c17_87, %c0_88] : memref<25x512xf32, #tpu.memory_space<vmem>>, vector<1x512xf32>
    %293 = vector.broadcast %292 : vector<1x512xf32> to vector<8x512xf32>
    %294 = arith.mulf %291, %293 : vector<8x512xf32>
    %c136 = arith.constant 136 : index
    %c0_89 = arith.constant 0 : index
    %295 = vector.load %arg12[%c136, %c0_89] : memref<200x512xf32, #tpu.memory_space<vmem>>, vector<8x512xf32>
    tpu.vector_store %arg12[%c136, %c0_89], %294 {strides = array<i32>} : memref<200x512xf32, #tpu.memory_space<vmem>>, vector<8x512xf32>,
    %c427_i32 = arith.constant 427 : i32
    %296 = tpu.dynamic_rotate %205 by %c427_i32 dim 1 : vector<8x512xf32>, i32 -> vector<8x512xf32>
    %c18_90 = arith.constant 18 : index
    %c0_91 = arith.constant 0 : index
    %297 = vector.load %arg6[%c18_90, %c0_91] : memref<25x512xf32, #tpu.memory_space<vmem>>, vector<1x512xf32>
    %298 = vector.broadcast %297 : vector<1x512xf32> to vector<8x512xf32>
    %299 = arith.mulf %296, %298 : vector<8x512xf32>
    %c144 = arith.constant 144 : index
    %c0_92 = arith.constant 0 : index
    %300 = vector.load %arg12[%c144, %c0_92] : memref<200x512xf32, #tpu.memory_space<vmem>>, vector<8x512xf32>
    tpu.vector_store %arg12[%c144, %c0_92], %299 {strides = array<i32>} : memref<200x512xf32, #tpu.memory_space<vmem>>, vector<8x512xf32>,
    %c422_i32 = arith.constant 422 : i32
    %301 = tpu.dynamic_rotate %205 by %c422_i32 dim 1 : vector<8x512xf32>, i32 -> vector<8x512xf32>
    %c19_93 = arith.constant 19 : index
    %c0_94 = arith.constant 0 : index
    %302 = vector.load %arg6[%c19_93, %c0_94] : memref<25x512xf32, #tpu.memory_space<vmem>>, vector<1x512xf32>
    %303 = vector.broadcast %302 : vector<1x512xf32> to vector<8x512xf32>
    %304 = arith.mulf %301, %303 : vector<8x512xf32>
    %c152 = arith.constant 152 : index
    %c0_95 = arith.constant 0 : index
    %305 = vector.load %arg12[%c152, %c0_95] : memref<200x512xf32, #tpu.memory_space<vmem>>, vector<8x512xf32>
    tpu.vector_store %arg12[%c152, %c0_95], %304 {strides = array<i32>} : memref<200x512xf32, #tpu.memory_space<vmem>>, vector<8x512xf32>,
    %c362_i32 = arith.constant 362 : i32
    %306 = tpu.dynamic_rotate %205 by %c362_i32 dim 1 : vector<8x512xf32>, i32 -> vector<8x512xf32>
    %c20_96 = arith.constant 20 : index
    %c0_97 = arith.constant 0 : index
    %307 = vector.load %arg6[%c20_96, %c0_97] : memref<25x512xf32, #tpu.memory_space<vmem>>, vector<1x512xf32>
    %308 = vector.broadcast %307 : vector<1x512xf32> to vector<8x512xf32>
    %309 = arith.mulf %306, %308 : vector<8x512xf32>
    %c160 = arith.constant 160 : index
    %c0_98 = arith.constant 0 : index
    %310 = vector.load %arg12[%c160, %c0_98] : memref<200x512xf32, #tpu.memory_space<vmem>>, vector<8x512xf32>
    tpu.vector_store %arg12[%c160, %c0_98], %309 {strides = array<i32>} : memref<200x512xf32, #tpu.memory_space<vmem>>, vector<8x512xf32>,
    %c357_i32 = arith.constant 357 : i32
    %311 = tpu.dynamic_rotate %205 by %c357_i32 dim 1 : vector<8x512xf32>, i32 -> vector<8x512xf32>
    %c21_99 = arith.constant 21 : index
    %c0_100 = arith.constant 0 : index
    %312 = vector.load %arg6[%c21_99, %c0_100] : memref<25x512xf32, #tpu.memory_space<vmem>>, vector<1x512xf32>
    %313 = vector.broadcast %312 : vector<1x512xf32> to vector<8x512xf32>
    %314 = arith.mulf %311, %313 : vector<8x512xf32>
    %c168 = arith.constant 168 : index
    %c0_101 = arith.constant 0 : index
    %315 = vector.load %arg12[%c168, %c0_101] : memref<200x512xf32, #tpu.memory_space<vmem>>, vector<8x512xf32>
    tpu.vector_store %arg12[%c168, %c0_101], %314 {strides = array<i32>} : memref<200x512xf32, #tpu.memory_space<vmem>>, vector<8x512xf32>,
    %c352_i32 = arith.constant 352 : i32
    %316 = tpu.dynamic_rotate %205 by %c352_i32 dim 1 : vector<8x512xf32>, i32 -> vector<8x512xf32>
    %c22_102 = arith.constant 22 : index
    %c0_103 = arith.constant 0 : index
    %317 = vector.load %arg6[%c22_102, %c0_103] : memref<25x512xf32, #tpu.memory_space<vmem>>, vector<1x512xf32>
    %318 = vector.broadcast %317 : vector<1x512xf32> to vector<8x512xf32>
    %319 = arith.mulf %316, %318 : vector<8x512xf32>
    %c176 = arith.constant 176 : index
    %c0_104 = arith.constant 0 : index
    %320 = vector.load %arg12[%c176, %c0_104] : memref<200x512xf32, #tpu.memory_space<vmem>>, vector<8x512xf32>
    tpu.vector_store %arg12[%c176, %c0_104], %319 {strides = array<i32>} : memref<200x512xf32, #tpu.memory_space<vmem>>, vector<8x512xf32>,
    %c347_i32 = arith.constant 347 : i32
    %321 = tpu.dynamic_rotate %205 by %c347_i32 dim 1 : vector<8x512xf32>, i32 -> vector<8x512xf32>
    %c23_105 = arith.constant 23 : index
    %c0_106 = arith.constant 0 : index
    %322 = vector.load %arg6[%c23_105, %c0_106] : memref<25x512xf32, #tpu.memory_space<vmem>>, vector<1x512xf32>
    %323 = vector.broadcast %322 : vector<1x512xf32> to vector<8x512xf32>
    %324 = arith.mulf %321, %323 : vector<8x512xf32>
    %c184 = arith.constant 184 : index
    %c0_107 = arith.constant 0 : index
    %325 = vector.load %arg12[%c184, %c0_107] : memref<200x512xf32, #tpu.memory_space<vmem>>, vector<8x512xf32>
    tpu.vector_store %arg12[%c184, %c0_107], %324 {strides = array<i32>} : memref<200x512xf32, #tpu.memory_space<vmem>>, vector<8x512xf32>,
    %c342_i32 = arith.constant 342 : i32
    %326 = tpu.dynamic_rotate %205 by %c342_i32 dim 1 : vector<8x512xf32>, i32 -> vector<8x512xf32>
    %c24_108 = arith.constant 24 : index
    %c0_109 = arith.constant 0 : index
    %327 = vector.load %arg6[%c24_108, %c0_109] : memref<25x512xf32, #tpu.memory_space<vmem>>, vector<1x512xf32>
    %328 = vector.broadcast %327 : vector<1x512xf32> to vector<8x512xf32>
    %329 = arith.mulf %326, %328 : vector<8x512xf32>
    %c192 = arith.constant 192 : index
    %c0_110 = arith.constant 0 : index
    %330 = vector.load %arg12[%c192, %c0_110] : memref<200x512xf32, #tpu.memory_space<vmem>>, vector<8x512xf32>
    tpu.vector_store %arg12[%c192, %c0_110], %329 {strides = array<i32>} : memref<200x512xf32, #tpu.memory_space<vmem>>, vector<8x512xf32>,
    %c0_111 = arith.constant 0 : index
    %c0_112 = arith.constant 0 : index
    %331 = vector.load %arg3[%c0_111, %c0_112] : memref<8x200xf32, #tpu.memory_space<vmem>>, vector<8x200xf32>
    %c0_113 = arith.constant 0 : index
    %c0_114 = arith.constant 0 : index
    %332 = vector.load %arg12[%c0_113, %c0_114] : memref<200x512xf32, #tpu.memory_space<vmem>>, vector<200x512xf32>
    %cst_115 = arith.constant dense<0.000000e+00> : vector<8x512xf32>
    %333 = tpu.matmul %331, %332, %cst_115 {dimension_numbers = #tpu.dot_dimension_numbers<[1], [0], [0], [1], [0, 0, 1, 1], [], []>} : vector<8x200xf32>, vector<200x512xf32>, vector<8x512xf32> -> vector<8x512xf32>
    %c0_116 = arith.constant 0 : index
    %c0_117 = arith.constant 0 : index
    %334 = vector.load %arg4[%c0_116, %c0_117] : memref<8x1xf32, #tpu.memory_space<vmem>>, vector<8x1xf32>
    %335 = vector.broadcast %334 : vector<8x1xf32> to vector<8x512xf32>
    %336 = arith.addf %333, %335 : vector<8x512xf32>
    %cst_118 = arith.constant 0.000000e+00 : f32
    %337 = vector.broadcast %cst_118 : f32 to vector<8x512xf32>
    %338 = arith.maximumf %336, %337 : vector<8x512xf32>
    %c170_i32_119 = arith.constant 170 : i32
    %339 = tpu.dynamic_rotate %338 by %c170_i32_119 dim 1 : vector<8x512xf32>, i32 -> vector<8x512xf32>
    %c0_120 = arith.constant 0 : index
    %c0_121 = arith.constant 0 : index
    %340 = vector.load %arg6[%c0_120, %c0_121] : memref<25x512xf32, #tpu.memory_space<vmem>>, vector<1x512xf32>
    %341 = vector.broadcast %340 : vector<1x512xf32> to vector<8x512xf32>
    %342 = arith.mulf %339, %341 : vector<8x512xf32>
    %c0_122 = arith.constant 0 : index
    %c0_123 = arith.constant 0 : index
    %343 = vector.load %arg12[%c0_122, %c0_123] : memref<200x512xf32, #tpu.memory_space<vmem>>, vector<8x512xf32>
    tpu.vector_store %arg12[%c0_122, %c0_123], %342 {strides = array<i32>} : memref<200x512xf32, #tpu.memory_space<vmem>>, vector<8x512xf32>,
    %c165_i32_124 = arith.constant 165 : i32
    %344 = tpu.dynamic_rotate %338 by %c165_i32_124 dim 1 : vector<8x512xf32>, i32 -> vector<8x512xf32>
    %c1_125 = arith.constant 1 : index
    %c0_126 = arith.constant 0 : index
    %345 = vector.load %arg6[%c1_125, %c0_126] : memref<25x512xf32, #tpu.memory_space<vmem>>, vector<1x512xf32>
    %346 = vector.broadcast %345 : vector<1x512xf32> to vector<8x512xf32>
    %347 = arith.mulf %344, %346 : vector<8x512xf32>
    %c8_127 = arith.constant 8 : index
    %c0_128 = arith.constant 0 : index
    %348 = vector.load %arg12[%c8_127, %c0_128] : memref<200x512xf32, #tpu.memory_space<vmem>>, vector<8x512xf32>
    tpu.vector_store %arg12[%c8_127, %c0_128], %347 {strides = array<i32>} : memref<200x512xf32, #tpu.memory_space<vmem>>, vector<8x512xf32>,
    %c160_i32_129 = arith.constant 160 : i32
    %349 = tpu.dynamic_rotate %338 by %c160_i32_129 dim 1 : vector<8x512xf32>, i32 -> vector<8x512xf32>
    %c2_130 = arith.constant 2 : index
    %c0_131 = arith.constant 0 : index
    %350 = vector.load %arg6[%c2_130, %c0_131] : memref<25x512xf32, #tpu.memory_space<vmem>>, vector<1x512xf32>
    %351 = vector.broadcast %350 : vector<1x512xf32> to vector<8x512xf32>
    %352 = arith.mulf %349, %351 : vector<8x512xf32>
    %c16_132 = arith.constant 16 : index
    %c0_133 = arith.constant 0 : index
    %353 = vector.load %arg12[%c16_132, %c0_133] : memref<200x512xf32, #tpu.memory_space<vmem>>, vector<8x512xf32>
    tpu.vector_store %arg12[%c16_132, %c0_133], %352 {strides = array<i32>} : memref<200x512xf32, #tpu.memory_space<vmem>>, vector<8x512xf32>,
    %c155_i32_134 = arith.constant 155 : i32
    %354 = tpu.dynamic_rotate %338 by %c155_i32_134 dim 1 : vector<8x512xf32>, i32 -> vector<8x512xf32>
    %c3_135 = arith.constant 3 : index
    %c0_136 = arith.constant 0 : index
    %355 = vector.load %arg6[%c3_135, %c0_136] : memref<25x512xf32, #tpu.memory_space<vmem>>, vector<1x512xf32>
    %356 = vector.broadcast %355 : vector<1x512xf32> to vector<8x512xf32>
    %357 = arith.mulf %354, %356 : vector<8x512xf32>
    %c24_137 = arith.constant 24 : index
    %c0_138 = arith.constant 0 : index
    %358 = vector.load %arg12[%c24_137, %c0_138] : memref<200x512xf32, #tpu.memory_space<vmem>>, vector<8x512xf32>
    tpu.vector_store %arg12[%c24_137, %c0_138], %357 {strides = array<i32>} : memref<200x512xf32, #tpu.memory_space<vmem>>, vector<8x512xf32>,
    %c150_i32_139 = arith.constant 150 : i32
    %359 = tpu.dynamic_rotate %338 by %c150_i32_139 dim 1 : vector<8x512xf32>, i32 -> vector<8x512xf32>
    %c4_140 = arith.constant 4 : index
    %c0_141 = arith.constant 0 : index
    %360 = vector.load %arg6[%c4_140, %c0_141] : memref<25x512xf32, #tpu.memory_space<vmem>>, vector<1x512xf32>
    %361 = vector.broadcast %360 : vector<1x512xf32> to vector<8x512xf32>
    %362 = arith.mulf %359, %361 : vector<8x512xf32>
    %c32_142 = arith.constant 32 : index
    %c0_143 = arith.constant 0 : index
    %363 = vector.load %arg12[%c32_142, %c0_143] : memref<200x512xf32, #tpu.memory_space<vmem>>, vector<8x512xf32>
    tpu.vector_store %arg12[%c32_142, %c0_143], %362 {strides = array<i32>} : memref<200x512xf32, #tpu.memory_space<vmem>>, vector<8x512xf32>,
    %c90_i32_144 = arith.constant 90 : i32
    %364 = tpu.dynamic_rotate %338 by %c90_i32_144 dim 1 : vector<8x512xf32>, i32 -> vector<8x512xf32>
    %c5_145 = arith.constant 5 : index
    %c0_146 = arith.constant 0 : index
    %365 = vector.load %arg6[%c5_145, %c0_146] : memref<25x512xf32, #tpu.memory_space<vmem>>, vector<1x512xf32>
    %366 = vector.broadcast %365 : vector<1x512xf32> to vector<8x512xf32>
    %367 = arith.mulf %364, %366 : vector<8x512xf32>
    %c40_147 = arith.constant 40 : index
    %c0_148 = arith.constant 0 : index
    %368 = vector.load %arg12[%c40_147, %c0_148] : memref<200x512xf32, #tpu.memory_space<vmem>>, vector<8x512xf32>
    tpu.vector_store %arg12[%c40_147, %c0_148], %367 {strides = array<i32>} : memref<200x512xf32, #tpu.memory_space<vmem>>, vector<8x512xf32>,
    %c85_i32_149 = arith.constant 85 : i32
    %369 = tpu.dynamic_rotate %338 by %c85_i32_149 dim 1 : vector<8x512xf32>, i32 -> vector<8x512xf32>
    %c6_150 = arith.constant 6 : index
    %c0_151 = arith.constant 0 : index
    %370 = vector.load %arg6[%c6_150, %c0_151] : memref<25x512xf32, #tpu.memory_space<vmem>>, vector<1x512xf32>
    %371 = vector.broadcast %370 : vector<1x512xf32> to vector<8x512xf32>
    %372 = arith.mulf %369, %371 : vector<8x512xf32>
    %c48_152 = arith.constant 48 : index
    %c0_153 = arith.constant 0 : index
    %373 = vector.load %arg12[%c48_152, %c0_153] : memref<200x512xf32, #tpu.memory_space<vmem>>, vector<8x512xf32>
    tpu.vector_store %arg12[%c48_152, %c0_153], %372 {strides = array<i32>} : memref<200x512xf32, #tpu.memory_space<vmem>>, vector<8x512xf32>,
    %c80_i32_154 = arith.constant 80 : i32
    %374 = tpu.dynamic_rotate %338 by %c80_i32_154 dim 1 : vector<8x512xf32>, i32 -> vector<8x512xf32>
    %c7_155 = arith.constant 7 : index
    %c0_156 = arith.constant 0 : index
    %375 = vector.load %arg6[%c7_155, %c0_156] : memref<25x512xf32, #tpu.memory_space<vmem>>, vector<1x512xf32>
    %376 = vector.broadcast %375 : vector<1x512xf32> to vector<8x512xf32>
    %377 = arith.mulf %374, %376 : vector<8x512xf32>
    %c56_157 = arith.constant 56 : index
    %c0_158 = arith.constant 0 : index
    %378 = vector.load %arg12[%c56_157, %c0_158] : memref<200x512xf32, #tpu.memory_space<vmem>>, vector<8x512xf32>
    tpu.vector_store %arg12[%c56_157, %c0_158], %377 {strides = array<i32>} : memref<200x512xf32, #tpu.memory_space<vmem>>, vector<8x512xf32>,
    %c75_i32_159 = arith.constant 75 : i32
    %379 = tpu.dynamic_rotate %338 by %c75_i32_159 dim 1 : vector<8x512xf32>, i32 -> vector<8x512xf32>
    %c8_160 = arith.constant 8 : index
    %c0_161 = arith.constant 0 : index
    %380 = vector.load %arg6[%c8_160, %c0_161] : memref<25x512xf32, #tpu.memory_space<vmem>>, vector<1x512xf32>
    %381 = vector.broadcast %380 : vector<1x512xf32> to vector<8x512xf32>
    %382 = arith.mulf %379, %381 : vector<8x512xf32>
    %c64_162 = arith.constant 64 : index
    %c0_163 = arith.constant 0 : index
    %383 = vector.load %arg12[%c64_162, %c0_163] : memref<200x512xf32, #tpu.memory_space<vmem>>, vector<8x512xf32>
    tpu.vector_store %arg12[%c64_162, %c0_163], %382 {strides = array<i32>} : memref<200x512xf32, #tpu.memory_space<vmem>>, vector<8x512xf32>,
    %c70_i32_164 = arith.constant 70 : i32
    %384 = tpu.dynamic_rotate %338 by %c70_i32_164 dim 1 : vector<8x512xf32>, i32 -> vector<8x512xf32>
    %c9_165 = arith.constant 9 : index
    %c0_166 = arith.constant 0 : index
    %385 = vector.load %arg6[%c9_165, %c0_166] : memref<25x512xf32, #tpu.memory_space<vmem>>, vector<1x512xf32>
    %386 = vector.broadcast %385 : vector<1x512xf32> to vector<8x512xf32>
    %387 = arith.mulf %384, %386 : vector<8x512xf32>
    %c72_167 = arith.constant 72 : index
    %c0_168 = arith.constant 0 : index
    %388 = vector.load %arg12[%c72_167, %c0_168] : memref<200x512xf32, #tpu.memory_space<vmem>>, vector<8x512xf32>
    tpu.vector_store %arg12[%c72_167, %c0_168], %387 {strides = array<i32>} : memref<200x512xf32, #tpu.memory_space<vmem>>, vector<8x512xf32>,
    %c10_i32_169 = arith.constant 10 : i32
    %389 = tpu.dynamic_rotate %338 by %c10_i32_169 dim 1 : vector<8x512xf32>, i32 -> vector<8x512xf32>
    %c10_170 = arith.constant 10 : index
    %c0_171 = arith.constant 0 : index
    %390 = vector.load %arg6[%c10_170, %c0_171] : memref<25x512xf32, #tpu.memory_space<vmem>>, vector<1x512xf32>
    %391 = vector.broadcast %390 : vector<1x512xf32> to vector<8x512xf32>
    %392 = arith.mulf %389, %391 : vector<8x512xf32>
    %c80_172 = arith.constant 80 : index
    %c0_173 = arith.constant 0 : index
    %393 = vector.load %arg12[%c80_172, %c0_173] : memref<200x512xf32, #tpu.memory_space<vmem>>, vector<8x512xf32>
    tpu.vector_store %arg12[%c80_172, %c0_173], %392 {strides = array<i32>} : memref<200x512xf32, #tpu.memory_space<vmem>>, vector<8x512xf32>,
    %c5_i32_174 = arith.constant 5 : i32
    %394 = tpu.dynamic_rotate %338 by %c5_i32_174 dim 1 : vector<8x512xf32>, i32 -> vector<8x512xf32>
    %c11_175 = arith.constant 11 : index
    %c0_176 = arith.constant 0 : index
    %395 = vector.load %arg6[%c11_175, %c0_176] : memref<25x512xf32, #tpu.memory_space<vmem>>, vector<1x512xf32>
    %396 = vector.broadcast %395 : vector<1x512xf32> to vector<8x512xf32>
    %397 = arith.mulf %394, %396 : vector<8x512xf32>
    %c88_177 = arith.constant 88 : index
    %c0_178 = arith.constant 0 : index
    %398 = vector.load %arg12[%c88_177, %c0_178] : memref<200x512xf32, #tpu.memory_space<vmem>>, vector<8x512xf32>
    tpu.vector_store %arg12[%c88_177, %c0_178], %397 {strides = array<i32>} : memref<200x512xf32, #tpu.memory_space<vmem>>, vector<8x512xf32>,
    %c0_i32_179 = arith.constant 0 : i32
    %399 = tpu.dynamic_rotate %338 by %c0_i32_179 dim 1 : vector<8x512xf32>, i32 -> vector<8x512xf32>
    %c12_180 = arith.constant 12 : index
    %c0_181 = arith.constant 0 : index
    %400 = vector.load %arg6[%c12_180, %c0_181] : memref<25x512xf32, #tpu.memory_space<vmem>>, vector<1x512xf32>
    %401 = vector.broadcast %400 : vector<1x512xf32> to vector<8x512xf32>
    %402 = arith.mulf %399, %401 : vector<8x512xf32>
    %c96_182 = arith.constant 96 : index
    %c0_183 = arith.constant 0 : index
    %403 = vector.load %arg12[%c96_182, %c0_183] : memref<200x512xf32, #tpu.memory_space<vmem>>, vector<8x512xf32>
    tpu.vector_store %arg12[%c96_182, %c0_183], %402 {strides = array<i32>} : memref<200x512xf32, #tpu.memory_space<vmem>>, vector<8x512xf32>,
    %c507_i32_184 = arith.constant 507 : i32
    %404 = tpu.dynamic_rotate %338 by %c507_i32_184 dim 1 : vector<8x512xf32>, i32 -> vector<8x512xf32>
    %c13_185 = arith.constant 13 : index
    %c0_186 = arith.constant 0 : index
    %405 = vector.load %arg6[%c13_185, %c0_186] : memref<25x512xf32, #tpu.memory_space<vmem>>, vector<1x512xf32>
    %406 = vector.broadcast %405 : vector<1x512xf32> to vector<8x512xf32>
    %407 = arith.mulf %404, %406 : vector<8x512xf32>
    %c104_187 = arith.constant 104 : index
    %c0_188 = arith.constant 0 : index
    %408 = vector.load %arg12[%c104_187, %c0_188] : memref<200x512xf32, #tpu.memory_space<vmem>>, vector<8x512xf32>
    tpu.vector_store %arg12[%c104_187, %c0_188], %407 {strides = array<i32>} : memref<200x512xf32, #tpu.memory_space<vmem>>, vector<8x512xf32>,
    %c502_i32_189 = arith.constant 502 : i32
    %409 = tpu.dynamic_rotate %338 by %c502_i32_189 dim 1 : vector<8x512xf32>, i32 -> vector<8x512xf32>
    %c14_190 = arith.constant 14 : index
    %c0_191 = arith.constant 0 : index
    %410 = vector.load %arg6[%c14_190, %c0_191] : memref<25x512xf32, #tpu.memory_space<vmem>>, vector<1x512xf32>
    %411 = vector.broadcast %410 : vector<1x512xf32> to vector<8x512xf32>
    %412 = arith.mulf %409, %411 : vector<8x512xf32>
    %c112_192 = arith.constant 112 : index
    %c0_193 = arith.constant 0 : index
    %413 = vector.load %arg12[%c112_192, %c0_193] : memref<200x512xf32, #tpu.memory_space<vmem>>, vector<8x512xf32>
    tpu.vector_store %arg12[%c112_192, %c0_193], %412 {strides = array<i32>} : memref<200x512xf32, #tpu.memory_space<vmem>>, vector<8x512xf32>,
    %c442_i32_194 = arith.constant 442 : i32
    %414 = tpu.dynamic_rotate %338 by %c442_i32_194 dim 1 : vector<8x512xf32>, i32 -> vector<8x512xf32>
    %c15_195 = arith.constant 15 : index
    %c0_196 = arith.constant 0 : index
    %415 = vector.load %arg6[%c15_195, %c0_196] : memref<25x512xf32, #tpu.memory_space<vmem>>, vector<1x512xf32>
    %416 = vector.broadcast %415 : vector<1x512xf32> to vector<8x512xf32>
    %417 = arith.mulf %414, %416 : vector<8x512xf32>
    %c120_197 = arith.constant 120 : index
    %c0_198 = arith.constant 0 : index
    %418 = vector.load %arg12[%c120_197, %c0_198] : memref<200x512xf32, #tpu.memory_space<vmem>>, vector<8x512xf32>
    tpu.vector_store %arg12[%c120_197, %c0_198], %417 {strides = array<i32>} : memref<200x512xf32, #tpu.memory_space<vmem>>, vector<8x512xf32>,
    %c437_i32_199 = arith.constant 437 : i32
    %419 = tpu.dynamic_rotate %338 by %c437_i32_199 dim 1 : vector<8x512xf32>, i32 -> vector<8x512xf32>
    %c16_200 = arith.constant 16 : index
    %c0_201 = arith.constant 0 : index
    %420 = vector.load %arg6[%c16_200, %c0_201] : memref<25x512xf32, #tpu.memory_space<vmem>>, vector<1x512xf32>
    %421 = vector.broadcast %420 : vector<1x512xf32> to vector<8x512xf32>
    %422 = arith.mulf %419, %421 : vector<8x512xf32>
    %c128_202 = arith.constant 128 : index
    %c0_203 = arith.constant 0 : index
    %423 = vector.load %arg12[%c128_202, %c0_203] : memref<200x512xf32, #tpu.memory_space<vmem>>, vector<8x512xf32>
    tpu.vector_store %arg12[%c128_202, %c0_203], %422 {strides = array<i32>} : memref<200x512xf32, #tpu.memory_space<vmem>>, vector<8x512xf32>,
    %c432_i32_204 = arith.constant 432 : i32
    %424 = tpu.dynamic_rotate %338 by %c432_i32_204 dim 1 : vector<8x512xf32>, i32 -> vector<8x512xf32>
    %c17_205 = arith.constant 17 : index
    %c0_206 = arith.constant 0 : index
    %425 = vector.load %arg6[%c17_205, %c0_206] : memref<25x512xf32, #tpu.memory_space<vmem>>, vector<1x512xf32>
    %426 = vector.broadcast %425 : vector<1x512xf32> to vector<8x512xf32>
    %427 = arith.mulf %424, %426 : vector<8x512xf32>
    %c136_207 = arith.constant 136 : index
    %c0_208 = arith.constant 0 : index
    %428 = vector.load %arg12[%c136_207, %c0_208] : memref<200x512xf32, #tpu.memory_space<vmem>>, vector<8x512xf32>
    tpu.vector_store %arg12[%c136_207, %c0_208], %427 {strides = array<i32>} : memref<200x512xf32, #tpu.memory_space<vmem>>, vector<8x512xf32>,
    %c427_i32_209 = arith.constant 427 : i32
    %429 = tpu.dynamic_rotate %338 by %c427_i32_209 dim 1 : vector<8x512xf32>, i32 -> vector<8x512xf32>
    %c18_210 = arith.constant 18 : index
    %c0_211 = arith.constant 0 : index
    %430 = vector.load %arg6[%c18_210, %c0_211] : memref<25x512xf32, #tpu.memory_space<vmem>>, vector<1x512xf32>
    %431 = vector.broadcast %430 : vector<1x512xf32> to vector<8x512xf32>
    %432 = arith.mulf %429, %431 : vector<8x512xf32>
    %c144_212 = arith.constant 144 : index
    %c0_213 = arith.constant 0 : index
    %433 = vector.load %arg12[%c144_212, %c0_213] : memref<200x512xf32, #tpu.memory_space<vmem>>, vector<8x512xf32>
    tpu.vector_store %arg12[%c144_212, %c0_213], %432 {strides = array<i32>} : memref<200x512xf32, #tpu.memory_space<vmem>>, vector<8x512xf32>,
    %c422_i32_214 = arith.constant 422 : i32
    %434 = tpu.dynamic_rotate %338 by %c422_i32_214 dim 1 : vector<8x512xf32>, i32 -> vector<8x512xf32>
    %c19_215 = arith.constant 19 : index
    %c0_216 = arith.constant 0 : index
    %435 = vector.load %arg6[%c19_215, %c0_216] : memref<25x512xf32, #tpu.memory_space<vmem>>, vector<1x512xf32>
    %436 = vector.broadcast %435 : vector<1x512xf32> to vector<8x512xf32>
    %437 = arith.mulf %434, %436 : vector<8x512xf32>
    %c152_217 = arith.constant 152 : index
    %c0_218 = arith.constant 0 : index
    %438 = vector.load %arg12[%c152_217, %c0_218] : memref<200x512xf32, #tpu.memory_space<vmem>>, vector<8x512xf32>
    tpu.vector_store %arg12[%c152_217, %c0_218], %437 {strides = array<i32>} : memref<200x512xf32, #tpu.memory_space<vmem>>, vector<8x512xf32>,
    %c362_i32_219 = arith.constant 362 : i32
    %439 = tpu.dynamic_rotate %338 by %c362_i32_219 dim 1 : vector<8x512xf32>, i32 -> vector<8x512xf32>
    %c20_220 = arith.constant 20 : index
    %c0_221 = arith.constant 0 : index
    %440 = vector.load %arg6[%c20_220, %c0_221] : memref<25x512xf32, #tpu.memory_space<vmem>>, vector<1x512xf32>
    %441 = vector.broadcast %440 : vector<1x512xf32> to vector<8x512xf32>
    %442 = arith.mulf %439, %441 : vector<8x512xf32>
    %c160_222 = arith.constant 160 : index
    %c0_223 = arith.constant 0 : index
    %443 = vector.load %arg12[%c160_222, %c0_223] : memref<200x512xf32, #tpu.memory_space<vmem>>, vector<8x512xf32>
    tpu.vector_store %arg12[%c160_222, %c0_223], %442 {strides = array<i32>} : memref<200x512xf32, #tpu.memory_space<vmem>>, vector<8x512xf32>,
    %c357_i32_224 = arith.constant 357 : i32
    %444 = tpu.dynamic_rotate %338 by %c357_i32_224 dim 1 : vector<8x512xf32>, i32 -> vector<8x512xf32>
    %c21_225 = arith.constant 21 : index
    %c0_226 = arith.constant 0 : index
    %445 = vector.load %arg6[%c21_225, %c0_226] : memref<25x512xf32, #tpu.memory_space<vmem>>, vector<1x512xf32>
    %446 = vector.broadcast %445 : vector<1x512xf32> to vector<8x512xf32>
    %447 = arith.mulf %444, %446 : vector<8x512xf32>
    %c168_227 = arith.constant 168 : index
    %c0_228 = arith.constant 0 : index
    %448 = vector.load %arg12[%c168_227, %c0_228] : memref<200x512xf32, #tpu.memory_space<vmem>>, vector<8x512xf32>
    tpu.vector_store %arg12[%c168_227, %c0_228], %447 {strides = array<i32>} : memref<200x512xf32, #tpu.memory_space<vmem>>, vector<8x512xf32>,
    %c352_i32_229 = arith.constant 352 : i32
    %449 = tpu.dynamic_rotate %338 by %c352_i32_229 dim 1 : vector<8x512xf32>, i32 -> vector<8x512xf32>
    %c22_230 = arith.constant 22 : index
    %c0_231 = arith.constant 0 : index
    %450 = vector.load %arg6[%c22_230, %c0_231] : memref<25x512xf32, #tpu.memory_space<vmem>>, vector<1x512xf32>
    %451 = vector.broadcast %450 : vector<1x512xf32> to vector<8x512xf32>
    %452 = arith.mulf %449, %451 : vector<8x512xf32>
    %c176_232 = arith.constant 176 : index
    %c0_233 = arith.constant 0 : index
    %453 = vector.load %arg12[%c176_232, %c0_233] : memref<200x512xf32, #tpu.memory_space<vmem>>, vector<8x512xf32>
    tpu.vector_store %arg12[%c176_232, %c0_233], %452 {strides = array<i32>} : memref<200x512xf32, #tpu.memory_space<vmem>>, vector<8x512xf32>,
    %c347_i32_234 = arith.constant 347 : i32
    %454 = tpu.dynamic_rotate %338 by %c347_i32_234 dim 1 : vector<8x512xf32>, i32 -> vector<8x512xf32>
    %c23_235 = arith.constant 23 : index
    %c0_236 = arith.constant 0 : index
    %455 = vector.load %arg6[%c23_235, %c0_236] : memref<25x512xf32, #tpu.memory_space<vmem>>, vector<1x512xf32>
    %456 = vector.broadcast %455 : vector<1x512xf32> to vector<8x512xf32>
    %457 = arith.mulf %454, %456 : vector<8x512xf32>
    %c184_237 = arith.constant 184 : index
    %c0_238 = arith.constant 0 : index
    %458 = vector.load %arg12[%c184_237, %c0_238] : memref<200x512xf32, #tpu.memory_space<vmem>>, vector<8x512xf32>
    tpu.vector_store %arg12[%c184_237, %c0_238], %457 {strides = array<i32>} : memref<200x512xf32, #tpu.memory_space<vmem>>, vector<8x512xf32>,
    %c342_i32_239 = arith.constant 342 : i32
    %459 = tpu.dynamic_rotate %338 by %c342_i32_239 dim 1 : vector<8x512xf32>, i32 -> vector<8x512xf32>
    %c24_240 = arith.constant 24 : index
    %c0_241 = arith.constant 0 : index
    %460 = vector.load %arg6[%c24_240, %c0_241] : memref<25x512xf32, #tpu.memory_space<vmem>>, vector<1x512xf32>
    %461 = vector.broadcast %460 : vector<1x512xf32> to vector<8x512xf32>
    %462 = arith.mulf %459, %461 : vector<8x512xf32>
    %c192_242 = arith.constant 192 : index
    %c0_243 = arith.constant 0 : index
    %463 = vector.load %arg12[%c192_242, %c0_243] : memref<200x512xf32, #tpu.memory_space<vmem>>, vector<8x512xf32>
    tpu.vector_store %arg12[%c192_242, %c0_243], %462 {strides = array<i32>} : memref<200x512xf32, #tpu.memory_space<vmem>>, vector<8x512xf32>,
    %c0_244 = arith.constant 0 : index
    %c0_245 = arith.constant 0 : index
    %464 = vector.load %arg3[%c0_244, %c0_245] : memref<8x200xf32, #tpu.memory_space<vmem>>, vector<8x200xf32>
    %c0_246 = arith.constant 0 : index
    %c0_247 = arith.constant 0 : index
    %465 = vector.load %arg12[%c0_246, %c0_247] : memref<200x512xf32, #tpu.memory_space<vmem>>, vector<200x512xf32>
    %cst_248 = arith.constant dense<0.000000e+00> : vector<8x512xf32>
    %466 = tpu.matmul %464, %465, %cst_248 {dimension_numbers = #tpu.dot_dimension_numbers<[1], [0], [0], [1], [0, 0, 1, 1], [], []>} : vector<8x200xf32>, vector<200x512xf32>, vector<8x512xf32> -> vector<8x512xf32>
    %c0_249 = arith.constant 0 : index
    %c0_250 = arith.constant 0 : index
    %467 = vector.load %arg4[%c0_249, %c0_250] : memref<8x1xf32, #tpu.memory_space<vmem>>, vector<8x1xf32>
    %468 = vector.broadcast %467 : vector<8x1xf32> to vector<8x512xf32>
    %469 = arith.addf %466, %468 : vector<8x512xf32>
    %470 = arith.addf %469, %205 : vector<8x512xf32>
    %cst_251 = arith.constant 0.000000e+00 : f32
    %471 = vector.broadcast %cst_251 : f32 to vector<8x512xf32>
    %472 = arith.maximumf %470, %471 : vector<8x512xf32>
    %c511_i32_252 = arith.constant 511 : i32
    %473 = tpu.dynamic_rotate %472 by %c511_i32_252 dim 1 : vector<8x512xf32>, i32 -> vector<8x512xf32>
    %474 = arith.maximumf %472, %473 : vector<8x512xf32>
    %c510_i32_253 = arith.constant 510 : i32
    %475 = tpu.dynamic_rotate %472 by %c510_i32_253 dim 1 : vector<8x512xf32>, i32 -> vector<8x512xf32>
    %476 = arith.maximumf %474, %475 : vector<8x512xf32>
    %c509_i32 = arith.constant 509 : i32
    %477 = tpu.dynamic_rotate %472 by %c509_i32 dim 1 : vector<8x512xf32>, i32 -> vector<8x512xf32>
    %478 = arith.maximumf %476, %477 : vector<8x512xf32>
    %c508_i32 = arith.constant 508 : i32
    %479 = tpu.dynamic_rotate %472 by %c508_i32 dim 1 : vector<8x512xf32>, i32 -> vector<8x512xf32>
    %480 = arith.maximumf %478, %479 : vector<8x512xf32>
    %c496_i32_254 = arith.constant 496 : i32
    %481 = tpu.dynamic_rotate %472 by %c496_i32_254 dim 1 : vector<8x512xf32>, i32 -> vector<8x512xf32>
    %482 = arith.maximumf %480, %481 : vector<8x512xf32>
    %c495_i32_255 = arith.constant 495 : i32
    %483 = tpu.dynamic_rotate %472 by %c495_i32_255 dim 1 : vector<8x512xf32>, i32 -> vector<8x512xf32>
    %484 = arith.maximumf %482, %483 : vector<8x512xf32>
    %c494_i32_256 = arith.constant 494 : i32
    %485 = tpu.dynamic_rotate %472 by %c494_i32_256 dim 1 : vector<8x512xf32>, i32 -> vector<8x512xf32>
    %486 = arith.maximumf %484, %485 : vector<8x512xf32>
    %c493_i32 = arith.constant 493 : i32
    %487 = tpu.dynamic_rotate %472 by %c493_i32 dim 1 : vector<8x512xf32>, i32 -> vector<8x512xf32>
    %488 = arith.maximumf %486, %487 : vector<8x512xf32>
    %c492_i32 = arith.constant 492 : i32
    %489 = tpu.dynamic_rotate %472 by %c492_i32 dim 1 : vector<8x512xf32>, i32 -> vector<8x512xf32>
    %490 = arith.maximumf %488, %489 : vector<8x512xf32>
    %491 = vector.extract_strided_slice %490 {offsets = [0, 0], sizes = [1, 256], strides = [1, 1]} : vector<8x512xf32> to vector<1x256xf32>
    %c0_257 = arith.constant 0 : index
    %c0_258 = arith.constant 0 : index
    %492 = vector.load %arg13[%c0_257, %c0_258] : memref<2x2048xf32, #tpu.memory_space<vmem>>, vector<1x256xf32>
    tpu.vector_store %arg13[%c0_257, %c0_258], %491 {strides = array<i32>} : memref<2x2048xf32, #tpu.memory_space<vmem>>, vector<1x256xf32>,
    %493 = vector.extract_strided_slice %490 {offsets = [1, 0], sizes = [1, 256], strides = [1, 1]} : vector<8x512xf32> to vector<1x256xf32>
    %c0_259 = arith.constant 0 : index
    %c256 = arith.constant 256 : index
    %494 = vector.load %arg13[%c0_259, %c256] : memref<2x2048xf32, #tpu.memory_space<vmem>>, vector<1x256xf32>
    tpu.vector_store %arg13[%c0_259, %c256], %493 {strides = array<i32>} : memref<2x2048xf32, #tpu.memory_space<vmem>>, vector<1x256xf32>,
    %495 = vector.extract_strided_slice %490 {offsets = [2, 0], sizes = [1, 256], strides = [1, 1]} : vector<8x512xf32> to vector<1x256xf32>
    %c0_260 = arith.constant 0 : index
    %c512 = arith.constant 512 : index
    %496 = vector.load %arg13[%c0_260, %c512] : memref<2x2048xf32, #tpu.memory_space<vmem>>, vector<1x256xf32>
    tpu.vector_store %arg13[%c0_260, %c512], %495 {strides = array<i32>} : memref<2x2048xf32, #tpu.memory_space<vmem>>, vector<1x256xf32>,
    %497 = vector.extract_strided_slice %490 {offsets = [3, 0], sizes = [1, 256], strides = [1, 1]} : vector<8x512xf32> to vector<1x256xf32>
    %c0_261 = arith.constant 0 : index
    %c768 = arith.constant 768 : index
    %498 = vector.load %arg13[%c0_261, %c768] : memref<2x2048xf32, #tpu.memory_space<vmem>>, vector<1x256xf32>
    tpu.vector_store %arg13[%c0_261, %c768], %497 {strides = array<i32>} : memref<2x2048xf32, #tpu.memory_space<vmem>>, vector<1x256xf32>,
    %499 = vector.extract_strided_slice %490 {offsets = [4, 0], sizes = [1, 256], strides = [1, 1]} : vector<8x512xf32> to vector<1x256xf32>
    %c0_262 = arith.constant 0 : index
    %c1024 = arith.constant 1024 : index
    %500 = vector.load %arg13[%c0_262, %c1024] : memref<2x2048xf32, #tpu.memory_space<vmem>>, vector<1x256xf32>
    tpu.vector_store %arg13[%c0_262, %c1024], %499 {strides = array<i32>} : memref<2x2048xf32, #tpu.memory_space<vmem>>, vector<1x256xf32>,
    %501 = vector.extract_strided_slice %490 {offsets = [5, 0], sizes = [1, 256], strides = [1, 1]} : vector<8x512xf32> to vector<1x256xf32>
    %c0_263 = arith.constant 0 : index
    %c1280 = arith.constant 1280 : index
    %502 = vector.load %arg13[%c0_263, %c1280] : memref<2x2048xf32, #tpu.memory_space<vmem>>, vector<1x256xf32>
    tpu.vector_store %arg13[%c0_263, %c1280], %501 {strides = array<i32>} : memref<2x2048xf32, #tpu.memory_space<vmem>>, vector<1x256xf32>,
    %503 = vector.extract_strided_slice %490 {offsets = [6, 0], sizes = [1, 256], strides = [1, 1]} : vector<8x512xf32> to vector<1x256xf32>
    %c0_264 = arith.constant 0 : index
    %c1536 = arith.constant 1536 : index
    %504 = vector.load %arg13[%c0_264, %c1536] : memref<2x2048xf32, #tpu.memory_space<vmem>>, vector<1x256xf32>
    tpu.vector_store %arg13[%c0_264, %c1536], %503 {strides = array<i32>} : memref<2x2048xf32, #tpu.memory_space<vmem>>, vector<1x256xf32>,
    %505 = vector.extract_strided_slice %490 {offsets = [7, 0], sizes = [1, 256], strides = [1, 1]} : vector<8x512xf32> to vector<1x256xf32>
    %c0_265 = arith.constant 0 : index
    %c1792 = arith.constant 1792 : index
    %506 = vector.load %arg13[%c0_265, %c1792] : memref<2x2048xf32, #tpu.memory_space<vmem>>, vector<1x256xf32>
    tpu.vector_store %arg13[%c0_265, %c1792], %505 {strides = array<i32>} : memref<2x2048xf32, #tpu.memory_space<vmem>>, vector<1x256xf32>,
    %507 = vector.extract_strided_slice %490 {offsets = [0, 256], sizes = [1, 256], strides = [1, 1]} : vector<8x512xf32> to vector<1x256xf32>
    %c1_266 = arith.constant 1 : index
    %c0_267 = arith.constant 0 : index
    %508 = vector.load %arg13[%c1_266, %c0_267] : memref<2x2048xf32, #tpu.memory_space<vmem>>, vector<1x256xf32>
    tpu.vector_store %arg13[%c1_266, %c0_267], %507 {strides = array<i32>} : memref<2x2048xf32, #tpu.memory_space<vmem>>, vector<1x256xf32>,
    %509 = vector.extract_strided_slice %490 {offsets = [1, 256], sizes = [1, 256], strides = [1, 1]} : vector<8x512xf32> to vector<1x256xf32>
    %c1_268 = arith.constant 1 : index
    %c256_269 = arith.constant 256 : index
    %510 = vector.load %arg13[%c1_268, %c256_269] : memref<2x2048xf32, #tpu.memory_space<vmem>>, vector<1x256xf32>
    tpu.vector_store %arg13[%c1_268, %c256_269], %509 {strides = array<i32>} : memref<2x2048xf32, #tpu.memory_space<vmem>>, vector<1x256xf32>,
    %511 = vector.extract_strided_slice %490 {offsets = [2, 256], sizes = [1, 256], strides = [1, 1]} : vector<8x512xf32> to vector<1x256xf32>
    %c1_270 = arith.constant 1 : index
    %c512_271 = arith.constant 512 : index
    %512 = vector.load %arg13[%c1_270, %c512_271] : memref<2x2048xf32, #tpu.memory_space<vmem>>, vector<1x256xf32>
    tpu.vector_store %arg13[%c1_270, %c512_271], %511 {strides = array<i32>} : memref<2x2048xf32, #tpu.memory_space<vmem>>, vector<1x256xf32>,
    %513 = vector.extract_strided_slice %490 {offsets = [3, 256], sizes = [1, 256], strides = [1, 1]} : vector<8x512xf32> to vector<1x256xf32>
    %c1_272 = arith.constant 1 : index
    %c768_273 = arith.constant 768 : index
    %514 = vector.load %arg13[%c1_272, %c768_273] : memref<2x2048xf32, #tpu.memory_space<vmem>>, vector<1x256xf32>
    tpu.vector_store %arg13[%c1_272, %c768_273], %513 {strides = array<i32>} : memref<2x2048xf32, #tpu.memory_space<vmem>>, vector<1x256xf32>,
    %515 = vector.extract_strided_slice %490 {offsets = [4, 256], sizes = [1, 256], strides = [1, 1]} : vector<8x512xf32> to vector<1x256xf32>
    %c1_274 = arith.constant 1 : index
    %c1024_275 = arith.constant 1024 : index
    %516 = vector.load %arg13[%c1_274, %c1024_275] : memref<2x2048xf32, #tpu.memory_space<vmem>>, vector<1x256xf32>
    tpu.vector_store %arg13[%c1_274, %c1024_275], %515 {strides = array<i32>} : memref<2x2048xf32, #tpu.memory_space<vmem>>, vector<1x256xf32>,
    %517 = vector.extract_strided_slice %490 {offsets = [5, 256], sizes = [1, 256], strides = [1, 1]} : vector<8x512xf32> to vector<1x256xf32>
    %c1_276 = arith.constant 1 : index
    %c1280_277 = arith.constant 1280 : index
    %518 = vector.load %arg13[%c1_276, %c1280_277] : memref<2x2048xf32, #tpu.memory_space<vmem>>, vector<1x256xf32>
    tpu.vector_store %arg13[%c1_276, %c1280_277], %517 {strides = array<i32>} : memref<2x2048xf32, #tpu.memory_space<vmem>>, vector<1x256xf32>,
    %519 = vector.extract_strided_slice %490 {offsets = [6, 256], sizes = [1, 256], strides = [1, 1]} : vector<8x512xf32> to vector<1x256xf32>
    %c1_278 = arith.constant 1 : index
    %c1536_279 = arith.constant 1536 : index
    %520 = vector.load %arg13[%c1_278, %c1536_279] : memref<2x2048xf32, #tpu.memory_space<vmem>>, vector<1x256xf32>
    tpu.vector_store %arg13[%c1_278, %c1536_279], %519 {strides = array<i32>} : memref<2x2048xf32, #tpu.memory_space<vmem>>, vector<1x256xf32>,
    %521 = vector.extract_strided_slice %490 {offsets = [7, 256], sizes = [1, 256], strides = [1, 1]} : vector<8x512xf32> to vector<1x256xf32>
    %c1_280 = arith.constant 1 : index
    %c1792_281 = arith.constant 1792 : index
    %522 = vector.load %arg13[%c1_280, %c1792_281] : memref<2x2048xf32, #tpu.memory_space<vmem>>, vector<1x256xf32>
    tpu.vector_store %arg13[%c1_280, %c1792_281], %521 {strides = array<i32>} : memref<2x2048xf32, #tpu.memory_space<vmem>>, vector<1x256xf32>,
    %c0_282 = arith.constant 0 : index
    %c0_283 = arith.constant 0 : index
    %523 = vector.load %arg13[%c0_282, %c0_283] : memref<2x2048xf32, #tpu.memory_space<vmem>>, vector<2x2048xf32>
    %c0_284 = arith.constant 0 : index
    %c0_285 = arith.constant 0 : index
    %524 = vector.load %arg7[%c0_284, %c0_285] : memref<2048x32xf32, #tpu.memory_space<vmem>>, vector<2048x32xf32>
    %cst_286 = arith.constant dense<0.000000e+00> : vector<2x32xf32>
    %525 = tpu.matmul %523, %524, %cst_286 {dimension_numbers = #tpu.dot_dimension_numbers<[1], [0], [0], [1], [0, 0, 1, 1], [], []>} : vector<2x2048xf32>, vector<2048x32xf32>, vector<2x32xf32> -> vector<2x32xf32>
    %c0_287 = arith.constant 0 : index
    %c0_288 = arith.constant 0 : index
    %526 = vector.load %arg8[%c0_287, %c0_288] : memref<1x32xf32, #tpu.memory_space<vmem>>, vector<1x32xf32>
    %527 = vector.broadcast %526 : vector<1x32xf32> to vector<2x32xf32>
    %528 = arith.addf %525, %527 : vector<2x32xf32>
    %cst_289 = arith.constant 0.000000e+00 : f32
    %529 = vector.broadcast %cst_289 : f32 to vector<2x32xf32>
    %530 = arith.maximumf %528, %529 : vector<2x32xf32>
    %c0_290 = arith.constant 0 : index
    %c0_291 = arith.constant 0 : index
    %531 = vector.load %arg9[%c0_290, %c0_291] : memref<32x5xf32, #tpu.memory_space<vmem>>, vector<32x5xf32>
    %cst_292 = arith.constant dense<0.000000e+00> : vector<2x5xf32>
    %532 = tpu.matmul %530, %531, %cst_292 {dimension_numbers = #tpu.dot_dimension_numbers<[1], [0], [0], [1], [0, 0, 1, 1], [], []>} : vector<2x32xf32>, vector<32x5xf32>, vector<2x5xf32> -> vector<2x5xf32>
    %c0_293 = arith.constant 0 : index
    %c0_294 = arith.constant 0 : index
    %533 = vector.load %arg10[%c0_293, %c0_294] : memref<1x5xf32, #tpu.memory_space<vmem>>, vector<1x5xf32>
    %534 = vector.broadcast %533 : vector<1x5xf32> to vector<2x5xf32>
    %535 = arith.addf %532, %534 : vector<2x5xf32>
    %c0_295 = arith.constant 0 : index
    %c0_296 = arith.constant 0 : index
    %536 = vector.load %arg11[%c0_295, %c0_296] : memref<2x5xf32, #tpu.memory_space<vmem>>, vector<2x5xf32>
    tpu.vector_store %arg11[%c0_295, %c0_296], %535 {strides = array<i32>} : memref<2x5xf32, #tpu.memory_space<vmem>>, vector<2x5xf32>,
    return
  }
}

</mosaic_0001>

<bundles_post_ra>
// kernel: forward.1
= control target key start
LH: loop header
LB: loop body
LE: loop exit
PB: predicated region body
PF: predicated region fallthrough
CT: control target
= control target key end

     0   :  { %v10892_v1 = vlaneseq  ;;  %v6686_v2 = vmov 1   ;;  %v6687_v4 = vmov 2   ;;  %v6688_v11 = vmov 3   ;;  %s10880_s0 = inlined_call_operand.vmem [shape: f32[1,512], index: 0, kind: input, shape index: {}]   ;;  %s10881_s1 = inlined_call_operand.vmem [shape: f32[8,25], index: 1, kind: input, shape index: {}]   ;;  %s10882_s2 = inlined_call_operand.vmem [shape: f32[8,1], index: 2, kind: input, shape index: {}]   ;;  %s10883_s3 = inlined_call_operand.vmem [shape: f32[8,200], index: 3, kind: input, shape index: {}]   ;;  %s10884_s4 = inlined_call_operand.vmem [shape: f32[8,1], index: 4, kind: input, shape index: {}]   ;;  %s10885_s5 = inlined_call_operand.vmem [shape: f32[25,512], index: 5, kind: input, shape index: {}]   ;;  %s10886_s6 = inlined_call_operand.vmem [shape: f32[25,512], index: 6, kind: input, shape index: {}]   ;;  %s10887_s7 = inlined_call_operand.vmem [shape: f32[2048,32], index: 7, kind: input, shape index: {}]   ;;  %s10888_s8 = inlined_call_operand.vmem [shape: f32[1,32], index: 8, kind: input, shape index: {}]   ;;  %s10889_s9 = inlined_call_operand.vmem [shape: f32[32,5], index: 9, kind: input, shape index: {}]   ;;  %s10890_s10 = inlined_call_operand.vmem [shape: f32[1,5], index: 10, kind: input, shape index: {}]   ;;  %s10891_s11 = inlined_call_operand.hbm [shape: f32[2,5], index: 11, kind: output, shape index: {}]  }
   0x1   :  { %v6830_v0 = vld [vmem:[%s10881_s1] sm:$0xff]  ;;  %6632 = vset.pattern.permute.xlu0 %v6686_v2  ;;  %6633 = vset.pattern.permute.xlu1 %v6687_v4 }
   0x2   :  { %189 = vperm.xlu0 %6632, %v6830_v0   ;;  %v6834_v3 = vshrl.u32 %v10892_v1, 7  ;;  %v39_v5 = vld [vmem:[%s10880_s0] sm:$0xf] }
   0x4   :  { %11002 = vst [vmem:[#allocation7_spill] sm:$0xff] %v6834_v3  ;;  %v6840_v6 = vsub.s32 0, %v6834_v3  ;;  %v6843_v7 = vsub.s32 3, %v6834_v3  ;;  %v6846_v8 = vsub.s32 1, %v6834_v3 }
   0x6   :  { %v6849_v9 = vrot.slane %v39_v5, %v6843_v7  ;;  %v6852_v10 = vrot.slane %v39_v5, %v6840_v6  ;;  %6634 = vset.pattern.permute.xlu0 %v6688_v11 }
   0x7   :  { %16 = vsyncpa [#allocation5], 0  ;;  %s6689_s1 = smov 34   ;;  %v6857_v12 = vrot.slane %v39_v5, %v6846_v8  ;;  %v6860_v13 = vsub.s32 2, %v6834_v3  ;;  %s6690_s0 = smov 33   ;;  %v6693_v15 = vmov 4  }
   0x8   :  { %68 = vrot.lane.b32.xlu0 %v6849_v9, %s6689_s1  ;;  %62 = vrot.lane.b32.xlu1 %v6852_v10, %s6689_s1  ;;  %s6691_s21 = smov 32   ;;  %s6692_s22 = smov 31   ;;  %v6694_v16 = vmov 13   ;;  %v6696_v17 = vmov 5   ;;  %v6698_v18 = vmov 6   ;;  %v6700_v19 = vmov 7  }
   0x9   :  { %v6865_v14 = vrot.slane %v39_v5, %v6860_v13  ;;  %s6695_s23 = smov 30   ;;  %s6697_s24 = smov 18   ;;  %v6702_v20 = vmov 8   ;;  %v6704_v21 = vmov 9   ;;  %v6706_v22 = vmov 10  }
   0xa   :  { %s6699_s25 = smov 17   ;;  %s6701_s26 = smov 16   ;;  %v6708_v23 = vmov 11   ;;  %v6710_v24 = vmov 12   ;;  %v6712_v25 = vmov 15   ;;  %v6715_v26 = vmov 16  }
   0xb   :  { %s6703_s27 = smov 15   ;;  %s6705_s28 = smov 14   ;;  %v6717_v31 = vmov 17   ;;  %v6719_v35 = vmov 18   ;;  %v6721_v38 = vmov 19   ;;  %v6722_v41 = vmov 14  }
   0xc   :  { %134 = vrot.lane.b32.xlu0 %v6857_v12, %s6690_s0  ;;  %64 = vrot.lane.b32.xlu1 %v6857_v12, %s6689_s1  ;;  %s6707_s29 = smov 2   ;;  %s6709_s30 = smov 1   ;;  %v6724_v44 = vmov 20   ;;  %v6726_v49 = vmov 21   ;;  %v6727_v50 = vmov 0   ;;  %v6729_v55 = vmov 22  }
   0xd   :  { %s10972_s12 = smov 127   ;;  %s10970_s13 = smov 126   ;;  %v6731_v60 = vmov 23   ;;  %v6733_v4 = vmov 24  }
   0xe   :  { %s6714_s14 = smov 114   ;;  %s6716_s15 = smov 113  }
   0xf   :  { %s10968_s16 = smov 112   ;;  %s10966_s17 = smov 111  }
  0x10   :  { %138 = vrot.lane.b32.xlu0 %v6849_v9, %s6690_s0  ;;  %66 = vrot.lane.b32.xlu1 %v6865_v14, %s6689_s1  ;;  %s10964_s18 = smov 110   ;;  %s6725_s19 = smov 98  }
  0x11   :  { %s6728_s20 = smov 97   ;;  %s10980_s1 = smov 96  }
  0x14   :  { %200 = vrot.lane.b32.xlu0 %v6852_v10, %s6691_s21  ;;  %132 = vrot.lane.b32.xlu1 %v6852_v10, %s6690_s0 }
  0x18   :  { %204 = vrot.lane.b32.xlu0 %v6865_v14, %s6691_s21  ;;  %136 = vrot.lane.b32.xlu1 %v6865_v14, %s6690_s0  ;;  %s6732_s0 = smov 95  }
  0x1c   :  { %325 = vperm.xlu0 %6634, %v6830_v0   ;;  %257 = vperm.xlu1 %6633, %v6830_v0  }
  0x20   :  { %272 = vrot.lane.b32.xlu0 %v6865_v14, %s6692_s22  ;;  %202 = vrot.lane.b32.xlu1 %v6857_v12, %s6691_s21 }
  0x21   :  { %6635 = vset.pattern.permute.xlu0 %v6693_v15  ;;  %6644 = vset.pattern.permute.xlu1 %v6694_v16 }
  0x24   :  { %393 = vperm.xlu0 %6635, %v6830_v0   ;;  %206 = vrot.lane.b32.xlu1 %v6849_v9, %s6691_s21 }
  0x28   :  { %340 = vrot.lane.b32.xlu0 %v6865_v14, %s6695_s23  ;;  %268 = vrot.lane.b32.xlu1 %v6852_v10, %s6692_s22 }
  0x29   :  { %6636 = vset.pattern.permute.xlu0 %v6696_v17 }
  0x2c   :  { %461 = vperm.xlu0 %6636, %v6830_v0   ;;  %270 = vrot.lane.b32.xlu1 %v6857_v12, %s6692_s22 }
  0x30   :  { %408 = vrot.lane.b32.xlu0 %v6865_v14, %s6697_s24  ;;  %274 = vrot.lane.b32.xlu1 %v6849_v9, %s6692_s22  ;;  %s6734_s22 = smov 94  }
  0x31   :  { %6637 = vset.pattern.permute.xlu0 %v6698_v18 }
  0x34   :  { %529 = vperm.xlu0 %6637, %v6830_v0   ;;  %336 = vrot.lane.b32.xlu1 %v6852_v10, %s6695_s23 }
  0x38   :  { %476 = vrot.lane.b32.xlu0 %v6865_v14, %s6699_s25  ;;  %338 = vrot.lane.b32.xlu1 %v6857_v12, %s6695_s23 }
  0x39   :  { %6638 = vset.pattern.permute.xlu0 %v6700_v19  ;;  %v1751_v19 = vld [vmem:[%s10882_s2] sm:$0xff]  ;;  %s6744_s2 = smov 10  }
  0x3c   :  { %597 = vperm.xlu0 %6638, %v6830_v0   ;;  %342 = vrot.lane.b32.xlu1 %v6849_v9, %s6695_s23  ;;  %s6742_s23 = smov 75  }
  0x40   :  { %544 = vrot.lane.b32.xlu0 %v6865_v14, %s6701_s26  ;;  %404 = vrot.lane.b32.xlu1 %v6852_v10, %s6697_s24 }
  0x41   :  { %6639 = vset.pattern.permute.xlu0 %v6702_v20 }
  0x44   :  { %665 = vperm.xlu0 %6639, %v6830_v0   ;;  %406 = vrot.lane.b32.xlu1 %v6857_v12, %s6697_s24 }
  0x48   :  { %612 = vrot.lane.b32.xlu0 %v6865_v14, %s6703_s27  ;;  %410 = vrot.lane.b32.xlu1 %v6849_v9, %s6697_s24  ;;  %s6743_s24 = smov 70  }
  0x49   :  { %6640 = vset.pattern.permute.xlu0 %v6704_v21 }
  0x4c   :  { %733 = vperm.xlu0 %6640, %v6830_v0   ;;  %472 = vrot.lane.b32.xlu1 %v6852_v10, %s6699_s25 }
  0x50   :  { %680 = vrot.lane.b32.xlu0 %v6865_v14, %s6705_s28  ;;  %474 = vrot.lane.b32.xlu1 %v6857_v12, %s6699_s25 }
  0x51   :  { %6641 = vset.pattern.permute.xlu0 %v6706_v22 }
  0x54   :  { %801 = vperm.xlu0 %6641, %v6830_v0   ;;  %478 = vrot.lane.b32.xlu1 %v6849_v9, %s6699_s25  ;;  %s6746_s25 = smov 123  }
  0x58   :  { %748 = vrot.lane.b32.xlu0 %v6865_v14, %s6707_s29  ;;  %540 = vrot.lane.b32.xlu1 %v6852_v10, %s6701_s26 }
  0x59   :  { %6642 = vset.pattern.permute.xlu0 %v6708_v23 }
  0x5c   :  { %869 = vperm.xlu0 %6642, %v6830_v0   ;;  %542 = vrot.lane.b32.xlu1 %v6857_v12, %s6701_s26 }
  0x60   :  { %816 = vrot.lane.b32.xlu0 %v6865_v14, %s6709_s30  ;;  %546 = vrot.lane.b32.xlu1 %v6849_v9, %s6701_s26  ;;  %s6747_s26 = smov 118  }
  0x61   :  { %6643 = vset.pattern.permute.xlu0 %v6710_v24 }
  0x64   :  { %924 = vperm.xlu0 %6643, %v6830_v0   ;;  %608 = vrot.lane.b32.xlu1 %v6852_v10, %s6703_s27 }
  0x68   :  { %937 = vrot.lane.b32.xlu0 %v6857_v12, %s10972_s12  ;;  %610 = vrot.lane.b32.xlu1 %v6857_v12, %s6703_s27 }
  0x69   :  { %6646 = vset.pattern.permute.xlu0 %v6712_v25 }
  0x6c   :  { %941 = vrot.lane.b32.xlu0 %v6849_v9, %s10972_s12  ;;  %614 = vrot.lane.b32.xlu1 %v6849_v9, %s6703_s27  ;;  %s6748_s27 = smov 58  }
  0x70   :  { %1003 = vrot.lane.b32.xlu0 %v6852_v10, %s10970_s13  ;;  %676 = vrot.lane.b32.xlu1 %v6852_v10, %s6705_s28 }
  0x74   :  { %1007 = vrot.lane.b32.xlu0 %v6865_v14, %s10970_s13  ;;  %678 = vrot.lane.b32.xlu1 %v6857_v12, %s6705_s28 }
  0x78   :  { %1128 = vperm.xlu0 %6646, %v6830_v0   ;;  %682 = vrot.lane.b32.xlu1 %v6849_v9, %s6705_s28  ;;  %s6749_s28 = smov 53  }
  0x7a   :  { %v6947_v27 = vpop.permute.xlu1 %62 }
  0x7c   :  { %1075 = vrot.lane.b32.xlu0 %v6865_v14, %s6714_s14  ;;  %744 = vrot.lane.b32.xlu1 %v6852_v10, %s6707_s29 }
  0x7d   :  { %6647 = vset.pattern.permute.xlu0 %v6715_v26 }
  0x7e   :  { %v6958_v29 = vpop.permute.xlu1 %64 }
  0x80   :  { %1196 = vperm.xlu0 %6647, %v6830_v0   ;;  %746 = vrot.lane.b32.xlu1 %v6857_v12, %s6707_s29 }
  0x81   :  { %v6952_v28 = vpop.permute.xlu0 %189 }
  0x82   :  { %v6967_v33 = vpop.permute.xlu1 %66 }
  0x84   :  { %1143 = vrot.lane.b32.xlu0 %v6865_v14, %s6716_s15  ;;  %750 = vrot.lane.b32.xlu1 %v6849_v9, %s6707_s29  ;;  %s10974_s29 = smov 43  }
  0x85   :  { %v6960_v30 = vpop.permute.xlu0 %68  ;;  %6648 = vset.pattern.permute.xlu0 %v6717_v31 }
  0x86   :  { %v6978_v36 = vpop.permute.xlu1 %132 }
  0x88   :  { %1264 = vperm.xlu0 %6648, %v6830_v0   ;;  %812 = vrot.lane.b32.xlu1 %v6852_v10, %s6709_s30 }
  0x89   :  { %v6965_v32 = vpop.permute.xlu0 %134 }
  0x8a   :  { %v6987_v40 = vpop.permute.xlu1 %136 }
  0x8c   :  { %1211 = vrot.lane.b32.xlu0 %v6865_v14, %s10968_s16  ;;  %814 = vrot.lane.b32.xlu1 %v6857_v12, %s6709_s30 }
  0x8d   :  { %v6973_v34 = vpop.permute.xlu0 %138  ;;  %6649 = vset.pattern.permute.xlu0 %v6719_v35 }
  0x90   :  { %1332 = vperm.xlu0 %6649, %v6830_v0   ;;  %818 = vrot.lane.b32.xlu1 %v6849_v9, %s6709_s30  ;;  %s6736_s30 = smov 37  }
  0x91   :  { %v6980_v37 = vpop.permute.xlu0 %200 }
  0x94   :  { %1279 = vrot.lane.b32.xlu0 %v6865_v14, %s10966_s17  ;;  %992 = vperm.xlu1 %6644, %v6830_v0  }
  0x95   :  { %6650 = vset.pattern.permute.xlu0 %v6721_v38  ;;  %v6985_v39 = vpop.permute.xlu0 %204 }
  0x98   :  { %1400 = vperm.xlu0 %6650, %v6830_v0   ;;  %935 = vrot.lane.b32.xlu1 %v6852_v10, %s10972_s12 }
  0x99   :  { %6645 = vset.pattern.permute.xlu1 %v6722_v41 }
  0x9b   :  { %v6992_v42 = vpop.permute.xlu1 %257  ;;  %v6994_v43 = vpop.permute.xlu0 %325 }
  0x9c   :  { %1347 = vrot.lane.b32.xlu0 %v6865_v14, %s10964_s18  ;;  %939 = vrot.lane.b32.xlu1 %v6865_v14, %s10972_s12  ;;  %s6752_s12 = smov 38  }
  0x9d   :  { %6651 = vset.pattern.permute.xlu0 %v6724_v44 }
  0x9f   :  { %v7000_v45 = vpop.permute.xlu1 %202  ;;  %v7002_v46 = vpop.permute.xlu0 %272 }
  0xa0   :  { %1468 = vperm.xlu0 %6651, %v6830_v0   ;;  %1060 = vperm.xlu1 %6645, %v6830_v0  }
  0xa3   :  { %v7006_v47 = vpop.permute.xlu1 %206  ;;  %v7008_v48 = vpop.permute.xlu0 %393 }
  0xa4   :  { %1415 = vrot.lane.b32.xlu0 %v6865_v14, %s6725_s19  ;;  %1005 = vrot.lane.b32.xlu1 %v6857_v12, %s10970_s13 }
  0xa5   :  { %6652 = vset.pattern.permute.xlu0 %v6726_v49  ;;  %6657 = vset.pattern.permute.xlu1 %v6727_v50 }
  0xa7   :  { %v7014_v51 = vpop.permute.xlu1 %268  ;;  %v7016_v52 = vpop.permute.xlu0 %340 }
  0xa8   :  { %1536 = vperm.xlu0 %6652, %v6830_v0   ;;  %1009 = vrot.lane.b32.xlu1 %v6849_v9, %s10970_s13  ;;  %s10978_s13 = smov 106  }
  0xab   :  { %v7021_v53 = vpop.permute.xlu1 %270  ;;  %v7023_v54 = vpop.permute.xlu0 %461 }
  0xac   :  { %1483 = vrot.lane.b32.xlu0 %v6865_v14, %s6728_s20  ;;  %1071 = vrot.lane.b32.xlu1 %v6852_v10, %s6714_s14 }
  0xad   :  { %6653 = vset.pattern.permute.xlu0 %v6729_v55 }
  0xaf   :  { %v7029_v56 = vpop.permute.xlu1 %274  ;;  %v7031_v57 = vpop.permute.xlu0 %408 }
  0xb0   :  { %1604 = vperm.xlu0 %6653, %v6830_v0   ;;  %1073 = vrot.lane.b32.xlu1 %v6857_v12, %s6714_s14 }
  0xb3   :  { %v7036_v58 = vpop.permute.xlu1 %336  ;;  %v7038_v59 = vpop.permute.xlu0 %529 }
  0xb4   :  { %11003 = vst [vmem:[#allocation8_spill] sm:$0xff] %v7038_v59  ;;  %1551 = vrot.lane.b32.xlu0 %v6865_v14, %s10980_s1  ;;  %1077 = vrot.lane.b32.xlu1 %v6849_v9, %s6714_s14  ;;  %s6737_s14 = smov 27  }
  0xb5   :  { %6654 = vset.pattern.permute.xlu0 %v6731_v60 }
  0xb7   :  { %v7044_v61 = vpop.permute.xlu1 %338  ;;  %v7046_v62 = vpop.permute.xlu0 %476 }
  0xb8   :  { %1672 = vperm.xlu0 %6654, %v6830_v0   ;;  %1139 = vrot.lane.b32.xlu1 %v6852_v10, %s6716_s15 }
  0xbb   :  { %v7051_v63 = vpop.permute.xlu1 %342  ;;  %v7053_v2 = vpop.permute.xlu0 %597 }
  0xbc   :  { %11004 = vst [vmem:[#allocation9_spill] sm:$0xff] %v7053_v2  ;;  %1619 = vrot.lane.b32.xlu0 %v6865_v14, %s6732_s0  ;;  %1141 = vrot.lane.b32.xlu1 %v6857_v12, %s6716_s15 }
  0xbd   :  { %6655 = vset.pattern.permute.xlu0 %v6733_v4 }
  0xbf   :  { %v7059_v5 = vpop.permute.xlu1 %404  ;;  %v7061_v11 = vpop.permute.xlu0 %544 }
  0xc0   :  { %1740 = vperm.xlu0 %6655, %v6830_v0   ;;  %1145 = vrot.lane.b32.xlu1 %v6849_v9, %s6716_s15  ;;  %s6738_s15 = smov 22  }
  0xc3   :  { %v7066_v15 = vpop.permute.xlu1 %406  ;;  %v7068_v16 = vpop.permute.xlu0 %665 }
  0xc4   :  { %11005 = vst [vmem:[#allocation10_spill] sm:$0xff] %v7068_v16  ;;  %6656 = vset.pattern.permute.xlu0 %v6727_v50  ;;  %1207 = vrot.lane.b32.xlu1 %v6852_v10, %s10968_s16 }
  0xc5   :  { %121 = vperm.xlu0 %6656, %v6830_v0  }
  0xc7   :  { %v7073_v17 = vpop.permute.xlu1 %410  ;;  %v7075_v18 = vpop.permute.xlu0 %612 }
  0xc8   :  { %11006 = vst [vmem:[#allocation11_spill] sm:$0xff] %v7075_v18  ;;  %1209 = vrot.lane.b32.xlu1 %v6857_v12, %s10968_s16  ;;  %v7358_v18 = vld [vmem:[%s10885_s5 + $0x21] ss:$8 sm:$0xf] }
  0xc9   :  { %1687 = vrot.lane.b32.xlu0 %v6865_v14, %s6734_s22 }
  0xcb   :  { %v7084_v20 = vpop.permute.xlu1 %472  ;;  %v7086_v21 = vpop.permute.xlu0 %733 }
  0xcc   :  { %11007 = vst [vmem:[#allocation12_spill] sm:$0xff] %v7086_v21  ;;  %1213 = vrot.lane.b32.xlu1 %v6849_v9, %s10968_s16  ;;  %s10976_s16 = smov 48  }
  0xcd   :  { %1754 = vperm.xlu0 %6656, %v1751_v19  }
  0xcf   :  { %v7090_v0 = vpop.permute.xlu1 %474  ;;  %v7092_v22 = vpop.permute.xlu0 %680 }
  0xd0   :  { %11008 = vst [vmem:[#allocation13_spill] sm:$0xff] %v7092_v22  ;;  %1275 = vrot.lane.b32.xlu1 %v6852_v10, %s10966_s17  ;;  %v7241_v22 = vld [vmem:[%s10885_s5 + $0x4] ss:$8 sm:$0xf] }
  0xd3   :  { %v7096_v23 = vpop.permute.xlu1 %478  ;;  %v7098_v24 = vpop.permute.xlu0 %801 }
  0xd4   :  { %11009 = vst [vmem:[#allocation14_spill] sm:$0xff] %v7098_v24  ;;  %1277 = vrot.lane.b32.xlu1 %v6857_v12, %s10966_s17 }
  0xd7   :  { %v7102_v25 = vpop.permute.xlu1 %540  ;;  %v7104_v26 = vpop.permute.xlu0 %748 }
  0xd8   :  { %11010 = vst [vmem:[#allocation15_spill] sm:$0xff] %v7104_v26  ;;  %1281 = vrot.lane.b32.xlu1 %v6849_v9, %s10966_s17  ;;  %s11278_s17 = smov 111  }
  0xdb   :  { %v7108_v31 = vpop.permute.xlu1 %542  ;;  %v7110_v35 = vpop.permute.xlu0 %869 }
  0xdc   :  { %11011 = vst [vmem:[#allocation16_spill] sm:$0xff] %v7110_v35  ;;  %1343 = vrot.lane.b32.xlu1 %v6852_v10, %s10964_s18 }
  0xdf   :  { %v7114_v38 = vpop.permute.xlu1 %546  ;;  %v7116_v41 = vpop.permute.xlu0 %816 }
  0xe0   :  { %11012 = vst [vmem:[#allocation17_spill] sm:$0xff] %v7114_v38  ;;  %11013 = vst [vmem:[#allocation18_spill] sm:$0xff] %v7116_v41  ;;  %1345 = vrot.lane.b32.xlu1 %v6857_v12, %s10964_s18  ;;  %v7310_v38 = vld [vmem:[%s10885_s5 + $0x20] ss:$8 sm:$0xf] }
  0xe3   :  { %v7120_v44 = vpop.permute.xlu1 %608  ;;  %v7122_v49 = vpop.permute.xlu0 %924 }
  0xe4   :  { %11014 = vst [vmem:[#allocation19_spill] sm:$0xff] %v7120_v44  ;;  %11015 = vst [vmem:[#allocation20_spill] sm:$0xff] %v7122_v49  ;;  %1349 = vrot.lane.b32.xlu1 %v6849_v9, %s10964_s18  ;;  %s10986_s18 = smov 86  }
  0xe7   :  { %v7126_v50 = vpop.permute.xlu1 %610  ;;  %v7128_v55 = vpop.permute.xlu0 %937 }
  0xe8   :  { %11016 = vst [vmem:[#allocation21_spill] sm:$0xff] %v7126_v50  ;;  %11017 = vst [vmem:[#allocation22_spill] sm:$0xff] %v7128_v55  ;;  %1411 = vrot.lane.b32.xlu1 %v6852_v10, %s6725_s19  ;;  %v7291_v50 = vld [vmem:[%s10885_s5 + $0x7] ss:$8 sm:$0xf] }
  0xeb   :  { %v7132_v60 = vpop.permute.xlu1 %614  ;;  %v7134_v4 = vpop.permute.xlu0 %941 }
  0xec   :  { %11018 = vst [vmem:[#allocation23_spill] sm:$0xff] %v7132_v60  ;;  %11019 = vst [vmem:[#allocation24_spill] sm:$0xff] %v7134_v4  ;;  %1413 = vrot.lane.b32.xlu1 %v6857_v12, %s6725_s19 }
  0xef   :  { %v7138_v19 = vpop.permute.xlu1 %676  ;;  %v7140_v1 = vpop.permute.xlu0 %1003 }
  0xf0   :  { %11020 = vst [vmem:[#allocation25_spill] sm:$0xff] %v7138_v19  ;;  %11021 = vst [vmem:[#allocation26_spill] sm:$0xff] %v7140_v1  ;;  %1417 = vrot.lane.b32.xlu1 %v6849_v9, %s6725_s19  ;;  %s6739_s19 = smov 90  }
  0xf3   :  { %v7144_v3 = vpop.permute.xlu1 %678  ;;  %v7146_v35 = vpop.permute.xlu0 %1007 }
  0xf4   :  { %11022 = vst [vmem:[#allocation27_spill] sm:$0xff] %v7144_v3  ;;  %11023 = vst [vmem:[#allocation28_spill] sm:$0xff] %v7146_v35  ;;  %1479 = vrot.lane.b32.xlu1 %v6852_v10, %s6728_s20 }
  0xf7   :  { %v7150_v55 = vpop.permute.xlu1 %682  ;;  %v7152_v4 = vpop.permute.xlu0 %1128 }
  0xf8   :  { %11024 = vst [vmem:[#allocation29_spill] sm:$0xff] %v7150_v55  ;;  %11025 = vst [vmem:[#allocation30_spill] sm:$0xff] %v7152_v4  ;;  %1481 = vrot.lane.b32.xlu1 %v6857_v12, %s6728_s20  ;;  %v7277_v55 = vld [vmem:[%s10885_s5 + $0x6] ss:$8 sm:$0xf] }
  0xfb   :  { %v7156_v24 = vpop.permute.xlu1 %744  ;;  %v7158_v1 = vpop.permute.xlu0 %1075 }
  0xfc   :  { %11026 = vst [vmem:[#allocation31_spill] sm:$0xff] %v7156_v24  ;;  %11027 = vst [vmem:[#allocation32_spill] sm:$0xff] %v7158_v1  ;;  %1485 = vrot.lane.b32.xlu1 %v6849_v9, %s6728_s20  ;;  %s6741_s20 = smov 80  }
  0xff   :  { %v7162_v41 = vpop.permute.xlu1 %746  ;;  %v7164_v35 = vpop.permute.xlu0 %1196 }
 0x100   :  { %11028 = vst [vmem:[#allocation33_spill] sm:$0xff] %v7162_v41  ;;  %11029 = vst [vmem:[#allocation34_spill] sm:$0xff] %v7164_v35  ;;  %1547 = vrot.lane.b32.xlu1 %v6852_v10, %s10980_s1 }
 0x103   :  { %v7168_v21 = vpop.permute.xlu1 %750  ;;  %v7170_v4 = vpop.permute.xlu0 %1143 }
 0x104   :  { %11030 = vst [vmem:[#allocation35_spill] sm:$0xff] %v7168_v21  ;;  %11031 = vst [vmem:[#allocation36_spill] sm:$0xff] %v7170_v4  ;;  %1549 = vrot.lane.b32.xlu1 %v6857_v12, %s10980_s1  ;;  %v11036_v21 = vlaneseq  ;;  %v7192_v4 = vld [vmem:[%s10885_s5] ss:$8 sm:$0xf] }
 0x106   :  { %v7187_v41 = vand.u32 127, %v11036_v21  ;;  %v7228_v21 = vld [vmem:[%s10885_s5 + $0x3] ss:$8 sm:$0xf] }
 0x107   :  { %v7174_v26 = vpop.permute.xlu1 %812  ;;  %v7176_v1 = vpop.permute.xlu0 %1264 }
 0x108   :  { %11032 = vst [vmem:[#allocation37_spill] sm:$0xff] %v7174_v26  ;;  %11033 = vst [vmem:[#allocation38_spill] sm:$0xff] %v7176_v1  ;;  %1553 = vrot.lane.b32.xlu1 %v6849_v9, %s10980_s1  ;;  %v7197_v1 = vld [vmem:[%s10885_s5 + $0x1] ss:$8 sm:$0xf]  ;;  %vm72_vm0 = vcmp.lt.s32.totalorder %v7187_v41, 34 }
 0x109   :  { %vm140_vm1 = vcmp.lt.s32.totalorder %v7187_v41, 33  ;;  %vm208_vm2 = vcmp.lt.s32.totalorder %v7187_v41, 32  ;;  %vm276_vm3 = vcmp.lt.s32.totalorder %v7187_v41, 31  ;;  %vm344_vm4 = vcmp.lt.s32.totalorder %v7187_v41, 30 }
 0x10a   :  { %vm412_vm5 = vcmp.lt.s32.totalorder %v7187_v41, 18  ;;  %vm480_vm6 = vcmp.lt.s32.totalorder %v7187_v41, 17  ;;  %vm548_vm7 = vcmp.lt.s32.totalorder %v7187_v41, 16  ;;  %vm616_vm8 = vcmp.lt.s32.totalorder %v7187_v41, 15 }
 0x10b   :  { %v7180_v24 = vpop.permute.xlu1 %814  ;;  %v7182_v35 = vpop.permute.xlu0 %1211  ;;  %vm684_vm9 = vcmp.lt.s32.totalorder %v7187_v41, 14  ;;  %vm752_vm10 = vcmp.lt.s32.totalorder %v7187_v41, 2  ;;  %vm820_vm11 = vcmp.lt.s32.totalorder %v7187_v41, 1  ;;  %vm10992_vm12 = vcmp.lt.s32.totalorder %v7187_v41, 127 }
 0x10c   :  { %11034 = vst [vmem:[#allocation39_spill] sm:$0xff] %v7180_v24  ;;  %11035 = vst [vmem:[#allocation40_spill] sm:$0xff] %v7182_v35  ;;  %1615 = vrot.lane.b32.xlu1 %v6852_v10, %s6732_s0  ;;  %v7206_v35 = vld [vmem:[%s10885_s5 + $0x2] ss:$8 sm:$0xf]  ;;  %vm10991_vm13 = vcmp.lt.s32.totalorder %v7187_v41, 126 }
 0x10d   :  { %vm1079_vm14 = vcmp.lt.s32.totalorder %v7187_v41, 114  ;;  %vm1147_vm15 = vcmp.lt.s32.totalorder %v7187_v41, 113 }
 0x10f   :  { %v7199_v26 = vpop.permute.xlu1 %818  ;;  %v7201_v24 = vpop.permute.xlu0 %1332 }
 0x110   :  { %11037 = vst [vmem:[#allocation41_spill] sm:$0xff] %v7199_v26  ;;  %11038 = vst [vmem:[#allocation42_spill] sm:$0xff] %v7201_v24  ;;  %1617 = vrot.lane.b32.xlu1 %v6857_v12, %s6732_s0  ;;  %v5733_v24 = vld [vmem:[%s10885_s5 + $0x24] ss:$8 sm:$0xf] }
 0x111   :  { %v7254_v26 = vld [vmem:[%s10885_s5 + $0x5] ss:$8 sm:$0xf]  ;;  %v890_v16 = vrot.slane %v5733_v24, %v6846_v8  ;;  %v894_v49 = vrot.slane %v5733_v24, %v6860_v13  ;;  %v886_v19 = vrot.slane %v5733_v24, %v6840_v6 }
 0x113   :  { %v7243_v3 = vpop.permute.xlu1 %992  ;;  %v7245_v60 = vpop.permute.xlu0 %1279  ;;  %v7302_v2 = vmul.f32 %v890_v16, %v6857_v12  ;;  %v7305_v44 = vmul.f32 %v894_v49, %v6865_v14  ;;  %v7322_v14 = vmul.f32 %v886_v19, %v6852_v10  ;;  %v11047_v19 = vrot.slane %v7192_v4, %v6846_v8 }
 0x114   :  { %11039 = vst [vmem:[#allocation43_spill] sm:$0xff] %v7243_v3  ;;  %11040 = vst [vmem:[#allocation44_spill] sm:$0xff] %v7245_v60  ;;  %1621 = vrot.lane.b32.xlu1 %v6849_v9, %s6732_s0  ;;  %v898_v3 = vrot.slane %v5733_v24, %v6843_v7  ;;  %v75_v24 = vsel %vm72_vm0, %v6947_v27, %v6958_v29  ;;  %s6745_s0 = smov 5  }
 0x115   :  { %11043 = vst [vmem:[#allocation47_spill] sm:$0xff] %v7305_v44 }
 0x116   :  { %v7319_v16 = vmul.f32 %v898_v3, %v6849_v9  ;;  %v7389_v3 = vmul.f32 %v11047_v19, %v75_v24 }
 0x117   :  { %v7293_v60 = vpop.permute.xlu1 %935  ;;  %v7295_v59 = vpop.permute.xlu0 %1400 }
 0x118   :  { %11041 = vst [vmem:[#allocation45_spill] sm:$0xff] %v7293_v60  ;;  %11042 = vst [vmem:[#allocation46_spill] sm:$0xff] %v7295_v59  ;;  %1683 = vrot.lane.b32.xlu1 %v6852_v10, %s6734_s22  ;;  %v74_v60 = vsel %vm72_vm0, %v6958_v29, %v6967_v33  ;;  %v143_v10 = vsel %vm140_vm1, %v6978_v36, %v6965_v32  ;;  %v144_v29 = vsel %vm140_vm1, %v6973_v34, %v6978_v36 }
 0x119   :  { %11044 = vst [vmem:[#allocation48_spill] sm:$0xff] %v7319_v16  ;;  %v76_v36 = vsel %vm72_vm0, %v6960_v30, %v6947_v27  ;;  %v11051_v27 = vrot.slane %v7197_v1, %v6846_v8 }
 0x11b   :  { %v7340_v49 = vpop.permute.xlu1 %939  ;;  %v7342_v59 = vpop.permute.xlu0 %1347 }
 0x11c   :  { %11045 = vst [vmem:[#allocation49_spill] sm:$0xff] %v7340_v49  ;;  %11046 = vst [vmem:[#allocation50_spill] sm:$0xff] %v7342_v59  ;;  %1685 = vrot.lane.b32.xlu1 %v6857_v12, %s6734_s22  ;;  %v142_v12 = vsel %vm140_vm1, %v6965_v32, %v6987_v40  ;;  %v73_v32 = vsel %vm72_vm0, %v6967_v33, %v6960_v30  ;;  %v7404_v49 = vld [vmem:[%s10885_s5 + $0x22] ss:$8 sm:$0xf]  ;;  %v11050_v33 = vrot.slane %v7192_v4, %v6860_v13 }
 0x11d   :  { %v169_v30 = vmul.f32 %v11051_v27, %v143_v10  ;;  %v141_v59 = vsel %vm140_vm1, %v6987_v40, %v6973_v34  ;;  %v11054_v40 = vrot.slane %v7192_v4, %v6840_v6  ;;  %v11058_v10 = vrot.slane %v7206_v35, %v6846_v8 }
 0x11e   :  { %v7413_v16 = vmul.f32 %v11050_v33, %v74_v60  ;;  %v11053_v33 = vrot.slane %v7197_v1, %v6840_v6  ;;  %vm10990_vm0 = vcmp.lt.s32.totalorder %v7187_v41, 112  ;;  %vm10985_vm1 = vcmp.lt.s32.totalorder %v7187_v41, 111 }
 0x11f   :  { %v7406_v24 = vpop.permute.xlu1 %1060  ;;  %v7408_v19 = vpop.permute.xlu0 %1468  ;;  %v7439_v27 = vmul.f32 %v11054_v40, %v76_v36  ;;  %v11056_v36 = vrot.slane %v7197_v1, %v6843_v7  ;;  %v7465_v40 = vld [vmem:[%s10885_s5 + $0x23] ss:$8 sm:$0xf] }
 0x120   :  { %11048 = vst [vmem:[#allocation51_spill] sm:$0xff] %v7406_v24  ;;  %11049 = vst [vmem:[#allocation52_spill] sm:$0xff] %v7408_v19  ;;  %1689 = vrot.lane.b32.xlu1 %v6849_v9, %s6734_s22  ;;  %v11052_v19 = vrot.slane %v7197_v1, %v6860_v13  ;;  %v168_v24 = vmul.f32 %v11053_v33, %v144_v29  ;;  %v11055_v9 = vrot.slane %v7192_v4, %v6843_v7  ;;  %s6740_s22 = smov 85  }
 0x121   :  { %v171_v33 = vmul.f32 %v11056_v36, %v141_v59  ;;  %v179_v1 = vrot.slane %v169_v30, %v6840_v6  ;;  %v210_v59 = vsel %vm208_vm2, %v7000_v45, %v6985_v39  ;;  %v212_v30 = vsel %vm208_vm2, %v7006_v47, %v6980_v37 }
 0x122   :  { %v170_v60 = vmul.f32 %v11052_v19, %v142_v12  ;;  %v7444_v44 = vmul.f32 %v11055_v9, %v73_v32  ;;  %v211_v12 = vsel %vm208_vm2, %v6980_v37, %v7000_v45  ;;  %v175_v4 = vrot.slane %v168_v24, %v6840_v6 }
 0x123   :  { %v7467_v9 = vpop.permute.xlu1 %1005  ;;  %v7469_v29 = vpop.permute.xlu0 %1415  ;;  %v237_v19 = vmul.f32 %v11058_v10, %v211_v12  ;;  %v187_v10 = vrot.slane %v171_v33, %v6840_v6  ;;  %v11059_v12 = vrot.slane %v7206_v35, %v6860_v13  ;;  %v209_v36 = vsel %vm208_vm2, %v6985_v39, %v7006_v47 }
 0x124   :  { %11057 = vst [vmem:[#allocation53_spill] sm:$0xff] %v7469_v29  ;;  %v183_v32 = vrot.slane %v170_v60, %v6840_v6  ;;  %v279_v45 = vsel %vm276_vm3, %v7014_v51, %v7021_v53  ;;  %v7515_v33 = vmul.f32 %v6952_v28, %v179_v1  ;;  %v278_v39 = vsel %vm276_vm3, %v7021_v53, %v7002_v46  ;;  %v7529_v60 = vld [vmem:[%s10885_s5 + $0x25] ss:$8 sm:$0xf] }
 0x125   :  { %v238_v37 = vmul.f32 %v11059_v12, %v210_v59  ;;  %v11062_v59 = vrot.slane %v7206_v35, %v6840_v6  ;;  %v11063_v53 = vrot.slane %v7206_v35, %v6843_v7  ;;  %v11064_v29 = vrot.slane %v7228_v21, %v6846_v8 }
 0x126   :  { %v7532_v1 = vmul.f32 %v6952_v28, %v183_v32  ;;  %v277_v32 = vsel %vm276_vm3, %v7002_v46, %v7029_v56  ;;  %v7560_v35 = vmul.f32 %v6952_v28, %v187_v10  ;;  %v11069_v46 = vrot.slane %v7228_v21, %v6843_v7 }
 0x127   :  { %v7510_v24 = vpop.permute.xlu1 %1009  ;;  %v7512_v34 = vpop.permute.xlu0 %1536  ;;  %v236_v12 = vmul.f32 %v11062_v59, %v212_v30  ;;  %v247_v30 = vrot.slane %v237_v19, %v6840_v6  ;;  %v239_v47 = vmul.f32 %v11063_v53, %v209_v36  ;;  %v280_v19 = vsel %vm276_vm3, %v7029_v56, %v7014_v51 }
 0x128   :  { %11060 = vst [vmem:[#allocation54_spill] sm:$0xff] %v7510_v24  ;;  %11061 = vst [vmem:[#allocation55_spill] sm:$0xff] %v7512_v34  ;;  %v7535_v34 = vmul.f32 %v6952_v28, %v175_v4  ;;  %v305_v24 = vmul.f32 %v11064_v29, %v279_v45  ;;  %v7557_v4 = vld [vmem:[%s10885_s5 + $0x26] ss:$8 sm:$0xf]  ;;  %v251_v29 = vrot.slane %v238_v37, %v6840_v6  ;;  %vm10984_vm3 = vcmp.lt.s32.totalorder %v7187_v41, 110 }
 0x129   :  { %v11065_v36 = vrot.slane %v7228_v21, %v6860_v13  ;;  %v243_v56 = vrot.slane %v236_v12, %v6840_v6  ;;  %v307_v59 = vmul.f32 %v11069_v46, %v277_v32  ;;  %v347_v12 = vsel %vm344_vm4, %v7036_v58, %v7044_v61 }
 0x12a   :  { %v7593_v10 = vmul.f32 %v6992_v42, %v247_v30  ;;  %v255_v37 = vrot.slane %v239_v47, %v6840_v6  ;;  %v7601_v32 = vmul.f32 %v6992_v42, %v251_v29  ;;  %v11072_v30 = vrot.slane %v7241_v22, %v6846_v8 }
 0x12b   :  { %v306_v45 = vmul.f32 %v11065_v36, %v278_v39  ;;  %v7568_v53 = vpop.permute.xlu1 %1071  ;;  %v7570_v51 = vpop.permute.xlu0 %1483  ;;  %v11068_v39 = vrot.slane %v7228_v21, %v6840_v6  ;;  %v7618_v29 = vmul.f32 %v6992_v42, %v243_v56  ;;  %v348_v21 = vsel %vm344_vm4, %v7051_v63, %v7036_v58 }
 0x12c   :  { %11066 = vst [vmem:[#allocation56_spill] sm:$0xff] %v7568_v53  ;;  %11067 = vst [vmem:[#allocation57_spill] sm:$0xff] %v7570_v51  ;;  %v315_v51 = vrot.slane %v305_v24, %v6840_v6  ;;  %v7611_v24 = vld [vmem:[%s10885_s5 + $0x27] ss:$8 sm:$0xf]  ;;  %v373_v46 = vmul.f32 %v11072_v30, %v347_v12  ;;  %v345_v56 = vsel %vm344_vm4, %v7016_v52, %v7051_v63 }
 0x12d   :  { %v304_v36 = vmul.f32 %v11068_v39, %v280_v19  ;;  %v319_v19 = vrot.slane %v306_v45, %v6840_v6  ;;  %11070 = vst [vmem:[#allocation58_spill] sm:$0xff] %v7611_v24  ;;  %v346_v45 = vsel %vm344_vm4, %v7044_v61, %v7016_v52  ;;  %v415_v61 = vsel %vm412_vm5, %v7059_v5, %v7066_v15 }
 0x12e   :  { %v7642_v12 = vmul.f32 %v6992_v42, %v255_v37  ;;  %v7645_v30 = vmul.f32 %v6994_v43, %v315_v51  ;;  %v11073_v52 = vrot.slane %v7241_v22, %v6860_v13  ;;  %v11074_v42 = vrot.slane %v7241_v22, %v6840_v6 }
 0x12f   :  { %v7613_v47 = vpop.permute.xlu1 %1073  ;;  %v7615_v39 = vpop.permute.xlu0 %1604  ;;  %v311_v28 = vrot.slane %v304_v36, %v6840_v6  ;;  %v7652_v36 = vmul.f32 %v6994_v43, %v319_v19  ;;  %v414_v51 = vsel %vm412_vm5, %v7066_v15, %v7031_v57  ;;  %v7671_v19 = vld [vmem:[%s10885_s5 + $0x40] ss:$8 sm:$0xf]  ;;  %vm1419_vm4 = vcmp.lt.s32.totalorder %v7187_v41, 98 }
 0x130   :  { %11071 = vst [vmem:[#allocation59_spill] sm:$0xff] %v7615_v39  ;;  %v323_v39 = vrot.slane %v307_v59, %v6840_v6  ;;  %v374_v63 = vmul.f32 %v11073_v52, %v346_v45  ;;  %v372_v37 = vmul.f32 %v11074_v42, %v348_v21  ;;  %11077 = vst [vmem:[#allocation62_spill] sm:$0xff] %v7671_v19 }
 0x131   :  { %v383_v45 = vrot.slane %v373_v46, %v6840_v6  ;;  %v11078_v52 = vrot.slane %v7241_v22, %v6843_v7  ;;  %v11079_v42 = vrot.slane %v7254_v26, %v6846_v8  ;;  %v416_v46 = vsel %vm412_vm5, %v7073_v17, %v7059_v5 }
 0x132   :  { %v387_v5 = vrot.slane %v374_v63, %v6840_v6  ;;  %v11109_v19 = vrot.slane %v7413_v16, %v6840_v6  ;;  %v11112_v16 = vld [vmem:[#allocation20_spill] sm:$0xff] }
 0x133   :  { %v7664_v58 = vpop.permute.xlu1 %1077  ;;  %v7666_v53 = vpop.permute.xlu0 %1551  ;;  %v375_v21 = vmul.f32 %v11078_v52, %v345_v56  ;;  %v441_v59 = vmul.f32 %v11079_v42, %v415_v61  ;;  %v11080_v56 = vrot.slane %v7254_v26, %v6860_v13  ;;  %v379_v52 = vrot.slane %v372_v37, %v6840_v6 }
 0x134   :  { %11075 = vst [vmem:[#allocation60_spill] sm:$0xff] %v7664_v58  ;;  %11076 = vst [vmem:[#allocation61_spill] sm:$0xff] %v7666_v53  ;;  %v7683_v53 = vmul.f32 %v6994_v43, %v311_v28  ;;  %v7686_v58 = vmul.f32 %v6994_v43, %v323_v39  ;;  %v413_v28 = vsel %vm412_vm5, %v7031_v57, %v7073_v17  ;;  %vm1487_vm5 = vcmp.lt.s32.totalorder %v7187_v41, 97 }
 0x135   :  { %v442_v61 = vmul.f32 %v11080_v56, %v414_v51  ;;  %v482_v51 = vsel %vm480_vm6, %v7090_v0, %v7046_v62  ;;  %v483_v57 = vsel %vm480_vm6, %v7084_v20, %v7090_v0  ;;  %v7720_v56 = vmul.f32 %v7008_v48, %v383_v45 }
 0x136   :  { %v391_v63 = vrot.slane %v375_v21, %v6840_v6  ;;  %v451_v37 = vrot.slane %v441_v59, %v6840_v6  ;;  %v11083_v39 = vrot.slane %v7254_v26, %v6840_v6  ;;  %v11084_v0 = vrot.slane %v7254_v26, %v6843_v7 }
 0x137   :  { %v7715_v17 = vpop.permute.xlu1 %1139  ;;  %v7717_v42 = vpop.permute.xlu0 %1672  ;;  %v481_v45 = vsel %vm480_vm6, %v7046_v62, %v7096_v23  ;;  %v484_v59 = vsel %vm480_vm6, %v7096_v23, %v7084_v20  ;;  %v551_v21 = vsel %vm548_vm7, %v7102_v25, %v7108_v31  ;;  %v11085_v26 = vrot.slane %v7277_v55, %v6846_v8  ;;  %v7757_v23 = vld [vmem:[%s10885_s5 + $0x41] ss:$8 sm:$0xf] }
 0x138   :  { %11081 = vst [vmem:[#allocation63_spill] sm:$0xff] %v7715_v17  ;;  %11082 = vst [vmem:[#allocation64_spill] sm:$0xff] %v7717_v42  ;;  %v440_v43 = vmul.f32 %v11083_v39, %v416_v46  ;;  %v443_v22 = vmul.f32 %v11084_v0, %v413_v28  ;;  %v455_v46 = vrot.slane %v442_v61, %v6840_v6  ;;  %vm1555_vm6 = vcmp.lt.s32.totalorder %v7187_v41, 96 }
 0x139   :  { %v509_v28 = vmul.f32 %v11085_v26, %v483_v57  ;;  %v11086_v39 = vrot.slane %v7277_v55, %v6860_v13  ;;  %v550_v20 = vsel %vm548_vm7, %v7108_v31, %v7061_v11  ;;  %11087 = vst [vmem:[#allocation65_spill] sm:$0xff] %v7757_v23  ;;  %v7760_v61 = vmul.f32 %v7008_v48, %v387_v5  ;;  %v11101_v31 = vld [vmem:[#allocation21_spill] sm:$0xff] }
 0x13a   :  { %v7763_v0 = vmul.f32 %v7008_v48, %v379_v52  ;;  %v11090_v5 = vrot.slane %v7277_v55, %v6840_v6  ;;  %v11091_v52 = vrot.slane %v7277_v55, %v6843_v7  ;;  %v459_v17 = vrot.slane %v443_v22, %v6840_v6  ;;  %v7803_v22 = vld [vmem:[%s10885_s5 + $0x42] ss:$8 sm:$0xf] }
 0x13b   :  { %v510_v62 = vmul.f32 %v11086_v39, %v482_v51  ;;  %v7765_v57 = vpop.permute.xlu1 %1141  ;;  %v7767_v26 = vpop.permute.xlu0 %1619  ;;  %v7774_v39 = vmul.f32 %v7008_v48, %v391_v63  ;;  %v447_v51 = vrot.slane %v440_v43, %v6840_v6  ;;  %v11093_v48 = vrot.slane %v7291_v50, %v6860_v13  ;;  %11094 = vst [vmem:[#allocation68_spill] sm:$0xff] %v7803_v22  ;;  %v11095_v43 = vld [vmem:[#allocation17_spill] sm:$0xff] }
 0x13c   :  { %11088 = vst [vmem:[#allocation66_spill] sm:$0xff] %v7765_v57  ;;  %11089 = vst [vmem:[#allocation67_spill] sm:$0xff] %v7767_v26  ;;  %v508_v15 = vmul.f32 %v11090_v5, %v484_v59  ;;  %v511_v42 = vmul.f32 %v11091_v52, %v481_v45  ;;  %v11092_v26 = vrot.slane %v7291_v50, %v6846_v8 }
 0x13d   :  { %v578_v63 = vmul.f32 %v11093_v48, %v550_v20  ;;  %v7793_v59 = vmul.f32 %v7023_v54, %v451_v37  ;;  %v7796_v55 = vmul.f32 %v7023_v54, %v455_v46  ;;  %v519_v45 = vrot.slane %v509_v28, %v6840_v6 }
 0x13e   :  { %v577_v24 = vmul.f32 %v11092_v26, %v551_v21  ;;  %v523_v21 = vrot.slane %v510_v62, %v6840_v6  ;;  %v552_v20 = vsel %vm548_vm7, %v11095_v43, %v7102_v25  ;;  %v515_v5 = vrot.slane %v508_v15, %v6840_v6 }
 0x13f   :  { %v7809_v26 = vpop.permute.xlu1 %1145  ;;  %v7811_v37 = vpop.permute.xlu0 %1740  ;;  %v527_v52 = vrot.slane %v511_v42, %v6840_v6  ;;  %v549_v25 = vsel %vm548_vm7, %v7061_v11, %v11095_v43  ;;  %v7828_v46 = vmul.f32 %v7023_v54, %v447_v51  ;;  %v7831_v28 = vmul.f32 %v7023_v54, %v459_v17  ;;  %v11098_v42 = vld [vmem:[#allocation8_spill] sm:$0xff] }
 0x140   :  { %11096 = vst [vmem:[#allocation17_spill] sm:$0xff] %v7809_v26  ;;  %11097 = vst [vmem:[#allocation69_spill] sm:$0xff] %v7811_v37  ;;  %v587_v48 = vrot.slane %v577_v24, %v6840_v6  ;;  %v591_v62 = vrot.slane %v578_v63, %v6840_v6  ;;  %v7839_v24 = vld [vmem:[%s10885_s5 + $0x43] ss:$8 sm:$0xf]  ;;  %v7842_v11 = vmul.f32 %v11098_v42, %v519_v45  ;;  %vm1623_vm7 = vcmp.lt.s32.totalorder %v7187_v41, 95 }
 0x141   :  { %v7845_v43 = vmul.f32 %v11098_v42, %v523_v21  ;;  %v11099_v54 = vrot.slane %v7291_v50, %v6840_v6  ;;  %v11100_v63 = vrot.slane %v7291_v50, %v6843_v7  ;;  %v11102_v37 = vld [vmem:[#allocation19_spill] sm:$0xff]  ;;  %v7869_v51 = vmul.f32 %v11098_v42, %v527_v52  ;;  %v11104_v50 = vld [vmem:[#allocation9_spill] sm:$0xff] }
 0x142   :  { %v619_v45 = vsel %vm616_vm8, %v11102_v37, %v11101_v31  ;;  %v11105_v21 = vld [vmem:[#allocation11_spill] sm:$0xff]  ;;  %v11108_v26 = vrot.slane %v7310_v38, %v6846_v8 }
 0x143   :  { %v576_v17 = vmul.f32 %v11099_v54, %v552_v20  ;;  %v579_v15 = vmul.f32 %v11100_v63, %v549_v25  ;;  %v7859_v23 = vpop.permute.xlu1 %1207  ;;  %v7866_v54 = vmul.f32 %v11098_v42, %v515_v5  ;;  %v7872_v25 = vmul.f32 %v11104_v50, %v587_v48 }
 0x144   :  { %11103 = vst [vmem:[#allocation8_spill] sm:$0xff] %v7859_v23  ;;  %v122_v63 = vpop.permute.xlu0 %121  ;;  %v7877_v23 = vmul.f32 %v11104_v50, %v591_v62  ;;  %v618_v20 = vsel %vm616_vm8, %v11101_v31, %v11105_v21  ;;  %v11106_v5 = vrot.slane %v7439_v27, %v6840_v6  ;;  %v11107_v48 = vrot.slane %v7389_v3, %v6840_v6 }
 0x145   :  { %v583_v22 = vrot.slane %v576_v17, %v6840_v6  ;;  %v645_v62 = vmul.f32 %v11108_v26, %v619_v45  ;;  %v126_v31 = vmul.f32 %v122_v63, %v11109_v19  ;;  %v11110_v27 = vrot.slane %v7444_v44, %v6840_v6 }
 0x146   :  { %v124_v52 = vmul.f32 %v122_v63, %v11106_v5  ;;  %v125_v42 = vmul.f32 %v122_v63, %v11107_v48  ;;  %v595_v57 = vrot.slane %v579_v15, %v6840_v6  ;;  %v11111_v45 = vrot.slane %v7322_v14, %v6840_v6 }
 0x147   :  { %v127_v5 = vmul.f32 %v122_v63, %v11110_v27  ;;  %v7903_v48 = vpop.permute.xlu1 %1209  ;;  %v11113_v44 = vrot.slane %v7302_v2, %v6840_v6  ;;  %v198_v63 = vadd.f32 %v7532_v1, %v126_v31  ;;  %v11117_v27 = vld [vmem:[#allocation23_spill] sm:$0xff]  ;;  %v7939_v1 = vmul.f32 %v11104_v50, %v583_v22  ;;  %v11118_v31 = vld [vmem:[#allocation48_spill] sm:$0xff] }
 0x148   :  { %v196_v3 = vadd.f32 %v7535_v34, %v124_v52  ;;  %v197_v17 = vadd.f32 %v7515_v33, %v125_v42  ;;  %v7911_v19 = vmul.f32 %v11112_v16, %v11111_v45  ;;  %v11114_v34 = vrot.slane %v7310_v38, %v6860_v13  ;;  %v11115_v52 = vld [vmem:[#allocation47_spill] sm:$0xff] }
 0x149   :  { %v7917_v15 = vmul.f32 %v11112_v16, %v11113_v44  ;;  %v11116_v42 = vrot.slane %v11115_v52, %v6840_v6  ;;  %v617_v2 = vsel %vm616_vm8, %v11105_v21, %v11117_v27  ;;  %v620_v45 = vsel %vm616_vm8, %v11117_v27, %v11102_v37  ;;  %v11120_v22 = vld [vmem:[#allocation27_spill] sm:$0xff]  ;;  %v11121_v37 = vld [vmem:[#allocation25_spill] sm:$0xff] }
 0x14a   :  { %v646_v33 = vmul.f32 %v11114_v34, %v618_v20  ;;  %v199_v20 = vadd.f32 %v7560_v35, %v127_v5  ;;  %v11119_v44 = vrot.slane %v11118_v31, %v6840_v6  ;;  %v655_v52 = vrot.slane %v645_v62, %v6840_v6 }
 0x14b   :  { %v7927_v14 = vmul.f32 %v11112_v16, %v11116_v42  ;;  %v264_v21 = vadd.f32 %v7618_v29, %v196_v3  ;;  %v7952_v42 = vld [vmem:[%s10885_s5 + $0x44] ss:$8 sm:$0xf]  ;;  %v7955_v35 = vmul.f32 %v11104_v50, %v595_v57  ;;  %v687_v5 = vsel %vm684_vm9, %v11121_v37, %v11120_v22  ;;  %v7963_v62 = vpop.permute.xlu1 %1213 }
 0x14c   :  { %v7945_v34 = vmul.f32 %v11112_v16, %v11119_v44  ;;  %v265_v16 = vadd.f32 %v7593_v10, %v197_v17  ;;  %v266_v27 = vadd.f32 %v7601_v32, %v198_v63  ;;  %v659_v29 = vrot.slane %v646_v33, %v6840_v6  ;;  %v11124_v44 = vld [vmem:[#allocation13_spill] sm:$0xff]  ;;  %v11125_v63 = vld [vmem:[#allocation10_spill] sm:$0xff] }
 0x14d   :  { %v11122_v3 = vrot.slane %v7310_v38, %v6840_v6  ;;  %v11123_v57 = vrot.slane %v7310_v38, %v6843_v7  ;;  %v686_v26 = vsel %vm684_vm9, %v11120_v22, %v11124_v44  ;;  %v267_v10 = vadd.f32 %v7642_v12, %v199_v20  ;;  %v11127_v22 = vld [vmem:[#allocation29_spill] sm:$0xff] }
 0x14e   :  { %v11126_v38 = vrot.slane %v7358_v18, %v6846_v8  ;;  %v688_v12 = vsel %vm684_vm9, %v11127_v22, %v11121_v37  ;;  %v332_v20 = vadd.f32 %v7683_v53, %v264_v21  ;;  %v8007_v37 = vmul.f32 %v11125_v63, %v659_v29  ;;  %v8026_v29 = vld [vmem:[%s10885_s5 + $0x45] ss:$8 sm:$0xf] }
 0x14f   :  { %v644_v31 = vmul.f32 %v11122_v3, %v620_v45  ;;  %v647_v50 = vmul.f32 %v11123_v57, %v617_v2  ;;  %v7984_v45 = vmul.f32 %v11125_v63, %v655_v52  ;;  %v11128_v3 = vrot.slane %v7358_v18, %v6860_v13  ;;  %v8004_v33 = vpop.permute.xlu1 %1275 }
 0x150   :  { %v713_v2 = vmul.f32 %v11126_v38, %v687_v5  ;;  %v685_v52 = vsel %vm684_vm9, %v11124_v44, %v11127_v22  ;;  %v333_v5 = vadd.f32 %v7645_v30, %v265_v16  ;;  %v334_v38 = vadd.f32 %v7652_v36, %v266_v27  ;;  %v11130_v22 = vld [vmem:[#allocation33_spill] sm:$0xff]  ;;  %v11131_v30 = vld [vmem:[#allocation31_spill] sm:$0xff] }
 0x151   :  { %v714_v57 = vmul.f32 %v11128_v3, %v686_v26  ;;  %v651_v53 = vrot.slane %v644_v31, %v6840_v6  ;;  %v663_v21 = vrot.slane %v647_v50, %v6840_v6  ;;  %v11129_v3 = vrot.slane %v7358_v18, %v6840_v6 }
 0x152   :  { %v755_v36 = vsel %vm752_vm10, %v11131_v30, %v11130_v22  ;;  %v335_v16 = vadd.f32 %v7686_v58, %v267_v10  ;;  %v723_v31 = vrot.slane %v713_v2, %v6840_v6  ;;  %v11132_v50 = vrot.slane %v7358_v18, %v6843_v7  ;;  %v11133_v10 = vld [vmem:[#allocation15_spill] sm:$0xff] }
 0x153   :  { %v712_v44 = vmul.f32 %v11129_v3, %v688_v12  ;;  %v400_v3 = vadd.f32 %v7763_v0, %v332_v20  ;;  %v1442_v26 = vrot.slane %v7952_v42, %v6843_v7  ;;  %v727_v58 = vrot.slane %v714_v57, %v6840_v6  ;;  %v8042_v32 = vpop.permute.xlu1 %1277 }
 0x154   :  { %v715_v12 = vmul.f32 %v11132_v50, %v685_v52  ;;  %v754_v27 = vsel %vm752_vm10, %v11130_v22, %v11133_v10  ;;  %v401_v17 = vadd.f32 %v7720_v56, %v333_v5  ;;  %v402_v2 = vadd.f32 %v7760_v61, %v334_v38  ;;  %v11135_v61 = vld [vmem:[#allocation35_spill] sm:$0xff]  ;;  %v11137_v50 = vld [vmem:[#allocation12_spill] sm:$0xff] }
 0x155   :  { %v8045_v18 = vmul.f32 %v11125_v63, %v651_v53  ;;  %v8048_v0 = vmul.f32 %v11125_v63, %v663_v21  ;;  %v11134_v20 = vrot.slane %v7404_v49, %v6846_v8  ;;  %v1498_v52 = vrot.slane %v8026_v29, %v6840_v6 }
 0x156   :  { %v719_v56 = vrot.slane %v712_v44, %v6840_v6  ;;  %v756_v5 = vsel %vm752_vm10, %v11135_v61, %v11131_v30  ;;  %v403_v38 = vadd.f32 %v7774_v39, %v335_v16  ;;  %v731_v53 = vrot.slane %v715_v12, %v6840_v6 }
 0x157   :  { %v781_v57 = vmul.f32 %v11134_v20, %v755_v36  ;;  %v11136_v21 = vrot.slane %v7404_v49, %v6860_v13  ;;  %v753_v44 = vsel %vm752_vm10, %v11133_v10, %v11135_v61  ;;  %v468_v36 = vadd.f32 %v7828_v46, %v400_v3  ;;  %v8081_v20 = vpop.permute.xlu1 %1281 }
 0x158   :  { %v8074_v30 = vmul.f32 %v11137_v50, %v723_v31  ;;  %v8077_v39 = vmul.f32 %v11137_v50, %v727_v58  ;;  %v469_v16 = vadd.f32 %v7793_v59, %v401_v17  ;;  %v470_v12 = vadd.f32 %v7796_v55, %v402_v2  ;;  %v8094_v59 = vld [vmem:[%s10885_s5 + $0x46] ss:$8 sm:$0xf] }
 0x159   :  { %v782_v22 = vmul.f32 %v11136_v21, %v754_v27  ;;  %v791_v27 = vrot.slane %v781_v57, %v6840_v6  ;;  %v11138_v21 = vrot.slane %v7404_v49, %v6840_v6  ;;  %v8097_v55 = vmul.f32 %v11137_v50, %v719_v56  ;;  %v11140_v58 = vld [vmem:[#allocation39_spill] sm:$0xff]  ;;  %v11141_v2 = vld [vmem:[#allocation37_spill] sm:$0xff]  ;;  %v11142_v31 = vld [vmem:[#allocation18_spill] sm:$0xff] }
 0x15a   :  { %v11139_v17 = vrot.slane %v7404_v49, %v6843_v7  ;;  %v823_v57 = vsel %vm820_vm11, %v11141_v2, %v11140_v58  ;;  %v471_v61 = vadd.f32 %v7831_v28, %v403_v38  ;;  %v822_v56 = vsel %vm820_vm11, %v11140_v58, %v11142_v31 }
 0x15b   :  { %v780_v10 = vmul.f32 %v11138_v21, %v756_v5  ;;  %v8108_v5 = vmul.f32 %v11137_v50, %v731_v53  ;;  %v795_v21 = vrot.slane %v782_v22, %v6840_v6  ;;  %v536_v49 = vadd.f32 %v7866_v54, %v468_v36  ;;  %v8123_v53 = vpop.permute.xlu1 %1343  ;;  %v11144_v50 = vld [vmem:[#allocation14_spill] sm:$0xff] }
 0x15c   :  { %v783_v3 = vmul.f32 %v11139_v17, %v753_v44  ;;  %v11143_v44 = vld [vmem:[#allocation41_spill] sm:$0xff]  ;;  %v537_v28 = vadd.f32 %v7842_v11, %v469_v16  ;;  %v538_v38 = vadd.f32 %v7845_v43, %v470_v12  ;;  %v8128_v58 = vmul.f32 %v11144_v50, %v791_v27  ;;  %v11148_v22 = vld [vmem:[#allocation22_spill] sm:$0xff] }
 0x15d   :  { %v824_v17 = vsel %vm820_vm11, %v11143_v44, %v11141_v2  ;;  %v787_v46 = vrot.slane %v780_v10, %v6840_v6  ;;  %v11145_v54 = vrot.slane %v7465_v40, %v6846_v8  ;;  %v11146_v43 = vrot.slane %v7465_v40, %v6860_v13 }
 0x15e   :  { %v799_v11 = vrot.slane %v783_v3, %v6840_v6  ;;  %v821_v12 = vsel %vm820_vm11, %v11142_v31, %v11143_v44  ;;  %v539_v27 = vadd.f32 %v7869_v51, %v471_v61  ;;  %v806_v10 = vmul.f32 %v11144_v50, %v795_v21  ;;  %v11150_v31 = vld [vmem:[#allocation24_spill] sm:$0xff] }
 0x15f   :  { %v849_v36 = vmul.f32 %v11145_v54, %v823_v57  ;;  %v850_v16 = vmul.f32 %v11146_v43, %v822_v56  ;;  %v11147_v57 = vrot.slane %v7465_v40, %v6840_v6  ;;  %v604_v2 = vadd.f32 %v7939_v1, %v536_v49  ;;  %v11149_v56 = vld [vmem:[#allocation45_spill] sm:$0xff]  ;;  %v8162_v44 = vpop.permute.xlu1 %1345 }
 0x160   :  { %v946_v43 = vsel %vm10992_vm12, %v11149_v56, %v11148_v22  ;;  %v947_v51 = vsel %vm10992_vm12, %v11150_v31, %v11149_v56  ;;  %v605_v61 = vadd.f32 %v7872_v25, %v537_v28  ;;  %v606_v21 = vadd.f32 %v7877_v23, %v538_v38  ;;  %v8167_v1 = vld [vmem:[%s10885_s5 + $0x47] ss:$8 sm:$0xf] }
 0x161   :  { %v848_v54 = vmul.f32 %v11147_v57, %v824_v17  ;;  %v804_v49 = vmul.f32 %v11144_v50, %v787_v46  ;;  %v859_v17 = vrot.slane %v849_v36, %v6840_v6  ;;  %v11151_v57 = vrot.slane %v7465_v40, %v6843_v7  ;;  %v11152_v38 = vld [vmem:[#allocation49_spill] sm:$0xff] }
 0x162   :  { %v807_v23 = vmul.f32 %v11144_v50, %v799_v11  ;;  %v863_v28 = vrot.slane %v850_v16, %v6840_v6  ;;  %v945_v56 = vsel %vm10992_vm12, %v11148_v22, %v11152_v38  ;;  %v607_v46 = vadd.f32 %v7955_v35, %v539_v27 }
 0x163   :  { %v851_v3 = vmul.f32 %v11151_v57, %v821_v12  ;;  %v11153_v36 = vrot.slane %v7529_v60, %v6840_v6  ;;  %v11154_v40 = vrot.slane %v7529_v60, %v6843_v7  ;;  %v672_v50 = vadd.f32 %v8045_v18, %v604_v2 }
 0x164   :  { %v1634_v11 = vrot.slane %v8167_v1, %v6840_v6  ;;  %v855_v16 = vrot.slane %v848_v54, %v6840_v6  ;;  %v944_v35 = vsel %vm10992_vm12, %v11152_v38, %v11150_v31  ;;  %v673_v22 = vadd.f32 %v7984_v45, %v605_v61  ;;  %v11157_v45 = vld [vmem:[#allocation26_spill] sm:$0xff]  ;;  %v11176_v54 = vld [vmem:[#allocation51_spill] sm:$0xff] }
 0x165   :  { %v971_v63 = vmul.f32 %v11153_v36, %v946_v43  ;;  %v974_v12 = vmul.f32 %v11154_v40, %v947_v51  ;;  %v674_v27 = vadd.f32 %v8007_v37, %v606_v21  ;;  %v8200_v43 = vpop.permute.xlu1 %1349  ;;  %v11155_v51 = vld [vmem:[#allocation16_spill] sm:$0xff]  ;;  %v867_v18 = vrot.slane %v851_v3, %v6840_v6 }
 0x166   :  { %v873_v57 = vmul.f32 %v11155_v51, %v859_v17  ;;  %v11156_v2 = vrot.slane %v7529_v60, %v6846_v8  ;;  %v874_v31 = vmul.f32 %v11155_v51, %v863_v28  ;;  %v1014_v37 = vsel %vm10991_vm13, %v11157_v45, %v7467_v9  ;;  %v8221_v21 = vld [vmem:[%s10885_s5 + $0x60] ss:$8 sm:$0xf]  ;;  %s6735_s5 = smov 42  }
 0x167   :  { %v675_v61 = vadd.f32 %v8048_v0, %v607_v46  ;;  %v978_v17 = vrot.slane %v971_v63, %v6840_v6  ;;  %v990_v38 = vrot.slane %v974_v12, %v6840_v6  ;;  %v11158_v28 = vrot.slane %v7529_v60, %v6860_v13 }
 0x168   :  { %v972_v36 = vmul.f32 %v11156_v2, %v945_v56  ;;  %v740_v40 = vadd.f32 %v8097_v55, %v672_v50  ;;  %v872_v0 = vmul.f32 %v11155_v51, %v855_v16  ;;  %v741_v46 = vadd.f32 %v8074_v30, %v673_v22  ;;  %v11160_v50 = vld [vmem:[#allocation28_spill] sm:$0xff] }
 0x169   :  { %v973_v56 = vmul.f32 %v11158_v28, %v944_v35  ;;  %v742_v2 = vadd.f32 %v8077_v39, %v674_v27  ;;  %v8232_v3 = vpop.permute.xlu1 %1411  ;;  %v875_v63 = vmul.f32 %v11155_v51, %v867_v18  ;;  %v11159_v60 = vrot.slane %v7557_v4, %v6840_v6  ;;  %v11161_v39 = vld [vmem:[#allocation54_spill] sm:$0xff]  ;;  %v11162_v51 = vld [vmem:[#allocation43_spill] sm:$0xff]  ;;  %v11169_v27 = vld [vmem:[#allocation36_spill] sm:$0xff] }
 0x16a   :  { %v982_v12 = vrot.slane %v972_v36, %v6840_v6  ;;  %v1013_v30 = vsel %vm10991_vm13, %v7467_v9, %v11160_v50  ;;  %v1012_v16 = vsel %vm10991_vm13, %v11160_v50, %v11161_v39  ;;  %v743_v22 = vadd.f32 %v8108_v5, %v675_v61 }
 0x16b   :  { %v1039_v35 = vmul.f32 %v11159_v60, %v1014_v37  ;;  %v995_v18 = vmul.f32 %v11162_v51, %v978_v17  ;;  %v8256_v36 = vmul.f32 %v11162_v51, %v990_v38  ;;  %v986_v37 = vrot.slane %v973_v56, %v6840_v6 }
 0x16c   :  { %v808_v28 = vadd.f32 %v804_v49, %v740_v40  ;;  %v1015_v9 = vsel %vm10991_vm13, %v11161_v39, %v11157_v45  ;;  %v809_v5 = vadd.f32 %v8128_v58, %v741_v46  ;;  %v810_v61 = vadd.f32 %v806_v10, %v742_v2  ;;  %v11165_v39 = vld [vmem:[#allocation32_spill] sm:$0xff] }
 0x16d   :  { %v8265_v60 = vpop.permute.xlu1 %1413  ;;  %v996_v38 = vmul.f32 %v11162_v51, %v982_v12  ;;  %v11163_v49 = vrot.slane %v7557_v4, %v6846_v8  ;;  %v1046_v40 = vrot.slane %v1039_v35, %v6840_v6  ;;  %v11164_v50 = vrot.slane %v7557_v4, %v6860_v13  ;;  %v11166_v10 = vld [vmem:[#allocation56_spill] sm:$0xff] }
 0x16e   :  { %v1081_v58 = vsel %vm1079_vm14, %v7613_v47, %v11165_v39  ;;  %v1082_v46 = vsel %vm1079_vm14, %v11166_v10, %v7613_v47  ;;  %v11167_v2 = vld [vmem:[#allocation60_spill] sm:$0xff]  ;;  %v811_v35 = vadd.f32 %v807_v23, %v743_v22  ;;  %v876_v17 = vadd.f32 %v872_v0, %v808_v28  ;;  %v11170_v47 = vld [vmem:[#allocation66_spill] sm:$0xff] }
 0x16f   :  { %v1040_v56 = vmul.f32 %v11163_v49, %v1013_v30  ;;  %v1041_v45 = vmul.f32 %v11164_v50, %v1012_v16  ;;  %v1080_v12 = vsel %vm1079_vm14, %v11165_v39, %v11167_v2  ;;  %v997_v30 = vmul.f32 %v11162_v51, %v986_v37  ;;  %v11171_v39 = vld [vmem:[#allocation63_spill] sm:$0xff] }
 0x170   :  { %v11168_v16 = vrot.slane %v7557_v4, %v6843_v7  ;;  %v1083_v50 = vsel %vm1079_vm14, %v11167_v2, %v11166_v10  ;;  %v1149_v55 = vsel %vm1147_vm15, %v11170_v47, %v11169_v27  ;;  %v1150_v23 = vsel %vm1147_vm15, %v11171_v39, %v11170_v47 }
 0x171   :  { %v877_v22 = vadd.f32 %v873_v57, %v809_v5  ;;  %v878_v51 = vadd.f32 %v874_v31, %v810_v61  ;;  %v8305_v4 = vpop.permute.xlu1 %1417  ;;  %v1050_v37 = vrot.slane %v1040_v56, %v6840_v6  ;;  %v1063_v47 = vmul.f32 %v11176_v54, %v1046_v40 }
 0x172   :  { %v1042_v49 = vmul.f32 %v11168_v16, %v1015_v9  ;;  %v11172_v9 = vld [vmem:[#allocation58_spill] sm:$0xff]  ;;  %v1054_v57 = vrot.slane %v1041_v45, %v6840_v6  ;;  %v879_v61 = vadd.f32 %v875_v63, %v811_v35  ;;  %v931_v40 = vadd.f32 %v7911_v19, %v876_v17  ;;  %v11181_v45 = vld [vmem:[#allocation17_spill] sm:$0xff] }
 0x173   :  { %v11173_v10 = vrot.slane %v11172_v9, %v6840_v6  ;;  %v11174_v28 = vrot.slane %v11172_v9, %v6846_v8  ;;  %v11175_v16 = vrot.slane %v11172_v9, %v6860_v13  ;;  %v11177_v31 = vrot.slane %v11172_v9, %v6843_v7 }
 0x174   :  { %v1058_v56 = vrot.slane %v1042_v49, %v6840_v6  ;;  %v1151_v63 = vsel %vm1147_vm15, %v11181_v45, %v11171_v39  ;;  %v932_v35 = vadd.f32 %v7917_v15, %v877_v22  ;;  %v933_v49 = vadd.f32 %v7927_v14, %v878_v51  ;;  %v11182_v15 = vld [vmem:[#allocation8_spill] sm:$0xff] }
 0x175   :  { %v1107_v0 = vmul.f32 %v11173_v10, %v1082_v46  ;;  %v1108_v2 = vmul.f32 %v11174_v28, %v1081_v58  ;;  %v1109_v25 = vmul.f32 %v11175_v16, %v1080_v12  ;;  %v1110_v5 = vmul.f32 %v11177_v31, %v1083_v50  ;;  %v11178_v46 = vld [vmem:[#allocation62_spill] sm:$0xff] }
 0x176   :  { %v11179_v58 = vrot.slane %v11178_v46, %v6840_v6  ;;  %v11180_v12 = vrot.slane %v11178_v46, %v6846_v8  ;;  %v1148_v50 = vsel %vm1147_vm15, %v11169_v27, %v11181_v45  ;;  %v1065_v27 = vmul.f32 %v11176_v54, %v1054_v57 }
 0x177   :  { %v1114_v19 = vrot.slane %v1107_v0, %v6840_v6  ;;  %v1118_v17 = vrot.slane %v1108_v2, %v6840_v6  ;;  %v1122_v9 = vrot.slane %v1109_v25, %v6840_v6  ;;  %v1126_v39 = vrot.slane %v1110_v5, %v6840_v6 }
 0x178   :  { %v1175_v10 = vmul.f32 %v11179_v58, %v1150_v23  ;;  %v1176_v28 = vmul.f32 %v11180_v12, %v1149_v55  ;;  %v8341_v23 = vpop.permute.xlu1 %1479  ;;  %v1064_v55 = vmul.f32 %v11176_v54, %v1050_v37  ;;  %v1218_v14 = vsel %vm10990_vm0, %v11182_v15, %v7903_v48 }
 0x179   :  { %v934_v22 = vadd.f32 %v7945_v34, %v879_v61  ;;  %v11183_v37 = vrot.slane %v11178_v46, %v6860_v13  ;;  %v11184_v25 = vrot.slane %v11178_v46, %v6843_v7  ;;  %v999_v16 = vadd.f32 %v995_v18, %v931_v40  ;;  %v11185_v34 = vld [vmem:[#allocation30_spill] sm:$0xff]  ;;  %v11188_v40 = vld [vmem:[#allocation40_spill] sm:$0xff] }
 0x17a   :  { %v1182_v51 = vrot.slane %v1175_v10, %v6840_v6  ;;  %v1066_v57 = vmul.f32 %v11176_v54, %v1058_v56  ;;  %v1186_v31 = vrot.slane %v1176_v28, %v6840_v6  ;;  %v1000_v5 = vadd.f32 %v996_v38, %v932_v35  ;;  %v11189_v56 = vld [vmem:[#allocation34_spill] sm:$0xff] }
 0x17b   :  { %v1177_v0 = vmul.f32 %v11183_v37, %v1148_v50  ;;  %v1178_v2 = vmul.f32 %v11184_v25, %v1151_v63  ;;  %v1001_v58 = vadd.f32 %v997_v30, %v933_v49  ;;  %v1131_v61 = vmul.f32 %v11185_v34, %v1114_v19  ;;  %v11186_v50 = vld [vmem:[#allocation65_spill] sm:$0xff] }
 0x17c   :  { %v8364_v12 = vpop.permute.xlu1 %1481  ;;  %v1132_v10 = vmul.f32 %v11185_v34, %v1118_v17  ;;  %v1133_v45 = vmul.f32 %v11185_v34, %v1122_v9  ;;  %v11187_v37 = vrot.slane %v11186_v50, %v6840_v6  ;;  %v1134_v18 = vmul.f32 %v11185_v34, %v1126_v39  ;;  %v11194_v34 = vld [vmem:[#allocation68_spill] sm:$0xff] }
 0x17d   :  { %v1217_v54 = vsel %vm10990_vm0, %v7903_v48, %v11188_v40  ;;  %v1002_v38 = vadd.f32 %v8256_v36, %v934_v22  ;;  %v1216_v30 = vsel %vm10990_vm0, %v11188_v40, %v7963_v62  ;;  %v1199_v28 = vmul.f32 %v11189_v56, %v1182_v51 }
 0x17e   :  { %v1243_v46 = vmul.f32 %v11187_v37, %v1218_v14  ;;  %v1190_v63 = vrot.slane %v1177_v0, %v6840_v6  ;;  %v1194_v35 = vrot.slane %v1178_v2, %v6840_v6  ;;  %v1067_v49 = vadd.f32 %v1063_v47, %v999_v16 }
 0x17f   :  { %v1200_v19 = vmul.f32 %v11189_v56, %v1186_v31  ;;  %v1068_v17 = vadd.f32 %v1064_v55, %v1000_v5  ;;  %v1069_v9 = vadd.f32 %v1065_v27, %v1001_v58  ;;  %v1219_v48 = vsel %vm10990_vm0, %v7963_v62, %v11182_v15  ;;  %v11192_v27 = vld [vmem:[#allocation44_spill] sm:$0xff] }
 0x180   :  { %v8390_v36 = vpop.permute.xlu1 %1485  ;;  %v11190_v39 = vrot.slane %v11186_v50, %v6846_v8  ;;  %v1250_v22 = vrot.slane %v1243_v46, %v6840_v6  ;;  %v11191_v47 = vrot.slane %v11186_v50, %v6860_v13  ;;  %v1286_v55 = vsel %vm10985_vm1, %v8004_v33, %v8042_v32 }
 0x181   :  { %v1070_v62 = vadd.f32 %v1066_v57, %v1002_v38  ;;  %v1285_v15 = vsel %vm10985_vm1, %v8042_v32, %v11192_v27  ;;  %v1284_v0 = vsel %vm10985_vm1, %v11192_v27, %v8081_v20  ;;  %v1287_v25 = vsel %vm10985_vm1, %v8081_v20, %v8004_v33  ;;  %v11199_v38 = vld [vmem:[#allocation50_spill] sm:$0xff] }
 0x182   :  { %v1244_v14 = vmul.f32 %v11190_v39, %v1217_v54  ;;  %v1245_v51 = vmul.f32 %v11191_v47, %v1216_v30  ;;  %v1201_v2 = vmul.f32 %v11189_v56, %v1190_v63  ;;  %v1202_v16 = vmul.f32 %v11189_v56, %v1194_v35  ;;  %v11200_v63 = vld [vmem:[#allocation38_spill] sm:$0xff] }
 0x183   :  { %v1135_v57 = vadd.f32 %v1131_v61, %v1067_v49  ;;  %v11193_v31 = vrot.slane %v11186_v50, %v6843_v7  ;;  %v1136_v32 = vadd.f32 %v1132_v10, %v1068_v17  ;;  %v1137_v58 = vadd.f32 %v1133_v45, %v1069_v9 }
 0x184   :  { %v11195_v37 = vrot.slane %v11194_v34, %v6840_v6  ;;  %v1354_v33 = vsel %vm10984_vm3, %v8123_v53, %v8162_v44  ;;  %v8428_v20 = vpop.permute.xlu1 %1547  ;;  %v11196_v61 = vrot.slane %v11194_v34, %v6846_v8  ;;  %v11197_v50 = vrot.slane %v11194_v34, %v6860_v13 }
 0x185   :  { %v1246_v5 = vmul.f32 %v11193_v31, %v1219_v48  ;;  %v11198_v45 = vrot.slane %v11194_v34, %v6843_v7  ;;  %v1352_v30 = vsel %vm10984_vm3, %v11199_v38, %v8200_v43  ;;  %v1254_v56 = vrot.slane %v1244_v14, %v6840_v6 }
 0x186   :  { %v1311_v46 = vmul.f32 %v11195_v37, %v1286_v55  ;;  %v1312_v40 = vmul.f32 %v11196_v61, %v1285_v15  ;;  %v1313_v10 = vmul.f32 %v11197_v50, %v1284_v0  ;;  %v1267_v35 = vmul.f32 %v11200_v63, %v1250_v22  ;;  %v11205_v61 = vld [vmem:[#allocation42_spill] sm:$0xff] }
 0x187   :  { %v1314_v54 = vmul.f32 %v11198_v45, %v1287_v25  ;;  %v1138_v49 = vadd.f32 %v1134_v18, %v1070_v62  ;;  %v1258_v17 = vrot.slane %v1245_v51, %v6840_v6  ;;  %v1203_v9 = vadd.f32 %v1199_v28, %v1135_v57 }
 0x188   :  { %v1262_v48 = vrot.slane %v1246_v5, %v6840_v6  ;;  %v11201_v39 = vrot.slane %v7839_v24, %v6840_v6  ;;  %v1355_v55 = vsel %vm10984_vm3, %v8200_v43, %v8123_v53  ;;  %v1204_v14 = vadd.f32 %v1200_v19, %v1136_v32  ;;  %v1550_v51 = vpop.permute.xlu1 %1549 }
 0x189   :  { %v1205_v27 = vadd.f32 %v1201_v2, %v1137_v58  ;;  %v1353_v18 = vsel %vm10984_vm3, %v8162_v44, %v11199_v38  ;;  %v11202_v28 = vrot.slane %v7839_v24, %v6860_v13  ;;  %v1318_v62 = vrot.slane %v1311_v46, %v6840_v6  ;;  %v11206_v38 = vld [vmem:[#allocation53_spill] sm:$0xff] }
 0x18a   :  { %v1379_v47 = vmul.f32 %v11201_v39, %v1354_v33  ;;  %v1322_v15 = vrot.slane %v1312_v40, %v6840_v6  ;;  %v1326_v0 = vrot.slane %v1313_v10, %v6840_v6  ;;  %v1330_v53 = vrot.slane %v1314_v54, %v6840_v6 }
 0x18b   :  { %v1381_v22 = vmul.f32 %v11202_v28, %v1352_v30  ;;  %v1268_v43 = vmul.f32 %v11200_v63, %v1254_v56  ;;  %v1206_v19 = vadd.f32 %v1202_v16, %v1138_v49  ;;  %v1269_v44 = vmul.f32 %v11200_v63, %v1258_v17 }
 0x18c   :  { %v11203_v25 = vrot.slane %v7839_v24, %v6843_v7  ;;  %v1271_v57 = vadd.f32 %v1267_v35, %v1203_v9  ;;  %v1270_v31 = vmul.f32 %v11200_v63, %v1262_v48  ;;  %v11204_v5 = vrot.slane %v7839_v24, %v6846_v8  ;;  %v1554_v33 = vpop.permute.xlu1 %1553 }
 0x18d   :  { %v1386_v58 = vrot.slane %v1379_v47, %v6840_v6  ;;  %v1272_v34 = vadd.f32 %v1268_v43, %v1204_v14  ;;  %v1273_v37 = vadd.f32 %v1269_v44, %v1205_v27  ;;  %v1394_v16 = vrot.slane %v1381_v22, %v6840_v6 }
 0x18e   :  { %v1382_v2 = vmul.f32 %v11203_v25, %v1355_v55  ;;  %v1380_v32 = vmul.f32 %v11204_v5, %v1353_v18  ;;  %v1422_v46 = vsel %vm1419_vm4, %v8232_v3, %v8265_v60  ;;  %v1335_v40 = vmul.f32 %v11205_v61, %v1318_v62  ;;  %v11211_v62 = vld [vmem:[#allocation57_spill] sm:$0xff] }
 0x18f   :  { %v1336_v50 = vmul.f32 %v11205_v61, %v1322_v15  ;;  %v1337_v24 = vmul.f32 %v11205_v61, %v1326_v0  ;;  %v1338_v10 = vmul.f32 %v11205_v61, %v1330_v53  ;;  %v1274_v45 = vadd.f32 %v1270_v31, %v1206_v19 }
 0x190   :  { %v1398_v54 = vrot.slane %v1382_v2, %v6840_v6  ;;  %v1421_v30 = vsel %vm1419_vm4, %v8265_v60, %v11206_v38  ;;  %v1420_v56 = vsel %vm1419_vm4, %v11206_v38, %v8305_v4  ;;  %v1339_v63 = vadd.f32 %v1335_v40, %v1271_v57  ;;  %v11208_v60 = vld [vmem:[#allocation46_spill] sm:$0xff]  ;;  %v1616_v14 = vpop.permute.xlu1 %1615  ;;  %v11213_v57 = vld [vmem:[#allocation61_spill] sm:$0xff] }
 0x191   :  { %v1390_v35 = vrot.slane %v1380_v32, %v6840_v6  ;;  %v11207_v49 = vrot.slane %v7952_v42, %v6840_v6  ;;  %v1423_v9 = vsel %vm1419_vm4, %v8305_v4, %v8232_v3  ;;  %v1340_v48 = vadd.f32 %v1336_v50, %v1272_v34 }
 0x192   :  { %v1341_v39 = vadd.f32 %v1337_v24, %v1273_v37  ;;  %v1403_v47 = vmul.f32 %v11208_v60, %v1386_v58  ;;  %v1405_v55 = vmul.f32 %v11208_v60, %v1394_v16  ;;  %v11209_v27 = vrot.slane %v7952_v42, %v6846_v8 }
 0x193   :  { %v1447_v17 = vmul.f32 %v11207_v49, %v1422_v46  ;;  %v11210_v28 = vrot.slane %v7952_v42, %v6860_v13  ;;  %v1489_v3 = vsel %vm1487_vm5, %v8364_v12, %v11211_v62  ;;  %v1490_v4 = vsel %vm1487_vm5, %v8341_v23, %v8364_v12  ;;  %v11218_v49 = vld [vmem:[#allocation67_spill] sm:$0xff] }
 0x194   :  { %v1448_v18 = vmul.f32 %v11209_v27, %v1421_v30  ;;  %v1342_v15 = vadd.f32 %v1338_v10, %v1274_v45  ;;  %v1406_v0 = vmul.f32 %v11208_v60, %v1398_v54  ;;  %v1450_v53 = vmul.f32 %v1442_v26, %v1423_v9  ;;  %v1618_v32 = vpop.permute.xlu1 %1617 }
 0x195   :  { %v1449_v22 = vmul.f32 %v11210_v28, %v1420_v56  ;;  %v1714_v43 = vrot.slane %v8221_v21, %v6843_v7  ;;  %v1404_v19 = vmul.f32 %v11208_v60, %v1390_v35  ;;  %v1407_v44 = vadd.f32 %v1403_v47, %v1339_v63 }
 0x196   :  { %v1454_v25 = vrot.slane %v1447_v17, %v6840_v6  ;;  %v1488_v12 = vsel %vm1487_vm5, %v11211_v62, %v8390_v36  ;;  %v1515_v2 = vmul.f32 %v1498_v52, %v1490_v4  ;;  %v11212_v42 = vrot.slane %v8026_v29, %v6846_v8 }
 0x197   :  { %v1557_v31 = vsel %vm1555_vm6, %v1550_v51, %v11213_v57  ;;  %v1558_v5 = vsel %vm1555_vm6, %v8428_v20, %v1550_v51  ;;  %v1408_v58 = vadd.f32 %v1404_v19, %v1340_v48  ;;  %v1409_v34 = vadd.f32 %v1405_v55, %v1341_v39  ;;  %v11215_v51 = vld [vmem:[#allocation52_spill] sm:$0xff] }
 0x198   :  { %v1516_v26 = vmul.f32 %v11212_v42, %v1489_v3  ;;  %v1458_v37 = vrot.slane %v1448_v18, %v6840_v6  ;;  %v1462_v16 = vrot.slane %v1449_v22, %v6840_v6  ;;  %v1410_v52 = vadd.f32 %v1406_v0, %v1342_v15  ;;  %v11222_v3 = vld [vmem:[#allocation55_spill] sm:$0xff] }
 0x199   :  { %v1466_v46 = vrot.slane %v1450_v53, %v6840_v6  ;;  %v11214_v61 = vrot.slane %v8026_v29, %v6860_v13  ;;  %v1626_v50 = vsel %vm1623_vm7, %v1616_v14, %v1618_v32  ;;  %vm1691_vm8 = vcmp.lt.s32.totalorder %v7187_v41, 94 }
 0x19a   :  { %v1471_v24 = vmul.f32 %v11215_v51, %v1454_v25  ;;  %v1491_v10 = vsel %vm1487_vm5, %v8390_v36, %v8341_v23  ;;  %v11216_v45 = vrot.slane %v8094_v59, %v6840_v6  ;;  %v11217_v38 = vrot.slane %v8094_v59, %v6846_v8  ;;  %v1622_v36 = vpop.permute.xlu1 %1621 }
 0x19b   :  { %v1517_v40 = vmul.f32 %v11214_v61, %v1488_v12  ;;  %v1522_v56 = vrot.slane %v1515_v2, %v6840_v6  ;;  %v1526_v63 = vrot.slane %v1516_v26, %v6840_v6  ;;  %v1556_v35 = vsel %vm1555_vm6, %v11213_v57, %v1554_v33 }
 0x19c   :  { %v1583_v54 = vmul.f32 %v11216_v45, %v1558_v5  ;;  %v1584_v30 = vmul.f32 %v11217_v38, %v1557_v31  ;;  %v1625_v23 = vsel %vm1623_vm7, %v1618_v32, %v11218_v49  ;;  %v1472_v17 = vmul.f32 %v11215_v51, %v1458_v37  ;;  %v11225_v32 = vld [vmem:[#allocation59_spill] sm:$0xff] }
 0x19d   :  { %v1473_v9 = vmul.f32 %v11215_v51, %v1462_v16  ;;  %v1559_v48 = vsel %vm1555_vm6, %v1554_v33, %v8428_v20  ;;  %v1651_v39 = vmul.f32 %v1634_v11, %v1626_v50  ;;  %v1474_v60 = vmul.f32 %v11215_v51, %v1466_v46  ;;  %v1688_v46 = vpop.permute.xlu0 %1687  ;;  %v11227_v51 = vld [vmem:[#allocation64_spill] sm:$0xff] }
 0x19e   :  { %v11219_v47 = vrot.slane %v8026_v29, %v6843_v7  ;;  %v1530_v27 = vrot.slane %v1517_v40, %v6840_v6  ;;  %v1624_v18 = vsel %vm1623_vm7, %v11218_v49, %v1622_v36  ;;  %v1590_v28 = vrot.slane %v1583_v54, %v6840_v6  ;;  %v1684_v19 = vpop.permute.xlu1 %1683 }
 0x19f   :  { %v1594_v20 = vrot.slane %v1584_v30, %v6840_v6  ;;  %v11220_v33 = vrot.slane %v8094_v59, %v6860_v13  ;;  %v11221_v22 = vrot.slane %v8167_v1, %v6846_v8  ;;  %v1475_v29 = vadd.f32 %v1471_v24, %v1407_v44 }
 0x1a0   :  { %v1518_v55 = vmul.f32 %v11219_v47, %v1491_v10  ;;  %v1539_v4 = vmul.f32 %v11222_v3, %v1522_v56  ;;  %v1540_v15 = vmul.f32 %v11222_v3, %v1526_v63  ;;  %v11223_v0 = vrot.slane %v8094_v59, %v6843_v7 }
 0x1a1   :  { %v1585_v11 = vmul.f32 %v11220_v33, %v1556_v35  ;;  %v1652_v62 = vmul.f32 %v11221_v22, %v1625_v23  ;;  %v1476_v25 = vadd.f32 %v1472_v17, %v1408_v58  ;;  %v1658_v12 = vrot.slane %v1651_v39, %v6840_v6 }
 0x1a2   :  { %v1586_v53 = vmul.f32 %v11223_v0, %v1559_v48  ;;  %v1627_v2 = vsel %vm1623_vm7, %v1622_v36, %v1616_v14  ;;  %v11224_v42 = vrot.slane %v8167_v1, %v6860_v13  ;;  %v1477_v44 = vadd.f32 %v1473_v9, %v1409_v34  ;;  %v1686_v50 = vpop.permute.xlu1 %1685 }
 0x1a3   :  { %v1478_v57 = vadd.f32 %v1474_v60, %v1410_v52  ;;  %v1534_v31 = vrot.slane %v1518_v55, %v6840_v6  ;;  %v1541_v5 = vmul.f32 %v11222_v3, %v1530_v27  ;;  %v1607_v59 = vmul.f32 %v11225_v32, %v1590_v28 }
 0x1a4   :  { %v1653_v26 = vmul.f32 %v11224_v42, %v1624_v18  ;;  %v1608_v37 = vmul.f32 %v11225_v32, %v1594_v20  ;;  %v1598_v58 = vrot.slane %v1585_v11, %v6840_v6  ;;  %v1662_v16 = vrot.slane %v1652_v62, %v6840_v6  ;;  %v11230_v20 = vld [vmem:[#allocation69_spill] sm:$0xff] }
 0x1a5   :  { %v1543_v14 = vadd.f32 %v1539_v4, %v1475_v29  ;;  %v1544_v61 = vadd.f32 %v1540_v15, %v1476_v25  ;;  %v1602_v40 = vrot.slane %v1586_v53, %v6840_v6  ;;  %v11226_v34 = vrot.slane %v8167_v1, %v6843_v7 }
 0x1a6   :  { %v1675_v24 = vmul.f32 %v11227_v51, %v1658_v12  ;;  %v1666_v10 = vrot.slane %v1653_v26, %v6840_v6  ;;  %v1693_v45 = vsel %vm1691_vm8, %v1686_v50, %v1688_v46  ;;  %v1694_v54 = vsel %vm1691_vm8, %v1684_v19, %v1686_v50  ;;  %v1690_v47 = vpop.permute.xlu1 %1689  ;;  %v1755_v12 = vpop.permute.xlu0 %1754 }
 0x1a7   :  { %v1654_v52 = vmul.f32 %v11226_v34, %v1627_v2  ;;  %v1542_v38 = vmul.f32 %v11222_v3, %v1534_v31  ;;  %v1545_v30 = vadd.f32 %v1541_v5, %v1477_v44  ;;  %v11228_v56 = vrot.slane %v8221_v21, %v6840_v6 }
 0x1a8   :  { %v11229_v1 = vrot.slane %v8221_v21, %v6846_v8  ;;  %v1611_v49 = vadd.f32 %v1607_v59, %v1543_v14  ;;  %v1612_v23 = vadd.f32 %v1608_v37, %v1544_v61  ;;  %v1609_v36 = vmul.f32 %v11225_v32, %v1598_v58  ;;  %v1774_v14 = vld [vmem:[%s10886_s6] ss:$8 sm:$0xf]  ;;  %v5746_v61 = vld [vmem:[%s10886_s6 + $0x1] ss:$8 sm:$0xf] }
 0x1a9   :  { %v1719_v63 = vmul.f32 %v11228_v56, %v1694_v54  ;;  %v1676_v17 = vmul.f32 %v11227_v51, %v1662_v16  ;;  %v1610_v9 = vmul.f32 %v11225_v32, %v1602_v40  ;;  %v1670_v48 = vrot.slane %v1654_v52, %v6840_v6 }
 0x1aa   :  { %v1720_v35 = vmul.f32 %v11229_v1, %v1693_v45  ;;  %v1679_v55 = vadd.f32 %v1675_v24, %v1611_v49  ;;  %v1677_v27 = vmul.f32 %v11227_v51, %v1666_v10  ;;  %v1692_v18 = vsel %vm1691_vm8, %v1688_v46, %v1690_v47 }
 0x1ab   :  { %v1726_v39 = vrot.slane %v1719_v63, %v6840_v6  ;;  %v1695_v28 = vsel %vm1691_vm8, %v1690_v47, %v1684_v19  ;;  %v11231_v22 = vrot.slane %v8221_v21, %v6860_v13  ;;  %v1546_v3 = vadd.f32 %v1542_v38, %v1478_v57 }
 0x1ac   :  { %v1730_v60 = vrot.slane %v1720_v35, %v6840_v6  ;;  %v1722_v29 = vmul.f32 %v1714_v43, %v1695_v28  ;;  %v1613_v4 = vadd.f32 %v1609_v36, %v1545_v30  ;;  %v1680_v15 = vadd.f32 %v1676_v17, %v1612_v23 }
 0x1ad   :  { %v1743_v33 = vmul.f32 %v11230_v20, %v1726_v39  ;;  %v1721_v62 = vmul.f32 %v11231_v22, %v1692_v18  ;;  %v1678_v0 = vmul.f32 %v11227_v51, %v1670_v48  ;;  %v1614_v2 = vadd.f32 %v1610_v9, %v1546_v3 }
 0x1ae   :  { %v1744_v11 = vmul.f32 %v11230_v20, %v1730_v60  ;;  %v1738_v25 = vrot.slane %v1722_v29, %v6840_v6  ;;  %v1681_v42 = vadd.f32 %v1677_v27, %v1613_v4  ;;  %vm1769_vm9 = vcmp.lt.s32.totalorder %v7187_v41, 42 }
 0x1af   :  { %v1747_v53 = vadd.f32 %v1743_v33, %v1679_v55  ;;  %v1734_v19 = vrot.slane %v1721_v62, %v6840_v6  ;;  %v1682_v43 = vadd.f32 %v1678_v0, %v1614_v2  ;;  %v1791_v52 = vrot.slane %v1774_v14, %v6843_v7  ;;  %v5748_v0 = vld [vmem:[%s10886_s6 + $0x3] ss:$8 sm:$0xf] }
 0x1b0   :  { %v1748_v26 = vadd.f32 %v1744_v11, %v1680_v15  ;;  %v1746_v21 = vmul.f32 %v11230_v20, %v1738_v25  ;;  %v1835_v50 = vrot.slane %v5746_v61, %v6843_v7  ;;  %v1787_v51 = vrot.slane %v1774_v14, %v6860_v13  ;;  %v5747_v15 = vld [vmem:[%s10886_s6 + $0x2] ss:$8 sm:$0xf] }
 0x1b1   :  { %v8652_v44 = vadd.f32 %v1755_v12, %v1747_v53  ;;  %v1745_v31 = vmul.f32 %v11230_v20, %v1734_v19  ;;  %vm1812_vm10 = vcmp.lt.s32.totalorder %v7187_v41, 37  ;;  %v1831_v45 = vrot.slane %v5746_v61, %v6860_v13 }
 0x1b2   :  { %v8658_v5 = vadd.f32 %v1755_v12, %v1748_v26  ;;  %v1750_v32 = vadd.f32 %v1746_v21, %v1682_v43  ;;  %v1783_v30 = vrot.slane %v1774_v14, %v6846_v8  ;;  %v1827_v56 = vrot.slane %v5746_v61, %v6846_v8 }
 0x1b3   :  { %v1749_v57 = vadd.f32 %v1745_v31, %v1681_v42  ;;  %1761 = vrot.lane.b32.xlu1 %v8652_v44, %s6735_s5  ;;  %v1779_v63 = vrot.slane %v1774_v14, %v6840_v6  ;;  %v1823_v1 = vrot.slane %v5746_v61, %v6840_v6  ;;  %v1874_v25 = vrot.slane %v5747_v15, %v6860_v13 }
 0x1b4   :  { %v8666_v37 = vadd.f32 %v1755_v12, %v1750_v32  ;;  %v1918_v2 = vrot.slane %v5748_v0, %v6860_v13  ;;  %vm1899_vm11 = vcmp.lt.s32.totalorder %v7187_v41, 27  ;;  %v1922_v31 = vrot.slane %v5748_v0, %v6843_v7 }
 0x1b5   :  { %v8660_v59 = vadd.f32 %v1755_v12, %v1749_v57  ;;  %v1878_v12 = vrot.slane %v5747_v15, %v6843_v7  ;;  %v1866_v21 = vrot.slane %v5747_v15, %v6840_v6  ;;  %v1870_v43 = vrot.slane %v5747_v15, %v6846_v8 }
 0x1b6   :  { %vm1943_vm14 = vcmp.lt.s32.totalorder %v7187_v41, 22  ;;  %vm1987_vm15 = vcmp.lt.s32.totalorder %v7187_v41, 90  ;;  %vm2031_vm4 = vcmp.lt.s32.totalorder %v7187_v41, 85  ;;  %vm2075_vm5 = vcmp.lt.s32.totalorder %v7187_v41, 80 }
 0x1b7   :  { %1765 = vrot.lane.b32.xlu0 %v8660_v59, %s6735_s5  ;;  %1763 = vrot.lane.b32.xlu1 %v8658_v5, %s6735_s5  ;;  %vm2953_vm7 = vcmask 588800   ;;  %vm2119_vm8 = vcmp.lt.s32.totalorder %v7187_v41, 75  ;;  %vm2163_vm3 = vcmp.lt.s32.totalorder %v7187_v41, 70  ;;  %vm2207_vm1 = vcmp.lt.s32.totalorder %v7187_v41, 10 }
 0x1b8   :  { %vm2251_vm0 = vcmp.lt.s32.totalorder %v7187_v41, 5  ;;  %vm10993_vm13 = vcmp.lt.s32.totalorder %v7187_v41, 123  ;;  %vm10995_vm12 = vcmp.lt.s32.totalorder %v7187_v41, 118 }
 0x1bb   :  { %1804 = vrot.lane.b32.xlu0 %v8652_v44, %s6736_s30  ;;  %1767 = vrot.lane.b32.xlu1 %v8666_v37, %s6735_s5 }
 0x1bf   :  { %1808 = vrot.lane.b32.xlu0 %v8660_v59, %s6736_s30  ;;  %1806 = vrot.lane.b32.xlu1 %v8658_v5, %s6736_s30 }
 0x1c3   :  { %1848 = vrot.lane.b32.xlu0 %v8652_v44, %s6691_s21  ;;  %1810 = vrot.lane.b32.xlu1 %v8666_v37, %s6736_s30 }
 0x1c7   :  { %1852 = vrot.lane.b32.xlu0 %v8660_v59, %s6691_s21  ;;  %1850 = vrot.lane.b32.xlu1 %v8658_v5, %s6691_s21 }
 0x1cb   :  { %1891 = vrot.lane.b32.xlu0 %v8652_v44, %s6737_s14  ;;  %1854 = vrot.lane.b32.xlu1 %v8666_v37, %s6691_s21 }
 0x1cf   :  { %1895 = vrot.lane.b32.xlu0 %v8660_v59, %s6737_s14  ;;  %1893 = vrot.lane.b32.xlu1 %v8658_v5, %s6737_s14 }
 0x1d3   :  { %1935 = vrot.lane.b32.xlu0 %v8652_v44, %s6738_s15  ;;  %1897 = vrot.lane.b32.xlu1 %v8666_v37, %s6737_s14 }
 0x1d7   :  { %1939 = vrot.lane.b32.xlu0 %v8660_v59, %s6738_s15  ;;  %1937 = vrot.lane.b32.xlu1 %v8658_v5, %s6738_s15 }
 0x1db   :  { %1979 = vrot.lane.b32.xlu0 %v8652_v44, %s6739_s19  ;;  %1941 = vrot.lane.b32.xlu1 %v8666_v37, %s6738_s15 }
 0x1df   :  { %1983 = vrot.lane.b32.xlu0 %v8660_v59, %s6739_s19  ;;  %1981 = vrot.lane.b32.xlu1 %v8658_v5, %s6739_s19 }
 0x1e3   :  { %2023 = vrot.lane.b32.xlu0 %v8652_v44, %s6740_s22  ;;  %1985 = vrot.lane.b32.xlu1 %v8666_v37, %s6739_s19 }
 0x1e7   :  { %2027 = vrot.lane.b32.xlu0 %v8660_v59, %s6740_s22  ;;  %2025 = vrot.lane.b32.xlu1 %v8658_v5, %s6740_s22 }
 0x1eb   :  { %2067 = vrot.lane.b32.xlu0 %v8652_v44, %s6741_s20  ;;  %2029 = vrot.lane.b32.xlu1 %v8666_v37, %s6740_s22 }
 0x1ef   :  { %2071 = vrot.lane.b32.xlu0 %v8660_v59, %s6741_s20  ;;  %2069 = vrot.lane.b32.xlu1 %v8658_v5, %s6741_s20 }
 0x1f3   :  { %2111 = vrot.lane.b32.xlu0 %v8652_v44, %s6742_s23  ;;  %2073 = vrot.lane.b32.xlu1 %v8666_v37, %s6741_s20 }
 0x1f7   :  { %2115 = vrot.lane.b32.xlu0 %v8660_v59, %s6742_s23  ;;  %2113 = vrot.lane.b32.xlu1 %v8658_v5, %s6742_s23 }
 0x1fb   :  { %2155 = vrot.lane.b32.xlu0 %v8652_v44, %s6743_s24  ;;  %2117 = vrot.lane.b32.xlu1 %v8666_v37, %s6742_s23 }
 0x1ff   :  { %2159 = vrot.lane.b32.xlu0 %v8660_v59, %s6743_s24  ;;  %2157 = vrot.lane.b32.xlu1 %v8658_v5, %s6743_s24 }
 0x203   :  { %2199 = vrot.lane.b32.xlu0 %v8652_v44, %s6744_s2  ;;  %2161 = vrot.lane.b32.xlu1 %v8666_v37, %s6743_s24 }
 0x207   :  { %2203 = vrot.lane.b32.xlu0 %v8660_v59, %s6744_s2  ;;  %2201 = vrot.lane.b32.xlu1 %v8658_v5, %s6744_s2 }
 0x20b   :  { %2243 = vrot.lane.b32.xlu0 %v8652_v44, %s6745_s0  ;;  %2205 = vrot.lane.b32.xlu1 %v8666_v37, %s6744_s2 }
 0x20f   :  { %2247 = vrot.lane.b32.xlu0 %v8660_v59, %s6745_s0  ;;  %2245 = vrot.lane.b32.xlu1 %v8658_v5, %s6745_s0 }
 0x213   :  { %2318 = vrot.lane.b32.xlu0 %v8652_v44, %s6746_s25  ;;  %2249 = vrot.lane.b32.xlu1 %v8666_v37, %s6745_s0 }
 0x217   :  { %2322 = vrot.lane.b32.xlu0 %v8660_v59, %s6746_s25  ;;  %2320 = vrot.lane.b32.xlu1 %v8658_v5, %s6746_s25 }
 0x21b   :  { %2362 = vrot.lane.b32.xlu0 %v8652_v44, %s6747_s26  ;;  %2324 = vrot.lane.b32.xlu1 %v8666_v37, %s6746_s25 }
 0x21f   :  { %2366 = vrot.lane.b32.xlu0 %v8660_v59, %s6747_s26  ;;  %2364 = vrot.lane.b32.xlu1 %v8658_v5, %s6747_s26 }
 0x223   :  { %2406 = vrot.lane.b32.xlu0 %v8652_v44, %s6748_s27  ;;  %2368 = vrot.lane.b32.xlu1 %v8666_v37, %s6747_s26 }
 0x225   :  { %v1762_v58 = vpop.permute.xlu1 %1761 }
 0x227   :  { %2410 = vrot.lane.b32.xlu0 %v8660_v59, %s6748_s27  ;;  %2408 = vrot.lane.b32.xlu1 %v8658_v5, %s6748_s27 }
 0x229   :  { %v1766_v16 = vpop.permute.xlu0 %1765  ;;  %v1764_v46 = vpop.permute.xlu1 %1763 }
 0x22a   :  { %v1772_v24 = vsel %vm1769_vm9, %v1762_v58, %v1764_v46  ;;  %v1771_v10 = vsel %vm1769_vm9, %v1764_v46, %v1766_v16 }
 0x22b   :  { %2450 = vrot.lane.b32.xlu0 %v8652_v44, %s6749_s28  ;;  %2412 = vrot.lane.b32.xlu1 %v8666_v37, %s6748_s27  ;;  %v1799_v49 = vmul.f32 %v1791_v52, %v1771_v10  ;;  %v1798_v36 = vmul.f32 %v1787_v51, %v1772_v24 }
 0x22d   :  { %v1805_v40 = vpop.permute.xlu0 %1804  ;;  %v1768_v34 = vpop.permute.xlu1 %1767 }
 0x22e   :  { %v1773_v48 = vsel %vm1769_vm9, %v1768_v34, %v1762_v58  ;;  %v1770_v39 = vsel %vm1769_vm9, %v1766_v16, %v1768_v34  ;;  %v1910_v58 = vrot.slane %v5748_v0, %v6840_v6  ;;  %v1914_v16 = vrot.slane %v5748_v0, %v6846_v8 }
 0x22f   :  { %2454 = vrot.lane.b32.xlu0 %v8660_v59, %s6749_s28  ;;  %2452 = vrot.lane.b32.xlu1 %v8658_v5, %s6749_s28  ;;  %v1797_v28 = vmul.f32 %v1783_v30, %v1773_v48  ;;  %v1796_v11 = vmul.f32 %v1779_v63, %v1770_v39 }
 0x231   :  { %v1809_v54 = vpop.permute.xlu0 %1808  ;;  %v1807_v38 = vpop.permute.xlu1 %1806 }
 0x232   :  { %v1815_v35 = vsel %vm1812_vm10, %v1805_v40, %v1807_v38  ;;  %v1814_v23 = vsel %vm1812_vm10, %v1807_v38, %v1809_v54 }
 0x233   :  { %2494 = vrot.lane.b32.xlu0 %v8652_v44, %s10976_s16  ;;  %2456 = vrot.lane.b32.xlu1 %v8666_v37, %s6749_s28  ;;  %v1843_v17 = vmul.f32 %v1835_v50, %v1814_v23  ;;  %v1842_v9 = vmul.f32 %v1831_v45, %v1815_v35 }
 0x235   :  { %v1849_v60 = vpop.permute.xlu0 %1848  ;;  %v1811_v47 = vpop.permute.xlu1 %1810  ;;  %v6145_v55 = vpack.c.bf16 %v1843_v17, %v1799_v49  ;;  %v6147_v27 = vpack.c.bf16 %v1842_v9, %v1798_v36  ;;  %v5750_v9 = vld [vmem:[%s10886_s6 + $0x5] ss:$8 sm:$0xf] }
 0x236   :  { %v1813_v18 = vsel %vm1812_vm10, %v1809_v54, %v1811_v47  ;;  %v1816_v20 = vsel %vm1812_vm10, %v1811_v47, %v1805_v40 }
 0x237   :  { %2498 = vrot.lane.b32.xlu0 %v8660_v59, %s10976_s16  ;;  %2496 = vrot.lane.b32.xlu1 %v8658_v5, %s10976_s16  ;;  %v1841_v33 = vmul.f32 %v1827_v56, %v1816_v20  ;;  %v1840_v22 = vmul.f32 %v1823_v1, %v1813_v18 }
 0x238   :  { %6146 = vmatprep.subr.bf16.mxu1 %v6145_v55  ;;  %v2002_v55 = vrot.slane %v5750_v9, %v6846_v8 }
 0x239   :  { %6148 = vmatpush1.bf16.msra.mxu1 %v6147_v27  ;;  %v1853_v62 = vpop.permute.xlu0 %1852  ;;  %v1851_v29 = vpop.permute.xlu1 %1850  ;;  %v6097_v3 = vpack.c.bf16 %v1841_v33, %v1797_v28  ;;  %v6099_v4 = vpack.c.bf16 %v1840_v22, %v1796_v11  ;;  %v2006_v33 = vrot.slane %v5750_v9, %v6860_v13 }
 0x23a   :  { %v1857_v42 = vsel %vm208_vm2, %v1851_v29, %v1853_v62  ;;  %v1858_v26 = vsel %vm208_vm2, %v1849_v60, %v1851_v29  ;;  %v1998_v29 = vrot.slane %v5750_v9, %v6840_v6 }
 0x23b   :  { %2538 = vrot.lane.b32.xlu0 %v8652_v44, %s10974_s29  ;;  %2500 = vrot.lane.b32.xlu1 %v8666_v37, %s10976_s16  ;;  %v1885_v46 = vmul.f32 %v1874_v25, %v1858_v26  ;;  %v1886_v14 = vmul.f32 %v1878_v12, %v1857_v42  ;;  %s10982_s16 = smov 101  }
 0x23c   :  { %6098 = vmatprep.subr.bf16.mxu0 %v6097_v3  ;;  %v2010_v3 = vrot.slane %v5750_v9, %v6843_v7 }
 0x23d   :  { %6100 = vmatpush1.bf16.msra.mxu0 %v6099_v4  ;;  %v1892_v53 = vpop.permute.xlu0 %1891  ;;  %v1855_v19 = vpop.permute.xlu1 %1854 }
 0x23e   :  { %v1856_v34 = vsel %vm208_vm2, %v1853_v62, %v1855_v19  ;;  %v1859_v51 = vsel %vm208_vm2, %v1855_v19, %v1849_v60  ;;  %v5749_v60 = vld [vmem:[%s10886_s6 + $0x4] ss:$8 sm:$0xf] }
 0x23f   :  { %2542 = vrot.lane.b32.xlu0 %v8660_v59, %s10974_s29  ;;  %2540 = vrot.lane.b32.xlu1 %v8658_v5, %s10974_s29  ;;  %v1883_v38 = vmul.f32 %v1866_v21, %v1856_v34  ;;  %v1884_v63 = vmul.f32 %v1870_v43, %v1859_v51  ;;  %v1958_v47 = vrot.slane %v5749_v60, %v6846_v8  ;;  %v5751_v34 = vld [vmem:[%s10886_s6 + $0x6] ss:$8 sm:$0xf] }
 0x240   :  { %v1966_v18 = vrot.slane %v5749_v60, %v6843_v7  ;;  %v1954_v28 = vrot.slane %v5749_v60, %v6840_v6  ;;  %v1962_v19 = vrot.slane %v5749_v60, %v6860_v13  ;;  %v2050_v60 = vrot.slane %v5751_v34, %v6860_v13 }
 0x241   :  { %v1896_v57 = vpop.permute.xlu0 %1895  ;;  %v1894_v32 = vpop.permute.xlu1 %1893 }
 0x242   :  { %v1901_v61 = vsel %vm1899_vm11, %v1894_v32, %v1896_v57  ;;  %v1902_v40 = vsel %vm1899_vm11, %v1892_v53, %v1894_v32 }
 0x243   :  { %v1929_v52 = vmul.f32 %v1918_v2, %v1902_v40  ;;  %v1930_v50 = vmul.f32 %v1922_v31, %v1901_v61  ;;  %2582 = vrot.lane.b32.xlu0 %v8652_v44, %s6752_s12  ;;  %2544 = vrot.lane.b32.xlu1 %v8666_v37, %s10974_s29  ;;  %s11277_s29 = smov 112  }
 0x245   :  { %v1936_v24 = vpop.permute.xlu0 %1935  ;;  %v1898_v10 = vpop.permute.xlu1 %1897  ;;  %v6149_v45 = vpack.c.bf16 %v1930_v50, %v1886_v14  ;;  %v6151_v54 = vpack.c.bf16 %v1929_v52, %v1885_v46  ;;  %v5752_v50 = vld [vmem:[%s10886_s6 + $0x7] ss:$8 sm:$0xf] }
 0x246   :  { %v1900_v30 = vsel %vm1899_vm11, %v1896_v57, %v1898_v10  ;;  %v1903_v56 = vsel %vm1899_vm11, %v1898_v10, %v1892_v53  ;;  %v2046_v10 = vrot.slane %v5751_v34, %v6846_v8 }
 0x247   :  { %v1927_v1 = vmul.f32 %v1910_v58, %v1900_v30  ;;  %v1928_v35 = vmul.f32 %v1914_v16, %v1903_v56  ;;  %2586 = vrot.lane.b32.xlu0 %v8660_v59, %s6752_s12  ;;  %2584 = vrot.lane.b32.xlu1 %v8658_v5, %s6752_s12  ;;  %v2054_v30 = vrot.slane %v5751_v34, %v6843_v7 }
 0x248   :  { %6150 = vmatprep.subr.bf16.mxu1 %v6149_v45 }
 0x249   :  { %6152 = vmatpush1.bf16.msra.mxu1 %v6151_v54  ;;  %v1940_v49 = vpop.permute.xlu0 %1939  ;;  %v1938_v23 = vpop.permute.xlu1 %1937  ;;  %v6101_v36 = vpack.c.bf16 %v1928_v35, %v1884_v63  ;;  %v6103_v17 = vpack.c.bf16 %v1927_v1, %v1883_v38  ;;  %v2090_v54 = vrot.slane %v5752_v50, %v6846_v8  ;;  %v2042_v38 = vrot.slane %v5751_v34, %v6840_v6 }
 0x24a   :  { %v1945_v22 = vsel %vm1943_vm14, %v1938_v23, %v1940_v49  ;;  %v1946_v25 = vsel %vm1943_vm14, %v1936_v24, %v1938_v23  ;;  %v2094_v63 = vrot.slane %v5752_v50, %v6860_v13  ;;  %v2086_v23 = vrot.slane %v5752_v50, %v6840_v6 }
 0x24b   :  { %2626 = vrot.lane.b32.xlu0 %v8652_v44, %s10978_s13  ;;  %2588 = vrot.lane.b32.xlu1 %v8666_v37, %s6752_s12  ;;  %v1974_v26 = vmul.f32 %v1966_v18, %v1945_v22  ;;  %v1973_v16 = vmul.f32 %v1962_v19, %v1946_v25  ;;  %v2846_v19 = vld [vmem:[%s10883_s3 + $0x8] sm:$0xff] }
 0x24c   :  { %6102 = vmatprep.subr.bf16.mxu0 %v6101_v36  ;;  %v2098_v36 = vrot.slane %v5752_v50, %v6843_v7  ;;  %5771 = vmatprep.mubr.msk.f32.mxu1 %vm2953_vm7, %v2846_v19 }
 0x24d   :  { %6104 = vmatpush1.bf16.msra.mxu0 %v6103_v17  ;;  %v1980_v48 = vpop.permute.xlu0 %1979  ;;  %v1942_v39 = vpop.permute.xlu1 %1941  ;;  %5770 = vmatprep.mubr.msk.f32.mxu0 %vm2953_vm7, %v2846_v19 }
 0x24e   :  { %v1947_v27 = vsel %vm1943_vm14, %v1942_v39, %v1936_v24  ;;  %v1944_v4 = vsel %vm1943_vm14, %v1940_v49, %v1942_v39 }
 0x24f   :  { %2630 = vrot.lane.b32.xlu0 %v8660_v59, %s10978_s13  ;;  %2628 = vrot.lane.b32.xlu1 %v8658_v5, %s10978_s13  ;;  %v1972_v15 = vmul.f32 %v1958_v47, %v1947_v27  ;;  %v1971_v31 = vmul.f32 %v1954_v28, %v1944_v4 }
 0x251   :  { %v1984_v20 = vpop.permute.xlu0 %1983  ;;  %v1982_v11 = vpop.permute.xlu1 %1981 }
 0x252   :  { %v1990_v62 = vsel %vm1987_vm15, %v1980_v48, %v1982_v11  ;;  %v1989_v53 = vsel %vm1987_vm15, %v1982_v11, %v1984_v20 }
 0x253   :  { %v2016_v0 = vmul.f32 %v2002_v55, %v1990_v62  ;;  %2670 = vrot.lane.b32.xlu0 %v8652_v44, %s10982_s16  ;;  %2632 = vrot.lane.b32.xlu1 %v8666_v37, %s10978_s13  ;;  %v2017_v57 = vmul.f32 %v2006_v33, %v1989_v53  ;;  %s10988_s13 = smov 91  }
 0x255   :  { %v2024_v12 = vpop.permute.xlu0 %2023  ;;  %v1986_v2 = vpop.permute.xlu1 %1985  ;;  %v6105_v42 = vpack.c.bf16 %v2016_v0, %v1972_v15  ;;  %v6155_v52 = vpack.c.bf16 %v2017_v57, %v1973_v16  ;;  %v2947_v57 = vld [vmem:[%s10884_s4] sm:$0xff] }
 0x256   :  { %v1988_v21 = vsel %vm1987_vm15, %v1984_v20, %v1986_v2  ;;  %v1991_v43 = vsel %vm1987_vm15, %v1986_v2, %v1980_v48  ;;  %v5754_v2 = vld [vmem:[%s10886_s6 + $0x21] ss:$8 sm:$0xf] }
 0x257   :  { %v2015_v32 = vmul.f32 %v1998_v29, %v1991_v43  ;;  %v2018_v58 = vmul.f32 %v2010_v3, %v1988_v21  ;;  %2674 = vrot.lane.b32.xlu0 %v8660_v59, %s10982_s16  ;;  %2672 = vrot.lane.b32.xlu1 %v8658_v5, %s10982_s16  ;;  %v2178_v21 = vrot.slane %v5754_v2, %v6846_v8 }
 0x258   :  { %6106 = vmatprep.subr.bf16.mxu0 %v6105_v42  ;;  %v2186_v34 = vrot.slane %v5754_v2, %v6843_v7 }
 0x259   :  { %v2028_v46 = vpop.permute.xlu0 %2027  ;;  %v2026_v14 = vpop.permute.xlu1 %2025  ;;  %v6107_v61 = vpack.c.bf16 %v2015_v32, %v1971_v31  ;;  %v6153_v40 = vpack.c.bf16 %v2018_v58, %v1974_v26 }
 0x25a   :  { %v2034_v45 = vsel %vm2031_vm4, %v2024_v12, %v2026_v14  ;;  %v2033_v47 = vsel %vm2031_vm4, %v2026_v14, %v2028_v46  ;;  %v2182_v14 = vrot.slane %v5754_v2, %v6860_v13 }
 0x25b   :  { %2714 = vrot.lane.b32.xlu0 %v8652_v44, %s10980_s1  ;;  %2676 = vrot.lane.b32.xlu1 %v8666_v37, %s10982_s16  ;;  %v2060_v35 = vmul.f32 %v2046_v10, %v2034_v45  ;;  %v2061_v3 = vmul.f32 %v2050_v60, %v2033_v47  ;;  %s11236_s16 = smov 96  }
 0x25c   :  { %6108 = vmatpush1.bf16.msra.mxu0 %v6107_v61  ;;  %6154 = vmatprep.subr.bf16.mxu1 %v6153_v40  ;;  %v2174_v40 = vrot.slane %v5754_v2, %v6840_v6 }
 0x25d   :  { %6156 = vmatpush1.bf16.msra.mxu1 %v6155_v52  ;;  %v2068_v51 = vpop.permute.xlu0 %2067  ;;  %v2030_v24 = vpop.permute.xlu1 %2029 }
 0x25e   :  { %v2032_v17 = vsel %vm2031_vm4, %v2028_v46, %v2030_v24  ;;  %v2035_v9 = vsel %vm2031_vm4, %v2030_v24, %v2024_v12  ;;  %v5753_v12 = vld [vmem:[%s10886_s6 + $0x20] ss:$8 sm:$0xf] }
 0x25f   :  { %2718 = vrot.lane.b32.xlu0 %v8660_v59, %s10980_s1  ;;  %2716 = vrot.lane.b32.xlu1 %v8658_v5, %s10980_s1  ;;  %v2059_v28 = vmul.f32 %v2042_v38, %v2035_v9  ;;  %v2062_v20 = vmul.f32 %v2054_v30, %v2032_v17  ;;  %v2134_v31 = vrot.slane %v5753_v12, %v6846_v8 }
 0x260   :  { %v2130_v32 = vrot.slane %v5753_v12, %v6840_v6  ;;  %v2142_v58 = vrot.slane %v5753_v12, %v6843_v7  ;;  %v2138_v24 = vrot.slane %v5753_v12, %v6860_v13  ;;  %v5758_v12 = vld [vmem:[%s10886_s6 + $0x25] ss:$8 sm:$0xf] }
 0x261   :  { %v2072_v56 = vpop.permute.xlu0 %2071  ;;  %v2070_v1 = vpop.permute.xlu1 %2069 }
 0x262   :  { %v2078_v49 = vsel %vm2075_vm5, %v2068_v51, %v2070_v1  ;;  %v2077_v39 = vsel %vm2075_vm5, %v2070_v1, %v2072_v56 }
 0x263   :  { %v2104_v48 = vmul.f32 %v2090_v54, %v2078_v49  ;;  %2757 = vrot.lane.b32.xlu0 %v8652_v44, %s10988_s13  ;;  %2720 = vrot.lane.b32.xlu1 %v8666_v37, %s10980_s1  ;;  %v2105_v22 = vmul.f32 %v2094_v63, %v2077_v39  ;;  %s6760_s1 = smov 108  }
 0x265   :  { %v2112_v55 = vpop.permute.xlu0 %2111  ;;  %v2074_v27 = vpop.permute.xlu1 %2073  ;;  %v6109_v18 = vpack.c.bf16 %v2104_v48, %v2060_v35  ;;  %v6159_v25 = vpack.c.bf16 %v2105_v22, %v2061_v3 }
 0x266   :  { %v2076_v33 = vsel %vm2075_vm5, %v2072_v56, %v2074_v27  ;;  %v2079_v11 = vsel %vm2075_vm5, %v2074_v27, %v2068_v51  ;;  %v5755_v27 = vld [vmem:[%s10886_s6 + $0x22] ss:$8 sm:$0xf] }
 0x267   :  { %v2103_v62 = vmul.f32 %v2086_v23, %v2079_v11  ;;  %v2106_v29 = vmul.f32 %v2098_v36, %v2076_v33  ;;  %2761 = vrot.lane.b32.xlu0 %v8660_v59, %s10988_s13  ;;  %2759 = vrot.lane.b32.xlu1 %v8658_v5, %s10988_s13  ;;  %v9031_v33 = vld [vmem:[%s10886_s6 + $0x24] ss:$8 sm:$0xf]  ;;  %v2222_v11 = vrot.slane %v5755_v27, %v6846_v8 }
 0x268   :  { %6110 = vmatprep.subr.bf16.mxu0 %v6109_v18  ;;  %v5756_v18 = vld [vmem:[%s10886_s6 + $0x23] ss:$8 sm:$0xf] }
 0x269   :  { %v2116_v4 = vpop.permute.xlu0 %2115  ;;  %v2114_v15 = vpop.permute.xlu1 %2113  ;;  %v6111_v0 = vpack.c.bf16 %v2103_v62, %v2059_v28  ;;  %v6157_v53 = vpack.c.bf16 %v2106_v29, %v2062_v20  ;;  %v2266_v22 = vrot.slane %v5756_v18, %v6846_v8  ;;  %v2218_v29 = vrot.slane %v5755_v27, %v6840_v6 }
 0x26a   :  { %v2122_v43 = vsel %vm2119_vm8, %v2112_v55, %v2114_v15  ;;  %v2121_v54 = vsel %vm2119_vm8, %v2114_v15, %v2116_v4  ;;  %v2297_v15 = vrot.slane %v9031_v33, %v6846_v8 }
 0x26b   :  { %2801 = vrot.lane.b32.xlu0 %v8652_v44, %s10986_s18  ;;  %2763 = vrot.lane.b32.xlu1 %v8666_v37, %s10988_s13  ;;  %v2148_v52 = vmul.f32 %v2134_v31, %v2122_v43  ;;  %v2149_v9 = vmul.f32 %v2138_v24, %v2121_v54  ;;  %v2274_v31 = vrot.slane %v5756_v18, %v6843_v7  ;;  %s11237_s13 = smov 91  }
 0x26c   :  { %6112 = vmatpush1.bf16.msra.mxu0 %v6111_v0  ;;  %6158 = vmatprep.subr.bf16.mxu1 %v6157_v53  ;;  %v2230_v0 = vrot.slane %v5755_v27, %v6843_v7  ;;  %v2270_v53 = vrot.slane %v5756_v18, %v6860_v13 }
 0x26d   :  { %6160 = vmatpush1.bf16.msra.mxu1 %v6159_v25  ;;  %v2156_v42 = vpop.permute.xlu0 %2155  ;;  %v2118_v26 = vpop.permute.xlu1 %2117  ;;  %v2262_v25 = vrot.slane %v5756_v18, %v6840_v6 }
 0x26e   :  { %v2120_v10 = vsel %vm2119_vm8, %v2116_v4, %v2118_v26  ;;  %v2123_v45 = vsel %vm2119_vm8, %v2118_v26, %v2112_v55 }
 0x26f   :  { %2805 = vrot.lane.b32.xlu0 %v8660_v59, %s10986_s18  ;;  %2803 = vrot.lane.b32.xlu1 %v8658_v5, %s10986_s18  ;;  %v2147_v49 = vmul.f32 %v2130_v32, %v2123_v45  ;;  %v2150_v23 = vmul.f32 %v2142_v58, %v2120_v10  ;;  %v2293_v32 = vrot.slane %v9031_v33, %v6840_v6 }
 0x271   :  { %v2160_v16 = vpop.permute.xlu0 %2159  ;;  %v2158_v46 = vpop.permute.xlu1 %2157 }
 0x272   :  { %v2166_v61 = vsel %vm2163_vm3, %v2156_v42, %v2158_v46  ;;  %v2165_v50 = vsel %vm2163_vm3, %v2158_v46, %v2160_v16 }
 0x273   :  { %v2192_v51 = vmul.f32 %v2178_v21, %v2166_v61  ;;  %2950 = vperm.xlu0 %6656, %v2947_v57   ;;  %2807 = vrot.lane.b32.xlu1 %v8666_v37, %s10986_s18  ;;  %v2193_v63 = vmul.f32 %v2182_v14, %v2165_v50  ;;  %v2226_v21 = vrot.slane %v5755_v27, %v6860_v13 }
 0x274   :  { %v2337_v61 = vrot.slane %v5758_v12, %v6840_v6  ;;  %v2341_v50 = vrot.slane %v5758_v12, %v6846_v8 }
 0x275   :  { %v2200_v38 = vpop.permute.xlu0 %2199  ;;  %v2162_v30 = vpop.permute.xlu1 %2161  ;;  %v6113_v56 = vpack.c.bf16 %v2192_v51, %v2148_v52  ;;  %v6163_v55 = vpack.c.bf16 %v2193_v63, %v2149_v9 }
 0x276   :  { %v2164_v1 = vsel %vm2163_vm3, %v2160_v16, %v2162_v30  ;;  %v2167_v35 = vsel %vm2163_vm3, %v2162_v30, %v2156_v42  ;;  %v2301_v30 = vrot.slane %v9031_v33, %v6860_v13 }
 0x277   :  { %v2191_v36 = vmul.f32 %v2174_v40, %v2167_v35  ;;  %v2194_v17 = vmul.f32 %v2186_v34, %v2164_v1  ;;  %6114 = vmatprep.subr.bf16.mxu0 %v6113_v56 }
 0x279   :  { %v2204_v48 = vpop.permute.xlu0 %2203  ;;  %v2202_v39 = vpop.permute.xlu1 %2201  ;;  %v6115_v60 = vpack.c.bf16 %v2191_v36, %v2147_v49  ;;  %v6161_v47 = vpack.c.bf16 %v2194_v17, %v2150_v23  ;;  %v2311_v49 = vmul.f32 %v2297_v15, %v8658_v5  ;;  %v2310_v23 = vmul.f32 %v2293_v32, %v8652_v44 }
 0x27a   :  { %v2210_v62 = vsel %vm2207_vm1, %v2200_v38, %v2202_v39  ;;  %v2209_v58 = vsel %vm2207_vm1, %v2202_v39, %v2204_v48 }
 0x27b   :  { %6116 = vmatpush1.bf16.msra.mxu0 %v6115_v60  ;;  %6162 = vmatprep.subr.bf16.mxu1 %v6161_v47  ;;  %v2236_v2 = vmul.f32 %v2222_v11, %v2210_v62  ;;  %v2237_v54 = vmul.f32 %v2226_v21, %v2209_v58  ;;  %v2349_v47 = vrot.slane %v5758_v12, %v6843_v7 }
 0x27c   :  { %6164 = vmatpush1.bf16.msra.mxu1 %v6163_v55 }
 0x27d   :  { %v2244_v28 = vpop.permute.xlu0 %2243  ;;  %v2206_v20 = vpop.permute.xlu1 %2205 }
 0x27e   :  { %v2208_v43 = vsel %vm2207_vm1, %v2204_v48, %v2206_v20  ;;  %v2211_v57 = vsel %vm2207_vm1, %v2206_v20, %v2200_v38  ;;  %v2305_v38 = vrot.slane %v9031_v33, %v6843_v7  ;;  %v2345_v48 = vrot.slane %v5758_v12, %v6860_v13 }
 0x27f   :  { %v2235_v51 = vmul.f32 %v2218_v29, %v2211_v57  ;;  %v2238_v24 = vmul.f32 %v2230_v0, %v2208_v43  ;;  %v2312_v29 = vmul.f32 %v2301_v30, %v8660_v59 }
 0x280   :  { %v2313_v62 = vmul.f32 %v2305_v38, %v8666_v37 }
 0x281   :  { %v2248_v3 = vpop.permute.xlu0 %2247  ;;  %v2246_v4 = vpop.permute.xlu1 %2245 }
 0x282   :  { %v2254_v19 = vsel %vm2251_vm0, %v2244_v28, %v2246_v4  ;;  %v2253_v42 = vsel %vm2251_vm0, %v2246_v4, %v2248_v3 }
 0x283   :  { %v2280_v26 = vmul.f32 %v2266_v22, %v2254_v19  ;;  %v2281_v40 = vmul.f32 %v2270_v53, %v2253_v42  ;;  %v5759_v53 = vld [vmem:[%s10886_s6 + $0x26] ss:$8 sm:$0xf]  ;;  %v5760_v19 = vld [vmem:[%s10886_s6 + $0x27] ss:$8 sm:$0xf] }
 0x284   :  { %v2385_v42 = vrot.slane %v5759_v53, %v6846_v8  ;;  %v2389_v57 = vrot.slane %v5759_v53, %v6860_v13  ;;  %v2393_v32 = vrot.slane %v5759_v53, %v6843_v7 }
 0x285   :  { %v2319_v16 = vpop.permute.xlu0 %2318  ;;  %v2250_v46 = vpop.permute.xlu1 %2249  ;;  %v6117_v14 = vpack.c.bf16 %v2280_v26, %v2236_v2  ;;  %v6167_v9 = vpack.c.bf16 %v2281_v40, %v2237_v54  ;;  %v2381_v2 = vrot.slane %v5759_v53, %v6840_v6  ;;  %v2425_v26 = vrot.slane %v5760_v19, %v6840_v6 }
 0x286   :  { %v2252_v34 = vsel %vm2251_vm0, %v2248_v3, %v2250_v46  ;;  %v2255_v52 = vsel %vm2251_vm0, %v2250_v46, %v2244_v28  ;;  %v2437_v40 = vrot.slane %v5760_v19, %v6843_v7 }
 0x287   :  { %v2279_v10 = vmul.f32 %v2262_v25, %v2255_v52  ;;  %v2282_v45 = vmul.f32 %v2274_v31, %v2252_v34  ;;  %6118 = vmatprep.subr.bf16.mxu0 %v6117_v14  ;;  %v2429_v31 = vrot.slane %v5760_v19, %v6846_v8 }
 0x289   :  { %v2323_v56 = vpop.permute.xlu0 %2322  ;;  %v2321_v63 = vpop.permute.xlu1 %2320  ;;  %v6119_v1 = vpack.c.bf16 %v2279_v10, %v2235_v51  ;;  %v6165_v35 = vpack.c.bf16 %v2282_v45, %v2238_v24 }
 0x28a   :  { %v2328_v36 = vsel %vm10993_vm13, %v2321_v63, %v2323_v56  ;;  %v2329_v17 = vsel %vm10993_vm13, %v2319_v16, %v2321_v63 }
 0x28b   :  { %v2354_v39 = vmul.f32 %v2337_v61, %v2329_v17  ;;  %v2355_v60 = vmul.f32 %v2341_v50, %v2328_v36  ;;  %6120 = vmatpush1.bf16.msra.mxu0 %v6119_v1  ;;  %6166 = vmatprep.subr.bf16.mxu1 %v6165_v35  ;;  %v2433_v61 = vrot.slane %v5760_v19, %v6860_v13 }
 0x28c   :  { %6168 = vmatpush1.bf16.msra.mxu1 %v6167_v9 }
 0x28d   :  { %v2363_v55 = vpop.permute.xlu0 %2362  ;;  %v2325_v27 = vpop.permute.xlu1 %2324  ;;  %v6121_v18 = vpack.c.bf16 %v2355_v60, %v2311_v49  ;;  %v6123_v28 = vpack.c.bf16 %v2354_v39, %v2310_v23  ;;  %v5761_v39 = vld [vmem:[%s10886_s6 + $0x40] ss:$8 sm:$0xf]  ;;  %v5762_v60 = vld [vmem:[%s10886_s6 + $0x41] ss:$8 sm:$0xf] }
 0x28e   :  { %v2327_v20 = vsel %vm10993_vm13, %v2323_v56, %v2325_v27  ;;  %v2330_v33 = vsel %vm10993_vm13, %v2325_v27, %v2319_v16  ;;  %vm10994_vm13 = vcmp.lt.s32.totalorder %v7187_v41, 58  ;;  %v2469_v27 = vrot.slane %v5761_v39, %v6840_v6 }
 0x28f   :  { %v2356_v11 = vmul.f32 %v2345_v48, %v2327_v20  ;;  %v2357_v22 = vmul.f32 %v2349_v47, %v2330_v33  ;;  %6122 = vmatprep.subr.bf16.mxu0 %v6121_v18  ;;  %v2473_v18 = vrot.slane %v5761_v39, %v6846_v8  ;;  %v2517_v20 = vrot.slane %v5762_v60, %v6846_v8 }
 0x290   :  { %6124 = vmatpush1.bf16.msra.mxu0 %v6123_v28  ;;  %v2513_v28 = vrot.slane %v5762_v60, %v6840_v6  ;;  %v2525_v53 = vrot.slane %v5762_v60, %v6843_v7 }
 0x291   :  { %v2367_v3 = vpop.permute.xlu0 %2366  ;;  %v2365_v4 = vpop.permute.xlu1 %2364  ;;  %v6169_v15 = vpack.c.bf16 %v2357_v22, %v2313_v62  ;;  %v6171_v0 = vpack.c.bf16 %v2356_v11, %v2312_v29  ;;  %v2477_v22 = vrot.slane %v5761_v39, %v6860_v13  ;;  %v2481_v62 = vrot.slane %v5761_v39, %v6843_v7 }
 0x292   :  { %v2372_v21 = vsel %vm10995_vm12, %v2365_v4, %v2367_v3  ;;  %v2373_v43 = vsel %vm10995_vm12, %v2363_v55, %v2365_v4 }
 0x293   :  { %6170 = vmatprep.subr.bf16.mxu1 %v6169_v15  ;;  %v2398_v34 = vmul.f32 %v2381_v2, %v2373_v43  ;;  %v2399_v52 = vmul.f32 %v2385_v42, %v2372_v21 }
 0x294   :  { %6172 = vmatpush1.bf16.msra.mxu1 %v6171_v0  ;;  %v2521_v0 = vrot.slane %v5762_v60, %v6860_v13 }
 0x295   :  { %v2407_v25 = vpop.permute.xlu0 %2406  ;;  %v2369_v12 = vpop.permute.xlu1 %2368 }
 0x296   :  { %v2371_v24 = vsel %vm10995_vm12, %v2367_v3, %v2369_v12  ;;  %v2374_v10 = vsel %vm10995_vm12, %v2369_v12, %v2363_v55  ;;  %vm10996_vm12 = vcmp.lt.s32.totalorder %v7187_v41, 48 }
 0x297   :  { %v2400_v1 = vmul.f32 %v2389_v57, %v2371_v24  ;;  %v2401_v35 = vmul.f32 %v2393_v32, %v2374_v10  ;;  %v5764_v24 = vld [vmem:[%s10886_s6 + $0x43] ss:$8 sm:$0xf] }
 0x298   :  { %v2613_v39 = vrot.slane %v5764_v24, %v6843_v7 }
 0x299   :  { %v2411_v58 = vpop.permute.xlu0 %2410  ;;  %v2409_v16 = vpop.permute.xlu1 %2408 }
 0x29a   :  { %v2416_v46 = vsel %vm10994_vm13, %v2409_v16, %v2411_v58  ;;  %v2417_v14 = vsel %vm10994_vm13, %v2407_v25, %v2409_v16 }
 0x29b   :  { %v2442_v50 = vmul.f32 %v2425_v26, %v2417_v14  ;;  %v2443_v51 = vmul.f32 %v2429_v31, %v2416_v46 }
 0x29d   :  { %v2451_v45 = vpop.permute.xlu0 %2450  ;;  %v2413_v54 = vpop.permute.xlu1 %2412  ;;  %v6125_v38 = vpack.c.bf16 %v2443_v51, %v2399_v52  ;;  %v6127_v30 = vpack.c.bf16 %v2442_v50, %v2398_v34  ;;  %v5763_v51 = vld [vmem:[%s10886_s6 + $0x42] ss:$8 sm:$0xf] }
 0x29e   :  { %v2415_v56 = vsel %vm10994_vm13, %v2411_v58, %v2413_v54  ;;  %v2418_v63 = vsel %vm10994_vm13, %v2413_v54, %v2407_v25  ;;  %vm10997_vm13 = vcmp.lt.s32.totalorder %v7187_v41, 53  ;;  %v2557_v54 = vrot.slane %v5763_v51, %v6840_v6 }
 0x29f   :  { %v2444_v49 = vmul.f32 %v2433_v61, %v2415_v56  ;;  %v2445_v23 = vmul.f32 %v2437_v40, %v2418_v63  ;;  %6126 = vmatprep.subr.bf16.mxu0 %v6125_v38  ;;  %v2561_v38 = vrot.slane %v5763_v51, %v6846_v8  ;;  %v2605_v56 = vrot.slane %v5764_v24, %v6846_v8 }
 0x2a0   :  { %6128 = vmatpush1.bf16.msra.mxu0 %v6127_v30  ;;  %v2601_v30 = vrot.slane %v5764_v24, %v6840_v6 }
 0x2a1   :  { %v2455_v36 = vpop.permute.xlu0 %2454  ;;  %v2453_v17 = vpop.permute.xlu1 %2452  ;;  %v6173_v9 = vpack.c.bf16 %v2445_v23, %v2401_v35  ;;  %v6175_v48 = vpack.c.bf16 %v2444_v49, %v2400_v1  ;;  %v2565_v35 = vrot.slane %v5763_v51, %v6860_v13  ;;  %v2569_v49 = vrot.slane %v5763_v51, %v6843_v7 }
 0x2a2   :  { %v2460_v33 = vsel %vm10997_vm13, %v2453_v17, %v2455_v36  ;;  %v2461_v11 = vsel %vm10997_vm13, %v2451_v45, %v2453_v17 }
 0x2a3   :  { %6174 = vmatprep.subr.bf16.mxu1 %v6173_v9  ;;  %v2486_v19 = vmul.f32 %v2469_v27, %v2461_v11  ;;  %v2487_v25 = vmul.f32 %v2473_v18, %v2460_v33 }
 0x2a4   :  { %6176 = vmatpush1.bf16.msra.mxu1 %v6175_v48  ;;  %v2609_v48 = vrot.slane %v5764_v24, %v6860_v13 }
 0x2a5   :  { %v2495_v47 = vpop.permute.xlu0 %2494  ;;  %v2457_v55 = vpop.permute.xlu1 %2456 }
 0x2a6   :  { %v2459_v42 = vsel %vm10997_vm13, %v2455_v36, %v2457_v55  ;;  %v2462_v26 = vsel %vm10997_vm13, %v2457_v55, %v2451_v45  ;;  %vm10998_vm13 = vcmp.lt.s32.totalorder %v7187_v41, 38 }
 0x2a7   :  { %v2488_v16 = vmul.f32 %v2477_v22, %v2459_v42  ;;  %v2489_v46 = vmul.f32 %v2481_v62, %v2462_v26  ;;  %v5766_v42 = vld [vmem:[%s10886_s6 + $0x45] ss:$8 sm:$0xf] }
 0x2a8   :  { %v2697_v51 = vrot.slane %v5766_v42, %v6860_v13 }
 0x2a9   :  { %v2499_v29 = vpop.permute.xlu0 %2498  ;;  %v2497_v3 = vpop.permute.xlu1 %2496 }
 0x2aa   :  { %v2504_v4 = vsel %vm10996_vm12, %v2497_v3, %v2499_v29  ;;  %v2505_v15 = vsel %vm10996_vm12, %v2495_v47, %v2497_v3 }
 0x2ab   :  { %v2530_v12 = vmul.f32 %v2513_v28, %v2505_v15  ;;  %v2531_v2 = vmul.f32 %v2517_v20, %v2504_v4 }
 0x2ad   :  { %v2539_v31 = vpop.permute.xlu0 %2538  ;;  %v2501_v21 = vpop.permute.xlu1 %2500  ;;  %v6129_v43 = vpack.c.bf16 %v2531_v2, %v2487_v25  ;;  %v6131_v57 = vpack.c.bf16 %v2530_v12, %v2486_v19  ;;  %v5765_v2 = vld [vmem:[%s10886_s6 + $0x44] ss:$8 sm:$0xf] }
 0x2ae   :  { %v2503_v32 = vsel %vm10996_vm12, %v2499_v29, %v2501_v21  ;;  %v2506_v58 = vsel %vm10996_vm12, %v2501_v21, %v2495_v47  ;;  %vm10999_vm12 = vcmp.lt.s32.totalorder %v7187_v41, 43  ;;  %v2657_v21 = vrot.slane %v5765_v2, %v6843_v7 }
 0x2af   :  { %v2532_v14 = vmul.f32 %v2521_v0, %v2503_v32  ;;  %v2533_v61 = vmul.f32 %v2525_v53, %v2506_v58  ;;  %6130 = vmatprep.subr.bf16.mxu0 %v6129_v43  ;;  %v2701_v43 = vrot.slane %v5766_v42, %v6843_v7  ;;  %v2649_v32 = vrot.slane %v5765_v2, %v6846_v8 }
 0x2b0   :  { %6132 = vmatpush1.bf16.msra.mxu0 %v6131_v57  ;;  %v2645_v24 = vrot.slane %v5765_v2, %v6840_v6 }
 0x2b1   :  { %v2543_v40 = vpop.permute.xlu0 %2542  ;;  %v2541_v34 = vpop.permute.xlu1 %2540  ;;  %v6177_v52 = vpack.c.bf16 %v2533_v61, %v2489_v46  ;;  %v6179_v50 = vpack.c.bf16 %v2532_v14, %v2488_v16  ;;  %v2653_v46 = vrot.slane %v5765_v2, %v6860_v13  ;;  %v2689_v14 = vrot.slane %v5766_v42, %v6840_v6 }
 0x2b2   :  { %v2548_v63 = vsel %vm10999_vm12, %v2541_v34, %v2543_v40  ;;  %v2549_v1 = vsel %vm10999_vm12, %v2539_v31, %v2541_v34 }
 0x2b3   :  { %6178 = vmatprep.subr.bf16.mxu1 %v6177_v52  ;;  %v2574_v60 = vmul.f32 %v2557_v54, %v2549_v1  ;;  %v2575_v47 = vmul.f32 %v2561_v38, %v2548_v63 }
 0x2b4   :  { %6180 = vmatpush1.bf16.msra.mxu1 %v6179_v50 }
 0x2b5   :  { %v2583_v10 = vpop.permute.xlu0 %2582  ;;  %v2545_v45 = vpop.permute.xlu1 %2544 }
 0x2b6   :  { %v2547_v18 = vsel %vm10999_vm12, %v2543_v40, %v2545_v45  ;;  %v2550_v28 = vsel %vm10999_vm12, %v2545_v45, %v2539_v31  ;;  %vm11000_vm12 = vcmp.lt.s32.totalorder %v7187_v41, 101  ;;  %v2693_v40 = vrot.slane %v5766_v42, %v6846_v8  ;;  %v5769_v42 = vld [vmem:[%s10886_s6 + $0x60] ss:$8 sm:$0xf] }
 0x2b7   :  { %v2576_v3 = vmul.f32 %v2565_v35, %v2547_v18  ;;  %v2577_v4 = vmul.f32 %v2569_v49, %v2550_v28  ;;  %v5768_v18 = vld [vmem:[%s10886_s6 + $0x47] ss:$8 sm:$0xf] }
 0x2b8   :  { %v2784_v2 = vrot.slane %v5768_v18, %v6860_v13 }
 0x2b9   :  { %v2587_v23 = vpop.permute.xlu0 %2586  ;;  %v2585_v36 = vpop.permute.xlu1 %2584 }
 0x2ba   :  { %v2592_v17 = vsel %vm10998_vm13, %v2585_v36, %v2587_v23  ;;  %v2593_v9 = vsel %vm10998_vm13, %v2583_v10, %v2585_v36 }
 0x2bb   :  { %v2618_v55 = vmul.f32 %v2601_v30, %v2593_v9  ;;  %v2619_v27 = vmul.f32 %v2605_v56, %v2592_v17 }
 0x2bd   :  { %v2627_v20 = vpop.permute.xlu0 %2626  ;;  %v2589_v33 = vpop.permute.xlu1 %2588  ;;  %v6133_v11 = vpack.c.bf16 %v2619_v27, %v2575_v47  ;;  %v6135_v22 = vpack.c.bf16 %v2618_v55, %v2574_v60  ;;  %v5767_v27 = vld [vmem:[%s10886_s6 + $0x46] ss:$8 sm:$0xf] }
 0x2be   :  { %v2591_v62 = vsel %vm10998_vm13, %v2587_v23, %v2589_v33  ;;  %v2594_v29 = vsel %vm10998_vm13, %v2589_v33, %v2583_v10  ;;  %vm11001_vm13 = vcmp.lt.s32.totalorder %v7187_v41, 106  ;;  %v2744_v33 = vrot.slane %v5767_v27, %v6843_v7 }
 0x2bf   :  { %v2620_v15 = vmul.f32 %v2609_v48, %v2591_v62  ;;  %v2621_v0 = vmul.f32 %v2613_v39, %v2594_v29  ;;  %6134 = vmatprep.subr.bf16.mxu0 %v6133_v11  ;;  %v2788_v11 = vrot.slane %v5768_v18, %v6843_v7  ;;  %v2736_v62 = vrot.slane %v5767_v27, %v6846_v8 }
 0x2c0   :  { %6136 = vmatpush1.bf16.msra.mxu0 %v6135_v22 }
 0x2c1   :  { %v2631_v53 = vpop.permute.xlu0 %2630  ;;  %v2629_v19 = vpop.permute.xlu1 %2628  ;;  %v6181_v25 = vpack.c.bf16 %v2621_v0, %v2577_v4  ;;  %v6183_v12 = vpack.c.bf16 %v2620_v15, %v2576_v3  ;;  %v2740_v4 = vrot.slane %v5767_v27, %v6860_v13  ;;  %v2776_v15 = vrot.slane %v5768_v18, %v6840_v6 }
 0x2c2   :  { %v2637_v57 = vsel %vm11001_vm13, %v2627_v20, %v2629_v19  ;;  %v2636_v54 = vsel %vm11001_vm13, %v2629_v19, %v2631_v53 }
 0x2c3   :  { %6182 = vmatprep.subr.bf16.mxu1 %v6181_v25  ;;  %v2665_v34 = vmul.f32 %v2657_v21, %v2637_v57  ;;  %v2662_v9 = vmul.f32 %v2645_v24, %v2636_v54 }
 0x2c4   :  { %6184 = vmatpush1.bf16.msra.mxu1 %v6183_v12 }
 0x2c5   :  { %v2671_v26 = vpop.permute.xlu0 %2670  ;;  %v2633_v31 = vpop.permute.xlu1 %2632 }
 0x2c6   :  { %v2635_v10 = vsel %vm11001_vm13, %v2631_v53, %v2633_v31  ;;  %v2638_v45 = vsel %vm11001_vm13, %v2633_v31, %v2627_v20  ;;  %v2780_v53 = vrot.slane %v5768_v18, %v6846_v8  ;;  %vm2809_vm13 = vcmp.lt.s32.totalorder %v7187_v41, 86 }
 0x2c7   :  { %v2663_v49 = vmul.f32 %v2649_v32, %v2635_v10  ;;  %v2664_v23 = vmul.f32 %v2653_v46, %v2638_v45 }
 0x2c9   :  { %v2675_v58 = vpop.permute.xlu0 %2674  ;;  %v2673_v16 = vpop.permute.xlu1 %2672 }
 0x2ca   :  { %v2681_v61 = vsel %vm11000_vm12, %v2671_v26, %v2673_v16  ;;  %v2680_v52 = vsel %vm11000_vm12, %v2673_v16, %v2675_v58 }
 0x2cb   :  { %v2709_v50 = vmul.f32 %v2701_v43, %v2681_v61  ;;  %v2706_v63 = vmul.f32 %v2689_v14, %v2680_v52  ;;  %v2832_v61 = vrot.slane %v5769_v42, %v6843_v7 }
 0x2cd   :  { %v2715_v38 = vpop.permute.xlu0 %2714  ;;  %v2677_v30 = vpop.permute.xlu1 %2676  ;;  %v6185_v56 = vpack.c.bf16 %v2709_v50, %v2665_v34  ;;  %v6139_v55 = vpack.c.bf16 %v2706_v63, %v2662_v9  ;;  %v2824_v63 = vrot.slane %v5769_v42, %v6846_v8 }
 0x2ce   :  { %v2679_v1 = vsel %vm11000_vm12, %v2675_v58, %v2677_v30  ;;  %v2682_v35 = vsel %vm11000_vm12, %v2677_v30, %v2671_v26  ;;  %vm2765_vm12 = vcmp.lt.s32.totalorder %v7187_v41, 91  ;;  %v2732_v26 = vrot.slane %v5767_v27, %v6840_v6 }
 0x2cf   :  { %v2707_v36 = vmul.f32 %v2693_v40, %v2679_v1  ;;  %v2708_v17 = vmul.f32 %v2697_v51, %v2682_v35  ;;  %6186 = vmatprep.subr.bf16.mxu1 %v6185_v56  ;;  %v2828_v1 = vrot.slane %v5769_v42, %v6860_v13  ;;  %v2820_v35 = vrot.slane %v5769_v42, %v6840_v6 }
 0x2d1   :  { %v2719_v48 = vpop.permute.xlu0 %2718  ;;  %v2717_v39 = vpop.permute.xlu1 %2716  ;;  %v6137_v60 = vpack.c.bf16 %v2707_v36, %v2663_v49  ;;  %v6187_v47 = vpack.c.bf16 %v2708_v17, %v2664_v23 }
 0x2d2   :  { %v2724_v22 = vsel %vm1555_vm6, %v2715_v38, %v2717_v39  ;;  %v2723_v43 = vsel %vm1555_vm6, %v2717_v39, %v2719_v48  ;;  %v2845_v39 = vld [vmem:[%s10883_s3] sm:$0xff] }
 0x2d3   :  { %6138 = vmatprep.subr.bf16.mxu0 %v6137_v60  ;;  %6188 = vmatpush1.bf16.msra.mxu1 %v6187_v47  ;;  %v2752_v19 = vmul.f32 %v2744_v33, %v2724_v22  ;;  %v2749_v51 = vmul.f32 %v2732_v26, %v2723_v43 }
 0x2d4   :  { %6140 = vmatpush1.bf16.msra.mxu0 %v6139_v55 }
 0x2d5   :  { %v2758_v28 = vpop.permute.xlu0 %2757  ;;  %v2721_v20 = vpop.permute.xlu1 %2720 }
 0x2d6   :  { %v2722_v31 = vsel %vm1555_vm6, %v2719_v48, %v2721_v20  ;;  %v2725_v21 = vsel %vm1555_vm6, %v2721_v20, %v2715_v38 }
 0x2d7   :  { %v2750_v40 = vmul.f32 %v2736_v62, %v2722_v31  ;;  %v2751_v34 = vmul.f32 %v2740_v4, %v2725_v21 }
 0x2d9   :  { %v2762_v29 = vpop.permute.xlu0 %2761  ;;  %v2760_v3 = vpop.permute.xlu1 %2759 }
 0x2da   :  { %v2768_v0 = vsel %vm2765_vm12, %v2758_v28, %v2760_v3  ;;  %v2767_v25 = vsel %vm2765_vm12, %v2760_v3, %v2762_v29 }
 0x2db   :  { %v2796_v12 = vmul.f32 %v2788_v11, %v2768_v0  ;;  %v2793_v16 = vmul.f32 %v2776_v15, %v2767_v25  ;;  %v5772_v25 = vld [vmem:[%s10886_s6 + $0x1] ss:$8 sm:$0xf] }
 0x2dc   :  { %v3170_v43 = vrot.slane %v5772_v25, %v6860_v13 }
 0x2dd   :  { %v2802_v57 = vpop.permute.xlu0 %2801  ;;  %v2764_v32 = vpop.permute.xlu1 %2763  ;;  %v6189_v58 = vpack.c.bf16 %v2796_v12, %v2752_v19  ;;  %v6143_v30 = vpack.c.bf16 %v2793_v16, %v2749_v51  ;;  %v3115_v12 = vld [vmem:[%s10886_s6] ss:$8 sm:$0xf]  ;;  %v3162_v16 = vrot.slane %v5772_v25, %v6840_v6 }
 0x2de   :  { %v2766_v46 = vsel %vm2765_vm12, %v2762_v29, %v2764_v32  ;;  %v2769_v14 = vsel %vm2765_vm12, %v2764_v32, %v2758_v28  ;;  %v3132_v42 = vrot.slane %v3115_v12, %v6843_v7  ;;  %v3120_v21 = vrot.slane %v3115_v12, %v6840_v6 }
 0x2df   :  { %v2794_v52 = vmul.f32 %v2780_v53, %v2766_v46  ;;  %v2795_v50 = vmul.f32 %v2784_v2, %v2769_v14  ;;  %6190 = vmatprep.subr.bf16.mxu1 %v6189_v58  ;;  %v3124_v32 = vrot.slane %v3115_v12, %v6846_v8  ;;  %v3166_v46 = vrot.slane %v5772_v25, %v6846_v8 }
 0x2e0   :  { %v3128_v14 = vrot.slane %v3115_v12, %v6860_v13 }
 0x2e1   :  { %v2804_v24 = vpop.permute.xlu1 %2803  ;;  %v6141_v10 = vpack.c.bf16 %v2794_v52, %v2750_v40  ;;  %v6191_v45 = vpack.c.bf16 %v2795_v50, %v2751_v34  ;;  %v2806_v54 = vpop.permute.xlu0 %2805 }
 0x2e2   :  { %v2812_v38 = vsel %vm2809_vm13, %v2802_v57, %v2804_v24  ;;  %v2811_v49 = vsel %vm2809_vm13, %v2804_v24, %v2806_v54 }
 0x2e3   :  { %6142 = vmatprep.subr.bf16.mxu0 %v6141_v10  ;;  %6192 = vmatpush1.bf16.msra.mxu1 %v6191_v45  ;;  %v2840_v56 = vmul.f32 %v2832_v61, %v2812_v38  ;;  %v2837_v60 = vmul.f32 %v2820_v35, %v2811_v49 }
 0x2e4   :  { %6144 = vmatpush1.bf16.msra.mxu0 %v6143_v30 }
 0x2e5   :  { %3076 = vmatprep.subr.mxu1 %v2840_v56  ;;  %v2808_v23 = vpop.permute.xlu1 %2807 }
 0x2e6   :  { %v2810_v36 = vsel %vm2809_vm13, %v2806_v54, %v2808_v23  ;;  %v2813_v17 = vsel %vm2809_vm13, %v2808_v23, %v2802_v57  ;;  %v3174_v57 = vrot.slane %v5772_v25, %v6843_v7 }
 0x2e7   :  { %v2838_v9 = vmul.f32 %v2824_v63, %v2810_v36  ;;  %v2839_v48 = vmul.f32 %v2828_v1, %v2813_v17 }
 0x2e9   :  { %3005 = vmatprep.subr.mxu0 %v2838_v9  ;;  %3077 = vmatpush1.msra.mxu1 %v2839_v48 }
 0x2ea   :  { %3006 = vmatpush1.msra.mxu0 %v2837_v60  ;;  %3093 = vmatmul.mubr.f32.vlgmr.msra.gmra.mrb[0].mxu1 %v2845_v39 }
 0x2eb   :  { %3022 = vmatmul.mubr.f32.vlgmr.msra.gmra.mrb[0].mxu0 %v2845_v39 }
 0x2f2   :  { %v2951_v47 = vpop.permute.xlu0 %2950 }
 0x3bd   :  { %v3094_v55 = vpop.f32.mrb[0].mxu1 }
 0x3be   :  { %v3023_v27 = vpop.f32.mrb[0].mxu0  ;;  %v3096_v18 = vpop.f32.mrb[1].mxu1  ;;  %v3095_v11 = vadd.f32 %v3094_v55, %v2951_v47  ;;  %v5773_v55 = vld [vmem:[%s10886_s6 + $0x2] ss:$8 sm:$0xf] }
 0x3bf   :  { %v3024_v28 = vadd.f32 %v3023_v27, %v2951_v47  ;;  %v3025_v20 = vpop.f32.mrb[1].mxu0  ;;  %v3097_v62 = vadd.f32 %v3096_v18, %v2951_v47  ;;  %v3216_v18 = vrot.slane %v5773_v55, %v6843_v7  ;;  %v3212_v25 = vrot.slane %v5773_v55, %v6860_v13 }
 0x3c0   :  { %v3026_v33 = vadd.f32 %v3025_v20, %v2951_v47  ;;  %v9272_v3 = vmax.f32 %v3095_v11, 0.0  ;;  %v5774_v47 = vld [vmem:[%s10886_s6 + $0x3] ss:$8 sm:$0xf] }
 0x3c1   :  { %v9264_v22 = vmax.f32 %v3024_v28, 0.0  ;;  %v9274_v4 = vmax.f32 %v3097_v62, 0.0  ;;  %v3254_v11 = vrot.slane %v5774_v47, %v6860_v13  ;;  %v3258_v62 = vrot.slane %v5774_v47, %v6843_v7 }
 0x3c2   :  { %v9266_v29 = vmax.f32 %v3026_v33, 0.0  ;;  %v3204_v33 = vrot.slane %v5773_v55, %v6840_v6 }
 0x3c3   :  { %3103 = vrot.lane.b32.xlu1 %v9264_v22, %s6735_s5 }
 0x3c4   :  { %3105 = vrot.lane.b32.xlu0 %v9266_v29, %s6735_s5 }
 0x3c7   :  { %3107 = vrot.lane.b32.xlu1 %v9272_v3, %s6735_s5 }
 0x3c8   :  { %3109 = vrot.lane.b32.xlu0 %v9274_v4, %s6735_s5 }
 0x3cb   :  { %3145 = vrot.lane.b32.xlu1 %v9264_v22, %s6736_s30 }
 0x3cc   :  { %3147 = vrot.lane.b32.xlu0 %v9266_v29, %s6736_s30 }
 0x3cf   :  { %3149 = vrot.lane.b32.xlu1 %v9272_v3, %s6736_s30 }
 0x3d0   :  { %3151 = vrot.lane.b32.xlu0 %v9274_v4, %s6736_s30 }
 0x3d3   :  { %3187 = vrot.lane.b32.xlu1 %v9264_v22, %s6691_s21 }
 0x3d4   :  { %3189 = vrot.lane.b32.xlu0 %v9266_v29, %s6691_s21 }
 0x3d7   :  { %3191 = vrot.lane.b32.xlu1 %v9272_v3, %s6691_s21 }
 0x3d8   :  { %3193 = vrot.lane.b32.xlu0 %v9274_v4, %s6691_s21  ;;  %s6766_s21 = smov [#allocation4]  }
 0x3d9   :  { %s5714_s5 = sshll.u32 %s6766_s21, 4  ;;  %s5715_s5 = int_to_ptr.vmem [resolvable:$true] %s5714_s5 }
 0x3da   :  { %s6662_s30 = scalar_lea.vmem %s5715_s5, 32  ;;  %p6667_p1 = scmp.lt.s32.totalorder %s5715_s5, %s5715_s5 }
 0x3db   :  { %3229 = vrot.lane.b32.xlu1 %v9264_v22, %s6737_s14  ;;  %p6663_p0 = scmp.ne.s32.totalorder %s5715_s5, %s6662_s30  ;;  %p6668_p2 = scmp.lt.s32.totalorder %s6662_s30, %s6662_s30 }
 0x3dc   :  { %3231 = vrot.lane.b32.xlu0 %v9266_v29, %s6737_s14 }
 0x3dd   :  { %p6669_p3 = por %p6668_p2, %p6667_p1 }
 0x3df   :  { %3233 = vrot.lane.b32.xlu1 %v9272_v3, %s6737_s14  ;;  %p6670_p4 = pnand %p6669_p3, %p6663_p0 }
 0x3e0   :  { %3235 = vrot.lane.b32.xlu0 %v9274_v4, %s6737_s14 }
 0x3e3   :  { %3271 = vrot.lane.b32.xlu1 %v9264_v22, %s6738_s15 }
 0x3e4   :  { %3273 = vrot.lane.b32.xlu0 %v9266_v29, %s6738_s15 }
 0x3e7   :  { %3275 = vrot.lane.b32.xlu1 %v9272_v3, %s6738_s15 }
 0x3e8   :  { %3277 = vrot.lane.b32.xlu0 %v9274_v4, %s6738_s15  ;;  %s11232_s15 = smov 48  }
 0x3eb   :  { %3313 = vrot.lane.b32.xlu1 %v9264_v22, %s6739_s19 }
 0x3ec   :  { %3315 = vrot.lane.b32.xlu0 %v9266_v29, %s6739_s19 }
 0x3ef   :  { %3317 = vrot.lane.b32.xlu1 %v9272_v3, %s6739_s19 }
 0x3f0   :  { %3319 = vrot.lane.b32.xlu0 %v9274_v4, %s6739_s19  ;;  %s11233_s19 = smov 43  }
 0x3f3   :  { %3355 = vrot.lane.b32.xlu1 %v9264_v22, %s6740_s22 }
 0x3f4   :  { %3357 = vrot.lane.b32.xlu0 %v9266_v29, %s6740_s22 }
 0x3f7   :  { %3359 = vrot.lane.b32.xlu1 %v9272_v3, %s6740_s22 }
 0x3f8   :  { %3361 = vrot.lane.b32.xlu0 %v9274_v4, %s6740_s22 }
 0x3fb   :  { %3397 = vrot.lane.b32.xlu1 %v9264_v22, %s6741_s20 }
 0x3fc   :  { %3399 = vrot.lane.b32.xlu0 %v9266_v29, %s6741_s20 }
 0x3ff   :  { %3401 = vrot.lane.b32.xlu1 %v9272_v3, %s6741_s20 }
 0x400   :  { %3403 = vrot.lane.b32.xlu0 %v9274_v4, %s6741_s20 }
 0x403   :  { %3439 = vrot.lane.b32.xlu1 %v9264_v22, %s6742_s23 }
 0x404   :  { %3441 = vrot.lane.b32.xlu0 %v9266_v29, %s6742_s23 }
 0x407   :  { %3443 = vrot.lane.b32.xlu1 %v9272_v3, %s6742_s23 }
 0x408   :  { %3445 = vrot.lane.b32.xlu0 %v9274_v4, %s6742_s23 }
 0x40b   :  { %3481 = vrot.lane.b32.xlu1 %v9264_v22, %s6743_s24 }
 0x40c   :  { %3483 = vrot.lane.b32.xlu0 %v9266_v29, %s6743_s24 }
 0x40f   :  { %3485 = vrot.lane.b32.xlu1 %v9272_v3, %s6743_s24 }
 0x410   :  { %3487 = vrot.lane.b32.xlu0 %v9274_v4, %s6743_s24 }
 0x413   :  { %3523 = vrot.lane.b32.xlu1 %v9264_v22, %s6744_s2 }
 0x414   :  { %3525 = vrot.lane.b32.xlu0 %v9266_v29, %s6744_s2 }
 0x417   :  { %3527 = vrot.lane.b32.xlu1 %v9272_v3, %s6744_s2 }
 0x418   :  { %3529 = vrot.lane.b32.xlu0 %v9274_v4, %s6744_s2 }
 0x41b   :  { %3565 = vrot.lane.b32.xlu1 %v9264_v22, %s6745_s0 }
 0x41c   :  { %3567 = vrot.lane.b32.xlu0 %v9266_v29, %s6745_s0 }
 0x41f   :  { %3569 = vrot.lane.b32.xlu1 %v9272_v3, %s6745_s0 }
 0x420   :  { %3571 = vrot.lane.b32.xlu0 %v9274_v4, %s6745_s0 }
 0x423   :  { %3637 = vrot.lane.b32.xlu1 %v9264_v22, %s6746_s25 }
 0x424   :  { %3639 = vrot.lane.b32.xlu0 %v9266_v29, %s6746_s25 }
 0x427   :  { %3641 = vrot.lane.b32.xlu1 %v9272_v3, %s6746_s25 }
 0x428   :  { %3643 = vrot.lane.b32.xlu0 %v9274_v4, %s6746_s25 }
 0x42b   :  { %3679 = vrot.lane.b32.xlu1 %v9264_v22, %s6747_s26 }
 0x42c   :  { %3681 = vrot.lane.b32.xlu0 %v9266_v29, %s6747_s26 }
 0x42f   :  { %3683 = vrot.lane.b32.xlu1 %v9272_v3, %s6747_s26 }
 0x430   :  { %3685 = vrot.lane.b32.xlu0 %v9274_v4, %s6747_s26  ;;  %s6759_s26 = smov 109  }
 0x433   :  { %3721 = vrot.lane.b32.xlu1 %v9264_v22, %s6748_s27 }
 0x434   :  { %3723 = vrot.lane.b32.xlu0 %v9266_v29, %s6748_s27 }
 0x435   :  { %v3104_v15 = vpop.permute.xlu1 %3103 }
 0x436   :  { %v3106_v0 = vpop.permute.xlu0 %3105 }
 0x437   :  { %3725 = vrot.lane.b32.xlu1 %v9272_v3, %s6748_s27  ;;  %v3113_v52 = vsel %vm1769_vm9, %v3104_v15, %v3106_v0 }
 0x438   :  { %3727 = vrot.lane.b32.xlu0 %v9274_v4, %s6748_s27  ;;  %v3139_v35 = vmul.f32 %v3128_v14, %v3113_v52  ;;  %s11234_s27 = smov 106  }
 0x439   :  { %v3108_v53 = vpop.permute.xlu1 %3107 }
 0x43a   :  { %v3110_v19 = vpop.permute.xlu0 %3109  ;;  %v3112_v31 = vsel %vm1769_vm9, %v3106_v0, %v3108_v53 }
 0x43b   :  { %3763 = vrot.lane.b32.xlu1 %v9264_v22, %s6749_s28  ;;  %v3111_v61 = vsel %vm1769_vm9, %v3108_v53, %v3110_v19  ;;  %v3114_v40 = vsel %vm1769_vm9, %v3110_v19, %v3104_v15  ;;  %v3140_v50 = vmul.f32 %v3132_v42, %v3112_v31  ;;  %v3208_v15 = vrot.slane %v5773_v55, %v6846_v8 }
 0x43c   :  { %3765 = vrot.lane.b32.xlu0 %v9266_v29, %s6749_s28  ;;  %v3137_v30 = vmul.f32 %v3120_v21, %v3111_v61  ;;  %v3138_v56 = vmul.f32 %v3124_v32, %v3114_v40  ;;  %v3246_v53 = vrot.slane %v5774_v47, %v6840_v6  ;;  %v3250_v19 = vrot.slane %v5774_v47, %v6846_v8 }
 0x43d   :  { %v3146_v2 = vpop.permute.xlu1 %3145  ;;  %vm11243_vm9 = vcmp.lt.s32.totalorder %v7187_v41, 118 }
 0x43e   :  { %v3148_v26 = vpop.permute.xlu0 %3147 }
 0x43f   :  { %3767 = vrot.lane.b32.xlu1 %v9272_v3, %s6749_s28  ;;  %v3155_v58 = vsel %vm1812_vm10, %v3146_v2, %v3148_v26 }
 0x440   :  { %3769 = vrot.lane.b32.xlu0 %v9274_v4, %s6749_s28  ;;  %v3181_v10 = vmul.f32 %v3170_v43, %v3155_v58  ;;  %s11235_s28 = smov 101  }
 0x441   :  { %v3150_v34 = vpop.permute.xlu1 %3149 }
 0x442   :  { %v3154_v51 = vsel %vm1812_vm10, %v3148_v26, %v3150_v34  ;;  %v3152_v24 = vpop.permute.xlu0 %3151  ;;  %v6243_v48 = vpack.c.bf16 %v3181_v10, %v3139_v35 }
 0x443   :  { %v3182_v45 = vmul.f32 %v3174_v57, %v3154_v51  ;;  %v3153_v54 = vsel %vm1812_vm10, %v3150_v34, %v3152_v24  ;;  %v3156_v38 = vsel %vm1812_vm10, %v3152_v24, %v3146_v2  ;;  %3805 = vrot.lane.b32.xlu1 %v9264_v22, %s11232_s15  ;;  %vm11244_vm10 = vcmp.lt.s32.totalorder %v7187_v41, 58 }
 0x444   :  { %v3179_v63 = vmul.f32 %v3162_v16, %v3153_v54  ;;  %v3180_v1 = vmul.f32 %v3166_v46, %v3156_v38  ;;  %3807 = vrot.lane.b32.xlu0 %v9266_v29, %s11232_s15  ;;  %v5776_v38 = vld [vmem:[%s10886_s6 + $0x5] ss:$8 sm:$0xf] }
 0x445   :  { %v3188_v49 = vpop.permute.xlu1 %3187  ;;  %v6241_v23 = vpack.c.bf16 %v3182_v45, %v3140_v50 }
 0x446   :  { %v6195_v36 = vpack.c.bf16 %v3179_v63, %v3137_v30  ;;  %v3190_v17 = vpop.permute.xlu0 %3189  ;;  %v6193_v9 = vpack.c.bf16 %v3180_v1, %v3138_v56  ;;  %v5775_v56 = vld [vmem:[%s10886_s6 + $0x4] ss:$8 sm:$0xf]  ;;  %v3334_v1 = vrot.slane %v5776_v38, %v6846_v8 }
 0x447   :  { %3809 = vrot.lane.b32.xlu1 %v9272_v3, %s11232_s15  ;;  %6242 = vmatprep.subr.bf16.mxu1 %v6241_v23  ;;  %v3197_v26 = vsel %vm208_vm2, %v3188_v49, %v3190_v17  ;;  %v3292_v63 = vrot.slane %v5775_v56, %v6846_v8  ;;  %v3300_v23 = vrot.slane %v5775_v56, %v6843_v7 }
 0x448   :  { %3811 = vrot.lane.b32.xlu0 %v9274_v4, %s11232_s15  ;;  %6194 = vmatprep.subr.bf16.mxu0 %v6193_v9  ;;  %v3223_v34 = vmul.f32 %v3212_v25, %v3197_v26 }
 0x449   :  { %6244 = vmatpush1.bf16.msra.mxu1 %v6243_v48  ;;  %6196 = vmatpush1.bf16.msra.mxu0 %v6195_v36  ;;  %v3192_v39 = vpop.permute.xlu1 %3191  ;;  %v3288_v36 = vrot.slane %v5775_v56, %v6840_v6  ;;  %v3338_v48 = vrot.slane %v5776_v38, %v6860_v13 }
 0x44a   :  { %v3194_v60 = vpop.permute.xlu0 %3193  ;;  %v3196_v20 = vsel %vm208_vm2, %v3190_v17, %v3192_v39 }
 0x44b   :  { %3847 = vrot.lane.b32.xlu1 %v9264_v22, %s11233_s19  ;;  %v3195_v12 = vsel %vm208_vm2, %v3192_v39, %v3194_v60  ;;  %v3198_v2 = vsel %vm208_vm2, %v3194_v60, %v3188_v49  ;;  %v3224_v31 = vmul.f32 %v3216_v18, %v3196_v20  ;;  %v3330_v39 = vrot.slane %v5776_v38, %v6840_v6 }
 0x44c   :  { %3849 = vrot.lane.b32.xlu0 %v9266_v29, %s11233_s19  ;;  %v3221_v46 = vmul.f32 %v3204_v33, %v3195_v12  ;;  %v3222_v14 = vmul.f32 %v3208_v15, %v3198_v2  ;;  %v3342_v60 = vrot.slane %v5776_v38, %v6843_v7  ;;  %v3296_v20 = vrot.slane %v5775_v56, %v6860_v13 }
 0x44d   :  { %v3230_v27 = vpop.permute.xlu1 %3229  ;;  %vm11239_vm2 = vcmp.lt.s32.totalorder %v7187_v41, 123 }
 0x44e   :  { %v3232_v28 = vpop.permute.xlu0 %3231 }
 0x44f   :  { %3851 = vrot.lane.b32.xlu1 %v9272_v3, %s11233_s19  ;;  %v3239_v0 = vsel %vm1899_vm11, %v3230_v27, %v3232_v28 }
 0x450   :  { %3853 = vrot.lane.b32.xlu0 %v9274_v4, %s11233_s19  ;;  %v3265_v57 = vmul.f32 %v3254_v11, %v3239_v0  ;;  %s11238_s19 = smov 86  }
 0x451   :  { %v3234_v42 = vpop.permute.xlu1 %3233 }
 0x452   :  { %v3238_v21 = vsel %vm1899_vm11, %v3232_v28, %v3234_v42  ;;  %v3236_v43 = vpop.permute.xlu0 %3235  ;;  %v6247_v45 = vpack.c.bf16 %v3265_v57, %v3223_v34 }
 0x453   :  { %v3266_v32 = vmul.f32 %v3258_v62, %v3238_v21  ;;  %v3237_v58 = vsel %vm1899_vm11, %v3234_v42, %v3236_v43  ;;  %v3240_v16 = vsel %vm1899_vm11, %v3236_v43, %v3230_v27  ;;  %3889 = vrot.lane.b32.xlu1 %v9264_v22, %s6752_s12  ;;  %vm11245_vm11 = vmmov %vm11243_vm9 }
 0x454   :  { %v3263_v61 = vmul.f32 %v3246_v53, %v3237_v58  ;;  %v3264_v40 = vmul.f32 %v3250_v19, %v3240_v16  ;;  %3891 = vrot.lane.b32.xlu0 %v9266_v29, %s6752_s12  ;;  %v5777_v58 = vld [vmem:[%s10886_s6 + $0x6] ss:$8 sm:$0xf] }
 0x455   :  { %v3272_v52 = vpop.permute.xlu1 %3271  ;;  %v6245_v50 = vpack.c.bf16 %v3266_v32, %v3224_v31 }
 0x456   :  { %v6199_v51 = vpack.c.bf16 %v3263_v61, %v3221_v46  ;;  %v3274_v24 = vpop.permute.xlu0 %3273  ;;  %v6197_v10 = vpack.c.bf16 %v3264_v40, %v3222_v14  ;;  %v5778_v46 = vld [vmem:[%s10886_s6 + $0x7] ss:$8 sm:$0xf]  ;;  %v3376_v61 = vrot.slane %v5777_v58, %v6846_v8 }
 0x457   :  { %3893 = vrot.lane.b32.xlu1 %v9272_v3, %s6752_s12  ;;  %6246 = vmatprep.subr.bf16.mxu1 %v6245_v50  ;;  %v3281_v33 = vsel %vm1943_vm14, %v3272_v52, %v3274_v24  ;;  %v3418_v40 = vrot.slane %v5778_v46, %v6846_v8  ;;  %v3372_v50 = vrot.slane %v5777_v58, %v6840_v6 }
 0x458   :  { %3895 = vrot.lane.b32.xlu0 %v9274_v4, %s6752_s12  ;;  %6198 = vmatprep.subr.bf16.mxu0 %v6197_v10  ;;  %v3307_v31 = vmul.f32 %v3296_v20, %v3281_v33  ;;  %v3426_v38 = vrot.slane %v5778_v46, %v6843_v7  ;;  %s6758_s12 = smov 124  }
 0x459   :  { %6248 = vmatpush1.bf16.msra.mxu1 %v6247_v45  ;;  %6200 = vmatpush1.bf16.msra.mxu0 %v6199_v51  ;;  %v3276_v54 = vpop.permute.xlu1 %3275  ;;  %v3384_v51 = vrot.slane %v5777_v58, %v6843_v7  ;;  %v3422_v45 = vrot.slane %v5778_v46, %v6860_v13 }
 0x45a   :  { %v3278_v30 = vpop.permute.xlu0 %3277  ;;  %v3280_v47 = vsel %vm1943_vm14, %v3274_v24, %v3276_v54 }
 0x45b   :  { %3931 = vrot.lane.b32.xlu1 %v9264_v22, %s11234_s27  ;;  %v3282_v35 = vsel %vm1943_vm14, %v3278_v30, %v3272_v52  ;;  %v3279_v55 = vsel %vm1943_vm14, %v3276_v54, %v3278_v30  ;;  %v3308_v0 = vmul.f32 %v3300_v23, %v3280_v47  ;;  %v3414_v54 = vrot.slane %v5778_v46, %v6840_v6  ;;  %vm11246_vm14 = vmmov %vm11243_vm9 }
 0x45c   :  { %3933 = vrot.lane.b32.xlu0 %v9266_v29, %s11234_s27  ;;  %v3306_v27 = vmul.f32 %v3292_v63, %v3282_v35  ;;  %v3305_v53 = vmul.f32 %v3288_v36, %v3279_v55 }
 0x45d   :  { %v3314_v49 = vpop.permute.xlu1 %3313 }
 0x45e   :  { %v3316_v17 = vpop.permute.xlu0 %3315 }
 0x45f   :  { %v3323_v9 = vsel %vm1987_vm15, %v3314_v49, %v3316_v17  ;;  %3935 = vrot.lane.b32.xlu1 %v9272_v3, %s11234_s27 }
 0x460   :  { %v3348_v18 = vmul.f32 %v3334_v1, %v3323_v9  ;;  %3937 = vrot.lane.b32.xlu0 %v9274_v4, %s11234_s27  ;;  %s11276_s27 = smov 126  }
 0x461   :  { %v3318_v28 = vpop.permute.xlu1 %3317 }
 0x462   :  { %v3322_v11 = vsel %vm1987_vm15, %v3316_v17, %v3318_v28  ;;  %v3320_v62 = vpop.permute.xlu0 %3319  ;;  %v6201_v15 = vpack.c.bf16 %v3348_v18, %v3306_v27 }
 0x463   :  { %v3321_v19 = vsel %vm1987_vm15, %v3318_v28, %v3320_v62  ;;  %v3324_v25 = vsel %vm1987_vm15, %v3320_v62, %v3314_v49  ;;  %3973 = vrot.lane.b32.xlu1 %v9264_v22, %s11235_s28  ;;  %v3349_v12 = vmul.f32 %v3338_v48, %v3322_v11  ;;  %v3380_v49 = vrot.slane %v5777_v58, %v6860_v13  ;;  %vm11247_vm15 = vmmov %vm11243_vm9 }
 0x464   :  { %v3347_v2 = vmul.f32 %v3330_v39, %v3324_v25  ;;  %v3350_v42 = vmul.f32 %v3342_v60, %v3321_v19  ;;  %3975 = vrot.lane.b32.xlu0 %v9266_v29, %s11235_s28  ;;  %6202 = vmatprep.subr.bf16.mxu0 %v6201_v15  ;;  %v4142_v15 = vld [vmem:[%s10883_s3 + $0x8] sm:$0xff] }
 0x465   :  { %v3356_v26 = vpop.permute.xlu1 %3355  ;;  %v6251_v32 = vpack.c.bf16 %v3349_v12, %v3307_v31  ;;  %5797 = vmatprep.mubr.msk.f32.mxu1 %vm2953_vm7, %v4142_v15  ;;  %v5780_v25 = vld [vmem:[%s10886_s6 + $0x21] ss:$8 sm:$0xf]  ;;  %5796 = vmatprep.mubr.msk.f32.mxu0 %vm2953_vm7, %v4142_v15 }
 0x466   :  { %v6203_v21 = vpack.c.bf16 %v3347_v2, %v3305_v53  ;;  %v3358_v43 = vpop.permute.xlu0 %3357  ;;  %v6249_v57 = vpack.c.bf16 %v3350_v42, %v3308_v0  ;;  %v5779_v53 = vld [vmem:[%s10886_s6 + $0x20] ss:$8 sm:$0xf]  ;;  %v3502_v42 = vrot.slane %v5780_v25, %v6846_v8  ;;  %v3506_v58 = vrot.slane %v5780_v25, %v6860_v13 }
 0x467   :  { %3977 = vrot.lane.b32.xlu1 %v9272_v3, %s11235_s28  ;;  %v3365_v34 = vsel %vm2031_vm4, %v3356_v26, %v3358_v43  ;;  %v3460_v2 = vrot.slane %v5779_v53, %v6846_v8 }
 0x468   :  { %3979 = vrot.lane.b32.xlu0 %v9274_v4, %s11235_s28  ;;  %6204 = vmatpush1.bf16.msra.mxu0 %v6203_v21  ;;  %v3390_v30 = vmul.f32 %v3376_v61, %v3365_v34  ;;  %v3510_v61 = vrot.slane %v5780_v25, %v6843_v7  ;;  %v3464_v34 = vrot.slane %v5779_v53, %v6860_v13  ;;  %s6757_s28 = smov 125  }
 0x469   :  { %6250 = vmatprep.subr.bf16.mxu1 %v6249_v57  ;;  %v3360_v16 = vpop.permute.xlu1 %3359  ;;  %v3468_v57 = vrot.slane %v5779_v53, %v6843_v7 }
 0x46a   :  { %6252 = vmatpush1.bf16.msra.mxu1 %v6251_v32  ;;  %v3362_v14 = vpop.permute.xlu0 %3361  ;;  %v3364_v23 = vsel %vm2031_vm4, %v3358_v43, %v3360_v16  ;;  %v3456_v43 = vrot.slane %v5779_v53, %v6840_v6 }
 0x46b   :  { %4015 = vrot.lane.b32.xlu1 %v9264_v22, %s11236_s16  ;;  %v3363_v56 = vsel %vm2031_vm4, %v3360_v16, %v3362_v14  ;;  %v3366_v63 = vsel %vm2031_vm4, %v3362_v14, %v3356_v26  ;;  %v3391_v20 = vmul.f32 %v3380_v49, %v3364_v23  ;;  %v3498_v14 = vrot.slane %v5780_v25, %v6840_v6  ;;  %vm11248_vm4 = vmmov %vm11244_vm10 }
 0x46c   :  { %4017 = vrot.lane.b32.xlu0 %v9266_v29, %s11236_s16  ;;  %v3389_v48 = vmul.f32 %v3372_v50, %v3366_v63  ;;  %v3392_v39 = vmul.f32 %v3384_v51, %v3363_v56  ;;  %vm11250_vm7 = vmmov %vm11248_vm4 }
 0x46d   :  { %v3398_v52 = vpop.permute.xlu1 %3397 }
 0x46e   :  { %v3400_v24 = vpop.permute.xlu0 %3399 }
 0x46f   :  { %v3407_v10 = vsel %vm2075_vm5, %v3398_v52, %v3400_v24  ;;  %4019 = vrot.lane.b32.xlu1 %v9272_v3, %s11236_s16 }
 0x470   :  { %v3432_v1 = vmul.f32 %v3418_v40, %v3407_v10  ;;  %4021 = vrot.lane.b32.xlu0 %v9274_v4, %s11236_s16  ;;  %v4243_v40 = vld [vmem:[%s10884_s4] sm:$0xff]  ;;  %s11279_s4 = smov 110  }
 0x471   :  { %v3402_v35 = vpop.permute.xlu1 %3401 }
 0x472   :  { %v3406_v36 = vsel %vm2075_vm5, %v3400_v24, %v3402_v35  ;;  %v3404_v17 = vpop.permute.xlu0 %3403  ;;  %v6205_v9 = vpack.c.bf16 %v3432_v1, %v3390_v30 }
 0x473   :  { %v3405_v60 = vsel %vm2075_vm5, %v3402_v35, %v3404_v17  ;;  %v3408_v47 = vsel %vm2075_vm5, %v3404_v17, %v3398_v52  ;;  %4057 = vrot.lane.b32.xlu1 %v9264_v22, %s11237_s13  ;;  %v3433_v55 = vmul.f32 %v3422_v45, %v3406_v36  ;;  %vm11249_vm5 = vmmov %vm11248_vm4 }
 0x474   :  { %v3431_v27 = vmul.f32 %v3414_v54, %v3408_v47  ;;  %v3434_v18 = vmul.f32 %v3426_v38, %v3405_v60  ;;  %4059 = vrot.lane.b32.xlu0 %v9266_v29, %s11237_s13  ;;  %6206 = vmatprep.subr.bf16.mxu0 %v6205_v9  ;;  %v5781_v60 = vld [vmem:[%s10886_s6 + $0x22] ss:$8 sm:$0xf] }
 0x475   :  { %v3440_v28 = vpop.permute.xlu1 %3439  ;;  %v6255_v0 = vpack.c.bf16 %v3433_v55, %v3391_v20  ;;  %v5782_v55 = vld [vmem:[%s10886_s6 + $0x23] ss:$8 sm:$0xf]  ;;  %v3552_v15 = vrot.slane %v5781_v60, %v6843_v7 }
 0x476   :  { %v6207_v33 = vpack.c.bf16 %v3431_v27, %v3389_v48  ;;  %v3442_v11 = vpop.permute.xlu0 %3441  ;;  %v6253_v62 = vpack.c.bf16 %v3434_v18, %v3392_v39  ;;  %v3544_v18 = vrot.slane %v5781_v60, %v6846_v8  ;;  %v3590_v53 = vrot.slane %v5782_v55, %v6860_v13 }
 0x477   :  { %4061 = vrot.lane.b32.xlu1 %v9272_v3, %s11237_s13  ;;  %v3449_v26 = vsel %vm2119_vm8, %v3440_v28, %v3442_v11 }
 0x478   :  { %4063 = vrot.lane.b32.xlu0 %v9274_v4, %s11237_s13  ;;  %6208 = vmatpush1.bf16.msra.mxu0 %v6207_v33  ;;  %v3474_v16 = vmul.f32 %v3460_v2, %v3449_v26  ;;  %v3594_v2 = vrot.slane %v5782_v55, %v6843_v7 }
 0x479   :  { %6254 = vmatprep.subr.bf16.mxu1 %v6253_v62  ;;  %v3444_v19 = vpop.permute.xlu1 %3443  ;;  %v3540_v62 = vrot.slane %v5781_v60, %v6840_v6 }
 0x47a   :  { %6256 = vmatpush1.bf16.msra.mxu1 %v6255_v0  ;;  %v3446_v12 = vpop.permute.xlu0 %3445  ;;  %v3448_v24 = vsel %vm2119_vm8, %v3442_v11, %v3444_v19 }
 0x47b   :  { %4099 = vrot.lane.b32.xlu1 %v9264_v22, %s11238_s19  ;;  %v3447_v52 = vsel %vm2119_vm8, %v3444_v19, %v3446_v12  ;;  %v3450_v50 = vsel %vm2119_vm8, %v3446_v12, %v3440_v28  ;;  %v3475_v23 = vmul.f32 %v3464_v34, %v3448_v24  ;;  %v3586_v28 = vrot.slane %v5782_v55, %v6846_v8 }
 0x47c   :  { %4101 = vrot.lane.b32.xlu0 %v9266_v29, %s11238_s19  ;;  %v3473_v63 = vmul.f32 %v3456_v43, %v3450_v50  ;;  %v3476_v1 = vmul.f32 %v3468_v57, %v3447_v52  ;;  %v3582_v12 = vrot.slane %v5782_v55, %v6840_v6  ;;  %vm11251_vm8 = vcmp.lt.s32.totalorder %v7187_v41, 53 }
 0x47d   :  { %v3482_v31 = vpop.permute.xlu1 %3481 }
 0x47e   :  { %v3484_v21 = vpop.permute.xlu0 %3483 }
 0x47f   :  { %v3491_v32 = vsel %vm2163_vm3, %v3482_v31, %v3484_v21  ;;  %4103 = vrot.lane.b32.xlu1 %v9272_v3, %s11238_s19 }
 0x480   :  { %v3516_v46 = vmul.f32 %v3502_v42, %v3491_v32  ;;  %4105 = vrot.lane.b32.xlu0 %v9274_v4, %s11238_s19  ;;  %v3548_v42 = vrot.slane %v5781_v60, %v6860_v13 }
 0x481   :  { %v3486_v51 = vpop.permute.xlu1 %3485 }
 0x482   :  { %v3490_v10 = vsel %vm2163_vm3, %v3484_v21, %v3486_v51  ;;  %v3488_v45 = vpop.permute.xlu0 %3487  ;;  %v6209_v54 = vpack.c.bf16 %v3516_v46, %v3474_v16  ;;  %v5783_v16 = vld [vmem:[%s10886_s6 + $0x24] ss:$8 sm:$0xf] }
 0x483   :  { %v3517_v38 = vmul.f32 %v3506_v58, %v3490_v10  ;;  %v3489_v30 = vsel %vm2163_vm3, %v3486_v51, %v3488_v45  ;;  %v3492_v56 = vsel %vm2163_vm3, %v3488_v45, %v3482_v31  ;;  %4246 = vperm.xlu1 %6657, %v4243_v40   ;;  %v5784_v40 = vld [vmem:[%s10886_s6 + $0x25] ss:$8 sm:$0xf]  ;;  %v3620_v45 = vrot.slane %v5783_v16, %v6860_v13 }
 0x484   :  { %v3515_v35 = vmul.f32 %v3498_v14, %v3492_v56  ;;  %v3518_v49 = vmul.f32 %v3510_v61, %v3489_v30  ;;  %6210 = vmatprep.subr.bf16.mxu0 %v6209_v54  ;;  %v3654_v30 = vrot.slane %v5784_v40, %v6840_v6 }
 0x485   :  { %v3524_v36 = vpop.permute.xlu1 %3523  ;;  %v6259_v39 = vpack.c.bf16 %v3517_v38, %v3475_v23  ;;  %v3612_v38 = vrot.slane %v5783_v16, %v6840_v6  ;;  %v3616_v23 = vrot.slane %v5783_v16, %v6846_v8 }
 0x486   :  { %v6211_v17 = vpack.c.bf16 %v3515_v35, %v3473_v63  ;;  %v3526_v9 = vpop.permute.xlu0 %3525  ;;  %v6257_v48 = vpack.c.bf16 %v3518_v49, %v3476_v1  ;;  %v3658_v49 = vrot.slane %v5784_v40, %v6846_v8 }
 0x487   :  { %v3533_v20 = vsel %vm2207_vm1, %v3524_v36, %v3526_v9 }
 0x488   :  { %6212 = vmatpush1.bf16.msra.mxu0 %v6211_v17  ;;  %6258 = vmatprep.subr.bf16.mxu1 %v6257_v48  ;;  %v3558_v19 = vmul.f32 %v3544_v18, %v3533_v20  ;;  %v3666_v17 = vrot.slane %v5784_v40, %v6843_v7  ;;  %v3630_v20 = vmul.f32 %v3616_v23, %v9266_v29  ;;  %v5786_v29 = vld [vmem:[%s10886_s6 + $0x27] ss:$8 sm:$0xf] }
 0x489   :  { %6260 = vmatpush1.bf16.msra.mxu1 %v6259_v39  ;;  %v3528_v47 = vpop.permute.xlu1 %3527 }
 0x48a   :  { %v3530_v27 = vpop.permute.xlu0 %3529  ;;  %v3532_v43 = vsel %vm2207_vm1, %v3526_v9, %v3528_v47  ;;  %v3624_v9 = vrot.slane %v5783_v16, %v6843_v7  ;;  %v3742_v16 = vrot.slane %v5786_v29, %v6846_v8 }
 0x48b   :  { %v3531_v26 = vsel %vm2207_vm1, %v3528_v47, %v3530_v27  ;;  %v3534_v31 = vsel %vm2207_vm1, %v3530_v27, %v3524_v36  ;;  %v3559_v24 = vmul.f32 %v3548_v42, %v3532_v43  ;;  %v3662_v36 = vrot.slane %v5784_v40, %v6860_v13 }
 0x48c   :  { %v3557_v34 = vmul.f32 %v3540_v62, %v3534_v31  ;;  %v3560_v52 = vmul.f32 %v3552_v15, %v3531_v26  ;;  %v3631_v47 = vmul.f32 %v3620_v45, %v9272_v3  ;;  %v3632_v15 = vmul.f32 %v3624_v9, %v9274_v4 }
 0x48d   :  { %v3566_v33 = vpop.permute.xlu1 %3565  ;;  %v3750_v40 = vrot.slane %v5786_v29, %v6843_v7 }
 0x48e   :  { %v3568_v11 = vpop.permute.xlu0 %3567 }
 0x48f   :  { %v3575_v0 = vsel %vm2251_vm0, %v3566_v33, %v3568_v11 }
 0x490   :  { %v3600_v25 = vmul.f32 %v3586_v28, %v3575_v0 }
 0x491   :  { %v3570_v21 = vpop.permute.xlu1 %3569 }
 0x492   :  { %v3574_v57 = vsel %vm2251_vm0, %v3568_v11, %v3570_v21  ;;  %v3572_v32 = vpop.permute.xlu0 %3571  ;;  %v6213_v58 = vpack.c.bf16 %v3600_v25, %v3558_v19 }
 0x493   :  { %v3601_v46 = vmul.f32 %v3590_v53, %v3574_v57  ;;  %v3573_v14 = vsel %vm2251_vm0, %v3570_v21, %v3572_v32  ;;  %v3576_v61 = vsel %vm2251_vm0, %v3572_v32, %v3566_v33  ;;  %vm11240_vm0 = vmmov %vm11239_vm2  ;;  %v3629_v33 = vmul.f32 %v3612_v38, %v9264_v22  ;;  %v5785_v22 = vld [vmem:[%s10886_s6 + $0x26] ss:$8 sm:$0xf] }
 0x494   :  { %v3599_v50 = vmul.f32 %v3582_v12, %v3576_v61  ;;  %v3602_v51 = vmul.f32 %v3594_v2, %v3573_v14  ;;  %6214 = vmatprep.subr.bf16.mxu0 %v6213_v58  ;;  %vm11241_vm1 = vmmov %vm11240_vm0  ;;  %v3696_v26 = vrot.slane %v5785_v22, %v6840_v6  ;;  %v3700_v31 = vrot.slane %v5785_v22, %v6846_v8 }
 0x495   :  { %v3638_v10 = vpop.permute.xlu1 %3637  ;;  %v6263_v1 = vpack.c.bf16 %v3601_v46, %v3559_v24  ;;  %vm11242_vm3 = vmmov %vm11240_vm0  ;;  %v3738_v21 = vrot.slane %v5786_v29, %v6840_v6  ;;  %v3704_v32 = vrot.slane %v5785_v22, %v6860_v13  ;;  %v3708_v14 = vrot.slane %v5785_v22, %v6843_v7 }
 0x496   :  { %v6215_v54 = vpack.c.bf16 %v3599_v50, %v3557_v34  ;;  %v3640_v56 = vpop.permute.xlu0 %3639  ;;  %v6261_v63 = vpack.c.bf16 %v3602_v51, %v3560_v52  ;;  %v3746_v61 = vrot.slane %v5786_v29, %v6860_v13 }
 0x497   :  { %v3647_v35 = vsel %vm11239_vm2, %v3638_v10, %v3640_v56  ;;  %vm11252_vm2 = vcmp.lt.s32.totalorder %v7187_v41, 48 }
 0x498   :  { %6216 = vmatpush1.bf16.msra.mxu0 %v6215_v54  ;;  %6262 = vmatprep.subr.bf16.mxu1 %v6261_v63  ;;  %v3671_v39 = vmul.f32 %v3654_v30, %v3647_v35 }
 0x499   :  { %6264 = vmatpush1.bf16.msra.mxu1 %v6263_v1  ;;  %v3642_v48 = vpop.permute.xlu1 %3641 }
 0x49a   :  { %v3646_v60 = vsel %vm11240_vm0, %v3640_v56, %v3642_v48  ;;  %v3644_v55 = vpop.permute.xlu0 %3643  ;;  %v6219_v19 = vpack.c.bf16 %v3671_v39, %v3629_v33  ;;  %vm11253_vm0 = vmmov %vm11251_vm8 }
 0x49b   :  { %v3672_v27 = vmul.f32 %v3658_v49, %v3646_v60  ;;  %v3645_v18 = vsel %vm11241_vm1, %v3642_v48, %v3644_v55  ;;  %v3648_v28 = vsel %vm11242_vm3, %v3644_v55, %v3638_v10  ;;  %v5787_v55 = vld [vmem:[%s10886_s6 + $0x40] ss:$8 sm:$0xf]  ;;  %vm11254_vm1 = vmmov %vm11253_vm0 }
 0x49c   :  { %v3673_v11 = vmul.f32 %v3662_v36, %v3645_v18  ;;  %v3674_v62 = vmul.f32 %v3666_v17, %v3648_v28  ;;  %v3780_v28 = vrot.slane %v5787_v55, %v6840_v6  ;;  %vm11255_vm3 = vmmov %vm11253_vm0 }
 0x49d   :  { %v3680_v0 = vpop.permute.xlu1 %3679  ;;  %v6217_v53 = vpack.c.bf16 %v3672_v27, %v3630_v20  ;;  %v5788_v27 = vld [vmem:[%s10886_s6 + $0x41] ss:$8 sm:$0xf]  ;;  %v3784_v20 = vrot.slane %v5787_v55, %v6846_v8 }
 0x49e   :  { %v6267_v3 = vpack.c.bf16 %v3673_v11, %v3631_v47  ;;  %v3682_v25 = vpop.permute.xlu0 %3681  ;;  %v6265_v12 = vpack.c.bf16 %v3674_v62, %v3632_v15  ;;  %v3822_v33 = vrot.slane %v5788_v27, %v6840_v6  ;;  %v3788_v15 = vrot.slane %v5787_v55, %v6860_v13 }
 0x49f   :  { %6218 = vmatprep.subr.bf16.mxu0 %v6217_v53  ;;  %v3689_v57 = vsel %vm11243_vm9, %v3680_v0, %v3682_v25  ;;  %v3826_v53 = vrot.slane %v5788_v27, %v6846_v8  ;;  %vm11256_vm9 = vmmov %vm11252_vm2 }
 0x4a0   :  { %6220 = vmatpush1.bf16.msra.mxu0 %v6219_v19  ;;  %6266 = vmatprep.subr.bf16.mxu1 %v6265_v12  ;;  %v3713_v51 = vmul.f32 %v3696_v26, %v3689_v57  ;;  %v3834_v12 = vrot.slane %v5788_v27, %v6843_v7 }
 0x4a1   :  { %6268 = vmatpush1.bf16.msra.mxu1 %v6267_v3  ;;  %v3684_v2 = vpop.permute.xlu1 %3683  ;;  %v3792_v3 = vrot.slane %v5787_v55, %v6843_v7 }
 0x4a2   :  { %v3686_v42 = vpop.permute.xlu0 %3685  ;;  %v3688_v46 = vsel %vm11245_vm11, %v3682_v25, %v3684_v2  ;;  %v3830_v25 = vrot.slane %v5788_v27, %v6860_v13  ;;  %vm11258_vm11 = vmmov %vm11252_vm2 }
 0x4a3   :  { %v3687_v34 = vsel %vm11246_vm14, %v3684_v2, %v3686_v42  ;;  %v3690_v52 = vsel %vm11247_vm15, %v3686_v42, %v3680_v0  ;;  %v3714_v54 = vmul.f32 %v3700_v31, %v3688_v46  ;;  %vm11259_vm14 = vcmp.lt.s32.totalorder %v7187_v41, 43 }
 0x4a4   :  { %v3715_v63 = vmul.f32 %v3704_v32, %v3687_v34  ;;  %v3716_v1 = vmul.f32 %v3708_v14, %v3690_v52  ;;  %vm11260_vm15 = vcmp.lt.s32.totalorder %v7187_v41, 38 }
 0x4a5   :  { %v3722_v4 = vpop.permute.xlu1 %3721 }
 0x4a6   :  { %v3724_v43 = vpop.permute.xlu0 %3723 }
 0x4a7   :  { %v3731_v58 = vsel %vm11244_vm10, %v3722_v4, %v3724_v43  ;;  %vm11257_vm10 = vmmov %vm11252_vm2 }
 0x4a8   :  { %v3755_v24 = vmul.f32 %v3738_v21, %v3731_v58 }
 0x4a9   :  { %v3726_v50 = vpop.permute.xlu1 %3725 }
 0x4aa   :  { %v3730_v10 = vsel %vm11248_vm4, %v3724_v43, %v3726_v50  ;;  %v3728_v45 = vpop.permute.xlu0 %3727  ;;  %v6223_v17 = vpack.c.bf16 %v3755_v24, %v3713_v51  ;;  %vm11261_vm4 = vmmov %vm11259_vm14 }
 0x4ab   :  { %v3756_v38 = vmul.f32 %v3742_v16, %v3730_v10  ;;  %v3729_v30 = vsel %vm11249_vm5, %v3726_v50, %v3728_v45  ;;  %v3732_v56 = vsel %vm11250_vm7, %v3728_v45, %v3722_v4  ;;  %v5789_v45 = vld [vmem:[%s10886_s6 + $0x42] ss:$8 sm:$0xf]  ;;  %vm11262_vm5 = vmmov %vm11261_vm4 }
 0x4ac   :  { %v3757_v35 = vmul.f32 %v3746_v61, %v3729_v30  ;;  %v3758_v49 = vmul.f32 %v3750_v40, %v3732_v56  ;;  %v3864_v30 = vrot.slane %v5789_v45, %v6840_v6  ;;  %v3868_v56 = vrot.slane %v5789_v45, %v6846_v8  ;;  %vm11263_vm7 = vmmov %vm11261_vm4 }
 0x4ad   :  { %v3764_v23 = vpop.permute.xlu1 %3763  ;;  %v6221_v36 = vpack.c.bf16 %v3756_v38, %v3714_v54  ;;  %v5790_v54 = vld [vmem:[%s10886_s6 + $0x43] ss:$8 sm:$0xf] }
 0x4ae   :  { %v6271_v9 = vpack.c.bf16 %v3757_v35, %v3715_v63  ;;  %v3766_v48 = vpop.permute.xlu0 %3765  ;;  %v6269_v39 = vpack.c.bf16 %v3758_v49, %v3716_v1  ;;  %v3906_v63 = vrot.slane %v5790_v54, %v6840_v6  ;;  %v3872_v49 = vrot.slane %v5789_v45, %v6860_v13 }
 0x4af   :  { %6222 = vmatprep.subr.bf16.mxu0 %v6221_v36  ;;  %v3773_v62 = vsel %vm11251_vm8, %v3764_v23, %v3766_v48  ;;  %v3910_v36 = vrot.slane %v5790_v54, %v6846_v8  ;;  %vm11264_vm8 = vmmov %vm11260_vm15 }
 0x4b0   :  { %6224 = vmatpush1.bf16.msra.mxu0 %v6223_v17  ;;  %6270 = vmatprep.subr.bf16.mxu1 %v6269_v39  ;;  %v3797_v29 = vmul.f32 %v3780_v28, %v3773_v62  ;;  %v3918_v39 = vrot.slane %v5790_v54, %v6843_v7 }
 0x4b1   :  { %6272 = vmatpush1.bf16.msra.mxu1 %v6271_v9  ;;  %v3768_v60 = vpop.permute.xlu1 %3767  ;;  %v3876_v9 = vrot.slane %v5789_v45, %v6843_v7 }
 0x4b2   :  { %v3770_v47 = vpop.permute.xlu0 %3769  ;;  %v3772_v19 = vsel %vm11253_vm0, %v3766_v48, %v3768_v60  ;;  %v3914_v48 = vrot.slane %v5790_v54, %v6860_v13 }
 0x4b3   :  { %v3771_v2 = vsel %vm11254_vm1, %v3768_v60, %v3770_v47  ;;  %v3774_v42 = vsel %vm11255_vm3, %v3770_v47, %v3764_v23  ;;  %v3798_v21 = vmul.f32 %v3784_v20, %v3772_v19  ;;  %vm11267_vm1 = vcmp.lt.s32.totalorder %v7187_v41, 106 }
 0x4b4   :  { %v3799_v58 = vmul.f32 %v3788_v15, %v3771_v2  ;;  %v3800_v16 = vmul.f32 %v3792_v3, %v3774_v42  ;;  %vm11268_vm3 = vcmp.lt.s32.totalorder %v7187_v41, 101 }
 0x4b5   :  { %v3806_v18 = vpop.permute.xlu1 %3805 }
 0x4b6   :  { %v3808_v11 = vpop.permute.xlu0 %3807 }
 0x4b7   :  { %v3815_v0 = vsel %vm11252_vm2, %v3806_v18, %v3808_v11  ;;  %vm11265_vm2 = vmmov %vm11264_vm8 }
 0x4b8   :  { %v3839_v4 = vmul.f32 %v3822_v33, %v3815_v0  ;;  %vm11266_vm0 = vmmov %vm11265_vm2 }
 0x4b9   :  { %v3810_v22 = vpop.permute.xlu1 %3809 }
 0x4ba   :  { %v3814_v26 = vsel %vm11256_vm9, %v3808_v11, %v3810_v22  ;;  %v3812_v31 = vpop.permute.xlu0 %3811  ;;  %v6227_v34 = vpack.c.bf16 %v3839_v4, %v3797_v29  ;;  %v5791_v4 = vld [vmem:[%s10886_s6 + $0x44] ss:$8 sm:$0xf]  ;;  %vm11269_vm9 = vmmov %vm11267_vm1 }
 0x4bb   :  { %v3840_v43 = vmul.f32 %v3826_v53, %v3814_v26  ;;  %v3813_v57 = vsel %vm11257_vm10, %v3810_v22, %v3812_v31  ;;  %v3816_v32 = vsel %vm11258_vm11, %v3812_v31, %v3806_v18  ;;  %v5792_v31 = vld [vmem:[%s10886_s6 + $0x45] ss:$8 sm:$0xf]  ;;  %vm11270_vm10 = vmmov %vm11267_vm1 }
 0x4bc   :  { %v3841_v46 = vmul.f32 %v3830_v25, %v3813_v57  ;;  %v3842_v14 = vmul.f32 %v3834_v12, %v3816_v32  ;;  %v4002_v57 = vrot.slane %v5792_v31, %v6843_v7  ;;  %vm11271_vm11 = vmmov %vm11267_vm1 }
 0x4bd   :  { %v3848_v61 = vpop.permute.xlu1 %3847  ;;  %v6225_v40 = vpack.c.bf16 %v3840_v43, %v3798_v21  ;;  %v3960_v43 = vrot.slane %v5791_v4, %v6843_v7 }
 0x4be   :  { %v6275_v52 = vpack.c.bf16 %v3841_v46, %v3799_v58  ;;  %v3850_v50 = vpop.permute.xlu0 %3849  ;;  %v6273_v51 = vpack.c.bf16 %v3842_v14, %v3800_v16  ;;  %v3952_v46 = vrot.slane %v5791_v4, %v6846_v8  ;;  %v3956_v14 = vrot.slane %v5791_v4, %v6860_v13 }
 0x4bf   :  { %6226 = vmatprep.subr.bf16.mxu0 %v6225_v40  ;;  %v3857_v35 = vsel %vm11259_vm14, %v3848_v61, %v3850_v50  ;;  %v3990_v40 = vrot.slane %v5792_v31, %v6840_v6  ;;  %vm11272_vm14 = vmmov %vm11268_vm3 }
 0x4c0   :  { %6228 = vmatpush1.bf16.msra.mxu0 %v6227_v34  ;;  %6274 = vmatprep.subr.bf16.mxu1 %v6273_v51  ;;  %v3881_v27 = vmul.f32 %v3864_v30, %v3857_v35  ;;  %v3998_v51 = vrot.slane %v5792_v31, %v6860_v13 }
 0x4c1   :  { %6276 = vmatpush1.bf16.msra.mxu1 %v6275_v52  ;;  %v3852_v24 = vpop.permute.xlu1 %3851 }
 0x4c2   :  { %v3854_v10 = vpop.permute.xlu0 %3853  ;;  %v3856_v17 = vsel %vm11261_vm4, %v3850_v50, %v3852_v24  ;;  %v3994_v50 = vrot.slane %v5792_v31, %v6846_v8  ;;  %vm11274_vm4 = vmmov %vm11268_vm3 }
 0x4c3   :  { %v3855_v60 = vsel %vm11262_vm5, %v3852_v24, %v3854_v10  ;;  %v3858_v47 = vsel %vm11263_vm7, %v3854_v10, %v3848_v61  ;;  %v3882_v33 = vmul.f32 %v3868_v56, %v3856_v17  ;;  %v3948_v24 = vrot.slane %v5791_v4, %v6840_v6  ;;  %v5795_v4 = vld [vmem:[%s10886_s6 + $0x60] ss:$8 sm:$0xf] }
 0x4c4   :  { %v3883_v0 = vmul.f32 %v3872_v49, %v3855_v60  ;;  %v3884_v53 = vmul.f32 %v3876_v9, %v3858_v47  ;;  %vm4442_vm7 = vcmp.lt.s32.totalorder %v7187_v41, 125 }
 0x4c5   :  { %v3890_v38 = vpop.permute.xlu1 %3889 }
 0x4c6   :  { %v3892_v1 = vpop.permute.xlu0 %3891 }
 0x4c7   :  { %v3899_v23 = vsel %vm11260_vm15, %v3890_v38, %v3892_v1  ;;  %vm11273_vm15 = vmmov %vm11268_vm3 }
 0x4c8   :  { %v3923_v18 = vmul.f32 %v3906_v63, %v3899_v23 }
 0x4c9   :  { %v3894_v55 = vpop.permute.xlu1 %3893 }
 0x4ca   :  { %v3898_v28 = vsel %vm11264_vm8, %v3892_v1, %v3894_v55  ;;  %v3896_v20 = vpop.permute.xlu0 %3895  ;;  %v6231_v2 = vpack.c.bf16 %v3923_v18, %v3881_v27  ;;  %v5793_v18 = vld [vmem:[%s10886_s6 + $0x46] ss:$8 sm:$0xf]  ;;  %vm11284_vm8 = vcmp.lt.s32.totalorder %v7187_v41, 126 }
 0x4cb   :  { %v3924_v11 = vmul.f32 %v3910_v36, %v3898_v28  ;;  %v3897_v62 = vsel %vm11265_vm2, %v3894_v55, %v3896_v20  ;;  %v3900_v15 = vsel %vm11266_vm0, %v3896_v20, %v3890_v38  ;;  %v5794_v20 = vld [vmem:[%s10886_s6 + $0x47] ss:$8 sm:$0xf]  ;;  %vm11285_vm2 = vmmov %vm11284_vm8  ;;  %vm4459_vm0 = vcmp.lt.s32.totalorder %v7187_v41, 124 }
 0x4cc   :  { %v3925_v19 = vmul.f32 %v3914_v48, %v3897_v62  ;;  %v3926_v3 = vmul.f32 %v3918_v39, %v3900_v15  ;;  %v4086_v62 = vrot.slane %v5794_v20, %v6843_v7 }
 0x4cd   :  { %v3932_v25 = vpop.permute.xlu1 %3931  ;;  %v6229_v12 = vpack.c.bf16 %v3924_v11, %v3882_v33  ;;  %v4044_v11 = vrot.slane %v5793_v18, %v6843_v7 }
 0x4ce   :  { %v6279_v42 = vpack.c.bf16 %v3925_v19, %v3883_v0  ;;  %v3934_v22 = vpop.permute.xlu0 %3933  ;;  %v6277_v29 = vpack.c.bf16 %v3926_v3, %v3884_v53  ;;  %v4036_v19 = vrot.slane %v5793_v18, %v6846_v8  ;;  %v4040_v3 = vrot.slane %v5793_v18, %v6860_v13 }
 0x4cf   :  { %6230 = vmatprep.subr.bf16.mxu0 %v6229_v12  ;;  %v3941_v32 = vsel %vm11267_vm1, %v3932_v25, %v3934_v22  ;;  %v4074_v12 = vrot.slane %v5794_v20, %v6840_v6  ;;  %vm11286_vm1 = vmmov %vm11285_vm2 }
 0x4d0   :  { %6232 = vmatpush1.bf16.msra.mxu0 %v6231_v2  ;;  %6278 = vmatprep.subr.bf16.mxu1 %v6277_v29  ;;  %v3968_v34 = vmul.f32 %v3960_v43, %v3941_v32  ;;  %v4082_v29 = vrot.slane %v5794_v20, %v6860_v13 }
 0x4d1   :  { %6280 = vmatpush1.bf16.msra.mxu1 %v6279_v42  ;;  %v3936_v26 = vpop.permute.xlu1 %3935 }
 0x4d2   :  { %v3938_v21 = vpop.permute.xlu0 %3937  ;;  %v3940_v38 = vsel %vm11271_vm11, %v3934_v22, %v3936_v26  ;;  %v4078_v22 = vrot.slane %v5794_v20, %v6846_v8  ;;  %vm11288_vm11 = vcmp.lt.s32.totalorder %v7187_v41, 112 }
 0x4d3   :  { %v3939_v10 = vsel %vm11269_vm9, %v3936_v26, %v3938_v21  ;;  %v3942_v45 = vsel %vm11270_vm10, %v3938_v21, %v3932_v25  ;;  %v3965_v48 = vmul.f32 %v3948_v24, %v3940_v38  ;;  %v4032_v26 = vrot.slane %v5793_v18, %v6840_v6 }
 0x4d4   :  { %v3966_v23 = vmul.f32 %v3952_v46, %v3939_v10  ;;  %v3967_v36 = vmul.f32 %v3956_v14, %v3942_v45  ;;  %vm4524_vm9 = vcmp.lt.s32.totalorder %v7187_v41, 109  ;;  %vm4541_vm10 = vcmp.lt.s32.totalorder %v7187_v41, 108 }
 0x4d5   :  { %v3974_v58 = vpop.permute.xlu1 %3973 }
 0x4d6   :  { %v3976_v16 = vpop.permute.xlu0 %3975 }
 0x4d7   :  { %v3983_v61 = vsel %vm11268_vm3, %v3974_v58, %v3976_v16  ;;  %vm11287_vm3 = vmmov %vm11286_vm1 }
 0x4d8   :  { %v4010_v52 = vmul.f32 %v4002_v57, %v3983_v61 }
 0x4d9   :  { %v3978_v54 = vpop.permute.xlu1 %3977 }
 0x4da   :  { %v3982_v30 = vsel %vm11272_vm14, %v3976_v16, %v3978_v54  ;;  %v3980_v56 = vpop.permute.xlu0 %3979  ;;  %v6281_v63 = vpack.c.bf16 %v4010_v52, %v3968_v34  ;;  %vm11289_vm14 = vmmov %vm11288_vm11 }
 0x4db   :  { %v4007_v1 = vmul.f32 %v3990_v40, %v3982_v30  ;;  %v3981_v35 = vsel %vm11273_vm15, %v3978_v54, %v3980_v56  ;;  %v3984_v49 = vsel %vm11274_vm4, %v3980_v56, %v3974_v58  ;;  %v4128_v40 = vrot.slane %v5795_v4, %v6843_v7  ;;  %vm11290_vm15 = vmmov %vm11288_vm11 }
 0x4dc   :  { %v4008_v17 = vmul.f32 %v3994_v50, %v3981_v35  ;;  %v4009_v9 = vmul.f32 %v3998_v51, %v3984_v49  ;;  %6282 = vmatprep.subr.bf16.mxu1 %v6281_v63  ;;  %v4124_v7 = vrot.slane %v5795_v4, %v6860_v13  ;;  %v4116_v35 = vrot.slane %v5795_v4, %v6840_v6  ;;  %vm11291_vm4 = vmmov %vm11288_vm11 }
 0x4dd   :  { %v4016_v39 = vpop.permute.xlu1 %4015  ;;  %v6235_v27 = vpack.c.bf16 %v4007_v1, %v3965_v48  ;;  %v4120_v1 = vrot.slane %v5795_v4, %v6846_v8  ;;  %v4141_v8 = vld [vmem:[%s10883_s3] sm:$0xff]  ;;  %s11275_s3 = smov 127  }
 0x4de   :  { %v6283_v60 = vpack.c.bf16 %v4009_v9, %v3967_v36  ;;  %v4018_v47 = vpop.permute.xlu0 %4017  ;;  %v6233_v55 = vpack.c.bf16 %v4008_v17, %v3966_v23  ;;  %v4741_v4 = vld [vmem:[%s10887_s7 + $0x100] sm:$0xff] }
 0x4df   :  { %v4025_v15 = vsel %vm1555_vm6, %v4016_v39, %v4018_v47 }
 0x4e0   :  { %6234 = vmatprep.subr.bf16.mxu0 %v6233_v55  ;;  %6284 = vmatpush1.bf16.msra.mxu1 %v6283_v60  ;;  %v4052_v2 = vmul.f32 %v4044_v11, %v4025_v15 }
 0x4e1   :  { %v4020_v28 = vpop.permute.xlu1 %4019  ;;  %6236 = vmatpush1.bf16.msra.mxu0 %v6235_v27 }
 0x4e2   :  { %v4022_v33 = vpop.permute.xlu0 %4021  ;;  %v4024_v57 = vsel %vm1555_vm6, %v4018_v47, %v4020_v28 }
 0x4e3   :  { %v4023_v31 = vsel %vm1555_vm6, %v4020_v28, %v4022_v33  ;;  %v4026_v21 = vsel %vm1555_vm6, %v4022_v33, %v4016_v39  ;;  %v4049_v24 = vmul.f32 %v4032_v26, %v4024_v57  ;;  %v4742_v26 = vld [vmem:[%s10887_s7 + $0x108] sm:$0xff] }
 0x4e4   :  { %v4050_v34 = vmul.f32 %v4036_v19, %v4023_v31  ;;  %v4051_v52 = vmul.f32 %v4040_v3, %v4026_v21  ;;  %v6323_v31 = vpack.c.bf16 %v4742_v26, %v4741_v4  ;;  %v4727_v21 = vld [vmem:[%s10887_s7 + $0x90] sm:$0xff] }
 0x4e5   :  { %v4058_v0 = vpop.permute.xlu1 %4057  ;;  %v4751_v26 = vld [vmem:[%s10887_s7 + $0x150] sm:$0xff] }
 0x4e6   :  { %v4060_v53 = vpop.permute.xlu0 %4059 }
 0x4e7   :  { %v4067_v25 = vsel %vm2765_vm12, %v4058_v0, %v4060_v53 }
 0x4e8   :  { %v4094_v42 = vmul.f32 %v4086_v62, %v4067_v25 }
 0x4e9   :  { %v4062_v43 = vpop.permute.xlu1 %4061 }
 0x4ea   :  { %v4066_v32 = vsel %vm2765_vm12, %v4060_v53, %v4062_v43  ;;  %v4064_v58 = vpop.permute.xlu0 %4063  ;;  %v6285_v16 = vpack.c.bf16 %v4094_v42, %v4052_v2  ;;  %v4757_v42 = vld [vmem:[%s10887_s7 + $0x180] sm:$0xff] }
 0x4eb   :  { %v4091_v46 = vmul.f32 %v4074_v12, %v4066_v32  ;;  %v4065_v14 = vsel %vm2765_vm12, %v4062_v43, %v4064_v58  ;;  %v4068_v61 = vsel %vm2765_vm12, %v4064_v58, %v4058_v0  ;;  %v4710_v12 = vld [vmem:[%s10887_s7 + $0x8] sm:$0xff]  ;;  %v4728_v43 = vld [vmem:[%s10887_s7 + $0x98] sm:$0xff]  ;;  %v4711_v32 = vld [vmem:[%s10887_s7 + $0x10] sm:$0xff]  ;;  %vm11280_vm12 = vcmp.lt.s32.totalorder %v7187_v41, 127 }
 0x4ec   :  { %v4092_v50 = vmul.f32 %v4078_v22, %v4065_v14  ;;  %v4093_v51 = vmul.f32 %v4082_v29, %v4068_v61  ;;  %6286 = vmatprep.subr.bf16.mxu1 %v6285_v16  ;;  %v4758_v22 = vld [vmem:[%s10887_s7 + $0x188] sm:$0xff]  ;;  %v6293_v57 = vpack.c.bf16 %v4728_v43, %v4727_v21  ;;  %v4712_v58 = vld [vmem:[%s10887_s7 + $0x18] sm:$0xff]  ;;  %v4737_v43 = vld [vmem:[%s10887_s7 + $0xe0] sm:$0xff] }
 0x4ed   :  { %v4100_v10 = vpop.permute.xlu1 %4099  ;;  %v6239_v30 = vpack.c.bf16 %v4091_v46, %v4049_v24  ;;  %v6321_v29 = vpack.c.bf16 %v4758_v22, %v4757_v42  ;;  %v6295_v16 = vpack.c.bf16 %v4712_v58, %v4711_v32  ;;  %v4759_v46 = vld [vmem:[%s10887_s7 + $0x190] sm:$0xff]  ;;  %v4760_v14 = vld [vmem:[%s10887_s7 + $0x198] sm:$0xff]  ;;  %v4721_v32 = vld [vmem:[%s10887_s7 + $0x60] sm:$0xff] }
 0x4ee   :  { %v6287_v45 = vpack.c.bf16 %v4093_v51, %v4051_v52  ;;  %v4102_v54 = vpop.permute.xlu0 %4101  ;;  %v6237_v38 = vpack.c.bf16 %v4092_v50, %v4050_v34  ;;  %v6325_v61 = vpack.c.bf16 %v4760_v14, %v4759_v46  ;;  %v4744_v34 = vld [vmem:[%s10887_s7 + $0x118] sm:$0xff]  ;;  %v4729_v50 = vld [vmem:[%s10887_s7 + $0xa0] sm:$0xff]  ;;  %v4730_v51 = vld [vmem:[%s10887_s7 + $0xa8] sm:$0xff] }
 0x4ef   :  { %v4109_v56 = vsel %vm2809_vm13, %v4100_v10, %v4102_v54  ;;  %v6297_v24 = vpack.c.bf16 %v4730_v51, %v4729_v50  ;;  %v4767_v22 = vld [vmem:[%s10887_s7 + $0x1d0] sm:$0xff]  ;;  %v4769_v46 = vld [vmem:[%s10887_s7 + $0x1e0] sm:$0xff]  ;;  %v4770_v14 = vld [vmem:[%s10887_s7 + $0x1e8] sm:$0xff] }
 0x4f0   :  { %v4136_v63 = vmul.f32 %v4128_v40, %v4109_v56  ;;  %6238 = vmatprep.subr.bf16.mxu0 %v6237_v38  ;;  %6288 = vmatpush1.bf16.msra.mxu1 %v6287_v45  ;;  %v4743_v40 = vld [vmem:[%s10887_s7 + $0x110] sm:$0xff]  ;;  %v4714_v45 = vld [vmem:[%s10887_s7 + $0x28] sm:$0xff]  ;;  %v4761_v38 = vld [vmem:[%s10887_s7 + $0x1a0] sm:$0xff] }
 0x4f1   :  { %v4104_v49 = vpop.permute.xlu1 %4103  ;;  %6240 = vmatpush1.bf16.msra.mxu0 %v6239_v30  ;;  %v6327_v52 = vpack.c.bf16 %v4744_v34, %v4743_v40  ;;  %v4762_v30 = vld [vmem:[%s10887_s7 + $0x1a8] sm:$0xff]  ;;  %v6345_v40 = vpack.c.bf16 %v4770_v14, %v4769_v46  ;;  %v4753_v34 = vld [vmem:[%s10887_s7 + $0x160] sm:$0xff]  ;;  %v4739_v50 = vld [vmem:[%s10887_s7 + $0xf0] sm:$0xff] }
 0x4f2   :  { %v4108_v23 = vsel %vm2809_vm13, %v4102_v54, %v4104_v49  ;;  %v4106_v36 = vpop.permute.xlu0 %4105  ;;  %4371 = vmatprep.subr.mxu1 %v4136_v63  ;;  %v6329_v56 = vpack.c.bf16 %v4762_v30, %v4761_v38  ;;  %v4745_v63 = vld [vmem:[%s10887_s7 + $0x120] sm:$0xff]  ;;  %v4771_v30 = vld [vmem:[%s10887_s7 + $0x1f0] sm:$0xff]  ;;  %vm11282_vm6 = vmmov %vm11280_vm12 }
 0x4f3   :  { %v4107_v17 = vsel %vm2809_vm13, %v4104_v49, %v4106_v36  ;;  %v4110_v9 = vsel %vm2809_vm13, %v4106_v36, %v4100_v10  ;;  %v4133_v6 = vmul.f32 %v4116_v35, %v4108_v23  ;;  %v4713_v10 = vld [vmem:[%s10887_s7 + $0x20] sm:$0xff]  ;;  %v4731_v35 = vld [vmem:[%s10887_s7 + $0xb0] sm:$0xff]  ;;  %v4732_v49 = vld [vmem:[%s10887_s7 + $0xb8] sm:$0xff] }
 0x4f4   :  { %v4134_v48 = vmul.f32 %v4120_v1, %v4107_v17  ;;  %v4135_v39 = vmul.f32 %v4124_v7, %v4110_v9  ;;  %v6299_v54 = vpack.c.bf16 %v4714_v45, %v4713_v10  ;;  %v4746_v1 = vld [vmem:[%s10887_s7 + $0x128] sm:$0xff]  ;;  %v6301_v23 = vpack.c.bf16 %v4732_v49, %v4731_v35  ;;  %v4715_v36 = vld [vmem:[%s10887_s7 + $0x30] sm:$0xff]  ;;  %v4716_v17 = vld [vmem:[%s10887_s7 + $0x38] sm:$0xff] }
 0x4f5   :  { %v6331_v7 = vpack.c.bf16 %v4746_v1, %v4745_v63  ;;  %v6303_v9 = vpack.c.bf16 %v4716_v17, %v4715_v36  ;;  %v4723_v10 = vld [vmem:[%s10887_s7 + $0x70] sm:$0xff]  ;;  %v4724_v45 = vld [vmem:[%s10887_s7 + $0x78] sm:$0xff]  ;;  %v4789_v49 = vld [vmem:[%s10887_s7 + $0x280] sm:$0xff] }
 0x4f6   :  { %4300 = vmatprep.subr.mxu0 %v4134_v48  ;;  %4372 = vmatpush1.msra.mxu1 %v4135_v39  ;;  %v4763_v48 = vld [vmem:[%s10887_s7 + $0x1b0] sm:$0xff]  ;;  %v4764_v39 = vld [vmem:[%s10887_s7 + $0x1b8] sm:$0xff]  ;;  %v6319_v38 = vpack.c.bf16 %v4724_v45, %v4723_v10  ;;  %v4821_v17 = vld [vmem:[%s10887_s7 + $0x380] sm:$0xff] }
 0x4f7   :  { %4301 = vmatpush1.msra.mxu0 %v4133_v6  ;;  %4388 = vmatmul.mubr.f32.vlgmr.msra.gmra.mrb[2].mxu1 %v4141_v8  ;;  %v4747_v6 = vld [vmem:[%s10887_s7 + $0x130] sm:$0xff]  ;;  %vm11281_vm13 = vmmov %vm11280_vm12 }
 0x4f8   :  { %4317 = vmatmul.mubr.f32.vlgmr.msra.gmra.mrb[2].mxu0 %v4141_v8  ;;  %6322 = vmatprep.subr.bf16.mxu1 %v6321_v29  ;;  %v6333_v8 = vpack.c.bf16 %v4764_v39, %v4763_v48  ;;  %v4768_v29 = vld [vmem:[%s10887_s7 + $0x1d8] sm:$0xff]  ;;  %v4755_v63 = vld [vmem:[%s10887_s7 + $0x170] sm:$0xff]  ;;  %vm11283_vm5 = vmmov %vm11282_vm6 }
 0x4f9   :  { %6324 = vmatpush3.bf16.msra.mxu1 %v6323_v31  ;;  %v6341_v4 = vpack.c.bf16 %v4768_v29, %v4767_v22  ;;  %v4752_v31 = vld [vmem:[%s10887_s7 + $0x158] sm:$0xff] }
 0x4fa   :  { %6326 = vmatprep.subr.bf16.mxu1 %v6325_v61  ;;  %v6343_v21 = vpack.c.bf16 %v4752_v31, %v4751_v26  ;;  %v6761_v26 = vmov 1966171168  }
 0x4fb   :  { %v10120_v31 = vunpack.c.l.s4 %v6761_v26 }
 0x4fd   :  { %6328 = vmatpush3.bf16.msra.mxu1 %v6327_v52  ;;  %v4754_v52 = vld [vmem:[%s10887_s7 + $0x168] sm:$0xff] }
 0x4fe   :  { %6330 = vmatprep.subr.bf16.mxu1 %v6329_v56  ;;  %v6347_v51 = vpack.c.bf16 %v4754_v52, %v4753_v34  ;;  %v4772_v56 = vld [vmem:[%s10887_s7 + $0x1f8] sm:$0xff] }
 0x4ff   :  { %v6349_v1 = vpack.c.bf16 %v4772_v56, %v4771_v30 }
 0x501   :  { %6332 = vmatpush3.bf16.msra.mxu1 %v6331_v7  ;;  %v4756_v7 = vld [vmem:[%s10887_s7 + $0x178] sm:$0xff] }
 0x502   :  { %v4247_v13 = vpop.permute.xlu1 %4246  ;;  %6334 = vmatprep.subr.bf16.mxu1 %v6333_v8  ;;  %v6351_v35 = vpack.c.bf16 %v4756_v7, %v4755_v63 }
 0x5ca   :  { %v4389_v60 = vpop.f32.mrb[2].mxu1 }
 0x5cb   :  { %v4318_v47 = vpop.f32.mrb[2].mxu0  ;;  %v4391_v55 = vpop.f32.mrb[3].mxu1  ;;  %v4390_v27 = vadd.f32 %v4389_v60, %v4247_v13 }
 0x5cc   :  { %v4319_v18 = vadd.f32 %v4318_v47, %v4247_v13  ;;  %v4320_v28 = vpop.f32.mrb[3].mxu0  ;;  %v4392_v20 = vadd.f32 %v4391_v55, %v4247_v13  ;;  %v4733_v47 = vld [vmem:[%s10887_s7 + $0xc0] sm:$0xff]  ;;  %v4734_v55 = vld [vmem:[%s10887_s7 + $0xc8] sm:$0xff] }
 0x5cd   :  { %v4321_v33 = vadd.f32 %v4320_v28, %v4247_v13  ;;  %v4396_v15 = vadd.f32 %v4390_v27, %v8660_v59  ;;  %v4748_v13 = vld [vmem:[%s10887_s7 + $0x138] sm:$0xff]  ;;  %v6305_v27 = vpack.c.bf16 %v4734_v55, %v4733_v47  ;;  %v4718_v28 = vld [vmem:[%s10887_s7 + $0x48] sm:$0xff] }
 0x5ce   :  { %v4394_v11 = vadd.f32 %v4319_v18, %v8652_v44  ;;  %v4397_v53 = vadd.f32 %v4392_v20, %v8666_v37  ;;  %v4725_v44 = vld [vmem:[%s10887_s7 + $0x80] sm:$0xff]  ;;  %v6335_v60 = vpack.c.bf16 %v4748_v13, %v4747_v6 }
 0x5cf   :  { %v4395_v62 = vadd.f32 %v4321_v33, %v8658_v5  ;;  %v9858_v3 = vmax.f32 %v4396_v15, 0.0  ;;  %v4726_v5 = vld [vmem:[%s10887_s7 + $0x88] sm:$0xff]  ;;  %v4709_v37 = vld [vmem:[%s10887_s7] sm:$0xff] }
 0x5d0   :  { %v9849_v0 = vmax.f32 %v4394_v11, 0.0  ;;  %v9860_v25 = vmax.f32 %v4397_v53, 0.0  ;;  %v6289_v59 = vpack.c.bf16 %v4726_v5, %v4725_v44  ;;  %v6291_v2 = vpack.c.bf16 %v4710_v12, %v4709_v37  ;;  %v4717_v18 = vld [vmem:[%s10887_s7 + $0x40] sm:$0xff]  ;;  %6336 = vmatpush3.bf16.msra.mxu1 %v6335_v60  ;;  %v4766_v11 = vld [vmem:[%s10887_s7 + $0x1c8] sm:$0xff]  ;;  %v4735_v5 = vld [vmem:[%s10887_s7 + $0xd0] sm:$0xff] }
 0x5d1   :  { %v9852_v19 = vmax.f32 %v4395_v62, 0.0  ;;  %v6307_v20 = vpack.c.bf16 %v4718_v28, %v4717_v18  ;;  %v4765_v33 = vld [vmem:[%s10887_s7 + $0x1c0] sm:$0xff]  ;;  %v4750_v53 = vld [vmem:[%s10887_s7 + $0x148] sm:$0xff]  ;;  %v4719_v12 = vld [vmem:[%s10887_s7 + $0x50] sm:$0xff] }
 0x5d2   :  { %4402 = vrot.lane.b32.xlu0 %v9849_v0, %s11275_s3  ;;  %6290 = vmatprep.subr.bf16.mxu0 %v6289_v59  ;;  %v6337_v62 = vpack.c.bf16 %v4766_v11, %v4765_v33  ;;  %v4749_v15 = vld [vmem:[%s10887_s7 + $0x140] sm:$0xff]  ;;  %v4736_v59 = vld [vmem:[%s10887_s7 + $0xd8] sm:$0xff] }
 0x5d3   :  { %4404 = vrot.lane.b32.xlu1 %v9852_v19, %s11275_s3  ;;  %6292 = vmatpush3.bf16.msra.mxu0 %v6291_v2  ;;  %v6339_v44 = vpack.c.bf16 %v4750_v53, %v4749_v15  ;;  %v6309_v37 = vpack.c.bf16 %v4736_v59, %v4735_v5  ;;  %v4720_v2 = vld [vmem:[%s10887_s7 + $0x58] sm:$0xff] }
 0x5d4   :  { %6294 = vmatprep.subr.bf16.mxu0 %v6293_v57  ;;  %6338 = vmatprep.subr.bf16.mxu1 %v6337_v62  ;;  %v6311_v42 = vpack.c.bf16 %v4720_v2, %v4719_v12  ;;  %v4738_v57 = vld [vmem:[%s10887_s7 + $0xe8] sm:$0xff] }
 0x5d5   :  { %6340 = vmatpush3.bf16.msra.mxu1 %v6339_v44  ;;  %v6313_v58 = vpack.c.bf16 %v4738_v57, %v4737_v43 }
 0x5d6   :  { %4406 = vrot.lane.b32.xlu0 %v9858_v3, %s11275_s3  ;;  %6342 = vmatprep.subr.bf16.mxu1 %v6341_v4 }
 0x5d7   :  { %4408 = vrot.lane.b32.xlu1 %v9860_v25, %s11275_s3  ;;  %6296 = vmatpush3.bf16.msra.mxu0 %v6295_v16  ;;  %v4722_v16 = vld [vmem:[%s10887_s7 + $0x68] sm:$0xff] }
 0x5d8   :  { %6298 = vmatprep.subr.bf16.mxu0 %v6297_v24  ;;  %v6315_v61 = vpack.c.bf16 %v4722_v16, %v4721_v32  ;;  %v4740_v24 = vld [vmem:[%s10887_s7 + $0xf8] sm:$0xff] }
 0x5d9   :  { %6344 = vmatpush3.bf16.msra.mxu1 %v6343_v21 }
 0x5da   :  { %4418 = vrot.lane.b32.xlu0 %v9849_v0, %s11276_s27  ;;  %6346 = vmatprep.subr.bf16.mxu1 %v6345_v40 }
 0x5db   :  { %4420 = vrot.lane.b32.xlu1 %v9852_v19, %s11276_s27  ;;  %6300 = vmatpush3.bf16.msra.mxu0 %v6299_v54  ;;  %v6317_v54 = vpack.c.bf16 %v4740_v24, %v4739_v50 }
 0x5dc   :  { %6302 = vmatprep.subr.bf16.mxu0 %v6301_v23  ;;  %v4790_v23 = vld [vmem:[%s10887_s7 + $0x288] sm:$0xff] }
 0x5dd   :  { %6348 = vmatpush3.bf16.msra.mxu1 %v6347_v51  ;;  %v6353_v36 = vpack.c.bf16 %v4790_v23, %v4789_v49 }
 0x5de   :  { %4422 = vrot.lane.b32.xlu0 %v9858_v3, %s11276_s27  ;;  %6350 = vmatprep.subr.bf16.mxu1 %v6349_v1 }
 0x5df   :  { %4424 = vrot.lane.b32.xlu1 %v9860_v25, %s11276_s27  ;;  %6304 = vmatpush3.bf16.msra.mxu0 %v6303_v9  ;;  %v4822_v9 = vld [vmem:[%s10887_s7 + $0x388] sm:$0xff] }
 0x5e0   :  { %6306 = vmatprep.subr.bf16.mxu0 %v6305_v27  ;;  %v6385_v48 = vpack.c.bf16 %v4822_v9, %v4821_v17 }
 0x5e1   :  { %6352 = vmatpush3.bf16.msra.mxu1 %v6351_v35 }
 0x5e2   :  { %4434 = vrot.lane.b32.xlu0 %v9849_v0, %s6757_s28  ;;  %6386 = vmatprep.subr.bf16.mxu1 %v6385_v48 }
 0x5e3   :  { %4436 = vrot.lane.b32.xlu1 %v9852_v19, %s6757_s28  ;;  %6308 = vmatpush3.bf16.msra.mxu0 %v6307_v20 }
 0x5e4   :  { %6310 = vmatprep.subr.bf16.mxu0 %v6309_v37 }
 0x5e6   :  { %4438 = vrot.lane.b32.xlu0 %v9858_v3, %s6757_s28 }
 0x5e7   :  { %4440 = vrot.lane.b32.xlu1 %v9860_v25, %s6757_s28  ;;  %6312 = vmatpush3.bf16.msra.mxu0 %v6311_v42 }
 0x5e8   :  { %6314 = vmatprep.subr.bf16.mxu0 %v6313_v58 }
 0x5ea   :  { %4451 = vrot.lane.b32.xlu0 %v9849_v0, %s6758_s12 }
 0x5eb   :  { %4453 = vrot.lane.b32.xlu1 %v9852_v19, %s6758_s12  ;;  %6316 = vmatpush3.bf16.msra.mxu0 %v6315_v61  ;;  %v4555_v61 = vunpack.c.0.s8 %v10120_v31 }
 0x5ec   :  { %6318 = vmatprep.subr.bf16.mxu0 %v6317_v54 }
 0x5ee   :  { %4455 = vrot.lane.b32.xlu0 %v9858_v3, %s6758_s12 }
 0x5ef   :  { %4457 = vrot.lane.b32.xlu1 %v9860_v25, %s6758_s12  ;;  %6320 = vmatpush3.bf16.msra.mxu0 %v6319_v38 }
 0x5f0   :  { %6354 = vmatprep.subr.bf16.mxu0 %v6353_v36 }
 0x5f2   :  { %4468 = vrot.lane.b32.xlu0 %v9849_v0, %s11277_s29 }
 0x5f3   :  { %4470 = vrot.lane.b32.xlu1 %v9852_v19, %s11277_s29 }
 0x5f6   :  { %4472 = vrot.lane.b32.xlu0 %v9858_v3, %s11277_s29 }
 0x5f7   :  { %4474 = vrot.lane.b32.xlu1 %v9860_v25, %s11277_s29 }
 0x5fa   :  { %4484 = vrot.lane.b32.xlu0 %v9849_v0, %s11278_s17 }
 0x5fb   :  { %4486 = vrot.lane.b32.xlu1 %v9852_v19, %s11278_s17 }
 0x5fe   :  { %4488 = vrot.lane.b32.xlu0 %v9858_v3, %s11278_s17 }
 0x5ff   :  { %4490 = vrot.lane.b32.xlu1 %v9860_v25, %s11278_s17 }
 0x602   :  { %4500 = vrot.lane.b32.xlu0 %v9849_v0, %s11279_s4 }
 0x603   :  { %4502 = vrot.lane.b32.xlu1 %v9852_v19, %s11279_s4 }
 0x606   :  { %4504 = vrot.lane.b32.xlu0 %v9858_v3, %s11279_s4 }
 0x607   :  { %4506 = vrot.lane.b32.xlu1 %v9860_v25, %s11279_s4 }
 0x60a   :  { %4516 = vrot.lane.b32.xlu0 %v9849_v0, %s6759_s26 }
 0x60b   :  { %4518 = vrot.lane.b32.xlu1 %v9852_v19, %s6759_s26 }
 0x60e   :  { %4520 = vrot.lane.b32.xlu0 %v9858_v3, %s6759_s26 }
 0x60f   :  { %4522 = vrot.lane.b32.xlu1 %v9860_v25, %s6759_s26 }
 0x612   :  { %4533 = vrot.lane.b32.xlu0 %v9849_v0, %s6760_s1 }
 0x613   :  { %4535 = vrot.lane.b32.xlu1 %v9852_v19, %s6760_s1 }
 0x616   :  { %4537 = vrot.lane.b32.xlu0 %v9858_v3, %s6760_s1 }
 0x617   :  { %4539 = vrot.lane.b32.xlu1 %v9860_v25, %s6760_s1 }
 0x644   :  { %v4403_v39 = vpop.permute.xlu0 %4402 }
 0x645   :  { %v4405_v8 = vpop.permute.xlu1 %4404 }
 0x646   :  { %v4412_v21 = vsel %vm11280_vm12, %v4403_v39, %v4405_v8  ;;  %vm11292_vm12 = vcmp.lt.s32.totalorder %v7187_v41, 111 }
 0x647   :  { %v4414_v40 = vmax.f32 %v9849_v0, %v4412_v21 }
 0x648   :  { %v4407_v6 = vpop.permute.xlu0 %4406 }
 0x649   :  { %v4409_v13 = vpop.permute.xlu1 %4408  ;;  %v4411_v43 = vsel %vm11281_vm13, %v4405_v8, %v4407_v6  ;;  %vm11293_vm13 = vmmov %vm11292_vm12 }
 0x64a   :  { %v4410_v57 = vsel %vm11282_vm6, %v4407_v6, %v4409_v13  ;;  %v4413_v32 = vsel %vm11283_vm5, %v4409_v13, %v4403_v39  ;;  %v4415_v34 = vmax.f32 %v9852_v19, %v4411_v43  ;;  %vm11294_vm6 = vmmov %vm11292_vm12 }
 0x64b   :  { %v4416_v51 = vmax.f32 %v9858_v3, %v4410_v57  ;;  %v4417_v24 = vmax.f32 %v9860_v25, %v4413_v32  ;;  %vm11295_vm5 = vmmov %vm11294_vm6 }
 0x64c   :  { %v4419_v60 = vpop.permute.xlu0 %4418 }
 0x64d   :  { %v4421_v47 = vpop.permute.xlu1 %4420 }
 0x64e   :  { %v4428_v16 = vsel %vm11284_vm8, %v4419_v60, %v4421_v47 }
 0x64f   :  { %v4430_v45 = vmax.f32 %v4414_v40, %v4428_v16 }
 0x650   :  { %v4423_v55 = vpop.permute.xlu0 %4422 }
 0x651   :  { %v4425_v27 = vpop.permute.xlu1 %4424  ;;  %v4427_v46 = vsel %vm11285_vm2, %v4421_v47, %v4423_v55 }
 0x652   :  { %v4426_v52 = vsel %vm11286_vm1, %v4423_v55, %v4425_v27  ;;  %v4429_v50 = vsel %vm11287_vm3, %v4425_v27, %v4419_v60  ;;  %v4431_v19 = vmax.f32 %v4415_v34, %v4427_v46  ;;  %vm6764_vm3 = vmmov 0  }
 0x653   :  { %v4432_v3 = vmax.f32 %v4416_v51, %v4426_v52  ;;  %v4433_v56 = vmax.f32 %v4417_v24, %v4429_v50  ;;  %v11300_v24 = vld [vmem:[#allocation7_spill] sm:$0xff] }
 0x654   :  { %v4435_v18 = vpop.permute.xlu0 %4434 }
 0x655   :  { %v4437_v28 = vpop.permute.xlu1 %4436 }
 0x656   :  { %v4445_v10 = vsel %vm4442_vm7, %v4435_v18, %v4437_v28 }
 0x657   :  { %v4447_v7 = vmax.f32 %v4430_v45, %v4445_v10  ;;  %v4558_v10 = vsub.s32 %v4555_v61, %v11300_v24 }
 0x658   :  { %v4439_v20 = vpop.permute.xlu0 %4438 }
 0x659   :  { %v4441_v33 = vpop.permute.xlu1 %4440  ;;  %v4444_v0 = vsel %vm4442_vm7, %v4437_v28, %v4439_v20 }
 0x65a   :  { %v4443_v54 = vsel %vm4442_vm7, %v4439_v20, %v4441_v33  ;;  %v4446_v38 = vsel %vm4442_vm7, %v4441_v33, %v4435_v18  ;;  %v4448_v35 = vmax.f32 %v4431_v19, %v4444_v0  ;;  %vm11296_vm7 = vcmp.lt.s32.totalorder %v7187_v41, 110 }
 0x65b   :  { %v4449_v36 = vmax.f32 %v4432_v3, %v4443_v54  ;;  %v4450_v17 = vmax.f32 %v4433_v56, %v4446_v38  ;;  %vm11297_vm8 = vmmov %vm11296_vm7 }
 0x65c   :  { %v4452_v11 = vpop.permute.xlu0 %4451  ;;  %vm11298_vm2 = vmmov %vm11296_vm7 }
 0x65d   :  { %v4454_v62 = vpop.permute.xlu1 %4453 }
 0x65e   :  { %v4462_v25 = vsel %vm4459_vm0, %v4452_v11, %v4454_v62 }
 0x65f   :  { %v4464_v39 = vmax.f32 %v4447_v7, %v4462_v25 }
 0x660   :  { %v4456_v15 = vpop.permute.xlu0 %4455 }
 0x661   :  { %v4458_v53 = vpop.permute.xlu1 %4457  ;;  %v4461_v63 = vsel %vm4459_vm0, %v4454_v62, %v4456_v15 }
 0x662   :  { %v4460_v49 = vsel %vm4459_vm0, %v4456_v15, %v4458_v53  ;;  %v4463_v23 = vsel %vm4459_vm0, %v4458_v53, %v4452_v11  ;;  %v4465_v8 = vmax.f32 %v4448_v35, %v4461_v63  ;;  %vm11299_vm0 = vmmov %vm11298_vm2  ;;  %v11301_v35 = vlaneseq }
 0x663   :  { %v4466_v47 = vmax.f32 %v4449_v36, %v4460_v49  ;;  %v4467_v55 = vmax.f32 %v4450_v17, %v4463_v23  ;;  %v6762_v17 = vmov 1983009808   ;;  %v4795_v49 = vld [vmem:[%s10887_s7 + $0x2b0] sm:$0xff] }
 0x664   :  { %v4469_v44 = vpop.permute.xlu0 %4468  ;;  %vm10209_vm1 = vcmp.lt.s32.totalorder %v11301_v35, 256 }
 0x665   :  { %v4471_v5 = vpop.permute.xlu1 %4470 }
 0x666   :  { %v4478_v9 = vsel %vm11288_vm11, %v4469_v44, %v4471_v5 }
 0x667   :  { %v4480_v20 = vmax.f32 %v4464_v39, %v4478_v9  ;;  %v4978_v9 = vunpack.c.l.s4 %v6762_v17  ;;  %v4809_v17 = vld [vmem:[%s10887_s7 + $0x320] sm:$0xff] }
 0x668   :  { %v4473_v59 = vpop.permute.xlu0 %4472 }
 0x669   :  { %v4475_v37 = vpop.permute.xlu1 %4474  ;;  %v4477_v48 = vsel %vm11289_vm14, %v4471_v5, %v4473_v59 }
 0x66a   :  { %v4476_v6 = vsel %vm11290_vm15, %v4473_v59, %v4475_v37  ;;  %v4479_v13 = vsel %vm11291_vm4, %v4475_v37, %v4469_v44  ;;  %v4481_v33 = vmax.f32 %v4465_v8, %v4477_v48 }
 0x66b   :  { %v4482_v15 = vmax.f32 %v4466_v47, %v4476_v6  ;;  %v4483_v53 = vmax.f32 %v4467_v55, %v4479_v13 }
 0x66c   :  { %v4485_v12 = vpop.permute.xlu0 %4484 }
 0x66d   :  { %v4487_v2 = vpop.permute.xlu1 %4486 }
 0x66e   :  { %v4494_v27 = vsel %vm11292_vm12, %v4485_v12, %v4487_v2 }
 0x66f   :  { %v4496_v59 = vmax.f32 %v4480_v20, %v4494_v27 }
 0x670   :  { %v4489_v42 = vpop.permute.xlu0 %4488 }
 0x671   :  { %v4491_v22 = vpop.permute.xlu1 %4490  ;;  %v4493_v18 = vsel %vm11293_vm13, %v4487_v2, %v4489_v42 }
 0x672   :  { %v4492_v11 = vsel %vm11294_vm6, %v4489_v42, %v4491_v22  ;;  %v4495_v62 = vsel %vm11295_vm5, %v4491_v22, %v4485_v12  ;;  %v4497_v37 = vmax.f32 %v4481_v33, %v4493_v18 }
 0x673   :  { %v4498_v12 = vmax.f32 %v4482_v15, %v4492_v11  ;;  %v4499_v22 = vmax.f32 %v4483_v53, %v4495_v62 }
 0x674   :  { %v10118_v29 = vpop.permute.xlu0 %4500 }
 0x675   :  { %v4503_v4 = vpop.permute.xlu1 %4502 }
 0x676   :  { %v4510_v44 = vsel %vm11296_vm7, %v10118_v29, %v4503_v4 }
 0x678   :  { %v4505_v58 = vpop.permute.xlu0 %4504 }
 0x679   :  { %v4507_v14 = vpop.permute.xlu1 %4506  ;;  %v4509_v5 = vsel %vm11297_vm8, %v4503_v4, %v4505_v58  ;;  %v4512_v4 = vmax.f32 %v4496_v59, %v4510_v44  ;;  %v4979_v59 = vunpack.c.0.s8 %v4978_v9  ;;  %v4810_v9 = vld [vmem:[%s10887_s7 + $0x328] sm:$0xff] }
 0x67a   :  { %v4508_v2 = vsel %vm11298_vm2, %v4505_v58, %v4507_v14  ;;  %v4511_v42 = vsel %vm11299_vm0, %v4507_v14, %v10118_v29  ;;  %v4513_v32 = vmax.f32 %v4497_v37, %v4509_v5 }
 0x67b   :  { %v4514_v46 = vmax.f32 %v4498_v12, %v4508_v2  ;;  %v4515_v29 = vmax.f32 %v4499_v22, %v4511_v42  ;;  %v10246_v37 = vsub.s32 %v4979_v59, %v11300_v24  ;;  %v4773_v2 = vld [vmem:[%s10887_s7 + $0x200] sm:$0xff]  ;;  %v4774_v42 = vld [vmem:[%s10887_s7 + $0x208] sm:$0xff]  ;;  %v4800_v59 = vld [vmem:[%s10887_s7 + $0x2d8] sm:$0xff] }
 0x67c   :  { %v4517_v30 = vpop.permute.xlu0 %4516 }
 0x67d   :  { %v4519_v1 = vpop.permute.xlu1 %4518 }
 0x67e   :  { %v4527_v21 = vsel %vm4524_vm9, %v4517_v30, %v4519_v1 }
 0x67f   :  { %v4529_v40 = vmax.f32 %v4512_v4, %v4527_v21  ;;  %v4805_v21 = vld [vmem:[%s10887_s7 + $0x300] sm:$0xff] }
 0x680   :  { %v4521_v60 = vpop.permute.xlu0 %4520 }
 0x681   :  { %v4523_v28 = vpop.permute.xlu1 %4522  ;;  %v4526_v43 = vsel %vm4524_vm9, %v4519_v1, %v4521_v60 }
 0x682   :  { %v4525_v16 = vsel %vm4524_vm9, %v4521_v60, %v4523_v28  ;;  %v4528_v58 = vsel %vm4524_vm9, %v4523_v28, %v4517_v30  ;;  %v4530_v34 = vmax.f32 %v4513_v32, %v4526_v43  ;;  %v4806_v43 = vld [vmem:[%s10887_s7 + $0x308] sm:$0xff]  ;;  %v4791_v32 = vld [vmem:[%s10887_s7 + $0x290] sm:$0xff]  ;;  %vm5632_vm9 = vcmask 261120  }
 0x683   :  { %v4531_v50 = vmax.f32 %v4514_v46, %v4525_v16  ;;  %v4532_v51 = vmax.f32 %v4515_v29, %v4528_v58  ;;  %v4792_v16 = vld [vmem:[%s10887_s7 + $0x298] sm:$0xff] }
 0x684   :  { %v4534_v26 = vpop.permute.xlu0 %4533 }
 0x685   :  { %v4536_v57 = vpop.permute.xlu1 %4535 }
 0x686   :  { %v4544_v14 = vsel %vm4541_vm10, %v4534_v26, %v4536_v57 }
 0x687   :  { %v4546_v19 = vmax.f32 %v4529_v40, %v4544_v14  ;;  %v4823_v40 = vld [vmem:[%s10887_s7 + $0x390] sm:$0xff] }
 0x688   :  { %v4538_v52 = vpop.permute.xlu0 %4537 }
 0x689   :  { %v4543_v0 = vsel %vm4541_vm10, %v4536_v57, %v4538_v52  ;;  %v4540_v45 = vpop.permute.xlu1 %4539  ;;  %v6355_v57 = vpack.c.bf16 %v4774_v42, %v4773_v2  ;;  %v4813_v42 = vld [vmem:[%s10887_s7 + $0x340] sm:$0xff] }
 0x68a   :  { %v4547_v54 = vmax.f32 %v4530_v34, %v4543_v0  ;;  %v4542_v38 = vsel %vm4541_vm10, %v4538_v52, %v4540_v45  ;;  %v4545_v30 = vsel %vm4541_vm10, %v4540_v45, %v4534_v26  ;;  %v4824_v34 = vld [vmem:[%s10887_s7 + $0x398] sm:$0xff]  ;;  %v6387_v52 = vpack.c.bf16 %v4806_v43, %v4805_v21 }
 0x68b   :  { %v4548_v3 = vmax.f32 %v4531_v50, %v4542_v38  ;;  %v4549_v56 = vmax.f32 %v4532_v51, %v4545_v30  ;;  %v4775_v50 = vld [vmem:[%s10887_s7 + $0x210] sm:$0xff]  ;;  %v4776_v51 = vld [vmem:[%s10887_s7 + $0x218] sm:$0xff]  ;;  %v6357_v0 = vpack.c.bf16 %v4792_v16, %v4791_v32  ;;  %v6389_v38 = vpack.c.bf16 %v4824_v34, %v4823_v40  ;;  %v4801_v16 = vld [vmem:[%s10887_s7 + $0x2e0] sm:$0xff] }
 0x68c   :  { %v4552_v25 = vcombine.low %v4546_v19, %v4547_v54  ;;  %v4592_v63 = vcombine.high %v4546_v19, %v4547_v54  ;;  %v4793_v19 = vld [vmem:[%s10887_s7 + $0x2a0] sm:$0xff]  ;;  %v4794_v54 = vld [vmem:[%s10887_s7 + $0x2a8] sm:$0xff]  ;;  %v4807_v30 = vld [vmem:[%s10887_s7 + $0x310] sm:$0xff]  ;;  %vm5706_vm10 = vcmask 33792  }
 0x68d   :  { %v4631_v1 = vcombine.low %v4548_v3, %v4549_v56  ;;  %v4668_v7 = vcombine.high %v4548_v3, %v4549_v56  ;;  %v4808_v3 = vld [vmem:[%s10887_s7 + $0x318] sm:$0xff] }
 0x68e   :  { %v4559_v31 = vrot.slane %v4552_v25, %v4558_v10  ;;  %v4599_v61 = vrot.slane %v4592_v63, %v4558_v10  ;;  %v6359_v25 = vpack.c.bf16 %v4776_v51, %v4775_v50  ;;  %v4825_v63 = vld [vmem:[%s10887_s7 + $0x3a0] sm:$0xff]  ;;  %v6391_v35 = vpack.c.bf16 %v4808_v3, %v4807_v30  ;;  %v4832_v21 = vld [vmem:[%s10887_s7 + $0x3d8] sm:$0xff]  ;;  %v4834_v50 = vld [vmem:[%s10887_s7 + $0x3e8] sm:$0xff] }
 0x68f   :  { %v4638_v23 = vrot.slane %v4631_v1, %v4558_v10  ;;  %v4675_v36 = vrot.slane %v4668_v7, %v4558_v10  ;;  %v4826_v1 = vld [vmem:[%s10887_s7 + $0x3a8] sm:$0xff]  ;;  %v6361_v7 = vpack.c.bf16 %v4794_v54, %v4793_v19  ;;  %v4816_v40 = vld [vmem:[%s10887_s7 + $0x358] sm:$0xff]  ;;  %v4803_v19 = vld [vmem:[%s10887_s7 + $0x2f0] sm:$0xff] }
 0x690   :  { %v4566_v48 = vrot.slane %v4559_v31, %v4558_v10  ;;  %v4573_v41 = vcombine.high %v4559_v31, %v4559_v31  ;;  %v4606_v39 = vrot.slane %v4599_v61, %v4558_v10  ;;  %v4610_v8 = vcombine.high %v4599_v61, %v4599_v61  ;;  %v4777_v31 = vld [vmem:[%s10887_s7 + $0x220] sm:$0xff]  ;;  %v4778_v61 = vld [vmem:[%s10887_s7 + $0x228] sm:$0xff]  ;;  %v4804_v54 = vld [vmem:[%s10887_s7 + $0x2f8] sm:$0xff] }
 0x691   :  { %v4645_v6 = vrot.slane %v4638_v23, %v4558_v10  ;;  %v4649_v13 = vcombine.high %v4638_v23, %v4638_v23  ;;  %v4682_v60 = vrot.slane %v4675_v36, %v4558_v10  ;;  %v4686_v47 = vcombine.high %v4675_v36, %v4675_v36  ;;  %v4796_v23 = vld [vmem:[%s10887_s7 + $0x2b8] sm:$0xff]  ;;  %v4817_v30 = vld [vmem:[%s10887_s7 + $0x360] sm:$0xff]  ;;  %v4818_v3 = vld [vmem:[%s10887_s7 + $0x368] sm:$0xff] }
 0x692   :  { %4572 = vst.msk [vmem:[#allocation3] ss:$2 sm:$0x3] %vm10209_vm1, %v4566_v48  ;;  %v4580_v55 = vrot.slane %v4573_v41, %v4558_v10  ;;  %v4584_v27 = vcombine.high %v4566_v48, %v4566_v48  ;;  %4609 = vst.msk [vmem:[#allocation3 + $0x10] ss:$2 sm:$0x3] %vm10209_vm1, %v4606_v39  ;;  %v4617_v18 = vrot.slane %v4610_v8, %v4558_v10 }
 0x693   :  { %v4621_v28 = vcombine.high %v4606_v39, %v4606_v39  ;;  %4648 = vst.msk [vmem:[#allocation3 + $0x1] ss:$2 sm:$0x3] %vm10209_vm1, %v4645_v6  ;;  %v4656_v20 = vrot.slane %v4649_v13, %v4558_v10  ;;  %v4660_v33 = vcombine.high %v4645_v6, %v4645_v6  ;;  %4685 = vst.msk [vmem:[#allocation3 + $0x11] ss:$2 sm:$0x3] %vm10209_vm1, %v4682_v60 }
 0x694   :  { %v4693_v11 = vrot.slane %v4686_v47, %v4558_v10  ;;  %v4697_v62 = vcombine.high %v4682_v60, %v4682_v60  ;;  %4583 = vst.msk [vmem:[#allocation3 + $0x4] ss:$2 sm:$0x3] %vm10209_vm1, %v4580_v55  ;;  %4587 = vst.msk [vmem:[#allocation3 + $0x8] ss:$2 sm:$0x3] %vm10209_vm1, %v4584_v27  ;;  %v4588_v15 = vcombine.high %v4580_v55, %v4580_v55 }
 0x695   :  { %4620 = vst.msk [vmem:[#allocation3 + $0x14] ss:$2 sm:$0x3] %vm10209_vm1, %v4617_v18  ;;  %4624 = vst.msk [vmem:[#allocation3 + $0x18] ss:$2 sm:$0x3] %vm10209_vm1, %v4621_v28  ;;  %v4625_v53 = vcombine.high %v4617_v18, %v4617_v18  ;;  %v4664_v44 = vcombine.high %v4656_v20, %v4656_v20  ;;  %v6393_v36 = vpack.c.bf16 %v4826_v1, %v4825_v63 }
 0x696   :  { %4659 = vst.msk [vmem:[#allocation3 + $0x5] ss:$2 sm:$0x3] %vm10209_vm1, %v4656_v20  ;;  %4663 = vst.msk [vmem:[#allocation3 + $0x9] ss:$2 sm:$0x3] %vm10209_vm1, %v4660_v33  ;;  %v4701_v5 = vcombine.high %v4693_v11, %v4693_v11  ;;  %v6363_v48 = vpack.c.bf16 %v4778_v61, %v4777_v31  ;;  %v6365_v8 = vpack.c.bf16 %v4796_v23, %v4795_v49 }
 0x697   :  { %4696 = vst.msk [vmem:[#allocation3 + $0x15] ss:$2 sm:$0x3] %vm10209_vm1, %v4693_v11  ;;  %4700 = vst.msk [vmem:[#allocation3 + $0x19] ss:$2 sm:$0x3] %vm10209_vm1, %v4697_v62  ;;  %v6395_v60 = vpack.c.bf16 %v4810_v9, %v4809_v17  ;;  %v6381_v1 = vpack.c.bf16 %v4804_v54, %v4803_v19 }
 0x698   :  { %4591 = vst.msk [vmem:[#allocation3 + $0xc] ss:$2 sm:$0x3] %vm10209_vm1, %v4588_v15  ;;  %4628 = vst.msk [vmem:[#allocation3 + $0x1c] ss:$2 sm:$0x3] %vm10209_vm1, %v4625_v53 }
 0x699   :  { %4667 = vst.msk [vmem:[#allocation3 + $0xd] ss:$2 sm:$0x3] %vm10209_vm1, %v4664_v44  ;;  %4704 = vst.msk [vmem:[#allocation3 + $0x1d] ss:$2 sm:$0x3] %vm10209_vm1, %v4701_v5 }
 0x69a   :  { %v4827_v41 = vld [vmem:[%s10887_s7 + $0x3b0] sm:$0xff]  ;;  %v4828_v39 = vld [vmem:[%s10887_s7 + $0x3b8] sm:$0xff]  ;;  %v4797_v47 = vld [vmem:[%s10887_s7 + $0x2c0] sm:$0xff] }
 0x69b   :  { %v4779_v6 = vld [vmem:[%s10887_s7 + $0x230] sm:$0xff]  ;;  %v4780_v13 = vld [vmem:[%s10887_s7 + $0x238] sm:$0xff]  ;;  %v4798_v55 = vld [vmem:[%s10887_s7 + $0x2c8] sm:$0xff]  ;;  %v6397_v27 = vpack.c.bf16 %v4828_v39, %v4827_v41 }
 0x69c   :  { %v4811_v18 = vld [vmem:[%s10887_s7 + $0x330] sm:$0xff]  ;;  %v4812_v28 = vld [vmem:[%s10887_s7 + $0x338] sm:$0xff]  ;;  %v6367_v20 = vpack.c.bf16 %v4780_v13, %v4779_v6  ;;  %v4829_v33 = vld [vmem:[%s10887_s7 + $0x3c0] sm:$0xff]  ;;  %v6369_v62 = vpack.c.bf16 %v4798_v55, %v4797_v47 }
 0x69d   :  { %v4705_v26 = vld [vmem:[#allocation3] sm:$0xff]  ;;  %v4830_v11 = vld [vmem:[%s10887_s7 + $0x3c8] sm:$0xff]  ;;  %v6399_v44 = vpack.c.bf16 %v4812_v28, %v4811_v18  ;;  %v4799_v5 = vld [vmem:[%s10887_s7 + $0x2d0] sm:$0xff] }
 0x69e   :  { %v4983_v12 = vrot.slane %v4705_v26, %v10246_v37  ;;  %v4976_v22 = vcombine.high %v4705_v26, %v4705_v26  ;;  %v4781_v15 = vld [vmem:[%s10887_s7 + $0x240] sm:$0xff]  ;;  %v4782_v53 = vld [vmem:[%s10887_s7 + $0x248] sm:$0xff]  ;;  %v6401_v2 = vpack.c.bf16 %v4830_v11, %v4829_v33  ;;  %v6373_v43 = vpack.c.bf16 %v4800_v59, %v4799_v5  ;;  %v4836_v63 = vld [vmem:[%s10887_s7 + $0x3f8] sm:$0xff] }
 0x69f   :  { %v4814_v26 = vld [vmem:[%s10887_s7 + $0x348] sm:$0xff]  ;;  %v4788_v31 = vld [vmem:[%s10887_s7 + $0x278] sm:$0xff]  ;;  %v4707_v61 = vld [vmem:[#allocation3 + $0x10] sm:$0xff] }
 0x6a0   :  { %v4706_v4 = vld [vmem:[#allocation3 + $0x8] sm:$0xff]  ;;  %v4991_v58 = vcombine.high %v4983_v12, %v4983_v12  ;;  %v4990_v46 = vrot.slane %v4976_v22, %v10246_v37  ;;  %v4831_v22 = vld [vmem:[%s10887_s7 + $0x3d0] sm:$0xff]  ;;  %v6403_v32 = vpack.c.bf16 %v4814_v26, %v4813_v42  ;;  %v4853_v49 = vld [vmem:[%s10887_s7 + $0x480] sm:$0xff]  ;;  %v10459_v55 = vrot.slane %v4707_v61, %v10246_v37 }
 0x6a1   :  { %v10269_v29 = vrot.slane %v4706_v4, %v10246_v37  ;;  %v4993_v14 = vcombine.high %v4706_v4, %v4706_v4  ;;  %v4784_v4 = vld [vmem:[%s10887_s7 + $0x258] sm:$0xff]  ;;  %v4854_v23 = vld [vmem:[%s10887_s7 + $0x488] sm:$0xff]  ;;  %v4819_v17 = vld [vmem:[%s10887_s7 + $0x370] sm:$0xff] }
 0x6a2   :  { %5124 = vmatprep.mubr.f32.mxu0 %v4991_v58  ;;  %v4992_v24 = vcombine.high %v4990_v46, %v4990_v46  ;;  %v4802_v58 = vld [vmem:[%s10887_s7 + $0x2e8] sm:$0xff]  ;;  %v4820_v9 = vld [vmem:[%s10887_s7 + $0x378] sm:$0xff]  ;;  %v4885_v41 = vld [vmem:[%s10887_s7 + $0x580] sm:$0xff]  ;;  %v6417_v6 = vpack.c.bf16 %v4854_v23, %v4853_v49 }
 0x6a3   :  { %v5008_v10 = vcombine.high %v10269_v29, %v10269_v29  ;;  %v10286_v45 = vrot.slane %v4993_v14, %v10246_v37  ;;  %5125 = vmatmul.mubr.f32.vlgmr.msra.gmra.mrb[4].mxu0 %v4983_v12  ;;  %v6371_v12 = vpack.c.bf16 %v4782_v53, %v4781_v15  ;;  %v4815_v14 = vld [vmem:[%s10887_s7 + $0x350] sm:$0xff]  ;;  %v6377_v51 = vpack.c.bf16 %v4802_v58, %v4801_v16  ;;  %v4886_v39 = vld [vmem:[%s10887_s7 + $0x588] sm:$0xff]  ;;  %v4837_v13 = vld [vmem:[%s10887_s7 + $0x400] sm:$0xff] }
 0x6a4   :  { %6356 = vmatpush3.bf16.msra.mxu0 %v6355_v57  ;;  %5194 = vmatprep.mubr.f32.mxu1 %v4992_v24  ;;  %v4783_v57 = vld [vmem:[%s10887_s7 + $0x250] sm:$0xff]  ;;  %v4785_v24 = vld [vmem:[%s10887_s7 + $0x260] sm:$0xff]  ;;  %v6415_v47 = vpack.c.bf16 %v4820_v9, %v4819_v17  ;;  %v4856_v18 = vld [vmem:[%s10887_s7 + $0x498] sm:$0xff]  ;;  %v6449_v28 = vpack.c.bf16 %v4886_v39, %v4885_v41 }
 0x6a5   :  { %v5009_v56 = vcombine.high %v10286_v45, %v10286_v45  ;;  %5264 = vmatprep.mubr.f32.mxu0 %v5008_v10  ;;  %5195 = vmatmul.mubr.f32.vlgmr.msra.gmra.mrb[4].mxu1 %v4990_v46  ;;  %v6405_v46 = vpack.c.bf16 %v4832_v21, %v4831_v22  ;;  %v6375_v34 = vpack.c.bf16 %v4784_v4, %v4783_v57  ;;  %v4786_v10 = vld [vmem:[%s10887_s7 + $0x268] sm:$0xff]  ;;  %v4887_v15 = vld [vmem:[%s10887_s7 + $0x590] sm:$0xff]  ;;  %v4888_v53 = vld [vmem:[%s10887_s7 + $0x598] sm:$0xff] }
 0x6a6   :  { %6388 = vmatpush3.bf16.msra.mxu1 %v6387_v52  ;;  %6358 = vmatprep.subr.bf16.mxu0 %v6357_v0  ;;  %v4833_v52 = vld [vmem:[%s10887_s7 + $0x3e0] sm:$0xff]  ;;  %v6407_v0 = vpack.c.bf16 %v4816_v40, %v4815_v14  ;;  %v4870_v33 = vld [vmem:[%s10887_s7 + $0x508] sm:$0xff]  ;;  %v4839_v5 = vld [vmem:[%s10887_s7 + $0x410] sm:$0xff]  ;;  %v6453_v22 = vpack.c.bf16 %v4888_v53, %v4887_v15 }
 0x6a7   :  { %5334 = vmatprep.mubr.f32.mxu1 %v5009_v56  ;;  %6390 = vmatprep.subr.bf16.mxu1 %v6389_v38  ;;  %v6409_v38 = vpack.c.bf16 %v4834_v50, %v4833_v52  ;;  %v6379_v56 = vpack.c.bf16 %v4786_v10, %v4785_v24  ;;  %v4840_v59 = vld [vmem:[%s10887_s7 + $0x418] sm:$0xff]  ;;  %v4857_v26 = vld [vmem:[%s10887_s7 + $0x4a0] sm:$0xff]  ;;  %v4871_v21 = vld [vmem:[%s10887_s7 + $0x510] sm:$0xff] }
 0x6a8   :  { %6360 = vmatpush3.bf16.msra.mxu0 %v6359_v25  ;;  %v4835_v25 = vld [vmem:[%s10887_s7 + $0x3f0] sm:$0xff]  ;;  %v6423_v4 = vpack.c.bf16 %v4840_v59, %v4839_v5  ;;  %v4841_v58 = vld [vmem:[%s10887_s7 + $0x420] sm:$0xff]  ;;  %v4874_v50 = vld [vmem:[%s10887_s7 + $0x528] sm:$0xff] }
 0x6a9   :  { %6362 = vmatprep.subr.bf16.mxu0 %v6361_v7  ;;  %v4787_v7 = vld [vmem:[%s10887_s7 + $0x270] sm:$0xff]  ;;  %v4873_v52 = vld [vmem:[%s10887_s7 + $0x520] sm:$0xff]  ;;  %v4892_v10 = vld [vmem:[%s10887_s7 + $0x5b8] sm:$0xff] }
 0x6aa   :  { %6392 = vmatpush3.bf16.msra.mxu1 %v6391_v35  ;;  %v6411_v35 = vpack.c.bf16 %v4818_v3, %v4817_v30  ;;  %v4859_v40 = vld [vmem:[%s10887_s7 + $0x4b0] sm:$0xff]  ;;  %v4844_v54 = vld [vmem:[%s10887_s7 + $0x438] sm:$0xff]  ;;  %v4861_v30 = vld [vmem:[%s10887_s7 + $0x4c0] sm:$0xff] }
 0x6ab   :  { %6394 = vmatprep.subr.bf16.mxu1 %v6393_v36  ;;  %v6413_v36 = vpack.c.bf16 %v4836_v63, %v4835_v25  ;;  %v4891_v24 = vld [vmem:[%s10887_s7 + $0x5b0] sm:$0xff]  ;;  %v4862_v3 = vld [vmem:[%s10887_s7 + $0x4c8] sm:$0xff]  ;;  %v4876_v63 = vld [vmem:[%s10887_s7 + $0x538] sm:$0xff] }
 0x6ac   :  { %6364 = vmatpush3.bf16.msra.mxu0 %v6363_v48  ;;  %v6383_v48 = vpack.c.bf16 %v4788_v31, %v4787_v7  ;;  %v4843_v19 = vld [vmem:[%s10887_s7 + $0x430] sm:$0xff]  ;;  %v4893_v7 = vld [vmem:[%s10887_s7 + $0x5c0] sm:$0xff]  ;;  %v4894_v31 = vld [vmem:[%s10887_s7 + $0x5c8] sm:$0xff] }
 0x6ad   :  { %6366 = vmatprep.subr.bf16.mxu0 %v6365_v8  ;;  %v5010_v8 = vcombine.high %v4707_v61, %v4707_v61  ;;  %v4875_v25 = vld [vmem:[%s10887_s7 + $0x530] sm:$0xff]  ;;  %v6433_v61 = vpack.c.bf16 %v4862_v3, %v4861_v30  ;;  %v4846_v49 = vld [vmem:[%s10887_s7 + $0x448] sm:$0xff]  ;;  %v4864_v17 = vld [vmem:[%s10887_s7 + $0x4d8] sm:$0xff]  ;;  %v6465_v9 = vpack.c.bf16 %v4894_v31, %v4893_v7 }
 0x6ae   :  { %6396 = vmatpush3.bf16.msra.mxu1 %v6395_v60  ;;  %v4838_v60 = vld [vmem:[%s10887_s7 + $0x408] sm:$0xff]  ;;  %v6463_v23 = vpack.c.bf16 %v4876_v63, %v4875_v25  ;;  %v4897_v53 = vld [vmem:[%s10887_s7 + $0x5e0] sm:$0xff]  ;;  %v4920_v25 = vld [vmem:[%s10887_s7 + $0x698] sm:$0xff] }
 0x6af   :  { %6398 = vmatprep.subr.bf16.mxu1 %v6397_v27  ;;  %v4855_v27 = vld [vmem:[%s10887_s7 + $0x490] sm:$0xff]  ;;  %v6419_v11 = vpack.c.bf16 %v4838_v60, %v4837_v13  ;;  %v4878_v41 = vld [vmem:[%s10887_s7 + $0x548] sm:$0xff]  ;;  %v4849_v59 = vld [vmem:[%s10887_s7 + $0x460] sm:$0xff] }
 0x6b0   :  { %6368 = vmatpush3.bf16.msra.mxu0 %v6367_v20  ;;  %v4869_v20 = vld [vmem:[%s10887_s7 + $0x500] sm:$0xff]  ;;  %v4847_v60 = vld [vmem:[%s10887_s7 + $0x450] sm:$0xff]  ;;  %v4934_v7 = vld [vmem:[%s10887_s7 + $0x708] sm:$0xff] }
 0x6b1   :  { %6370 = vmatprep.subr.bf16.mxu0 %v6369_v62  ;;  %v10474_v62 = vrot.slane %v5010_v8, %v10246_v37  ;;  %v6451_v42 = vpack.c.bf16 %v4870_v33, %v4869_v20  ;;  %v4895_v8 = vld [vmem:[%s10887_s7 + $0x5d0] sm:$0xff] }
 0x6b2   :  { %6400 = vmatpush3.bf16.msra.mxu1 %v6399_v44  ;;  %v6421_v44 = vpack.c.bf16 %v4856_v18, %v4855_v27  ;;  %v4865_v18 = vld [vmem:[%s10887_s7 + $0x4e0] sm:$0xff]  ;;  %v4879_v33 = vld [vmem:[%s10887_s7 + $0x550] sm:$0xff] }
 0x6b3   :  { %6402 = vmatprep.subr.bf16.mxu1 %v6401_v2  ;;  %v5025_v2 = vcombine.high %v10459_v55, %v10459_v55  ;;  %v5026_v57 = vcombine.high %v10474_v62, %v10474_v62 }
 0x6b4   :  { %6372 = vmatpush3.bf16.msra.mxu0 %v6371_v12  ;;  %v4858_v12 = vld [vmem:[%s10887_s7 + $0x4a8] sm:$0xff] }
 0x6b5   :  { %6374 = vmatprep.subr.bf16.mxu0 %v6373_v43  ;;  %v4872_v43 = vld [vmem:[%s10887_s7 + $0x518] sm:$0xff]  ;;  %v6425_v16 = vpack.c.bf16 %v4858_v12, %v4857_v26  ;;  %v4867_v26 = vld [vmem:[%s10887_s7 + $0x4f0] sm:$0xff] }
 0x6b6   :  { %6404 = vmatpush3.bf16.msra.mxu1 %v6403_v32  ;;  %v4890_v32 = vld [vmem:[%s10887_s7 + $0x5a8] sm:$0xff]  ;;  %v6455_v14 = vpack.c.bf16 %v4872_v43, %v4871_v21  ;;  %v4868_v12 = vld [vmem:[%s10887_s7 + $0x4f8] sm:$0xff]  ;;  %v4881_v21 = vld [vmem:[%s10887_s7 + $0x560] sm:$0xff] }
 0x6b7   :  { %6406 = vmatprep.subr.bf16.mxu1 %v6405_v46  ;;  %v4842_v46 = vld [vmem:[%s10887_s7 + $0x428] sm:$0xff] }
 0x6b8   :  { %6376 = vmatpush3.bf16.msra.mxu0 %v6375_v34  ;;  %v4882_v43 = vld [vmem:[%s10887_s7 + $0x568] sm:$0xff] }
 0x6b9   :  { %6378 = vmatprep.subr.bf16.mxu0 %v6377_v51  ;;  %v6427_v51 = vpack.c.bf16 %v4842_v46, %v4841_v58  ;;  %v4852_v58 = vld [vmem:[%s10887_s7 + $0x478] sm:$0xff] }
 0x6ba   :  { %6408 = vmatpush3.bf16.msra.mxu1 %v6407_v0  ;;  %v4708_v46 = vld [vmem:[#allocation3 + $0x18] sm:$0xff] }
 0x6bb   :  { %6410 = vmatprep.subr.bf16.mxu1 %v6409_v38  ;;  %v6459_v38 = vpack.c.bf16 %v4874_v50, %v4873_v52  ;;  %v4883_v52 = vld [vmem:[%s10887_s7 + $0x570] sm:$0xff]  ;;  %v4884_v50 = vld [vmem:[%s10887_s7 + $0x578] sm:$0xff]  ;;  %v10663_v3 = vrot.slane %v4708_v46, %v10246_v37 }
 0x6bc   :  { %6380 = vmatpush3.bf16.msra.mxu0 %v6379_v56  ;;  %v6461_v56 = vpack.c.bf16 %v4892_v10, %v4891_v24  ;;  %v4949_v24 = vld [vmem:[%s10887_s7 + $0x780] sm:$0xff]  ;;  %v4950_v10 = vld [vmem:[%s10887_s7 + $0x788] sm:$0xff]  ;;  %v6479_v30 = vpack.c.bf16 %v4884_v50, %v4883_v52 }
 0x6bd   :  { %6382 = vmatprep.subr.bf16.mxu0 %v6381_v1  ;;  %v6431_v1 = vpack.c.bf16 %v4844_v54, %v4843_v19  ;;  %v4901_v54 = vld [vmem:[%s10887_s7 + $0x600] sm:$0xff]  ;;  %v6513_v63 = vpack.c.bf16 %v4950_v10, %v4949_v24  ;;  %v4959_v10 = vld [vmem:[%s10887_s7 + $0x7d0] sm:$0xff] }
 0x6be   :  { %6412 = vmatpush3.bf16.msra.mxu1 %v6411_v35  ;;  %v4845_v35 = vld [vmem:[%s10887_s7 + $0x440] sm:$0xff] }
 0x6bf   :  { %6414 = vmatprep.subr.bf16.mxu1 %v6413_v36  ;;  %v4863_v36 = vld [vmem:[%s10887_s7 + $0x4d0] sm:$0xff]  ;;  %v6435_v39 = vpack.c.bf16 %v4846_v49, %v4845_v35  ;;  %v4952_v49 = vld [vmem:[%s10887_s7 + $0x798] sm:$0xff]  ;;  %v4941_v50 = vld [vmem:[%s10887_s7 + $0x740] sm:$0xff] }
 0x6c0   :  { %6384 = vmatpush3.bf16.msra.mxu0 %v6383_v48  ;;  %v4877_v48 = vld [vmem:[%s10887_s7 + $0x540] sm:$0xff]  ;;  %v6437_v13 = vpack.c.bf16 %v4864_v17, %v4863_v36  ;;  %v4951_v35 = vld [vmem:[%s10887_s7 + $0x790] sm:$0xff]  ;;  %v4904_v17 = vld [vmem:[%s10887_s7 + $0x618] sm:$0xff] }
 0x6c1   :  { %6418 = vmatprep.subr.bf16.mxu0 %v6417_v6  ;;  %v4896_v6 = vld [vmem:[%s10887_s7 + $0x5d8] sm:$0xff]  ;;  %v6467_v27 = vpack.c.bf16 %v4878_v41, %v4877_v48  ;;  %v4903_v36 = vld [vmem:[%s10887_s7 + $0x610] sm:$0xff]  ;;  %v4921_v48 = vld [vmem:[%s10887_s7 + $0x6a0] sm:$0xff] }
 0x6c2   :  { %6416 = vmatpush3.bf16.msra.mxu1 %v6415_v47  ;;  %v4848_v47 = vld [vmem:[%s10887_s7 + $0x458] sm:$0xff]  ;;  %v6469_v20 = vpack.c.bf16 %v4896_v6, %v4895_v8  ;;  %v4922_v41 = vld [vmem:[%s10887_s7 + $0x6a8] sm:$0xff]  ;;  %v4935_v8 = vld [vmem:[%s10887_s7 + $0x710] sm:$0xff] }
 0x6c3   :  { %5265 = vmatmul.mubr.f32.vlgmr.msra.gmra.mrb[6].mxu0 %v10269_v29  ;;  %6450 = vmatprep.subr.bf16.mxu1 %v6449_v28  ;;  %v4889_v29 = vld [vmem:[%s10887_s7 + $0x5a0] sm:$0xff]  ;;  %v4866_v28 = vld [vmem:[%s10887_s7 + $0x4e8] sm:$0xff]  ;;  %v6439_v15 = vpack.c.bf16 %v4848_v47, %v4847_v60  ;;  %v4936_v6 = vld [vmem:[%s10887_s7 + $0x718] sm:$0xff]  ;;  %v6487_v60 = vpack.c.bf16 %v4904_v17, %v4903_v36 }
 0x6c4   :  { %6420 = vmatpush3.bf16.msra.mxu0 %v6419_v11  ;;  %5404 = vmatprep.mubr.f32.mxu0 %v5025_v2  ;;  %v6457_v34 = vpack.c.bf16 %v4890_v32, %v4889_v29  ;;  %v4880_v11 = vld [vmem:[%s10887_s7 + $0x558] sm:$0xff]  ;;  %v6441_v5 = vpack.c.bf16 %v4866_v28, %v4865_v18  ;;  %v4850_v2 = vld [vmem:[%s10887_s7 + $0x468] sm:$0xff]  ;;  %v6445_v32 = vpack.c.bf16 %v4868_v12, %v4867_v26  ;;  %v4905_v18 = vld [vmem:[%s10887_s7 + $0x620] sm:$0xff] }
 0x6c5   :  { %5335 = vmatmul.mubr.f32.vlgmr.msra.gmra.mrb[6].mxu1 %v10286_v45  ;;  %6422 = vmatprep.subr.bf16.mxu0 %v6421_v44  ;;  %v4860_v45 = vld [vmem:[%s10887_s7 + $0x4b8] sm:$0xff]  ;;  %v4898_v44 = vld [vmem:[%s10887_s7 + $0x5e8] sm:$0xff]  ;;  %v4913_v36 = vld [vmem:[%s10887_s7 + $0x660] sm:$0xff] }
 0x6c6   :  { %6452 = vmatpush3.bf16.msra.mxu1 %v6451_v42  ;;  %5474 = vmatprep.mubr.f32.mxu1 %v5026_v57  ;;  %v6429_v0 = vpack.c.bf16 %v4860_v45, %v4859_v40  ;;  %v6471_v42 = vpack.c.bf16 %v4880_v11, %v4879_v33  ;;  %v6443_v57 = vpack.c.bf16 %v4850_v2, %v4849_v59  ;;  %v4900_v29 = vld [vmem:[%s10887_s7 + $0x5f8] sm:$0xff]  ;;  %v4917_v40 = vld [vmem:[%s10887_s7 + $0x680] sm:$0xff]  ;;  %v4918_v45 = vld [vmem:[%s10887_s7 + $0x688] sm:$0xff] }
 0x6c7   :  { %6454 = vmatprep.subr.bf16.mxu1 %v6453_v22  ;;  %v6473_v22 = vpack.c.bf16 %v4898_v44, %v4897_v53  ;;  %v6481_v19 = vpack.c.bf16 %v4918_v45, %v4917_v40  ;;  %v4954_v47 = vld [vmem:[%s10887_s7 + $0x7a8] sm:$0xff]  ;;  %v4923_v33 = vld [vmem:[%s10887_s7 + $0x6b0] sm:$0xff]  ;;  %v4956_v59 = vld [vmem:[%s10887_s7 + $0x7b8] sm:$0xff] }
 0x6c8   :  { %6424 = vmatpush3.bf16.msra.mxu0 %v6423_v4  ;;  %v4899_v4 = vld [vmem:[%s10887_s7 + $0x5f0] sm:$0xff]  ;;  %v4906_v28 = vld [vmem:[%s10887_s7 + $0x628] sm:$0xff]  ;;  %v4908_v26 = vld [vmem:[%s10887_s7 + $0x638] sm:$0xff] }
 0x6c9   :  { %6426 = vmatprep.subr.bf16.mxu0 %v6425_v16  ;;  %v4851_v16 = vld [vmem:[%s10887_s7 + $0x470] sm:$0xff]  ;;  %v4938_v53 = vld [vmem:[%s10887_s7 + $0x728] sm:$0xff]  ;;  %v6491_v44 = vpack.c.bf16 %v4906_v28, %v4905_v18 }
 0x6ca   :  { %6456 = vmatpush3.bf16.msra.mxu1 %v6455_v14  ;;  %v6475_v14 = vpack.c.bf16 %v4882_v43, %v4881_v21  ;;  %v4926_v21 = vld [vmem:[%s10887_s7 + $0x6c8] sm:$0xff]  ;;  %v4927_v45 = vld [vmem:[%s10887_s7 + $0x6d0] sm:$0xff] }
 0x6cb   :  { %6458 = vmatprep.subr.bf16.mxu1 %v6457_v34  ;;  %v6477_v34 = vpack.c.bf16 %v4900_v29, %v4899_v4  ;;  %v4940_v4 = vld [vmem:[%s10887_s7 + $0x738] sm:$0xff]  ;;  %v4914_v17 = vld [vmem:[%s10887_s7 + $0x668] sm:$0xff] }
 0x6cc   :  { %6428 = vmatpush3.bf16.msra.mxu0 %v6427_v51  ;;  %v6447_v51 = vpack.c.bf16 %v4852_v58, %v4851_v16  ;;  %v4958_v16 = vld [vmem:[%s10887_s7 + $0x7c8] sm:$0xff] }
 0x6cd   :  { %6430 = vmatprep.subr.bf16.mxu0 %v6429_v0  ;;  %v5027_v0 = vcombine.high %v4708_v46, %v4708_v46  ;;  %v4909_v46 = vld [vmem:[%s10887_s7 + $0x640] sm:$0xff] }
 0x6ce   :  { %6460 = vmatpush3.bf16.msra.mxu1 %v6459_v38  ;;  %v4902_v38 = vld [vmem:[%s10887_s7 + $0x608] sm:$0xff] }
 0x6cf   :  { %6462 = vmatprep.subr.bf16.mxu1 %v6461_v56  ;;  %v4919_v56 = vld [vmem:[%s10887_s7 + $0x690] sm:$0xff]  ;;  %v6483_v31 = vpack.c.bf16 %v4902_v38, %v4901_v54  ;;  %v4912_v38 = vld [vmem:[%s10887_s7 + $0x658] sm:$0xff] }
 0x6d0   :  { %6432 = vmatpush3.bf16.msra.mxu0 %v6431_v1  ;;  %v4933_v1 = vld [vmem:[%s10887_s7 + $0x700] sm:$0xff]  ;;  %v4911_v54 = vld [vmem:[%s10887_s7 + $0x650] sm:$0xff] }
 0x6d1   :  { %6434 = vmatprep.subr.bf16.mxu0 %v6433_v61  ;;  %v10678_v61 = vrot.slane %v5027_v0, %v10246_v37  ;;  %v5042_v37 = vcombine.high %v10663_v3, %v10663_v3  ;;  %v4960_v0 = vld [vmem:[%s10887_s7 + $0x7d8] sm:$0xff] }
 0x6d2   :  { %6464 = vmatpush3.bf16.msra.mxu1 %v6463_v23  ;;  %v6485_v23 = vpack.c.bf16 %v4920_v25, %v4919_v56  ;;  %v4929_v56 = vld [vmem:[%s10887_s7 + $0x6e0] sm:$0xff]  ;;  %v4930_v25 = vld [vmem:[%s10887_s7 + $0x6e8] sm:$0xff] }
 0x6d3   :  { %6466 = vmatprep.subr.bf16.mxu1 %v6465_v9  ;;  %v6515_v9 = vpack.c.bf16 %v4934_v7, %v4933_v1  ;;  %v4943_v1 = vld [vmem:[%s10887_s7 + $0x750] sm:$0xff]  ;;  %v4944_v7 = vld [vmem:[%s10887_s7 + $0x758] sm:$0xff] }
 0x6d4   :  { %6436 = vmatpush3.bf16.msra.mxu0 %v6435_v39  ;;  %v6517_v39 = vpack.c.bf16 %v4952_v49, %v4951_v35  ;;  %v4961_v35 = vld [vmem:[%s10887_s7 + $0x7e0] sm:$0xff]  ;;  %v4962_v49 = vld [vmem:[%s10887_s7 + $0x7e8] sm:$0xff] }
 0x6d5   :  { %6438 = vmatprep.subr.bf16.mxu0 %v6437_v13  ;;  %v5043_v13 = vcombine.high %v10678_v61, %v10678_v61 }
 0x6d6   :  { %6468 = vmatpush3.bf16.msra.mxu1 %v6467_v27  ;;  %v6489_v27 = vpack.c.bf16 %v4922_v41, %v4921_v48  ;;  %v4932_v48 = vld [vmem:[%s10887_s7 + $0x6f8] sm:$0xff]  ;;  %v6537_v41 = vpack.c.bf16 %v4962_v49, %v4961_v35  ;;  %v5799_v49 = vld [vmem:[%s10890_s10] ss:$0 sm:$0xff] }
 0x6d7   :  { %6470 = vmatprep.subr.bf16.mxu1 %v6469_v20  ;;  %v6519_v20 = vpack.c.bf16 %v4936_v6, %v4935_v8  ;;  %v4946_v8 = vld [vmem:[%s10887_s7 + $0x768] sm:$0xff]  ;;  %v6507_v6 = vpack.c.bf16 %v4914_v17, %v4913_v36 }
 0x6d8   :  { %6440 = vmatpush3.bf16.msra.mxu0 %v6439_v15  ;;  %v4937_v15 = vld [vmem:[%s10887_s7 + $0x720] sm:$0xff] }
 0x6d9   :  { %6442 = vmatprep.subr.bf16.mxu0 %v6441_v5  ;;  %v4955_v5 = vld [vmem:[%s10887_s7 + $0x7b0] sm:$0xff]  ;;  %v6523_v12 = vpack.c.bf16 %v4938_v53, %v4937_v15  ;;  %v5621_v15 = vld [vmem:[%s10889_s9] sm:$0xff]  ;;  %v5622_v53 = vld [vmem:[%s10889_s9 + $0x8] sm:$0xff] }
 0x6da   :  { %6472 = vmatpush3.bf16.msra.mxu1 %v6471_v42  ;;  %v4907_v42 = vld [vmem:[%s10887_s7 + $0x630] sm:$0xff]  ;;  %v6525_v43 = vpack.c.bf16 %v4956_v59, %v4955_v5  ;;  %v6763_v5 = vmov 0.0|0.0  }
 0x6db   :  { %6474 = vmatprep.subr.bf16.mxu1 %v6473_v22  ;;  %v4925_v22 = vld [vmem:[%s10887_s7 + $0x6c0] sm:$0xff]  ;;  %v6495_v29 = vpack.c.bf16 %v4908_v26, %v4907_v42  ;;  %v5623_v59 = vld [vmem:[%s10889_s9 + $0x10] sm:$0xff] }
 0x6dc   :  { %6444 = vmatpush3.bf16.msra.mxu0 %v6443_v57  ;;  %v4939_v57 = vld [vmem:[%s10887_s7 + $0x730] sm:$0xff]  ;;  %v6497_v58 = vpack.c.bf16 %v4926_v21, %v4925_v22  ;;  %v5798_v26 = vld [vmem:[%s10888_s8] ss:$0 sm:$0xff] }
 0x6dd   :  { %6446 = vmatprep.subr.bf16.mxu0 %v6445_v32  ;;  %v4957_v32 = vld [vmem:[%s10887_s7 + $0x7c0] sm:$0xff]  ;;  %v6527_v40 = vpack.c.bf16 %v4940_v4, %v4939_v57 }
 0x6de   :  { %6476 = vmatpush3.bf16.msra.mxu1 %v6475_v14  ;;  %v4910_v14 = vld [vmem:[%s10887_s7 + $0x648] sm:$0xff]  ;;  %v6529_v52 = vpack.c.bf16 %v4958_v16, %v4957_v32 }
 0x6df   :  { %6478 = vmatprep.subr.bf16.mxu1 %v6477_v34  ;;  %v4928_v34 = vld [vmem:[%s10887_s7 + $0x6d8] sm:$0xff]  ;;  %v6499_v24 = vpack.c.bf16 %v4910_v14, %v4909_v46 }
 0x6e0   :  { %6448 = vmatpush3.bf16.msra.mxu0 %v6447_v51  ;;  %v4942_v51 = vld [vmem:[%s10887_s7 + $0x748] sm:$0xff] }
 0x6e1   :  { %6482 = vmatprep.subr.bf16.mxu0 %v6481_v19  ;;  %v6501_v19 = vpack.c.bf16 %v4928_v34, %v4927_v45 }
 0x6e2   :  { %6480 = vmatpush3.bf16.msra.mxu1 %v6479_v30  ;;  %v6531_v30 = vpack.c.bf16 %v4942_v51, %v4941_v50 }
 0x6e3   :  { %5405 = vmatmul.mubr.f32.vlgmr.msra.gmra.mrb[8].mxu0 %v10459_v55  ;;  %6514 = vmatprep.subr.bf16.mxu1 %v6513_v63  ;;  %v4953_v55 = vld [vmem:[%s10887_s7 + $0x7a0] sm:$0xff]  ;;  %v6533_v63 = vpack.c.bf16 %v4960_v0, %v4959_v10 }
 0x6e4   :  { %6484 = vmatpush3.bf16.msra.mxu0 %v6483_v31  ;;  %5544 = vmatprep.mubr.f32.mxu0 %v5042_v37  ;;  %v6521_v11 = vpack.c.bf16 %v4954_v47, %v4953_v55  ;;  %v6503_v31 = vpack.c.bf16 %v4912_v38, %v4911_v54  ;;  %v6535_v37 = vpack.c.bf16 %v4944_v7, %v4943_v1  ;;  %v4915_v47 = vld [vmem:[%s10887_s7 + $0x670] sm:$0xff] }
 0x6e5   :  { %5475 = vmatmul.mubr.f32.vlgmr.msra.gmra.mrb[8].mxu1 %v10474_v62  ;;  %6486 = vmatprep.subr.bf16.mxu0 %v6485_v23  ;;  %v4924_v62 = vld [vmem:[%s10887_s7 + $0x6b8] sm:$0xff]  ;;  %v6505_v23 = vpack.c.bf16 %v4930_v25, %v4929_v56 }
 0x6e6   :  { %6516 = vmatpush3.bf16.msra.mxu1 %v6515_v9  ;;  %5614 = vmatprep.mubr.f32.mxu1 %v5043_v13  ;;  %v6493_v2 = vpack.c.bf16 %v4924_v62, %v4923_v33  ;;  %v4931_v9 = vld [vmem:[%s10887_s7 + $0x6f0] sm:$0xff]  ;;  %v4948_v33 = vld [vmem:[%s10887_s7 + $0x778] sm:$0xff] }
 0x6e7   :  { %6518 = vmatprep.subr.bf16.mxu1 %v6517_v39  ;;  %v4945_v39 = vld [vmem:[%s10887_s7 + $0x760] sm:$0xff]  ;;  %v4963_v13 = vld [vmem:[%s10887_s7 + $0x7f0] sm:$0xff]  ;;  %v6509_v55 = vpack.c.bf16 %v4932_v48, %v4931_v9 }
 0x6e8   :  { %6488 = vmatpush3.bf16.msra.mxu0 %v6487_v60  ;;  %v4964_v60 = vld [vmem:[%s10887_s7 + $0x7f8] sm:$0xff]  ;;  %v6539_v18 = vpack.c.bf16 %v4946_v8, %v4945_v39 }
 0x6e9   :  { %6490 = vmatprep.subr.bf16.mxu0 %v6489_v27  ;;  %v4916_v27 = vld [vmem:[%s10887_s7 + $0x678] sm:$0xff]  ;;  %v6541_v28 = vpack.c.bf16 %v4964_v60, %v4963_v13 }
 0x6ea   :  { %6520 = vmatpush3.bf16.msra.mxu1 %v6519_v20  ;;  %v4947_v20 = vld [vmem:[%s10887_s7 + $0x770] sm:$0xff]  ;;  %v6511_v62 = vpack.c.bf16 %v4916_v27, %v4915_v47 }
 0x6eb   :  { %6522 = vmatprep.subr.bf16.mxu1 %v6521_v11  ;;  %v6543_v11 = vpack.c.bf16 %v4948_v33, %v4947_v20 }
 0x6ec   :  { %6492 = vmatpush3.bf16.msra.mxu0 %v6491_v44  ;;  %v6546_v44 = vpack.c.bf16 %v5622_v53, %v5621_v15 }
 0x6ed   :  { %6494 = vmatprep.subr.bf16.mxu0 %v6493_v2  ;;  %v6765_v2 = vmov 0.0  }
 0x6ee   :  { %6524 = vmatpush3.bf16.msra.mxu1 %v6523_v12 }
 0x6ef   :  { %6526 = vmatprep.subr.bf16.mxu1 %v6525_v43 }
 0x6f0   :  { %6496 = vmatpush3.bf16.msra.mxu0 %v6495_v29 }
 0x6f1   :  { %6498 = vmatprep.subr.bf16.mxu0 %v6497_v58 }
 0x6f2   :  { %6528 = vmatpush3.bf16.msra.mxu1 %v6527_v40 }
 0x6f3   :  { %6530 = vmatprep.subr.bf16.mxu1 %v6529_v52 }
 0x6f4   :  { %6500 = vmatpush3.bf16.msra.mxu0 %v6499_v24 }
 0x6f5   :  { %6502 = vmatprep.subr.bf16.mxu0 %v6501_v19 }
 0x6f6   :  { %6532 = vmatpush3.bf16.msra.mxu1 %v6531_v30 }
 0x6f7   :  { %6534 = vmatprep.subr.bf16.mxu1 %v6533_v63 }
 0x6f8   :  { %6504 = vmatpush3.bf16.msra.mxu0 %v6503_v31 }
 0x6f9   :  { %6506 = vmatprep.subr.bf16.mxu0 %v6505_v23 }
 0x6fa   :  { %6536 = vmatpush3.bf16.msra.mxu1 %v6535_v37 }
 0x6fb   :  { %6538 = vmatprep.subr.bf16.mxu1 %v6537_v41 }
 0x6fc   :  { %6508 = vmatpush3.bf16.msra.mxu0 %v6507_v6 }
 0x6fd   :  { %6510 = vmatprep.subr.bf16.mxu0 %v6509_v55 }
 0x6fe   :  { %6540 = vmatpush3.bf16.msra.mxu1 %v6539_v18 }
 0x6ff   :  { %6542 = vmatprep.subr.bf16.mxu1 %v6541_v28 }
 0x700   :  { %6512 = vmatpush3.bf16.msra.mxu0 %v6511_v62 }
 0x701   :  { %6545 = vmatprep.subr.bf16.mxu0 %v6763_v5 }
 0x702   :  { %6544 = vmatpush3.bf16.msra.mxu1 %v6543_v11 }
 0x703   :  { %5545 = vmatmul.mubr.f32.vlgmr.msra.gmra.mrb[10].mxu0 %v10663_v3  ;;  %v5624_v3 = vld [vmem:[%s10889_s9 + $0x18] sm:$0xff] }
 0x704   :  { %6547 = vmatpush3.bf16.msra.mxu0 %v6546_v44  ;;  %6094 = vmatprep.mubr.msk.f32.mxu0 %vm6764_vm3, %v6765_v2 }
 0x705   :  { %5615 = vmatmul.mubr.f32.vlgmr.msra.gmra.mrb[10].mxu1 %v10678_v61  ;;  %6548 = vmatprep.subr.bf16.mxu0 %v6763_v5  ;;  %v6549_v61 = vpack.c.bf16 %v5624_v3, %v5623_v59 }
 0x708   :  { %6550 = vmatpush3.bf16.msra.mxu0 %v6549_v61 }
 0x776   :  { %v5833_v42 = vpop.f32.mrb[4].mxu0 }
 0x777   :  { %v5834_v12 = vpop.f32.mrb[5].mxu0 }
 0x778   :  { %v5835_v22 = vadd.f32 %v5834_v12, %v5833_v42  ;;  %v5868_v21 = vpop.f32.mrb[4].mxu1 }
 0x779   :  { %v5869_v43 = vpop.f32.mrb[5].mxu1 }
 0x77a   :  { %v5127_v57 = vadd.f32 %v5835_v22, %v5798_v26  ;;  %v5870_v4 = vadd.f32 %v5869_v43, %v5868_v21 }
 0x77c   :  { %v5197_v29 = vadd.f32 %v5870_v4, %v5127_v57 }
 0x796   :  { %v5903_v32 = vpop.f32.mrb[6].mxu0 }
 0x797   :  { %v5904_v16 = vpop.f32.mrb[7].mxu0 }
 0x798   :  { %v5905_v58 = vadd.f32 %v5904_v16, %v5903_v32  ;;  %v5938_v46 = vpop.f32.mrb[6].mxu1 }
 0x799   :  { %v5939_v14 = vpop.f32.mrb[7].mxu1 }
 0x79a   :  { %v5267_v40 = vadd.f32 %v5905_v58, %v5197_v29  ;;  %v5940_v45 = vadd.f32 %v5939_v14, %v5938_v46 }
 0x79c   :  { %v5337_v34 = vadd.f32 %v5940_v45, %v5267_v40 }
 0x7b6   :  { %v5973_v52 = vpop.f32.mrb[8].mxu0 }
 0x7b7   :  { %v5974_v50 = vpop.f32.mrb[9].mxu0 }
 0x7b8   :  { %v5975_v51 = vadd.f32 %v5974_v50, %v5973_v52  ;;  %v6008_v24 = vpop.f32.mrb[8].mxu1 }
 0x7b9   :  { %v6009_v10 = vpop.f32.mrb[9].mxu1 }
 0x7ba   :  { %v5407_v0 = vadd.f32 %v5975_v51, %v5337_v34  ;;  %v6010_v19 = vadd.f32 %v6009_v10, %v6008_v24 }
 0x7bc   :  { %v5477_v54 = vadd.f32 %v6010_v19, %v5407_v0 }
 0x7d6   :  { %v6043_v38 = vpop.f32.mrb[10].mxu0 }
 0x7d7   :  { %v6044_v30 = vpop.f32.mrb[11].mxu0 }
 0x7d8   :  { %v6045_v56 = vadd.f32 %v6044_v30, %v6043_v38  ;;  %v6078_v25 = vpop.f32.mrb[10].mxu1 }
 0x7d9   :  { %v6079_v63 = vpop.f32.mrb[11].mxu1 }
 0x7da   :  { %v5547_v1 = vadd.f32 %v6045_v56, %v5477_v54  ;;  %v6080_v7 = vadd.f32 %v6079_v63, %v6078_v25 }
 0x7dc   :  { %v5617_v31 = vadd.f32 %v6080_v7, %v5547_v1 }
 0x7de   :  { %v5620_v35 = vmax.f32 %v5617_v31, 0.0 }
 0x7e0   :  { %6095 = vmatmul.mubr.msk.f32.vlgmr.msra.gmra.mrb[12].mxu0 %vm5632_vm9, %v5620_v35 }
 0x8b3   :  { %v5702_v23 = vpop.f32.mrb[12].mxu0 }
 0x8b4   :  { %v5703_v36 = vadd.f32 %v5799_v49, %v5702_v23  ;;  %v6096_v17 = vpop.f32.mrb[13].mxu0 }
 0x8b6   :  { %5707 = vst.msk [vmem:[#allocation4] sm:$0x3] %vm5706_vm10, %v5703_v36 }
 0x8b7   :  { %6673 = shalt.err (!%p6670_p4)
}
 0x8b8   :  { %s6674_s19 = scalar_lea.hbm %s10891_s11, 32 }
 0x8b9   :  { %p6675_p5 = scmp.ne.s32.totalorder %s10891_s11, %s6674_s19  ;;  %p6678_p6 = scmp.lt.u32.totalorder %s6674_s19, %s10891_s11 }
 0x8bb   :  { %p6680_p7 = pnand %p6678_p6, %p6675_p5 }
 0x8bd   :  { %6683 = shalt.err (!%p6680_p7)
}
 0x8be   :  { %5717 = dma.vmem_to_hbm [thread:$0]  %s5715_s5, 32, %s10891_s11, [#allocation5]  }
 0x8bf   :  { %6684 = dma.done.wait [#allocation5], 32  }
 0x8c0   :  { %6685 = vsyncadd [#allocation5], 4294967264 }
 0x8c1   :  { %5721 = vsyncpa [#allocation5], 1 }

</bundles_post_ra>
